<compile_context>
chip_gen: v6e
topology: v6e:2x2x1
jax: 0.10.0
libtpu: 0.0.40
codegen_flags: <defaults>
</compile_context>

<pallas_src>
import functools

import jax
import jax.numpy as jnp
from jax.experimental import pallas as pl
from jax.experimental.pallas import tpu as pltpu


_COMPILER_PARAMS = pltpu.CompilerParams(
    dimension_semantics=("parallel",),          # batch tiles are independent
    vmem_limit_bytes=48 * 1024 * 1024,          # well under v7x's 64 MiB/TC
)


# ----------------------------- LSTM cell math -----------------------------
def _lstm_cell(gates, h, c, t, lens, H):
    """PyTorch gate order i, f, g, o. gates = x@Wih + h@Whh + (b_ih+b_hh), f32."""
    i = jax.nn.sigmoid(gates[:, 0 * H:1 * H])
    f = jax.nn.sigmoid(gates[:, 1 * H:2 * H])
    g = jnp.tanh(gates[:, 2 * H:3 * H])
    o = jax.nn.sigmoid(gates[:, 3 * H:4 * H])
    c_new = f * c + i * g
    h_new = o * jnp.tanh(c_new)
    mask = t < lens                              # (B,1) -> broadcast over H
    return jnp.where(mask, h_new, h), jnp.where(mask, c_new, c)


# ----------------------- fused bidirectional layer core -----------------------
def _bilstm_core(x_ref, wih_ref, whh_f_ref, whh_b_ref, bias_ref, len_ref,
                 seq_ref, gxf_sc, gxb_sc, h_f_sc, c_f_sc, h_b_sc, c_b_sc,
                 *, T, H, unroll):
    """One bidirectional LSTM layer for one batch tile.

    x_ref    : (T, B, D)    bf16   time-major inputs
    wih_ref  : (D, 8H)      bf16   [Wih_fwd^T | Wih_bwd^T]
    whh_*_ref: (H, 4H)      bf16   Whh^T per direction
    bias_ref : (1, 8H)      f32    [b_fwd | b_bwd] (b_ih + b_hh)
    len_ref  : (B, 1)       i32    sequence lengths (0 for padded rows)
    seq_ref  : (T, B, 2H)   bf16   per-step [h_fwd | h_bwd]  (or None)
    gx*_sc   : (T*B, 4H)    f32    hoisted input-projection gates per direction
    h/c *_sc : (B, H)       f32    running state per direction
    """
    B = h_f_sc.shape[0]
    G = 4 * H
    D = x_ref.shape[-1]

    # ---- prologue: hoisted input projection, one big MXU matmul ----
    x2d = x_ref[...].reshape(T * B, D)                          # bf16
    gx = jnp.dot(x2d, wih_ref[...], preferred_element_type=jnp.float32)
    gx = gx + bias_ref[...]                                     # (T*B, 8H) f32
    gxf_sc[...] = gx[:, :G]                                     # fwd gates
    gxb_sc[...] = gx[:, G:]                                     # bwd gates

    h_f_sc[...] = jnp.zeros_like(h_f_sc)
    c_f_sc[...] = jnp.zeros_like(c_f_sc)
    h_b_sc[...] = jnp.zeros_like(h_b_sc)
    c_b_sc[...] = jnp.zeros_like(c_b_sc)

    lens = len_ref[...]                                         # (B, 1) i32
    whh_f = whh_f_ref[...]
    whh_b = whh_b_ref[...]

    def body(s, carry):
        tf = s                       # forward time index
        tb = T - 1 - s               # backward time index
        # --- forward direction step at t = tf ---
        row_f = pl.multiple_of(tf * B, B)
        h_f = h_f_sc[...]
        gates_f = gxf_sc[pl.ds(row_f, B)] + jnp.dot(
            h_f.astype(jnp.bfloat16), whh_f, preferred_element_type=jnp.float32)
        h_f_new, c_f_new = _lstm_cell(gates_f, h_f, c_f_sc[...], tf, lens, H)
        h_f_sc[...] = h_f_new
        c_f_sc[...] = c_f_new
        # --- backward direction step at t = tb ---
        row_b = pl.multiple_of(tb * B, B)
        h_b = h_b_sc[...]
        gates_b = gxb_sc[pl.ds(row_b, B)] + jnp.dot(
            h_b.astype(jnp.bfloat16), whh_b, preferred_element_type=jnp.float32)
        h_b_new, c_b_new = _lstm_cell(gates_b, h_b, c_b_sc[...], tb, lens, H)
        h_b_sc[...] = h_b_new
        c_b_sc[...] = c_b_new
        if seq_ref is not None:
            # fwd hidden -> lanes [0, H), bwd hidden -> lanes [H, 2H)
            seq_ref[tf, :, 0:H] = h_f_new.astype(seq_ref.dtype)
            seq_ref[tb, :, H:2 * H] = h_b_new.astype(seq_ref.dtype)
        return carry

    jax.lax.fori_loop(0, T, body, 0, unroll=unroll)


def _bilstm_seq_kernel(x_ref, wih_ref, whh_f_ref, whh_b_ref, bias_ref, len_ref,
                       seq_ref,
                       gxf_sc, gxb_sc, h_f_sc, c_f_sc, h_b_sc, c_b_sc,
                       *, T, H, unroll):
    _bilstm_core(x_ref, wih_ref, whh_f_ref, whh_b_ref, bias_ref, len_ref,
                 seq_ref, gxf_sc, gxb_sc, h_f_sc, c_f_sc, h_b_sc, c_b_sc,
                 T=T, H=H, unroll=unroll)


def _bilstm_head_kernel(x_ref, wih_ref, whh_f_ref, whh_b_ref, bias_ref, len_ref,
                        w1_ref, b1_ref, w2_ref, b2_ref,
                        out_ref,
                        gxf_sc, gxb_sc, h_f_sc, c_f_sc, h_b_sc, c_b_sc,
                        *, T, H, unroll):
    # Last layer: no per-step sequence output needed (PyTorch discards it);
    # only the final fwd/bwd hiddens feed the head, computed in the epilogue
    # while they are still in VMEM.
    _bilstm_core(x_ref, wih_ref, whh_f_ref, whh_b_ref, bias_ref, len_ref,
                 None, gxf_sc, gxb_sc, h_f_sc, c_f_sc, h_b_sc, c_b_sc,
                 T=T, H=H, unroll=unroll)
    # Fused head: Linear(2H->128) -> Linear(128->O); dropouts are identity.
    # cat((h_f, h_b), dim=1) @ W1  ==  h_f @ W1[:H] + h_b @ W1[H:]
    h_f = h_f_sc[...].astype(jnp.bfloat16)
    h_b = h_b_sc[...].astype(jnp.bfloat16)
    z = (jnp.dot(h_f, w1_ref[0:H, :], preferred_element_type=jnp.float32)
         + jnp.dot(h_b, w1_ref[H:2 * H, :], preferred_element_type=jnp.float32)
         + b1_ref[...])
    out_ref[...] = (jnp.dot(z.astype(jnp.bfloat16), w2_ref[...],
                            preferred_element_type=jnp.float32) + b2_ref[...])


# ----------------------------- layer wrappers -----------------------------
def _layer_scratches(T, b_tile, H):
    return [
        pltpu.VMEM((T * b_tile, 4 * H), jnp.float32),  # fwd gate pre-activations
        pltpu.VMEM((T * b_tile, 4 * H), jnp.float32),  # bwd gate pre-activations
        pltpu.VMEM((b_tile, H), jnp.float32),          # h_fwd
        pltpu.VMEM((b_tile, H), jnp.float32),          # c_fwd
        pltpu.VMEM((b_tile, H), jnp.float32),          # h_bwd
        pltpu.VMEM((b_tile, H), jnp.float32),          # c_bwd
    ]


def _full_spec(shape):
    return pl.BlockSpec(shape, lambda b: (0,) * len(shape))


def _bilstm_seq_layer(x, lw, lens2d, *, b_tile):
    T, B, D = x.shape
    H = lw["whh_f"].shape[0]
    unroll = T if T <= 16 else 4
    kernel = functools.partial(_bilstm_seq_kernel, T=T, H=H, unroll=unroll)
    return pl.pallas_call(
        kernel,
        out_shape=jax.ShapeDtypeStruct((T, B, 2 * H), jnp.bfloat16),
        grid=(B // b_tile,),
        in_specs=[
            pl.BlockSpec((T, b_tile, D), lambda b: (0, b, 0)),
            _full_spec(lw["wih"].shape),
            _full_spec(lw["whh_f"].shape),
            _full_spec(lw["whh_b"].shape),
            _full_spec(lw["bias"].shape),
            pl.BlockSpec((b_tile, 1), lambda b: (b, 0)),
        ],
        out_specs=pl.BlockSpec((T, b_tile, 2 * H), lambda b: (0, b, 0)),
        scratch_shapes=_layer_scratches(T, b_tile, H),
        compiler_params=_COMPILER_PARAMS,
    )(x, lw["wih"], lw["whh_f"], lw["whh_b"], lw["bias"], lens2d)


def _bilstm_head_layer(x, lw, lens2d, head, *, b_tile):
    T, B, D = x.shape
    H = lw["whh_f"].shape[0]
    O = head["w2"].shape[1]
    unroll = T if T <= 16 else 4
    kernel = functools.partial(_bilstm_head_kernel, T=T, H=H, unroll=unroll)
    return pl.pallas_call(
        kernel,
        out_shape=jax.ShapeDtypeStruct((B, O), jnp.float32),
        grid=(B // b_tile,),
        in_specs=[
            pl.BlockSpec((T, b_tile, D), lambda b: (0, b, 0)),
            _full_spec(lw["wih"].shape),
            _full_spec(lw["whh_f"].shape),
            _full_spec(lw["whh_b"].shape),
            _full_spec(lw["bias"].shape),
            pl.BlockSpec((b_tile, 1), lambda b: (b, 0)),
            _full_spec(head["w1"].shape),
            _full_spec(head["b1"].shape),
            _full_spec(head["w2"].shape),
            _full_spec(head["b2"].shape),
        ],
        out_specs=pl.BlockSpec((b_tile, O), lambda b: (b, 0)),
        scratch_shapes=_layer_scratches(T, b_tile, H),
        compiler_params=_COMPILER_PARAMS,
    )(x, lw["wih"], lw["whh_f"], lw["whh_b"], lw["bias"], lens2d,
      head["w1"], head["b1"], head["w2"], head["b2"])


# ----------------------------- params / model -----------------------------
def init_params(key, vocab_size, embedding_size, hidden_size, output_size,
                num_layers, pad_idx):
    """Random params, generated in PyTorch layout and converted ONCE into the
    fused / transposed / bf16 layouts the kernels consume."""
    H = hidden_size
    keys = iter(jax.random.split(key, 8 * num_layers + 8))

    def u(shape, scale=0.1):
        return jax.random.uniform(next(keys), shape, jnp.float32, -scale, scale)

    emb = u((vocab_size, embedding_size)).at[pad_idx].set(0.0)

    lstm = []
    for layer in range(num_layers):
        in_dim = embedding_size if layer == 0 else 2 * H
        w_ih_f, w_hh_f = u((4 * H, in_dim)), u((4 * H, H))
        b_ih_f, b_hh_f = u((4 * H,)), u((4 * H,))
        w_ih_b, w_hh_b = u((4 * H, in_dim)), u((4 * H, H))
        b_ih_b, b_hh_b = u((4 * H,)), u((4 * H,))
        lstm.append(dict(
            # (D, 8H) = [Wih_fwd^T | Wih_bwd^T], bf16 MXU operand
            wih=jnp.concatenate([w_ih_f.T, w_ih_b.T], axis=1).astype(jnp.bfloat16),
            whh_f=w_hh_f.T.astype(jnp.bfloat16),              # (H, 4H)
            whh_b=w_hh_b.T.astype(jnp.bfloat16),              # (H, 4H)
            bias=jnp.concatenate([b_ih_f + b_hh_f,
                                  b_ih_b + b_hh_b]).reshape(1, 8 * H),  # f32
        ))

    head = dict(
        w1=u((128, 2 * H)).T.astype(jnp.bfloat16),            # (2H, 128)
        b1=u((128,)).reshape(1, 128),                         # f32
        w2=u((output_size, 128)).T.astype(jnp.bfloat16),      # (128, O)
        b2=u((output_size,)).reshape(1, output_size),         # f32
    )
    return dict(emb=emb, lstm=lstm, head=head)


def s2dc_forward(params, text, text_lengths, *, b_tile=16):
    B, T = text.shape
    # Embedding lookup (gather) stays in XLA glue; Dropout = identity at eval.
    emb = params["emb"][text]                                  # (B, T, E) f32
    x = jnp.transpose(emb, (1, 0, 2)).astype(jnp.bfloat16)     # (T, B, E)

    # Pad batch to the tile size (bf16 sublane granularity). Padded rows get
    # length 0 so the length mask keeps their h/c at zero throughout.
    B_pad = ((B + b_tile - 1) // b_tile) * b_tile
    lens = text_lengths.astype(jnp.int32)
    if B_pad != B:
        x = jnp.pad(x, ((0, 0), (0, B_pad - B), (0, 0)))
        lens = jnp.pad(lens, (0, B_pad - B))
    lens2d = lens.reshape(B_pad, 1)

    n_layers = len(params["lstm"])
    out = None
    for li, lw in enumerate(params["lstm"]):
        if li < n_layers - 1:
            x = _bilstm_seq_layer(x, lw, lens2d, b_tile=b_tile)
        else:
            out = _bilstm_head_layer(x, lw, lens2d, params["head"],
                                     b_tile=b_tile)
    return out[:B]


if __name__ == "__main__":
    # Small config consistent with the module's __init__.
    vocab_size, embedding_size, hidden_size = 50, 16, 32
    output_size, num_layers, pad_idx = 4, 2, 0
    B, T = 2, 8

    key = jax.random.PRNGKey(0)
    k_par, k_txt = jax.random.split(key)
    params = init_params(k_par, vocab_size, embedding_size, hidden_size,
                         output_size, num_layers, pad_idx)

    text_lengths = jnp.array([8, 5], dtype=jnp.int32)
    text = jax.random.randint(k_txt, (B, T), 1, vocab_size, dtype=jnp.int32)
    # zero-pad (pad_idx) positions past each sequence length
    pos = jnp.arange(T)[None, :]
    text = jnp.where(pos < text_lengths[:, None], text, pad_idx).astype(jnp.int32)

    out = jax.jit(s2dc_forward)(params, text, text_lengths)
    jax.block_until_ready(out)
    assert out.shape == (B, output_size)
    print("KERNEL_OK")
</pallas_src>

<mosaic_0001>
module attributes {stable_mosaic.version = 11 : i64} {
  func.func @_bilstm_seq_kernel(%arg0: i32, %arg1: memref<8x16x16xbf16, #tpu.memory_space<vmem>>, %arg2: memref<16x256xbf16, #tpu.memory_space<vmem>>, %arg3: memref<32x128xbf16, #tpu.memory_space<vmem>>, %arg4: memref<32x128xbf16, #tpu.memory_space<vmem>>, %arg5: memref<1x256xf32, #tpu.memory_space<vmem>>, %arg6: memref<16x1xi32, #tpu.memory_space<vmem>>, %arg7: memref<8x16x64xbf16, #tpu.memory_space<vmem>>, %arg8: memref<128x128xf32, #tpu.memory_space<vmem>>, %arg9: memref<128x128xf32, #tpu.memory_space<vmem>>, %arg10: memref<16x32xf32, #tpu.memory_space<vmem>>, %arg11: memref<16x32xf32, #tpu.memory_space<vmem>>, %arg12: memref<16x32xf32, #tpu.memory_space<vmem>>, %arg13: memref<16x32xf32, #tpu.memory_space<vmem>>) attributes {dimension_semantics = [#tpu.dimension_semantics<parallel>], iteration_bounds = array<i64: 1>, scalar_prefetch = 0 : i64, scratch_operands = 6 : i64, tpu.core_type = #tpu.core_type<tc>, window_params = [{transform_indices = @transform_0, window_bounds = array<i64: 8, 16, 16>}, {pipeline_mode = #tpu.pipeline_mode<synchronous>, transform_indices = @transform_1, window_bounds = array<i64: 16, 256>}, {pipeline_mode = #tpu.pipeline_mode<synchronous>, transform_indices = @transform_2, window_bounds = array<i64: 32, 128>}, {pipeline_mode = #tpu.pipeline_mode<synchronous>, transform_indices = @transform_3, window_bounds = array<i64: 32, 128>}, {pipeline_mode = #tpu.pipeline_mode<synchronous>, transform_indices = @transform_4, window_bounds = array<i64: 1, 256>}, {transform_indices = @transform_5, window_bounds = array<i64: 16, 1>}, {transform_indices = @transform_6, window_bounds = array<i64: 8, 16, 64>}]} {
    %c0 = arith.constant 0 : index
    %c0_0 = arith.constant 0 : index
    %c0_1 = arith.constant 0 : index
    %0 = vector.load %arg1[%c0, %c0_0, %c0_1] : memref<8x16x16xbf16, #tpu.memory_space<vmem>>, vector<8x16x16xbf16>
    %1 = vector.shape_cast %0 : vector<8x16x16xbf16> to vector<128x16xbf16>
    %c0_2 = arith.constant 0 : index
    %c0_3 = arith.constant 0 : index
    %2 = vector.load %arg2[%c0_2, %c0_3] : memref<16x256xbf16, #tpu.memory_space<vmem>>, vector<16x256xbf16>
    %cst = arith.constant dense<0.000000e+00> : vector<128x256xf32>
    %3 = tpu.matmul %1, %2, %cst {dimension_numbers = #tpu.dot_dimension_numbers<[1], [0], [0], [1], [0, 0, 1, 1], [], []>} : vector<128x16xbf16>, vector<16x256xbf16>, vector<128x256xf32> -> vector<128x256xf32>
    %c0_4 = arith.constant 0 : index
    %c0_5 = arith.constant 0 : index
    %4 = vector.load %arg5[%c0_4, %c0_5] : memref<1x256xf32, #tpu.memory_space<vmem>>, vector<1x256xf32>
    %5 = vector.broadcast %4 : vector<1x256xf32> to vector<128x256xf32>
    %6 = arith.addf %3, %5 : vector<128x256xf32>
    %7 = vector.extract_strided_slice %6 {offsets = [0, 0], sizes = [128, 128], strides = [1, 1]} : vector<128x256xf32> to vector<128x128xf32>
    %c0_6 = arith.constant 0 : index
    %c0_7 = arith.constant 0 : index
    %8 = vector.load %arg8[%c0_6, %c0_7] : memref<128x128xf32, #tpu.memory_space<vmem>>, vector<128x128xf32>
    tpu.vector_store %arg8[%c0_6, %c0_7], %7 {strides = array<i32>} : memref<128x128xf32, #tpu.memory_space<vmem>>, vector<128x128xf32>,
    %9 = vector.extract_strided_slice %6 {offsets = [0, 128], sizes = [128, 128], strides = [1, 1]} : vector<128x256xf32> to vector<128x128xf32>
    %c0_8 = arith.constant 0 : index
    %c0_9 = arith.constant 0 : index
    %10 = vector.load %arg9[%c0_8, %c0_9] : memref<128x128xf32, #tpu.memory_space<vmem>>, vector<128x128xf32>
    tpu.vector_store %arg9[%c0_8, %c0_9], %9 {strides = array<i32>} : memref<128x128xf32, #tpu.memory_space<vmem>>, vector<128x128xf32>,
    %cst_10 = arith.constant 0.000000e+00 : f32
    %11 = vector.broadcast %cst_10 : f32 to vector<16x32xf32>
    %c0_11 = arith.constant 0 : index
    %c0_12 = arith.constant 0 : index
    %12 = vector.load %arg10[%c0_11, %c0_12] : memref<16x32xf32, #tpu.memory_space<vmem>>, vector<16x32xf32>
    tpu.vector_store %arg10[%c0_11, %c0_12], %11 {strides = array<i32>} : memref<16x32xf32, #tpu.memory_space<vmem>>, vector<16x32xf32>,
    %cst_13 = arith.constant 0.000000e+00 : f32
    %13 = vector.broadcast %cst_13 : f32 to vector<16x32xf32>
    %c0_14 = arith.constant 0 : index
    %c0_15 = arith.constant 0 : index
    %14 = vector.load %arg11[%c0_14, %c0_15] : memref<16x32xf32, #tpu.memory_space<vmem>>, vector<16x32xf32>
    tpu.vector_store %arg11[%c0_14, %c0_15], %13 {strides = array<i32>} : memref<16x32xf32, #tpu.memory_space<vmem>>, vector<16x32xf32>,
    %cst_16 = arith.constant 0.000000e+00 : f32
    %15 = vector.broadcast %cst_16 : f32 to vector<16x32xf32>
    %c0_17 = arith.constant 0 : index
    %c0_18 = arith.constant 0 : index
    %16 = vector.load %arg12[%c0_17, %c0_18] : memref<16x32xf32, #tpu.memory_space<vmem>>, vector<16x32xf32>
    tpu.vector_store %arg12[%c0_17, %c0_18], %15 {strides = array<i32>} : memref<16x32xf32, #tpu.memory_space<vmem>>, vector<16x32xf32>,
    %cst_19 = arith.constant 0.000000e+00 : f32
    %17 = vector.broadcast %cst_19 : f32 to vector<16x32xf32>
    %c0_20 = arith.constant 0 : index
    %c0_21 = arith.constant 0 : index
    %18 = vector.load %arg13[%c0_20, %c0_21] : memref<16x32xf32, #tpu.memory_space<vmem>>, vector<16x32xf32>
    tpu.vector_store %arg13[%c0_20, %c0_21], %17 {strides = array<i32>} : memref<16x32xf32, #tpu.memory_space<vmem>>, vector<16x32xf32>,
    %c0_22 = arith.constant 0 : index
    %c0_23 = arith.constant 0 : index
    %19 = vector.load %arg6[%c0_22, %c0_23] : memref<16x1xi32, #tpu.memory_space<vmem>>, vector<16x1xi32>
    %c0_24 = arith.constant 0 : index
    %c0_25 = arith.constant 0 : index
    %20 = vector.load %arg3[%c0_24, %c0_25] : memref<32x128xbf16, #tpu.memory_space<vmem>>, vector<32x128xbf16>
    %c0_26 = arith.constant 0 : index
    %c0_27 = arith.constant 0 : index
    %21 = vector.load %arg4[%c0_26, %c0_27] : memref<32x128xbf16, #tpu.memory_space<vmem>>, vector<32x128xbf16>
    %c0_i32 = arith.constant 0 : i32
    %c7_i32 = arith.constant 7 : i32
    %22 = arith.subi %c7_i32, %c0_i32 : i32
    %c16_i32 = arith.constant 16 : i32
    %23 = arith.muli %c0_i32, %c16_i32 : i32
    %24 = tpu.assume_multiple %23, 16 : i32
    %c0_28 = arith.constant 0 : index
    %c0_29 = arith.constant 0 : index
    %25 = vector.load %arg10[%c0_28, %c0_29] : memref<16x32xf32, #tpu.memory_space<vmem>>, vector<16x32xf32>
    %26 = arith.index_cast %24 : i32 to index
    %c0_30 = arith.constant 0 : index
    %27 = vector.load %arg8[%26, %c0_30] : memref<128x128xf32, #tpu.memory_space<vmem>>, vector<16x128xf32>
    %28 = arith.truncf %25 : vector<16x32xf32> to vector<16x32xbf16>
    %cst_31 = arith.constant dense<0.000000e+00> : vector<16x128xf32>
    %29 = tpu.matmul %28, %20, %cst_31 {dimension_numbers = #tpu.dot_dimension_numbers<[1], [0], [0], [1], [0, 0, 1, 1], [], []>} : vector<16x32xbf16>, vector<32x128xbf16>, vector<16x128xf32> -> vector<16x128xf32>
    %30 = arith.addf %27, %29 : vector<16x128xf32>
    %c0_32 = arith.constant 0 : index
    %c0_33 = arith.constant 0 : index
    %31 = vector.load %arg11[%c0_32, %c0_33] : memref<16x32xf32, #tpu.memory_space<vmem>>, vector<16x32xf32>
    %32 = vector.extract_strided_slice %30 {offsets = [0, 0], sizes = [16, 32], strides = [1, 1]} : vector<16x128xf32> to vector<16x32xf32>
    %33 = arith.negf %32 : vector<16x32xf32>
    %34 = math.exp %33 : vector<16x32xf32>
    %cst_34 = arith.constant 1.000000e+00 : f32
    %35 = vector.broadcast %cst_34 : f32 to vector<16x32xf32>
    %36 = arith.addf %35, %34 : vector<16x32xf32>
    %37 = arith.divf %35, %36 : vector<16x32xf32>
    %38 = vector.extract_strided_slice %30 {offsets = [0, 32], sizes = [16, 32], strides = [1, 1]} : vector<16x128xf32> to vector<16x32xf32>
    %39 = arith.negf %38 : vector<16x32xf32>
    %40 = math.exp %39 : vector<16x32xf32>
    %cst_35 = arith.constant 1.000000e+00 : f32
    %41 = vector.broadcast %cst_35 : f32 to vector<16x32xf32>
    %42 = arith.addf %41, %40 : vector<16x32xf32>
    %43 = arith.divf %41, %42 : vector<16x32xf32>
    %44 = vector.extract_strided_slice %30 {offsets = [0, 64], sizes = [16, 32], strides = [1, 1]} : vector<16x128xf32> to vector<16x32xf32>
    %45 = math.tanh %44 : vector<16x32xf32>
    %46 = vector.extract_strided_slice %30 {offsets = [0, 96], sizes = [16, 32], strides = [1, 1]} : vector<16x128xf32> to vector<16x32xf32>
    %47 = arith.negf %46 : vector<16x32xf32>
    %48 = math.exp %47 : vector<16x32xf32>
    %cst_36 = arith.constant 1.000000e+00 : f32
    %49 = vector.broadcast %cst_36 : f32 to vector<16x32xf32>
    %50 = arith.addf %49, %48 : vector<16x32xf32>
    %51 = arith.divf %49, %50 : vector<16x32xf32>
    %52 = arith.mulf %43, %31 : vector<16x32xf32>
    %53 = arith.mulf %37, %45 : vector<16x32xf32>
    %54 = arith.addf %52, %53 : vector<16x32xf32>
    %55 = math.tanh %54 : vector<16x32xf32>
    %56 = arith.mulf %51, %55 : vector<16x32xf32>
    %57 = vector.broadcast %c0_i32 : i32 to vector<16x1xi32>
    %58 = arith.cmpi slt, %57, %19 : vector<16x1xi32>
    %59 = vector.shape_cast %58 : vector<16x1xi1> to vector<16x1xi1>
    %60 = vector.broadcast %59 : vector<16x1xi1> to vector<16x32xi1>
    %61 = arith.select %60, %56, %25 : vector<16x32xi1>, vector<16x32xf32>
    %62 = vector.shape_cast %58 : vector<16x1xi1> to vector<16x1xi1>
    %63 = vector.broadcast %62 : vector<16x1xi1> to vector<16x32xi1>
    %64 = arith.select %63, %54, %31 : vector<16x32xi1>, vector<16x32xf32>
    %c0_37 = arith.constant 0 : index
    %c0_38 = arith.constant 0 : index
    %65 = vector.load %arg10[%c0_37, %c0_38] : memref<16x32xf32, #tpu.memory_space<vmem>>, vector<16x32xf32>
    tpu.vector_store %arg10[%c0_37, %c0_38], %61 {strides = array<i32>} : memref<16x32xf32, #tpu.memory_space<vmem>>, vector<16x32xf32>,
    %c0_39 = arith.constant 0 : index
    %c0_40 = arith.constant 0 : index
    %66 = vector.load %arg11[%c0_39, %c0_40] : memref<16x32xf32, #tpu.memory_space<vmem>>, vector<16x32xf32>
    tpu.vector_store %arg11[%c0_39, %c0_40], %64 {strides = array<i32>} : memref<16x32xf32, #tpu.memory_space<vmem>>, vector<16x32xf32>,
    %c16_i32_41 = arith.constant 16 : i32
    %67 = arith.muli %22, %c16_i32_41 : i32
    %68 = tpu.assume_multiple %67, 16 : i32
    %c0_42 = arith.constant 0 : index
    %c0_43 = arith.constant 0 : index
    %69 = vector.load %arg12[%c0_42, %c0_43] : memref<16x32xf32, #tpu.memory_space<vmem>>, vector<16x32xf32>
    %70 = arith.index_cast %68 : i32 to index
    %c0_44 = arith.constant 0 : index
    %71 = vector.load %arg9[%70, %c0_44] : memref<128x128xf32, #tpu.memory_space<vmem>>, vector<16x128xf32>
    %72 = arith.truncf %69 : vector<16x32xf32> to vector<16x32xbf16>
    %cst_45 = arith.constant dense<0.000000e+00> : vector<16x128xf32>
    %73 = tpu.matmul %72, %21, %cst_45 {dimension_numbers = #tpu.dot_dimension_numbers<[1], [0], [0], [1], [0, 0, 1, 1], [], []>} : vector<16x32xbf16>, vector<32x128xbf16>, vector<16x128xf32> -> vector<16x128xf32>
    %74 = arith.addf %71, %73 : vector<16x128xf32>
    %c0_46 = arith.constant 0 : index
    %c0_47 = arith.constant 0 : index
    %75 = vector.load %arg13[%c0_46, %c0_47] : memref<16x32xf32, #tpu.memory_space<vmem>>, vector<16x32xf32>
    %76 = vector.extract_strided_slice %74 {offsets = [0, 0], sizes = [16, 32], strides = [1, 1]} : vector<16x128xf32> to vector<16x32xf32>
    %77 = arith.negf %76 : vector<16x32xf32>
    %78 = math.exp %77 : vector<16x32xf32>
    %cst_48 = arith.constant 1.000000e+00 : f32
    %79 = vector.broadcast %cst_48 : f32 to vector<16x32xf32>
    %80 = arith.addf %79, %78 : vector<16x32xf32>
    %81 = arith.divf %79, %80 : vector<16x32xf32>
    %82 = vector.extract_strided_slice %74 {offsets = [0, 32], sizes = [16, 32], strides = [1, 1]} : vector<16x128xf32> to vector<16x32xf32>
    %83 = arith.negf %82 : vector<16x32xf32>
    %84 = math.exp %83 : vector<16x32xf32>
    %cst_49 = arith.constant 1.000000e+00 : f32
    %85 = vector.broadcast %cst_49 : f32 to vector<16x32xf32>
    %86 = arith.addf %85, %84 : vector<16x32xf32>
    %87 = arith.divf %85, %86 : vector<16x32xf32>
    %88 = vector.extract_strided_slice %74 {offsets = [0, 64], sizes = [16, 32], strides = [1, 1]} : vector<16x128xf32> to vector<16x32xf32>
    %89 = math.tanh %88 : vector<16x32xf32>
    %90 = vector.extract_strided_slice %74 {offsets = [0, 96], sizes = [16, 32], strides = [1, 1]} : vector<16x128xf32> to vector<16x32xf32>
    %91 = arith.negf %90 : vector<16x32xf32>
    %92 = math.exp %91 : vector<16x32xf32>
    %cst_50 = arith.constant 1.000000e+00 : f32
    %93 = vector.broadcast %cst_50 : f32 to vector<16x32xf32>
    %94 = arith.addf %93, %92 : vector<16x32xf32>
    %95 = arith.divf %93, %94 : vector<16x32xf32>
    %96 = arith.mulf %87, %75 : vector<16x32xf32>
    %97 = arith.mulf %81, %89 : vector<16x32xf32>
    %98 = arith.addf %96, %97 : vector<16x32xf32>
    %99 = math.tanh %98 : vector<16x32xf32>
    %100 = arith.mulf %95, %99 : vector<16x32xf32>
    %101 = vector.broadcast %22 : i32 to vector<16x1xi32>
    %102 = arith.cmpi slt, %101, %19 : vector<16x1xi32>
    %103 = vector.shape_cast %102 : vector<16x1xi1> to vector<16x1xi1>
    %104 = vector.broadcast %103 : vector<16x1xi1> to vector<16x32xi1>
    %105 = arith.select %104, %100, %69 : vector<16x32xi1>, vector<16x32xf32>
    %106 = vector.shape_cast %102 : vector<16x1xi1> to vector<16x1xi1>
    %107 = vector.broadcast %106 : vector<16x1xi1> to vector<16x32xi1>
    %108 = arith.select %107, %98, %75 : vector<16x32xi1>, vector<16x32xf32>
    %c0_51 = arith.constant 0 : index
    %c0_52 = arith.constant 0 : index
    %109 = vector.load %arg12[%c0_51, %c0_52] : memref<16x32xf32, #tpu.memory_space<vmem>>, vector<16x32xf32>
    tpu.vector_store %arg12[%c0_51, %c0_52], %105 {strides = array<i32>} : memref<16x32xf32, #tpu.memory_space<vmem>>, vector<16x32xf32>,
    %c0_53 = arith.constant 0 : index
    %c0_54 = arith.constant 0 : index
    %110 = vector.load %arg13[%c0_53, %c0_54] : memref<16x32xf32, #tpu.memory_space<vmem>>, vector<16x32xf32>
    tpu.vector_store %arg13[%c0_53, %c0_54], %108 {strides = array<i32>} : memref<16x32xf32, #tpu.memory_space<vmem>>, vector<16x32xf32>,
    %111 = arith.truncf %61 : vector<16x32xf32> to vector<16x32xbf16>
    %112 = arith.index_cast %c0_i32 : i32 to index
    %c0_55 = arith.constant 0 : index
    %c0_56 = arith.constant 0 : index
    %113 = vector.load %arg7[%112, %c0_55, %c0_56] : memref<8x16x64xbf16, #tpu.memory_space<vmem>>, vector<1x16x32xbf16>
    %114 = vector.shape_cast %113 : vector<1x16x32xbf16> to vector<16x32xbf16>
    %115 = vector.shape_cast %111 : vector<16x32xbf16> to vector<1x16x32xbf16>
    tpu.vector_store %arg7[%112, %c0_55, %c0_56], %115 {strides = array<i32>} : memref<8x16x64xbf16, #tpu.memory_space<vmem>>, vector<1x16x32xbf16>,
    %116 = arith.truncf %105 : vector<16x32xf32> to vector<16x32xbf16>
    %117 = arith.index_cast %22 : i32 to index
    %c0_57 = arith.constant 0 : index
    %c32 = arith.constant 32 : index
    %118 = vector.load %arg7[%117, %c0_57, %c32] : memref<8x16x64xbf16, #tpu.memory_space<vmem>>, vector<1x16x32xbf16>
    %119 = vector.shape_cast %118 : vector<1x16x32xbf16> to vector<16x32xbf16>
    %120 = vector.shape_cast %116 : vector<16x32xbf16> to vector<1x16x32xbf16>
    tpu.vector_store %arg7[%117, %c0_57, %c32], %120 {strides = array<i32>} : memref<8x16x64xbf16, #tpu.memory_space<vmem>>, vector<1x16x32xbf16>,
    %c1_i32 = arith.constant 1 : i32
    %c7_i32_58 = arith.constant 7 : i32
    %121 = arith.subi %c7_i32_58, %c1_i32 : i32
    %c16_i32_59 = arith.constant 16 : i32
    %122 = arith.muli %c1_i32, %c16_i32_59 : i32
    %123 = tpu.assume_multiple %122, 16 : i32
    %c0_60 = arith.constant 0 : index
    %c0_61 = arith.constant 0 : index
    %124 = vector.load %arg10[%c0_60, %c0_61] : memref<16x32xf32, #tpu.memory_space<vmem>>, vector<16x32xf32>
    %125 = arith.index_cast %123 : i32 to index
    %c0_62 = arith.constant 0 : index
    %126 = vector.load %arg8[%125, %c0_62] : memref<128x128xf32, #tpu.memory_space<vmem>>, vector<16x128xf32>
    %127 = arith.truncf %124 : vector<16x32xf32> to vector<16x32xbf16>
    %cst_63 = arith.constant dense<0.000000e+00> : vector<16x128xf32>
    %128 = tpu.matmul %127, %20, %cst_63 {dimension_numbers = #tpu.dot_dimension_numbers<[1], [0], [0], [1], [0, 0, 1, 1], [], []>} : vector<16x32xbf16>, vector<32x128xbf16>, vector<16x128xf32> -> vector<16x128xf32>
    %129 = arith.addf %126, %128 : vector<16x128xf32>
    %c0_64 = arith.constant 0 : index
    %c0_65 = arith.constant 0 : index
    %130 = vector.load %arg11[%c0_64, %c0_65] : memref<16x32xf32, #tpu.memory_space<vmem>>, vector<16x32xf32>
    %131 = vector.extract_strided_slice %129 {offsets = [0, 0], sizes = [16, 32], strides = [1, 1]} : vector<16x128xf32> to vector<16x32xf32>
    %132 = arith.negf %131 : vector<16x32xf32>
    %133 = math.exp %132 : vector<16x32xf32>
    %cst_66 = arith.constant 1.000000e+00 : f32
    %134 = vector.broadcast %cst_66 : f32 to vector<16x32xf32>
    %135 = arith.addf %134, %133 : vector<16x32xf32>
    %136 = arith.divf %134, %135 : vector<16x32xf32>
    %137 = vector.extract_strided_slice %129 {offsets = [0, 32], sizes = [16, 32], strides = [1, 1]} : vector<16x128xf32> to vector<16x32xf32>
    %138 = arith.negf %137 : vector<16x32xf32>
    %139 = math.exp %138 : vector<16x32xf32>
    %cst_67 = arith.constant 1.000000e+00 : f32
    %140 = vector.broadcast %cst_67 : f32 to vector<16x32xf32>
    %141 = arith.addf %140, %139 : vector<16x32xf32>
    %142 = arith.divf %140, %141 : vector<16x32xf32>
    %143 = vector.extract_strided_slice %129 {offsets = [0, 64], sizes = [16, 32], strides = [1, 1]} : vector<16x128xf32> to vector<16x32xf32>
    %144 = math.tanh %143 : vector<16x32xf32>
    %145 = vector.extract_strided_slice %129 {offsets = [0, 96], sizes = [16, 32], strides = [1, 1]} : vector<16x128xf32> to vector<16x32xf32>
    %146 = arith.negf %145 : vector<16x32xf32>
    %147 = math.exp %146 : vector<16x32xf32>
    %cst_68 = arith.constant 1.000000e+00 : f32
    %148 = vector.broadcast %cst_68 : f32 to vector<16x32xf32>
    %149 = arith.addf %148, %147 : vector<16x32xf32>
    %150 = arith.divf %148, %149 : vector<16x32xf32>
    %151 = arith.mulf %142, %130 : vector<16x32xf32>
    %152 = arith.mulf %136, %144 : vector<16x32xf32>
    %153 = arith.addf %151, %152 : vector<16x32xf32>
    %154 = math.tanh %153 : vector<16x32xf32>
    %155 = arith.mulf %150, %154 : vector<16x32xf32>
    %156 = vector.broadcast %c1_i32 : i32 to vector<16x1xi32>
    %157 = arith.cmpi slt, %156, %19 : vector<16x1xi32>
    %158 = vector.shape_cast %157 : vector<16x1xi1> to vector<16x1xi1>
    %159 = vector.broadcast %158 : vector<16x1xi1> to vector<16x32xi1>
    %160 = arith.select %159, %155, %124 : vector<16x32xi1>, vector<16x32xf32>
    %161 = vector.shape_cast %157 : vector<16x1xi1> to vector<16x1xi1>
    %162 = vector.broadcast %161 : vector<16x1xi1> to vector<16x32xi1>
    %163 = arith.select %162, %153, %130 : vector<16x32xi1>, vector<16x32xf32>
    %c0_69 = arith.constant 0 : index
    %c0_70 = arith.constant 0 : index
    %164 = vector.load %arg10[%c0_69, %c0_70] : memref<16x32xf32, #tpu.memory_space<vmem>>, vector<16x32xf32>
    tpu.vector_store %arg10[%c0_69, %c0_70], %160 {strides = array<i32>} : memref<16x32xf32, #tpu.memory_space<vmem>>, vector<16x32xf32>,
    %c0_71 = arith.constant 0 : index
    %c0_72 = arith.constant 0 : index
    %165 = vector.load %arg11[%c0_71, %c0_72] : memref<16x32xf32, #tpu.memory_space<vmem>>, vector<16x32xf32>
    tpu.vector_store %arg11[%c0_71, %c0_72], %163 {strides = array<i32>} : memref<16x32xf32, #tpu.memory_space<vmem>>, vector<16x32xf32>,
    %c16_i32_73 = arith.constant 16 : i32
    %166 = arith.muli %121, %c16_i32_73 : i32
    %167 = tpu.assume_multiple %166, 16 : i32
    %c0_74 = arith.constant 0 : index
    %c0_75 = arith.constant 0 : index
    %168 = vector.load %arg12[%c0_74, %c0_75] : memref<16x32xf32, #tpu.memory_space<vmem>>, vector<16x32xf32>
    %169 = arith.index_cast %167 : i32 to index
    %c0_76 = arith.constant 0 : index
    %170 = vector.load %arg9[%169, %c0_76] : memref<128x128xf32, #tpu.memory_space<vmem>>, vector<16x128xf32>
    %171 = arith.truncf %168 : vector<16x32xf32> to vector<16x32xbf16>
    %cst_77 = arith.constant dense<0.000000e+00> : vector<16x128xf32>
    %172 = tpu.matmul %171, %21, %cst_77 {dimension_numbers = #tpu.dot_dimension_numbers<[1], [0], [0], [1], [0, 0, 1, 1], [], []>} : vector<16x32xbf16>, vector<32x128xbf16>, vector<16x128xf32> -> vector<16x128xf32>
    %173 = arith.addf %170, %172 : vector<16x128xf32>
    %c0_78 = arith.constant 0 : index
    %c0_79 = arith.constant 0 : index
    %174 = vector.load %arg13[%c0_78, %c0_79] : memref<16x32xf32, #tpu.memory_space<vmem>>, vector<16x32xf32>
    %175 = vector.extract_strided_slice %173 {offsets = [0, 0], sizes = [16, 32], strides = [1, 1]} : vector<16x128xf32> to vector<16x32xf32>
    %176 = arith.negf %175 : vector<16x32xf32>
    %177 = math.exp %176 : vector<16x32xf32>
    %cst_80 = arith.constant 1.000000e+00 : f32
    %178 = vector.broadcast %cst_80 : f32 to vector<16x32xf32>
    %179 = arith.addf %178, %177 : vector<16x32xf32>
    %180 = arith.divf %178, %179 : vector<16x32xf32>
    %181 = vector.extract_strided_slice %173 {offsets = [0, 32], sizes = [16, 32], strides = [1, 1]} : vector<16x128xf32> to vector<16x32xf32>
    %182 = arith.negf %181 : vector<16x32xf32>
    %183 = math.exp %182 : vector<16x32xf32>
    %cst_81 = arith.constant 1.000000e+00 : f32
    %184 = vector.broadcast %cst_81 : f32 to vector<16x32xf32>
    %185 = arith.addf %184, %183 : vector<16x32xf32>
    %186 = arith.divf %184, %185 : vector<16x32xf32>
    %187 = vector.extract_strided_slice %173 {offsets = [0, 64], sizes = [16, 32], strides = [1, 1]} : vector<16x128xf32> to vector<16x32xf32>
    %188 = math.tanh %187 : vector<16x32xf32>
    %189 = vector.extract_strided_slice %173 {offsets = [0, 96], sizes = [16, 32], strides = [1, 1]} : vector<16x128xf32> to vector<16x32xf32>
    %190 = arith.negf %189 : vector<16x32xf32>
    %191 = math.exp %190 : vector<16x32xf32>
    %cst_82 = arith.constant 1.000000e+00 : f32
    %192 = vector.broadcast %cst_82 : f32 to vector<16x32xf32>
    %193 = arith.addf %192, %191 : vector<16x32xf32>
    %194 = arith.divf %192, %193 : vector<16x32xf32>
    %195 = arith.mulf %186, %174 : vector<16x32xf32>
    %196 = arith.mulf %180, %188 : vector<16x32xf32>
    %197 = arith.addf %195, %196 : vector<16x32xf32>
    %198 = math.tanh %197 : vector<16x32xf32>
    %199 = arith.mulf %194, %198 : vector<16x32xf32>
    %200 = vector.broadcast %121 : i32 to vector<16x1xi32>
    %201 = arith.cmpi slt, %200, %19 : vector<16x1xi32>
    %202 = vector.shape_cast %201 : vector<16x1xi1> to vector<16x1xi1>
    %203 = vector.broadcast %202 : vector<16x1xi1> to vector<16x32xi1>
    %204 = arith.select %203, %199, %168 : vector<16x32xi1>, vector<16x32xf32>
    %205 = vector.shape_cast %201 : vector<16x1xi1> to vector<16x1xi1>
    %206 = vector.broadcast %205 : vector<16x1xi1> to vector<16x32xi1>
    %207 = arith.select %206, %197, %174 : vector<16x32xi1>, vector<16x32xf32>
    %c0_83 = arith.constant 0 : index
    %c0_84 = arith.constant 0 : index
    %208 = vector.load %arg12[%c0_83, %c0_84] : memref<16x32xf32, #tpu.memory_space<vmem>>, vector<16x32xf32>
    tpu.vector_store %arg12[%c0_83, %c0_84], %204 {strides = array<i32>} : memref<16x32xf32, #tpu.memory_space<vmem>>, vector<16x32xf32>,
    %c0_85 = arith.constant 0 : index
    %c0_86 = arith.constant 0 : index
    %209 = vector.load %arg13[%c0_85, %c0_86] : memref<16x32xf32, #tpu.memory_space<vmem>>, vector<16x32xf32>
    tpu.vector_store %arg13[%c0_85, %c0_86], %207 {strides = array<i32>} : memref<16x32xf32, #tpu.memory_space<vmem>>, vector<16x32xf32>,
    %210 = arith.truncf %160 : vector<16x32xf32> to vector<16x32xbf16>
    %211 = arith.index_cast %c1_i32 : i32 to index
    %c0_87 = arith.constant 0 : index
    %c0_88 = arith.constant 0 : index
    %212 = vector.load %arg7[%211, %c0_87, %c0_88] : memref<8x16x64xbf16, #tpu.memory_space<vmem>>, vector<1x16x32xbf16>
    %213 = vector.shape_cast %212 : vector<1x16x32xbf16> to vector<16x32xbf16>
    %214 = vector.shape_cast %210 : vector<16x32xbf16> to vector<1x16x32xbf16>
    tpu.vector_store %arg7[%211, %c0_87, %c0_88], %214 {strides = array<i32>} : memref<8x16x64xbf16, #tpu.memory_space<vmem>>, vector<1x16x32xbf16>,
    %215 = arith.truncf %204 : vector<16x32xf32> to vector<16x32xbf16>
    %216 = arith.index_cast %121 : i32 to index
    %c0_89 = arith.constant 0 : index
    %c32_90 = arith.constant 32 : index
    %217 = vector.load %arg7[%216, %c0_89, %c32_90] : memref<8x16x64xbf16, #tpu.memory_space<vmem>>, vector<1x16x32xbf16>
    %218 = vector.shape_cast %217 : vector<1x16x32xbf16> to vector<16x32xbf16>
    %219 = vector.shape_cast %215 : vector<16x32xbf16> to vector<1x16x32xbf16>
    tpu.vector_store %arg7[%216, %c0_89, %c32_90], %219 {strides = array<i32>} : memref<8x16x64xbf16, #tpu.memory_space<vmem>>, vector<1x16x32xbf16>,
    %c2_i32 = arith.constant 2 : i32
    %c7_i32_91 = arith.constant 7 : i32
    %220 = arith.subi %c7_i32_91, %c2_i32 : i32
    %c16_i32_92 = arith.constant 16 : i32
    %221 = arith.muli %c2_i32, %c16_i32_92 : i32
    %222 = tpu.assume_multiple %221, 16 : i32
    %c0_93 = arith.constant 0 : index
    %c0_94 = arith.constant 0 : index
    %223 = vector.load %arg10[%c0_93, %c0_94] : memref<16x32xf32, #tpu.memory_space<vmem>>, vector<16x32xf32>
    %224 = arith.index_cast %222 : i32 to index
    %c0_95 = arith.constant 0 : index
    %225 = vector.load %arg8[%224, %c0_95] : memref<128x128xf32, #tpu.memory_space<vmem>>, vector<16x128xf32>
    %226 = arith.truncf %223 : vector<16x32xf32> to vector<16x32xbf16>
    %cst_96 = arith.constant dense<0.000000e+00> : vector<16x128xf32>
    %227 = tpu.matmul %226, %20, %cst_96 {dimension_numbers = #tpu.dot_dimension_numbers<[1], [0], [0], [1], [0, 0, 1, 1], [], []>} : vector<16x32xbf16>, vector<32x128xbf16>, vector<16x128xf32> -> vector<16x128xf32>
    %228 = arith.addf %225, %227 : vector<16x128xf32>
    %c0_97 = arith.constant 0 : index
    %c0_98 = arith.constant 0 : index
    %229 = vector.load %arg11[%c0_97, %c0_98] : memref<16x32xf32, #tpu.memory_space<vmem>>, vector<16x32xf32>
    %230 = vector.extract_strided_slice %228 {offsets = [0, 0], sizes = [16, 32], strides = [1, 1]} : vector<16x128xf32> to vector<16x32xf32>
    %231 = arith.negf %230 : vector<16x32xf32>
    %232 = math.exp %231 : vector<16x32xf32>
    %cst_99 = arith.constant 1.000000e+00 : f32
    %233 = vector.broadcast %cst_99 : f32 to vector<16x32xf32>
    %234 = arith.addf %233, %232 : vector<16x32xf32>
    %235 = arith.divf %233, %234 : vector<16x32xf32>
    %236 = vector.extract_strided_slice %228 {offsets = [0, 32], sizes = [16, 32], strides = [1, 1]} : vector<16x128xf32> to vector<16x32xf32>
    %237 = arith.negf %236 : vector<16x32xf32>
    %238 = math.exp %237 : vector<16x32xf32>
    %cst_100 = arith.constant 1.000000e+00 : f32
    %239 = vector.broadcast %cst_100 : f32 to vector<16x32xf32>
    %240 = arith.addf %239, %238 : vector<16x32xf32>
    %241 = arith.divf %239, %240 : vector<16x32xf32>
    %242 = vector.extract_strided_slice %228 {offsets = [0, 64], sizes = [16, 32], strides = [1, 1]} : vector<16x128xf32> to vector<16x32xf32>
    %243 = math.tanh %242 : vector<16x32xf32>
    %244 = vector.extract_strided_slice %228 {offsets = [0, 96], sizes = [16, 32], strides = [1, 1]} : vector<16x128xf32> to vector<16x32xf32>
    %245 = arith.negf %244 : vector<16x32xf32>
    %246 = math.exp %245 : vector<16x32xf32>
    %cst_101 = arith.constant 1.000000e+00 : f32
    %247 = vector.broadcast %cst_101 : f32 to vector<16x32xf32>
    %248 = arith.addf %247, %246 : vector<16x32xf32>
    %249 = arith.divf %247, %248 : vector<16x32xf32>
    %250 = arith.mulf %241, %229 : vector<16x32xf32>
    %251 = arith.mulf %235, %243 : vector<16x32xf32>
    %252 = arith.addf %250, %251 : vector<16x32xf32>
    %253 = math.tanh %252 : vector<16x32xf32>
    %254 = arith.mulf %249, %253 : vector<16x32xf32>
    %255 = vector.broadcast %c2_i32 : i32 to vector<16x1xi32>
    %256 = arith.cmpi slt, %255, %19 : vector<16x1xi32>
    %257 = vector.shape_cast %256 : vector<16x1xi1> to vector<16x1xi1>
    %258 = vector.broadcast %257 : vector<16x1xi1> to vector<16x32xi1>
    %259 = arith.select %258, %254, %223 : vector<16x32xi1>, vector<16x32xf32>
    %260 = vector.shape_cast %256 : vector<16x1xi1> to vector<16x1xi1>
    %261 = vector.broadcast %260 : vector<16x1xi1> to vector<16x32xi1>
    %262 = arith.select %261, %252, %229 : vector<16x32xi1>, vector<16x32xf32>
    %c0_102 = arith.constant 0 : index
    %c0_103 = arith.constant 0 : index
    %263 = vector.load %arg10[%c0_102, %c0_103] : memref<16x32xf32, #tpu.memory_space<vmem>>, vector<16x32xf32>
    tpu.vector_store %arg10[%c0_102, %c0_103], %259 {strides = array<i32>} : memref<16x32xf32, #tpu.memory_space<vmem>>, vector<16x32xf32>,
    %c0_104 = arith.constant 0 : index
    %c0_105 = arith.constant 0 : index
    %264 = vector.load %arg11[%c0_104, %c0_105] : memref<16x32xf32, #tpu.memory_space<vmem>>, vector<16x32xf32>
    tpu.vector_store %arg11[%c0_104, %c0_105], %262 {strides = array<i32>} : memref<16x32xf32, #tpu.memory_space<vmem>>, vector<16x32xf32>,
    %c16_i32_106 = arith.constant 16 : i32
    %265 = arith.muli %220, %c16_i32_106 : i32
    %266 = tpu.assume_multiple %265, 16 : i32
    %c0_107 = arith.constant 0 : index
    %c0_108 = arith.constant 0 : index
    %267 = vector.load %arg12[%c0_107, %c0_108] : memref<16x32xf32, #tpu.memory_space<vmem>>, vector<16x32xf32>
    %268 = arith.index_cast %266 : i32 to index
    %c0_109 = arith.constant 0 : index
    %269 = vector.load %arg9[%268, %c0_109] : memref<128x128xf32, #tpu.memory_space<vmem>>, vector<16x128xf32>
    %270 = arith.truncf %267 : vector<16x32xf32> to vector<16x32xbf16>
    %cst_110 = arith.constant dense<0.000000e+00> : vector<16x128xf32>
    %271 = tpu.matmul %270, %21, %cst_110 {dimension_numbers = #tpu.dot_dimension_numbers<[1], [0], [0], [1], [0, 0, 1, 1], [], []>} : vector<16x32xbf16>, vector<32x128xbf16>, vector<16x128xf32> -> vector<16x128xf32>
    %272 = arith.addf %269, %271 : vector<16x128xf32>
    %c0_111 = arith.constant 0 : index
    %c0_112 = arith.constant 0 : index
    %273 = vector.load %arg13[%c0_111, %c0_112] : memref<16x32xf32, #tpu.memory_space<vmem>>, vector<16x32xf32>
    %274 = vector.extract_strided_slice %272 {offsets = [0, 0], sizes = [16, 32], strides = [1, 1]} : vector<16x128xf32> to vector<16x32xf32>
    %275 = arith.negf %274 : vector<16x32xf32>
    %276 = math.exp %275 : vector<16x32xf32>
    %cst_113 = arith.constant 1.000000e+00 : f32
    %277 = vector.broadcast %cst_113 : f32 to vector<16x32xf32>
    %278 = arith.addf %277, %276 : vector<16x32xf32>
    %279 = arith.divf %277, %278 : vector<16x32xf32>
    %280 = vector.extract_strided_slice %272 {offsets = [0, 32], sizes = [16, 32], strides = [1, 1]} : vector<16x128xf32> to vector<16x32xf32>
    %281 = arith.negf %280 : vector<16x32xf32>
    %282 = math.exp %281 : vector<16x32xf32>
    %cst_114 = arith.constant 1.000000e+00 : f32
    %283 = vector.broadcast %cst_114 : f32 to vector<16x32xf32>
    %284 = arith.addf %283, %282 : vector<16x32xf32>
    %285 = arith.divf %283, %284 : vector<16x32xf32>
    %286 = vector.extract_strided_slice %272 {offsets = [0, 64], sizes = [16, 32], strides = [1, 1]} : vector<16x128xf32> to vector<16x32xf32>
    %287 = math.tanh %286 : vector<16x32xf32>
    %288 = vector.extract_strided_slice %272 {offsets = [0, 96], sizes = [16, 32], strides = [1, 1]} : vector<16x128xf32> to vector<16x32xf32>
    %289 = arith.negf %288 : vector<16x32xf32>
    %290 = math.exp %289 : vector<16x32xf32>
    %cst_115 = arith.constant 1.000000e+00 : f32
    %291 = vector.broadcast %cst_115 : f32 to vector<16x32xf32>
    %292 = arith.addf %291, %290 : vector<16x32xf32>
    %293 = arith.divf %291, %292 : vector<16x32xf32>
    %294 = arith.mulf %285, %273 : vector<16x32xf32>
    %295 = arith.mulf %279, %287 : vector<16x32xf32>
    %296 = arith.addf %294, %295 : vector<16x32xf32>
    %297 = math.tanh %296 : vector<16x32xf32>
    %298 = arith.mulf %293, %297 : vector<16x32xf32>
    %299 = vector.broadcast %220 : i32 to vector<16x1xi32>
    %300 = arith.cmpi slt, %299, %19 : vector<16x1xi32>
    %301 = vector.shape_cast %300 : vector<16x1xi1> to vector<16x1xi1>
    %302 = vector.broadcast %301 : vector<16x1xi1> to vector<16x32xi1>
    %303 = arith.select %302, %298, %267 : vector<16x32xi1>, vector<16x32xf32>
    %304 = vector.shape_cast %300 : vector<16x1xi1> to vector<16x1xi1>
    %305 = vector.broadcast %304 : vector<16x1xi1> to vector<16x32xi1>
    %306 = arith.select %305, %296, %273 : vector<16x32xi1>, vector<16x32xf32>
    %c0_116 = arith.constant 0 : index
    %c0_117 = arith.constant 0 : index
    %307 = vector.load %arg12[%c0_116, %c0_117] : memref<16x32xf32, #tpu.memory_space<vmem>>, vector<16x32xf32>
    tpu.vector_store %arg12[%c0_116, %c0_117], %303 {strides = array<i32>} : memref<16x32xf32, #tpu.memory_space<vmem>>, vector<16x32xf32>,
    %c0_118 = arith.constant 0 : index
    %c0_119 = arith.constant 0 : index
    %308 = vector.load %arg13[%c0_118, %c0_119] : memref<16x32xf32, #tpu.memory_space<vmem>>, vector<16x32xf32>
    tpu.vector_store %arg13[%c0_118, %c0_119], %306 {strides = array<i32>} : memref<16x32xf32, #tpu.memory_space<vmem>>, vector<16x32xf32>,
    %309 = arith.truncf %259 : vector<16x32xf32> to vector<16x32xbf16>
    %310 = arith.index_cast %c2_i32 : i32 to index
    %c0_120 = arith.constant 0 : index
    %c0_121 = arith.constant 0 : index
    %311 = vector.load %arg7[%310, %c0_120, %c0_121] : memref<8x16x64xbf16, #tpu.memory_space<vmem>>, vector<1x16x32xbf16>
    %312 = vector.shape_cast %311 : vector<1x16x32xbf16> to vector<16x32xbf16>
    %313 = vector.shape_cast %309 : vector<16x32xbf16> to vector<1x16x32xbf16>
    tpu.vector_store %arg7[%310, %c0_120, %c0_121], %313 {strides = array<i32>} : memref<8x16x64xbf16, #tpu.memory_space<vmem>>, vector<1x16x32xbf16>,
    %314 = arith.truncf %303 : vector<16x32xf32> to vector<16x32xbf16>
    %315 = arith.index_cast %220 : i32 to index
    %c0_122 = arith.constant 0 : index
    %c32_123 = arith.constant 32 : index
    %316 = vector.load %arg7[%315, %c0_122, %c32_123] : memref<8x16x64xbf16, #tpu.memory_space<vmem>>, vector<1x16x32xbf16>
    %317 = vector.shape_cast %316 : vector<1x16x32xbf16> to vector<16x32xbf16>
    %318 = vector.shape_cast %314 : vector<16x32xbf16> to vector<1x16x32xbf16>
    tpu.vector_store %arg7[%315, %c0_122, %c32_123], %318 {strides = array<i32>} : memref<8x16x64xbf16, #tpu.memory_space<vmem>>, vector<1x16x32xbf16>,
    %c3_i32 = arith.constant 3 : i32
    %c7_i32_124 = arith.constant 7 : i32
    %319 = arith.subi %c7_i32_124, %c3_i32 : i32
    %c16_i32_125 = arith.constant 16 : i32
    %320 = arith.muli %c3_i32, %c16_i32_125 : i32
    %321 = tpu.assume_multiple %320, 16 : i32
    %c0_126 = arith.constant 0 : index
    %c0_127 = arith.constant 0 : index
    %322 = vector.load %arg10[%c0_126, %c0_127] : memref<16x32xf32, #tpu.memory_space<vmem>>, vector<16x32xf32>
    %323 = arith.index_cast %321 : i32 to index
    %c0_128 = arith.constant 0 : index
    %324 = vector.load %arg8[%323, %c0_128] : memref<128x128xf32, #tpu.memory_space<vmem>>, vector<16x128xf32>
    %325 = arith.truncf %322 : vector<16x32xf32> to vector<16x32xbf16>
    %cst_129 = arith.constant dense<0.000000e+00> : vector<16x128xf32>
    %326 = tpu.matmul %325, %20, %cst_129 {dimension_numbers = #tpu.dot_dimension_numbers<[1], [0], [0], [1], [0, 0, 1, 1], [], []>} : vector<16x32xbf16>, vector<32x128xbf16>, vector<16x128xf32> -> vector<16x128xf32>
    %327 = arith.addf %324, %326 : vector<16x128xf32>
    %c0_130 = arith.constant 0 : index
    %c0_131 = arith.constant 0 : index
    %328 = vector.load %arg11[%c0_130, %c0_131] : memref<16x32xf32, #tpu.memory_space<vmem>>, vector<16x32xf32>
    %329 = vector.extract_strided_slice %327 {offsets = [0, 0], sizes = [16, 32], strides = [1, 1]} : vector<16x128xf32> to vector<16x32xf32>
    %330 = arith.negf %329 : vector<16x32xf32>
    %331 = math.exp %330 : vector<16x32xf32>
    %cst_132 = arith.constant 1.000000e+00 : f32
    %332 = vector.broadcast %cst_132 : f32 to vector<16x32xf32>
    %333 = arith.addf %332, %331 : vector<16x32xf32>
    %334 = arith.divf %332, %333 : vector<16x32xf32>
    %335 = vector.extract_strided_slice %327 {offsets = [0, 32], sizes = [16, 32], strides = [1, 1]} : vector<16x128xf32> to vector<16x32xf32>
    %336 = arith.negf %335 : vector<16x32xf32>
    %337 = math.exp %336 : vector<16x32xf32>
    %cst_133 = arith.constant 1.000000e+00 : f32
    %338 = vector.broadcast %cst_133 : f32 to vector<16x32xf32>
    %339 = arith.addf %338, %337 : vector<16x32xf32>
    %340 = arith.divf %338, %339 : vector<16x32xf32>
    %341 = vector.extract_strided_slice %327 {offsets = [0, 64], sizes = [16, 32], strides = [1, 1]} : vector<16x128xf32> to vector<16x32xf32>
    %342 = math.tanh %341 : vector<16x32xf32>
    %343 = vector.extract_strided_slice %327 {offsets = [0, 96], sizes = [16, 32], strides = [1, 1]} : vector<16x128xf32> to vector<16x32xf32>
    %344 = arith.negf %343 : vector<16x32xf32>
    %345 = math.exp %344 : vector<16x32xf32>
    %cst_134 = arith.constant 1.000000e+00 : f32
    %346 = vector.broadcast %cst_134 : f32 to vector<16x32xf32>
    %347 = arith.addf %346, %345 : vector<16x32xf32>
    %348 = arith.divf %346, %347 : vector<16x32xf32>
    %349 = arith.mulf %340, %328 : vector<16x32xf32>
    %350 = arith.mulf %334, %342 : vector<16x32xf32>
    %351 = arith.addf %349, %350 : vector<16x32xf32>
    %352 = math.tanh %351 : vector<16x32xf32>
    %353 = arith.mulf %348, %352 : vector<16x32xf32>
    %354 = vector.broadcast %c3_i32 : i32 to vector<16x1xi32>
    %355 = arith.cmpi slt, %354, %19 : vector<16x1xi32>
    %356 = vector.shape_cast %355 : vector<16x1xi1> to vector<16x1xi1>
    %357 = vector.broadcast %356 : vector<16x1xi1> to vector<16x32xi1>
    %358 = arith.select %357, %353, %322 : vector<16x32xi1>, vector<16x32xf32>
    %359 = vector.shape_cast %355 : vector<16x1xi1> to vector<16x1xi1>
    %360 = vector.broadcast %359 : vector<16x1xi1> to vector<16x32xi1>
    %361 = arith.select %360, %351, %328 : vector<16x32xi1>, vector<16x32xf32>
    %c0_135 = arith.constant 0 : index
    %c0_136 = arith.constant 0 : index
    %362 = vector.load %arg10[%c0_135, %c0_136] : memref<16x32xf32, #tpu.memory_space<vmem>>, vector<16x32xf32>
    tpu.vector_store %arg10[%c0_135, %c0_136], %358 {strides = array<i32>} : memref<16x32xf32, #tpu.memory_space<vmem>>, vector<16x32xf32>,
    %c0_137 = arith.constant 0 : index
    %c0_138 = arith.constant 0 : index
    %363 = vector.load %arg11[%c0_137, %c0_138] : memref<16x32xf32, #tpu.memory_space<vmem>>, vector<16x32xf32>
    tpu.vector_store %arg11[%c0_137, %c0_138], %361 {strides = array<i32>} : memref<16x32xf32, #tpu.memory_space<vmem>>, vector<16x32xf32>,
    %c16_i32_139 = arith.constant 16 : i32
    %364 = arith.muli %319, %c16_i32_139 : i32
    %365 = tpu.assume_multiple %364, 16 : i32
    %c0_140 = arith.constant 0 : index
    %c0_141 = arith.constant 0 : index
    %366 = vector.load %arg12[%c0_140, %c0_141] : memref<16x32xf32, #tpu.memory_space<vmem>>, vector<16x32xf32>
    %367 = arith.index_cast %365 : i32 to index
    %c0_142 = arith.constant 0 : index
    %368 = vector.load %arg9[%367, %c0_142] : memref<128x128xf32, #tpu.memory_space<vmem>>, vector<16x128xf32>
    %369 = arith.truncf %366 : vector<16x32xf32> to vector<16x32xbf16>
    %cst_143 = arith.constant dense<0.000000e+00> : vector<16x128xf32>
    %370 = tpu.matmul %369, %21, %cst_143 {dimension_numbers = #tpu.dot_dimension_numbers<[1], [0], [0], [1], [0, 0, 1, 1], [], []>} : vector<16x32xbf16>, vector<32x128xbf16>, vector<16x128xf32> -> vector<16x128xf32>
    %371 = arith.addf %368, %370 : vector<16x128xf32>
    %c0_144 = arith.constant 0 : index
    %c0_145 = arith.constant 0 : index
    %372 = vector.load %arg13[%c0_144, %c0_145] : memref<16x32xf32, #tpu.memory_space<vmem>>, vector<16x32xf32>
    %373 = vector.extract_strided_slice %371 {offsets = [0, 0], sizes = [16, 32], strides = [1, 1]} : vector<16x128xf32> to vector<16x32xf32>
    %374 = arith.negf %373 : vector<16x32xf32>
    %375 = math.exp %374 : vector<16x32xf32>
    %cst_146 = arith.constant 1.000000e+00 : f32
    %376 = vector.broadcast %cst_146 : f32 to vector<16x32xf32>
    %377 = arith.addf %376, %375 : vector<16x32xf32>
    %378 = arith.divf %376, %377 : vector<16x32xf32>
    %379 = vector.extract_strided_slice %371 {offsets = [0, 32], sizes = [16, 32], strides = [1, 1]} : vector<16x128xf32> to vector<16x32xf32>
    %380 = arith.negf %379 : vector<16x32xf32>
    %381 = math.exp %380 : vector<16x32xf32>
    %cst_147 = arith.constant 1.000000e+00 : f32
    %382 = vector.broadcast %cst_147 : f32 to vector<16x32xf32>
    %383 = arith.addf %382, %381 : vector<16x32xf32>
    %384 = arith.divf %382, %383 : vector<16x32xf32>
    %385 = vector.extract_strided_slice %371 {offsets = [0, 64], sizes = [16, 32], strides = [1, 1]} : vector<16x128xf32> to vector<16x32xf32>
    %386 = math.tanh %385 : vector<16x32xf32>
    %387 = vector.extract_strided_slice %371 {offsets = [0, 96], sizes = [16, 32], strides = [1, 1]} : vector<16x128xf32> to vector<16x32xf32>
    %388 = arith.negf %387 : vector<16x32xf32>
    %389 = math.exp %388 : vector<16x32xf32>
    %cst_148 = arith.constant 1.000000e+00 : f32
    %390 = vector.broadcast %cst_148 : f32 to vector<16x32xf32>
    %391 = arith.addf %390, %389 : vector<16x32xf32>
    %392 = arith.divf %390, %391 : vector<16x32xf32>
    %393 = arith.mulf %384, %372 : vector<16x32xf32>
    %394 = arith.mulf %378, %386 : vector<16x32xf32>
    %395 = arith.addf %393, %394 : vector<16x32xf32>
    %396 = math.tanh %395 : vector<16x32xf32>
    %397 = arith.mulf %392, %396 : vector<16x32xf32>
    %398 = vector.broadcast %319 : i32 to vector<16x1xi32>
    %399 = arith.cmpi slt, %398, %19 : vector<16x1xi32>
    %400 = vector.shape_cast %399 : vector<16x1xi1> to vector<16x1xi1>
    %401 = vector.broadcast %400 : vector<16x1xi1> to vector<16x32xi1>
    %402 = arith.select %401, %397, %366 : vector<16x32xi1>, vector<16x32xf32>
    %403 = vector.shape_cast %399 : vector<16x1xi1> to vector<16x1xi1>
    %404 = vector.broadcast %403 : vector<16x1xi1> to vector<16x32xi1>
    %405 = arith.select %404, %395, %372 : vector<16x32xi1>, vector<16x32xf32>
    %c0_149 = arith.constant 0 : index
    %c0_150 = arith.constant 0 : index
    %406 = vector.load %arg12[%c0_149, %c0_150] : memref<16x32xf32, #tpu.memory_space<vmem>>, vector<16x32xf32>
    tpu.vector_store %arg12[%c0_149, %c0_150], %402 {strides = array<i32>} : memref<16x32xf32, #tpu.memory_space<vmem>>, vector<16x32xf32>,
    %c0_151 = arith.constant 0 : index
    %c0_152 = arith.constant 0 : index
    %407 = vector.load %arg13[%c0_151, %c0_152] : memref<16x32xf32, #tpu.memory_space<vmem>>, vector<16x32xf32>
    tpu.vector_store %arg13[%c0_151, %c0_152], %405 {strides = array<i32>} : memref<16x32xf32, #tpu.memory_space<vmem>>, vector<16x32xf32>,
    %408 = arith.truncf %358 : vector<16x32xf32> to vector<16x32xbf16>
    %409 = arith.index_cast %c3_i32 : i32 to index
    %c0_153 = arith.constant 0 : index
    %c0_154 = arith.constant 0 : index
    %410 = vector.load %arg7[%409, %c0_153, %c0_154] : memref<8x16x64xbf16, #tpu.memory_space<vmem>>, vector<1x16x32xbf16>
    %411 = vector.shape_cast %410 : vector<1x16x32xbf16> to vector<16x32xbf16>
    %412 = vector.shape_cast %408 : vector<16x32xbf16> to vector<1x16x32xbf16>
    tpu.vector_store %arg7[%409, %c0_153, %c0_154], %412 {strides = array<i32>} : memref<8x16x64xbf16, #tpu.memory_space<vmem>>, vector<1x16x32xbf16>,
    %413 = arith.truncf %402 : vector<16x32xf32> to vector<16x32xbf16>
    %414 = arith.index_cast %319 : i32 to index
    %c0_155 = arith.constant 0 : index
    %c32_156 = arith.constant 32 : index
    %415 = vector.load %arg7[%414, %c0_155, %c32_156] : memref<8x16x64xbf16, #tpu.memory_space<vmem>>, vector<1x16x32xbf16>
    %416 = vector.shape_cast %415 : vector<1x16x32xbf16> to vector<16x32xbf16>
    %417 = vector.shape_cast %413 : vector<16x32xbf16> to vector<1x16x32xbf16>
    tpu.vector_store %arg7[%414, %c0_155, %c32_156], %417 {strides = array<i32>} : memref<8x16x64xbf16, #tpu.memory_space<vmem>>, vector<1x16x32xbf16>,
    %c4_i32 = arith.constant 4 : i32
    %c7_i32_157 = arith.constant 7 : i32
    %418 = arith.subi %c7_i32_157, %c4_i32 : i32
    %c16_i32_158 = arith.constant 16 : i32
    %419 = arith.muli %c4_i32, %c16_i32_158 : i32
    %420 = tpu.assume_multiple %419, 16 : i32
    %c0_159 = arith.constant 0 : index
    %c0_160 = arith.constant 0 : index
    %421 = vector.load %arg10[%c0_159, %c0_160] : memref<16x32xf32, #tpu.memory_space<vmem>>, vector<16x32xf32>
    %422 = arith.index_cast %420 : i32 to index
    %c0_161 = arith.constant 0 : index
    %423 = vector.load %arg8[%422, %c0_161] : memref<128x128xf32, #tpu.memory_space<vmem>>, vector<16x128xf32>
    %424 = arith.truncf %421 : vector<16x32xf32> to vector<16x32xbf16>
    %cst_162 = arith.constant dense<0.000000e+00> : vector<16x128xf32>
    %425 = tpu.matmul %424, %20, %cst_162 {dimension_numbers = #tpu.dot_dimension_numbers<[1], [0], [0], [1], [0, 0, 1, 1], [], []>} : vector<16x32xbf16>, vector<32x128xbf16>, vector<16x128xf32> -> vector<16x128xf32>
    %426 = arith.addf %423, %425 : vector<16x128xf32>
    %c0_163 = arith.constant 0 : index
    %c0_164 = arith.constant 0 : index
    %427 = vector.load %arg11[%c0_163, %c0_164] : memref<16x32xf32, #tpu.memory_space<vmem>>, vector<16x32xf32>
    %428 = vector.extract_strided_slice %426 {offsets = [0, 0], sizes = [16, 32], strides = [1, 1]} : vector<16x128xf32> to vector<16x32xf32>
    %429 = arith.negf %428 : vector<16x32xf32>
    %430 = math.exp %429 : vector<16x32xf32>
    %cst_165 = arith.constant 1.000000e+00 : f32
    %431 = vector.broadcast %cst_165 : f32 to vector<16x32xf32>
    %432 = arith.addf %431, %430 : vector<16x32xf32>
    %433 = arith.divf %431, %432 : vector<16x32xf32>
    %434 = vector.extract_strided_slice %426 {offsets = [0, 32], sizes = [16, 32], strides = [1, 1]} : vector<16x128xf32> to vector<16x32xf32>
    %435 = arith.negf %434 : vector<16x32xf32>
    %436 = math.exp %435 : vector<16x32xf32>
    %cst_166 = arith.constant 1.000000e+00 : f32
    %437 = vector.broadcast %cst_166 : f32 to vector<16x32xf32>
    %438 = arith.addf %437, %436 : vector<16x32xf32>
    %439 = arith.divf %437, %438 : vector<16x32xf32>
    %440 = vector.extract_strided_slice %426 {offsets = [0, 64], sizes = [16, 32], strides = [1, 1]} : vector<16x128xf32> to vector<16x32xf32>
    %441 = math.tanh %440 : vector<16x32xf32>
    %442 = vector.extract_strided_slice %426 {offsets = [0, 96], sizes = [16, 32], strides = [1, 1]} : vector<16x128xf32> to vector<16x32xf32>
    %443 = arith.negf %442 : vector<16x32xf32>
    %444 = math.exp %443 : vector<16x32xf32>
    %cst_167 = arith.constant 1.000000e+00 : f32
    %445 = vector.broadcast %cst_167 : f32 to vector<16x32xf32>
    %446 = arith.addf %445, %444 : vector<16x32xf32>
    %447 = arith.divf %445, %446 : vector<16x32xf32>
    %448 = arith.mulf %439, %427 : vector<16x32xf32>
    %449 = arith.mulf %433, %441 : vector<16x32xf32>
    %450 = arith.addf %448, %449 : vector<16x32xf32>
    %451 = math.tanh %450 : vector<16x32xf32>
    %452 = arith.mulf %447, %451 : vector<16x32xf32>
    %453 = vector.broadcast %c4_i32 : i32 to vector<16x1xi32>
    %454 = arith.cmpi slt, %453, %19 : vector<16x1xi32>
    %455 = vector.shape_cast %454 : vector<16x1xi1> to vector<16x1xi1>
    %456 = vector.broadcast %455 : vector<16x1xi1> to vector<16x32xi1>
    %457 = arith.select %456, %452, %421 : vector<16x32xi1>, vector<16x32xf32>
    %458 = vector.shape_cast %454 : vector<16x1xi1> to vector<16x1xi1>
    %459 = vector.broadcast %458 : vector<16x1xi1> to vector<16x32xi1>
    %460 = arith.select %459, %450, %427 : vector<16x32xi1>, vector<16x32xf32>
    %c0_168 = arith.constant 0 : index
    %c0_169 = arith.constant 0 : index
    %461 = vector.load %arg10[%c0_168, %c0_169] : memref<16x32xf32, #tpu.memory_space<vmem>>, vector<16x32xf32>
    tpu.vector_store %arg10[%c0_168, %c0_169], %457 {strides = array<i32>} : memref<16x32xf32, #tpu.memory_space<vmem>>, vector<16x32xf32>,
    %c0_170 = arith.constant 0 : index
    %c0_171 = arith.constant 0 : index
    %462 = vector.load %arg11[%c0_170, %c0_171] : memref<16x32xf32, #tpu.memory_space<vmem>>, vector<16x32xf32>
    tpu.vector_store %arg11[%c0_170, %c0_171], %460 {strides = array<i32>} : memref<16x32xf32, #tpu.memory_space<vmem>>, vector<16x32xf32>,
    %c16_i32_172 = arith.constant 16 : i32
    %463 = arith.muli %418, %c16_i32_172 : i32
    %464 = tpu.assume_multiple %463, 16 : i32
    %c0_173 = arith.constant 0 : index
    %c0_174 = arith.constant 0 : index
    %465 = vector.load %arg12[%c0_173, %c0_174] : memref<16x32xf32, #tpu.memory_space<vmem>>, vector<16x32xf32>
    %466 = arith.index_cast %464 : i32 to index
    %c0_175 = arith.constant 0 : index
    %467 = vector.load %arg9[%466, %c0_175] : memref<128x128xf32, #tpu.memory_space<vmem>>, vector<16x128xf32>
    %468 = arith.truncf %465 : vector<16x32xf32> to vector<16x32xbf16>
    %cst_176 = arith.constant dense<0.000000e+00> : vector<16x128xf32>
    %469 = tpu.matmul %468, %21, %cst_176 {dimension_numbers = #tpu.dot_dimension_numbers<[1], [0], [0], [1], [0, 0, 1, 1], [], []>} : vector<16x32xbf16>, vector<32x128xbf16>, vector<16x128xf32> -> vector<16x128xf32>
    %470 = arith.addf %467, %469 : vector<16x128xf32>
    %c0_177 = arith.constant 0 : index
    %c0_178 = arith.constant 0 : index
    %471 = vector.load %arg13[%c0_177, %c0_178] : memref<16x32xf32, #tpu.memory_space<vmem>>, vector<16x32xf32>
    %472 = vector.extract_strided_slice %470 {offsets = [0, 0], sizes = [16, 32], strides = [1, 1]} : vector<16x128xf32> to vector<16x32xf32>
    %473 = arith.negf %472 : vector<16x32xf32>
    %474 = math.exp %473 : vector<16x32xf32>
    %cst_179 = arith.constant 1.000000e+00 : f32
    %475 = vector.broadcast %cst_179 : f32 to vector<16x32xf32>
    %476 = arith.addf %475, %474 : vector<16x32xf32>
    %477 = arith.divf %475, %476 : vector<16x32xf32>
    %478 = vector.extract_strided_slice %470 {offsets = [0, 32], sizes = [16, 32], strides = [1, 1]} : vector<16x128xf32> to vector<16x32xf32>
    %479 = arith.negf %478 : vector<16x32xf32>
    %480 = math.exp %479 : vector<16x32xf32>
    %cst_180 = arith.constant 1.000000e+00 : f32
    %481 = vector.broadcast %cst_180 : f32 to vector<16x32xf32>
    %482 = arith.addf %481, %480 : vector<16x32xf32>
    %483 = arith.divf %481, %482 : vector<16x32xf32>
    %484 = vector.extract_strided_slice %470 {offsets = [0, 64], sizes = [16, 32], strides = [1, 1]} : vector<16x128xf32> to vector<16x32xf32>
    %485 = math.tanh %484 : vector<16x32xf32>
    %486 = vector.extract_strided_slice %470 {offsets = [0, 96], sizes = [16, 32], strides = [1, 1]} : vector<16x128xf32> to vector<16x32xf32>
    %487 = arith.negf %486 : vector<16x32xf32>
    %488 = math.exp %487 : vector<16x32xf32>
    %cst_181 = arith.constant 1.000000e+00 : f32
    %489 = vector.broadcast %cst_181 : f32 to vector<16x32xf32>
    %490 = arith.addf %489, %488 : vector<16x32xf32>
    %491 = arith.divf %489, %490 : vector<16x32xf32>
    %492 = arith.mulf %483, %471 : vector<16x32xf32>
    %493 = arith.mulf %477, %485 : vector<16x32xf32>
    %494 = arith.addf %492, %493 : vector<16x32xf32>
    %495 = math.tanh %494 : vector<16x32xf32>
    %496 = arith.mulf %491, %495 : vector<16x32xf32>
    %497 = vector.broadcast %418 : i32 to vector<16x1xi32>
    %498 = arith.cmpi slt, %497, %19 : vector<16x1xi32>
    %499 = vector.shape_cast %498 : vector<16x1xi1> to vector<16x1xi1>
    %500 = vector.broadcast %499 : vector<16x1xi1> to vector<16x32xi1>
    %501 = arith.select %500, %496, %465 : vector<16x32xi1>, vector<16x32xf32>
    %502 = vector.shape_cast %498 : vector<16x1xi1> to vector<16x1xi1>
    %503 = vector.broadcast %502 : vector<16x1xi1> to vector<16x32xi1>
    %504 = arith.select %503, %494, %471 : vector<16x32xi1>, vector<16x32xf32>
    %c0_182 = arith.constant 0 : index
    %c0_183 = arith.constant 0 : index
    %505 = vector.load %arg12[%c0_182, %c0_183] : memref<16x32xf32, #tpu.memory_space<vmem>>, vector<16x32xf32>
    tpu.vector_store %arg12[%c0_182, %c0_183], %501 {strides = array<i32>} : memref<16x32xf32, #tpu.memory_space<vmem>>, vector<16x32xf32>,
    %c0_184 = arith.constant 0 : index
    %c0_185 = arith.constant 0 : index
    %506 = vector.load %arg13[%c0_184, %c0_185] : memref<16x32xf32, #tpu.memory_space<vmem>>, vector<16x32xf32>
    tpu.vector_store %arg13[%c0_184, %c0_185], %504 {strides = array<i32>} : memref<16x32xf32, #tpu.memory_space<vmem>>, vector<16x32xf32>,
    %507 = arith.truncf %457 : vector<16x32xf32> to vector<16x32xbf16>
    %508 = arith.index_cast %c4_i32 : i32 to index
    %c0_186 = arith.constant 0 : index
    %c0_187 = arith.constant 0 : index
    %509 = vector.load %arg7[%508, %c0_186, %c0_187] : memref<8x16x64xbf16, #tpu.memory_space<vmem>>, vector<1x16x32xbf16>
    %510 = vector.shape_cast %509 : vector<1x16x32xbf16> to vector<16x32xbf16>
    %511 = vector.shape_cast %507 : vector<16x32xbf16> to vector<1x16x32xbf16>
    tpu.vector_store %arg7[%508, %c0_186, %c0_187], %511 {strides = array<i32>} : memref<8x16x64xbf16, #tpu.memory_space<vmem>>, vector<1x16x32xbf16>,
    %512 = arith.truncf %501 : vector<16x32xf32> to vector<16x32xbf16>
    %513 = arith.index_cast %418 : i32 to index
    %c0_188 = arith.constant 0 : index
    %c32_189 = arith.constant 32 : index
    %514 = vector.load %arg7[%513, %c0_188, %c32_189] : memref<8x16x64xbf16, #tpu.memory_space<vmem>>, vector<1x16x32xbf16>
    %515 = vector.shape_cast %514 : vector<1x16x32xbf16> to vector<16x32xbf16>
    %516 = vector.shape_cast %512 : vector<16x32xbf16> to vector<1x16x32xbf16>
    tpu.vector_store %arg7[%513, %c0_188, %c32_189], %516 {strides = array<i32>} : memref<8x16x64xbf16, #tpu.memory_space<vmem>>, vector<1x16x32xbf16>,
    %c5_i32 = arith.constant 5 : i32
    %c7_i32_190 = arith.constant 7 : i32
    %517 = arith.subi %c7_i32_190, %c5_i32 : i32
    %c16_i32_191 = arith.constant 16 : i32
    %518 = arith.muli %c5_i32, %c16_i32_191 : i32
    %519 = tpu.assume_multiple %518, 16 : i32
    %c0_192 = arith.constant 0 : index
    %c0_193 = arith.constant 0 : index
    %520 = vector.load %arg10[%c0_192, %c0_193] : memref<16x32xf32, #tpu.memory_space<vmem>>, vector<16x32xf32>
    %521 = arith.index_cast %519 : i32 to index
    %c0_194 = arith.constant 0 : index
    %522 = vector.load %arg8[%521, %c0_194] : memref<128x128xf32, #tpu.memory_space<vmem>>, vector<16x128xf32>
    %523 = arith.truncf %520 : vector<16x32xf32> to vector<16x32xbf16>
    %cst_195 = arith.constant dense<0.000000e+00> : vector<16x128xf32>
    %524 = tpu.matmul %523, %20, %cst_195 {dimension_numbers = #tpu.dot_dimension_numbers<[1], [0], [0], [1], [0, 0, 1, 1], [], []>} : vector<16x32xbf16>, vector<32x128xbf16>, vector<16x128xf32> -> vector<16x128xf32>
    %525 = arith.addf %522, %524 : vector<16x128xf32>
    %c0_196 = arith.constant 0 : index
    %c0_197 = arith.constant 0 : index
    %526 = vector.load %arg11[%c0_196, %c0_197] : memref<16x32xf32, #tpu.memory_space<vmem>>, vector<16x32xf32>
    %527 = vector.extract_strided_slice %525 {offsets = [0, 0], sizes = [16, 32], strides = [1, 1]} : vector<16x128xf32> to vector<16x32xf32>
    %528 = arith.negf %527 : vector<16x32xf32>
    %529 = math.exp %528 : vector<16x32xf32>
    %cst_198 = arith.constant 1.000000e+00 : f32
    %530 = vector.broadcast %cst_198 : f32 to vector<16x32xf32>
    %531 = arith.addf %530, %529 : vector<16x32xf32>
    %532 = arith.divf %530, %531 : vector<16x32xf32>
    %533 = vector.extract_strided_slice %525 {offsets = [0, 32], sizes = [16, 32], strides = [1, 1]} : vector<16x128xf32> to vector<16x32xf32>
    %534 = arith.negf %533 : vector<16x32xf32>
    %535 = math.exp %534 : vector<16x32xf32>
    %cst_199 = arith.constant 1.000000e+00 : f32
    %536 = vector.broadcast %cst_199 : f32 to vector<16x32xf32>
    %537 = arith.addf %536, %535 : vector<16x32xf32>
    %538 = arith.divf %536, %537 : vector<16x32xf32>
    %539 = vector.extract_strided_slice %525 {offsets = [0, 64], sizes = [16, 32], strides = [1, 1]} : vector<16x128xf32> to vector<16x32xf32>
    %540 = math.tanh %539 : vector<16x32xf32>
    %541 = vector.extract_strided_slice %525 {offsets = [0, 96], sizes = [16, 32], strides = [1, 1]} : vector<16x128xf32> to vector<16x32xf32>
    %542 = arith.negf %541 : vector<16x32xf32>
    %543 = math.exp %542 : vector<16x32xf32>
    %cst_200 = arith.constant 1.000000e+00 : f32
    %544 = vector.broadcast %cst_200 : f32 to vector<16x32xf32>
    %545 = arith.addf %544, %543 : vector<16x32xf32>
    %546 = arith.divf %544, %545 : vector<16x32xf32>
    %547 = arith.mulf %538, %526 : vector<16x32xf32>
    %548 = arith.mulf %532, %540 : vector<16x32xf32>
    %549 = arith.addf %547, %548 : vector<16x32xf32>
    %550 = math.tanh %549 : vector<16x32xf32>
    %551 = arith.mulf %546, %550 : vector<16x32xf32>
    %552 = vector.broadcast %c5_i32 : i32 to vector<16x1xi32>
    %553 = arith.cmpi slt, %552, %19 : vector<16x1xi32>
    %554 = vector.shape_cast %553 : vector<16x1xi1> to vector<16x1xi1>
    %555 = vector.broadcast %554 : vector<16x1xi1> to vector<16x32xi1>
    %556 = arith.select %555, %551, %520 : vector<16x32xi1>, vector<16x32xf32>
    %557 = vector.shape_cast %553 : vector<16x1xi1> to vector<16x1xi1>
    %558 = vector.broadcast %557 : vector<16x1xi1> to vector<16x32xi1>
    %559 = arith.select %558, %549, %526 : vector<16x32xi1>, vector<16x32xf32>
    %c0_201 = arith.constant 0 : index
    %c0_202 = arith.constant 0 : index
    %560 = vector.load %arg10[%c0_201, %c0_202] : memref<16x32xf32, #tpu.memory_space<vmem>>, vector<16x32xf32>
    tpu.vector_store %arg10[%c0_201, %c0_202], %556 {strides = array<i32>} : memref<16x32xf32, #tpu.memory_space<vmem>>, vector<16x32xf32>,
    %c0_203 = arith.constant 0 : index
    %c0_204 = arith.constant 0 : index
    %561 = vector.load %arg11[%c0_203, %c0_204] : memref<16x32xf32, #tpu.memory_space<vmem>>, vector<16x32xf32>
    tpu.vector_store %arg11[%c0_203, %c0_204], %559 {strides = array<i32>} : memref<16x32xf32, #tpu.memory_space<vmem>>, vector<16x32xf32>,
    %c16_i32_205 = arith.constant 16 : i32
    %562 = arith.muli %517, %c16_i32_205 : i32
    %563 = tpu.assume_multiple %562, 16 : i32
    %c0_206 = arith.constant 0 : index
    %c0_207 = arith.constant 0 : index
    %564 = vector.load %arg12[%c0_206, %c0_207] : memref<16x32xf32, #tpu.memory_space<vmem>>, vector<16x32xf32>
    %565 = arith.index_cast %563 : i32 to index
    %c0_208 = arith.constant 0 : index
    %566 = vector.load %arg9[%565, %c0_208] : memref<128x128xf32, #tpu.memory_space<vmem>>, vector<16x128xf32>
    %567 = arith.truncf %564 : vector<16x32xf32> to vector<16x32xbf16>
    %cst_209 = arith.constant dense<0.000000e+00> : vector<16x128xf32>
    %568 = tpu.matmul %567, %21, %cst_209 {dimension_numbers = #tpu.dot_dimension_numbers<[1], [0], [0], [1], [0, 0, 1, 1], [], []>} : vector<16x32xbf16>, vector<32x128xbf16>, vector<16x128xf32> -> vector<16x128xf32>
    %569 = arith.addf %566, %568 : vector<16x128xf32>
    %c0_210 = arith.constant 0 : index
    %c0_211 = arith.constant 0 : index
    %570 = vector.load %arg13[%c0_210, %c0_211] : memref<16x32xf32, #tpu.memory_space<vmem>>, vector<16x32xf32>
    %571 = vector.extract_strided_slice %569 {offsets = [0, 0], sizes = [16, 32], strides = [1, 1]} : vector<16x128xf32> to vector<16x32xf32>
    %572 = arith.negf %571 : vector<16x32xf32>
    %573 = math.exp %572 : vector<16x32xf32>
    %cst_212 = arith.constant 1.000000e+00 : f32
    %574 = vector.broadcast %cst_212 : f32 to vector<16x32xf32>
    %575 = arith.addf %574, %573 : vector<16x32xf32>
    %576 = arith.divf %574, %575 : vector<16x32xf32>
    %577 = vector.extract_strided_slice %569 {offsets = [0, 32], sizes = [16, 32], strides = [1, 1]} : vector<16x128xf32> to vector<16x32xf32>
    %578 = arith.negf %577 : vector<16x32xf32>
    %579 = math.exp %578 : vector<16x32xf32>
    %cst_213 = arith.constant 1.000000e+00 : f32
    %580 = vector.broadcast %cst_213 : f32 to vector<16x32xf32>
    %581 = arith.addf %580, %579 : vector<16x32xf32>
    %582 = arith.divf %580, %581 : vector<16x32xf32>
    %583 = vector.extract_strided_slice %569 {offsets = [0, 64], sizes = [16, 32], strides = [1, 1]} : vector<16x128xf32> to vector<16x32xf32>
    %584 = math.tanh %583 : vector<16x32xf32>
    %585 = vector.extract_strided_slice %569 {offsets = [0, 96], sizes = [16, 32], strides = [1, 1]} : vector<16x128xf32> to vector<16x32xf32>
    %586 = arith.negf %585 : vector<16x32xf32>
    %587 = math.exp %586 : vector<16x32xf32>
    %cst_214 = arith.constant 1.000000e+00 : f32
    %588 = vector.broadcast %cst_214 : f32 to vector<16x32xf32>
    %589 = arith.addf %588, %587 : vector<16x32xf32>
    %590 = arith.divf %588, %589 : vector<16x32xf32>
    %591 = arith.mulf %582, %570 : vector<16x32xf32>
    %592 = arith.mulf %576, %584 : vector<16x32xf32>
    %593 = arith.addf %591, %592 : vector<16x32xf32>
    %594 = math.tanh %593 : vector<16x32xf32>
    %595 = arith.mulf %590, %594 : vector<16x32xf32>
    %596 = vector.broadcast %517 : i32 to vector<16x1xi32>
    %597 = arith.cmpi slt, %596, %19 : vector<16x1xi32>
    %598 = vector.shape_cast %597 : vector<16x1xi1> to vector<16x1xi1>
    %599 = vector.broadcast %598 : vector<16x1xi1> to vector<16x32xi1>
    %600 = arith.select %599, %595, %564 : vector<16x32xi1>, vector<16x32xf32>
    %601 = vector.shape_cast %597 : vector<16x1xi1> to vector<16x1xi1>
    %602 = vector.broadcast %601 : vector<16x1xi1> to vector<16x32xi1>
    %603 = arith.select %602, %593, %570 : vector<16x32xi1>, vector<16x32xf32>
    %c0_215 = arith.constant 0 : index
    %c0_216 = arith.constant 0 : index
    %604 = vector.load %arg12[%c0_215, %c0_216] : memref<16x32xf32, #tpu.memory_space<vmem>>, vector<16x32xf32>
    tpu.vector_store %arg12[%c0_215, %c0_216], %600 {strides = array<i32>} : memref<16x32xf32, #tpu.memory_space<vmem>>, vector<16x32xf32>,
    %c0_217 = arith.constant 0 : index
    %c0_218 = arith.constant 0 : index
    %605 = vector.load %arg13[%c0_217, %c0_218] : memref<16x32xf32, #tpu.memory_space<vmem>>, vector<16x32xf32>
    tpu.vector_store %arg13[%c0_217, %c0_218], %603 {strides = array<i32>} : memref<16x32xf32, #tpu.memory_space<vmem>>, vector<16x32xf32>,
    %606 = arith.truncf %556 : vector<16x32xf32> to vector<16x32xbf16>
    %607 = arith.index_cast %c5_i32 : i32 to index
    %c0_219 = arith.constant 0 : index
    %c0_220 = arith.constant 0 : index
    %608 = vector.load %arg7[%607, %c0_219, %c0_220] : memref<8x16x64xbf16, #tpu.memory_space<vmem>>, vector<1x16x32xbf16>
    %609 = vector.shape_cast %608 : vector<1x16x32xbf16> to vector<16x32xbf16>
    %610 = vector.shape_cast %606 : vector<16x32xbf16> to vector<1x16x32xbf16>
    tpu.vector_store %arg7[%607, %c0_219, %c0_220], %610 {strides = array<i32>} : memref<8x16x64xbf16, #tpu.memory_space<vmem>>, vector<1x16x32xbf16>,
    %611 = arith.truncf %600 : vector<16x32xf32> to vector<16x32xbf16>
    %612 = arith.index_cast %517 : i32 to index
    %c0_221 = arith.constant 0 : index
    %c32_222 = arith.constant 32 : index
    %613 = vector.load %arg7[%612, %c0_221, %c32_222] : memref<8x16x64xbf16, #tpu.memory_space<vmem>>, vector<1x16x32xbf16>
    %614 = vector.shape_cast %613 : vector<1x16x32xbf16> to vector<16x32xbf16>
    %615 = vector.shape_cast %611 : vector<16x32xbf16> to vector<1x16x32xbf16>
    tpu.vector_store %arg7[%612, %c0_221, %c32_222], %615 {strides = array<i32>} : memref<8x16x64xbf16, #tpu.memory_space<vmem>>, vector<1x16x32xbf16>,
    %c6_i32 = arith.constant 6 : i32
    %c7_i32_223 = arith.constant 7 : i32
    %616 = arith.subi %c7_i32_223, %c6_i32 : i32
    %c16_i32_224 = arith.constant 16 : i32
    %617 = arith.muli %c6_i32, %c16_i32_224 : i32
    %618 = tpu.assume_multiple %617, 16 : i32
    %c0_225 = arith.constant 0 : index
    %c0_226 = arith.constant 0 : index
    %619 = vector.load %arg10[%c0_225, %c0_226] : memref<16x32xf32, #tpu.memory_space<vmem>>, vector<16x32xf32>
    %620 = arith.index_cast %618 : i32 to index
    %c0_227 = arith.constant 0 : index
    %621 = vector.load %arg8[%620, %c0_227] : memref<128x128xf32, #tpu.memory_space<vmem>>, vector<16x128xf32>
    %622 = arith.truncf %619 : vector<16x32xf32> to vector<16x32xbf16>
    %cst_228 = arith.constant dense<0.000000e+00> : vector<16x128xf32>
    %623 = tpu.matmul %622, %20, %cst_228 {dimension_numbers = #tpu.dot_dimension_numbers<[1], [0], [0], [1], [0, 0, 1, 1], [], []>} : vector<16x32xbf16>, vector<32x128xbf16>, vector<16x128xf32> -> vector<16x128xf32>
    %624 = arith.addf %621, %623 : vector<16x128xf32>
    %c0_229 = arith.constant 0 : index
    %c0_230 = arith.constant 0 : index
    %625 = vector.load %arg11[%c0_229, %c0_230] : memref<16x32xf32, #tpu.memory_space<vmem>>, vector<16x32xf32>
    %626 = vector.extract_strided_slice %624 {offsets = [0, 0], sizes = [16, 32], strides = [1, 1]} : vector<16x128xf32> to vector<16x32xf32>
    %627 = arith.negf %626 : vector<16x32xf32>
    %628 = math.exp %627 : vector<16x32xf32>
    %cst_231 = arith.constant 1.000000e+00 : f32
    %629 = vector.broadcast %cst_231 : f32 to vector<16x32xf32>
    %630 = arith.addf %629, %628 : vector<16x32xf32>
    %631 = arith.divf %629, %630 : vector<16x32xf32>
    %632 = vector.extract_strided_slice %624 {offsets = [0, 32], sizes = [16, 32], strides = [1, 1]} : vector<16x128xf32> to vector<16x32xf32>
    %633 = arith.negf %632 : vector<16x32xf32>
    %634 = math.exp %633 : vector<16x32xf32>
    %cst_232 = arith.constant 1.000000e+00 : f32
    %635 = vector.broadcast %cst_232 : f32 to vector<16x32xf32>
    %636 = arith.addf %635, %634 : vector<16x32xf32>
    %637 = arith.divf %635, %636 : vector<16x32xf32>
    %638 = vector.extract_strided_slice %624 {offsets = [0, 64], sizes = [16, 32], strides = [1, 1]} : vector<16x128xf32> to vector<16x32xf32>
    %639 = math.tanh %638 : vector<16x32xf32>
    %640 = vector.extract_strided_slice %624 {offsets = [0, 96], sizes = [16, 32], strides = [1, 1]} : vector<16x128xf32> to vector<16x32xf32>
    %641 = arith.negf %640 : vector<16x32xf32>
    %642 = math.exp %641 : vector<16x32xf32>
    %cst_233 = arith.constant 1.000000e+00 : f32
    %643 = vector.broadcast %cst_233 : f32 to vector<16x32xf32>
    %644 = arith.addf %643, %642 : vector<16x32xf32>
    %645 = arith.divf %643, %644 : vector<16x32xf32>
    %646 = arith.mulf %637, %625 : vector<16x32xf32>
    %647 = arith.mulf %631, %639 : vector<16x32xf32>
    %648 = arith.addf %646, %647 : vector<16x32xf32>
    %649 = math.tanh %648 : vector<16x32xf32>
    %650 = arith.mulf %645, %649 : vector<16x32xf32>
    %651 = vector.broadcast %c6_i32 : i32 to vector<16x1xi32>
    %652 = arith.cmpi slt, %651, %19 : vector<16x1xi32>
    %653 = vector.shape_cast %652 : vector<16x1xi1> to vector<16x1xi1>
    %654 = vector.broadcast %653 : vector<16x1xi1> to vector<16x32xi1>
    %655 = arith.select %654, %650, %619 : vector<16x32xi1>, vector<16x32xf32>
    %656 = vector.shape_cast %652 : vector<16x1xi1> to vector<16x1xi1>
    %657 = vector.broadcast %656 : vector<16x1xi1> to vector<16x32xi1>
    %658 = arith.select %657, %648, %625 : vector<16x32xi1>, vector<16x32xf32>
    %c0_234 = arith.constant 0 : index
    %c0_235 = arith.constant 0 : index
    %659 = vector.load %arg10[%c0_234, %c0_235] : memref<16x32xf32, #tpu.memory_space<vmem>>, vector<16x32xf32>
    tpu.vector_store %arg10[%c0_234, %c0_235], %655 {strides = array<i32>} : memref<16x32xf32, #tpu.memory_space<vmem>>, vector<16x32xf32>,
    %c0_236 = arith.constant 0 : index
    %c0_237 = arith.constant 0 : index
    %660 = vector.load %arg11[%c0_236, %c0_237] : memref<16x32xf32, #tpu.memory_space<vmem>>, vector<16x32xf32>
    tpu.vector_store %arg11[%c0_236, %c0_237], %658 {strides = array<i32>} : memref<16x32xf32, #tpu.memory_space<vmem>>, vector<16x32xf32>,
    %c16_i32_238 = arith.constant 16 : i32
    %661 = arith.muli %616, %c16_i32_238 : i32
    %662 = tpu.assume_multiple %661, 16 : i32
    %c0_239 = arith.constant 0 : index
    %c0_240 = arith.constant 0 : index
    %663 = vector.load %arg12[%c0_239, %c0_240] : memref<16x32xf32, #tpu.memory_space<vmem>>, vector<16x32xf32>
    %664 = arith.index_cast %662 : i32 to index
    %c0_241 = arith.constant 0 : index
    %665 = vector.load %arg9[%664, %c0_241] : memref<128x128xf32, #tpu.memory_space<vmem>>, vector<16x128xf32>
    %666 = arith.truncf %663 : vector<16x32xf32> to vector<16x32xbf16>
    %cst_242 = arith.constant dense<0.000000e+00> : vector<16x128xf32>
    %667 = tpu.matmul %666, %21, %cst_242 {dimension_numbers = #tpu.dot_dimension_numbers<[1], [0], [0], [1], [0, 0, 1, 1], [], []>} : vector<16x32xbf16>, vector<32x128xbf16>, vector<16x128xf32> -> vector<16x128xf32>
    %668 = arith.addf %665, %667 : vector<16x128xf32>
    %c0_243 = arith.constant 0 : index
    %c0_244 = arith.constant 0 : index
    %669 = vector.load %arg13[%c0_243, %c0_244] : memref<16x32xf32, #tpu.memory_space<vmem>>, vector<16x32xf32>
    %670 = vector.extract_strided_slice %668 {offsets = [0, 0], sizes = [16, 32], strides = [1, 1]} : vector<16x128xf32> to vector<16x32xf32>
    %671 = arith.negf %670 : vector<16x32xf32>
    %672 = math.exp %671 : vector<16x32xf32>
    %cst_245 = arith.constant 1.000000e+00 : f32
    %673 = vector.broadcast %cst_245 : f32 to vector<16x32xf32>
    %674 = arith.addf %673, %672 : vector<16x32xf32>
    %675 = arith.divf %673, %674 : vector<16x32xf32>
    %676 = vector.extract_strided_slice %668 {offsets = [0, 32], sizes = [16, 32], strides = [1, 1]} : vector<16x128xf32> to vector<16x32xf32>
    %677 = arith.negf %676 : vector<16x32xf32>
    %678 = math.exp %677 : vector<16x32xf32>
    %cst_246 = arith.constant 1.000000e+00 : f32
    %679 = vector.broadcast %cst_246 : f32 to vector<16x32xf32>
    %680 = arith.addf %679, %678 : vector<16x32xf32>
    %681 = arith.divf %679, %680 : vector<16x32xf32>
    %682 = vector.extract_strided_slice %668 {offsets = [0, 64], sizes = [16, 32], strides = [1, 1]} : vector<16x128xf32> to vector<16x32xf32>
    %683 = math.tanh %682 : vector<16x32xf32>
    %684 = vector.extract_strided_slice %668 {offsets = [0, 96], sizes = [16, 32], strides = [1, 1]} : vector<16x128xf32> to vector<16x32xf32>
    %685 = arith.negf %684 : vector<16x32xf32>
    %686 = math.exp %685 : vector<16x32xf32>
    %cst_247 = arith.constant 1.000000e+00 : f32
    %687 = vector.broadcast %cst_247 : f32 to vector<16x32xf32>
    %688 = arith.addf %687, %686 : vector<16x32xf32>
    %689 = arith.divf %687, %688 : vector<16x32xf32>
    %690 = arith.mulf %681, %669 : vector<16x32xf32>
    %691 = arith.mulf %675, %683 : vector<16x32xf32>
    %692 = arith.addf %690, %691 : vector<16x32xf32>
    %693 = math.tanh %692 : vector<16x32xf32>
    %694 = arith.mulf %689, %693 : vector<16x32xf32>
    %695 = vector.broadcast %616 : i32 to vector<16x1xi32>
    %696 = arith.cmpi slt, %695, %19 : vector<16x1xi32>
    %697 = vector.shape_cast %696 : vector<16x1xi1> to vector<16x1xi1>
    %698 = vector.broadcast %697 : vector<16x1xi1> to vector<16x32xi1>
    %699 = arith.select %698, %694, %663 : vector<16x32xi1>, vector<16x32xf32>
    %700 = vector.shape_cast %696 : vector<16x1xi1> to vector<16x1xi1>
    %701 = vector.broadcast %700 : vector<16x1xi1> to vector<16x32xi1>
    %702 = arith.select %701, %692, %669 : vector<16x32xi1>, vector<16x32xf32>
    %c0_248 = arith.constant 0 : index
    %c0_249 = arith.constant 0 : index
    %703 = vector.load %arg12[%c0_248, %c0_249] : memref<16x32xf32, #tpu.memory_space<vmem>>, vector<16x32xf32>
    tpu.vector_store %arg12[%c0_248, %c0_249], %699 {strides = array<i32>} : memref<16x32xf32, #tpu.memory_space<vmem>>, vector<16x32xf32>,
    %c0_250 = arith.constant 0 : index
    %c0_251 = arith.constant 0 : index
    %704 = vector.load %arg13[%c0_250, %c0_251] : memref<16x32xf32, #tpu.memory_space<vmem>>, vector<16x32xf32>
    tpu.vector_store %arg13[%c0_250, %c0_251], %702 {strides = array<i32>} : memref<16x32xf32, #tpu.memory_space<vmem>>, vector<16x32xf32>,
    %705 = arith.truncf %655 : vector<16x32xf32> to vector<16x32xbf16>
    %706 = arith.index_cast %c6_i32 : i32 to index
    %c0_252 = arith.constant 0 : index
    %c0_253 = arith.constant 0 : index
    %707 = vector.load %arg7[%706, %c0_252, %c0_253] : memref<8x16x64xbf16, #tpu.memory_space<vmem>>, vector<1x16x32xbf16>
    %708 = vector.shape_cast %707 : vector<1x16x32xbf16> to vector<16x32xbf16>
    %709 = vector.shape_cast %705 : vector<16x32xbf16> to vector<1x16x32xbf16>
    tpu.vector_store %arg7[%706, %c0_252, %c0_253], %709 {strides = array<i32>} : memref<8x16x64xbf16, #tpu.memory_space<vmem>>, vector<1x16x32xbf16>,
    %710 = arith.truncf %699 : vector<16x32xf32> to vector<16x32xbf16>
    %711 = arith.index_cast %616 : i32 to index
    %c0_254 = arith.constant 0 : index
    %c32_255 = arith.constant 32 : index
    %712 = vector.load %arg7[%711, %c0_254, %c32_255] : memref<8x16x64xbf16, #tpu.memory_space<vmem>>, vector<1x16x32xbf16>
    %713 = vector.shape_cast %712 : vector<1x16x32xbf16> to vector<16x32xbf16>
    %714 = vector.shape_cast %710 : vector<16x32xbf16> to vector<1x16x32xbf16>
    tpu.vector_store %arg7[%711, %c0_254, %c32_255], %714 {strides = array<i32>} : memref<8x16x64xbf16, #tpu.memory_space<vmem>>, vector<1x16x32xbf16>,
    %c7_i32_256 = arith.constant 7 : i32
    %c7_i32_257 = arith.constant 7 : i32
    %715 = arith.subi %c7_i32_257, %c7_i32_256 : i32
    %c16_i32_258 = arith.constant 16 : i32
    %716 = arith.muli %c7_i32_256, %c16_i32_258 : i32
    %717 = tpu.assume_multiple %716, 16 : i32
    %c0_259 = arith.constant 0 : index
    %c0_260 = arith.constant 0 : index
    %718 = vector.load %arg10[%c0_259, %c0_260] : memref<16x32xf32, #tpu.memory_space<vmem>>, vector<16x32xf32>
    %719 = arith.index_cast %717 : i32 to index
    %c0_261 = arith.constant 0 : index
    %720 = vector.load %arg8[%719, %c0_261] : memref<128x128xf32, #tpu.memory_space<vmem>>, vector<16x128xf32>
    %721 = arith.truncf %718 : vector<16x32xf32> to vector<16x32xbf16>
    %cst_262 = arith.constant dense<0.000000e+00> : vector<16x128xf32>
    %722 = tpu.matmul %721, %20, %cst_262 {dimension_numbers = #tpu.dot_dimension_numbers<[1], [0], [0], [1], [0, 0, 1, 1], [], []>} : vector<16x32xbf16>, vector<32x128xbf16>, vector<16x128xf32> -> vector<16x128xf32>
    %723 = arith.addf %720, %722 : vector<16x128xf32>
    %c0_263 = arith.constant 0 : index
    %c0_264 = arith.constant 0 : index
    %724 = vector.load %arg11[%c0_263, %c0_264] : memref<16x32xf32, #tpu.memory_space<vmem>>, vector<16x32xf32>
    %725 = vector.extract_strided_slice %723 {offsets = [0, 0], sizes = [16, 32], strides = [1, 1]} : vector<16x128xf32> to vector<16x32xf32>
    %726 = arith.negf %725 : vector<16x32xf32>
    %727 = math.exp %726 : vector<16x32xf32>
    %cst_265 = arith.constant 1.000000e+00 : f32
    %728 = vector.broadcast %cst_265 : f32 to vector<16x32xf32>
    %729 = arith.addf %728, %727 : vector<16x32xf32>
    %730 = arith.divf %728, %729 : vector<16x32xf32>
    %731 = vector.extract_strided_slice %723 {offsets = [0, 32], sizes = [16, 32], strides = [1, 1]} : vector<16x128xf32> to vector<16x32xf32>
    %732 = arith.negf %731 : vector<16x32xf32>
    %733 = math.exp %732 : vector<16x32xf32>
    %cst_266 = arith.constant 1.000000e+00 : f32
    %734 = vector.broadcast %cst_266 : f32 to vector<16x32xf32>
    %735 = arith.addf %734, %733 : vector<16x32xf32>
    %736 = arith.divf %734, %735 : vector<16x32xf32>
    %737 = vector.extract_strided_slice %723 {offsets = [0, 64], sizes = [16, 32], strides = [1, 1]} : vector<16x128xf32> to vector<16x32xf32>
    %738 = math.tanh %737 : vector<16x32xf32>
    %739 = vector.extract_strided_slice %723 {offsets = [0, 96], sizes = [16, 32], strides = [1, 1]} : vector<16x128xf32> to vector<16x32xf32>
    %740 = arith.negf %739 : vector<16x32xf32>
    %741 = math.exp %740 : vector<16x32xf32>
    %cst_267 = arith.constant 1.000000e+00 : f32
    %742 = vector.broadcast %cst_267 : f32 to vector<16x32xf32>
    %743 = arith.addf %742, %741 : vector<16x32xf32>
    %744 = arith.divf %742, %743 : vector<16x32xf32>
    %745 = arith.mulf %736, %724 : vector<16x32xf32>
    %746 = arith.mulf %730, %738 : vector<16x32xf32>
    %747 = arith.addf %745, %746 : vector<16x32xf32>
    %748 = math.tanh %747 : vector<16x32xf32>
    %749 = arith.mulf %744, %748 : vector<16x32xf32>
    %750 = vector.broadcast %c7_i32_256 : i32 to vector<16x1xi32>
    %751 = arith.cmpi slt, %750, %19 : vector<16x1xi32>
    %752 = vector.shape_cast %751 : vector<16x1xi1> to vector<16x1xi1>
    %753 = vector.broadcast %752 : vector<16x1xi1> to vector<16x32xi1>
    %754 = arith.select %753, %749, %718 : vector<16x32xi1>, vector<16x32xf32>
    %755 = vector.shape_cast %751 : vector<16x1xi1> to vector<16x1xi1>
    %756 = vector.broadcast %755 : vector<16x1xi1> to vector<16x32xi1>
    %757 = arith.select %756, %747, %724 : vector<16x32xi1>, vector<16x32xf32>
    %c0_268 = arith.constant 0 : index
    %c0_269 = arith.constant 0 : index
    %758 = vector.load %arg10[%c0_268, %c0_269] : memref<16x32xf32, #tpu.memory_space<vmem>>, vector<16x32xf32>
    tpu.vector_store %arg10[%c0_268, %c0_269], %754 {strides = array<i32>} : memref<16x32xf32, #tpu.memory_space<vmem>>, vector<16x32xf32>,
    %c0_270 = arith.constant 0 : index
    %c0_271 = arith.constant 0 : index
    %759 = vector.load %arg11[%c0_270, %c0_271] : memref<16x32xf32, #tpu.memory_space<vmem>>, vector<16x32xf32>
    tpu.vector_store %arg11[%c0_270, %c0_271], %757 {strides = array<i32>} : memref<16x32xf32, #tpu.memory_space<vmem>>, vector<16x32xf32>,
    %c16_i32_272 = arith.constant 16 : i32
    %760 = arith.muli %715, %c16_i32_272 : i32
    %761 = tpu.assume_multiple %760, 16 : i32
    %c0_273 = arith.constant 0 : index
    %c0_274 = arith.constant 0 : index
    %762 = vector.load %arg12[%c0_273, %c0_274] : memref<16x32xf32, #tpu.memory_space<vmem>>, vector<16x32xf32>
    %763 = arith.index_cast %761 : i32 to index
    %c0_275 = arith.constant 0 : index
    %764 = vector.load %arg9[%763, %c0_275] : memref<128x128xf32, #tpu.memory_space<vmem>>, vector<16x128xf32>
    %765 = arith.truncf %762 : vector<16x32xf32> to vector<16x32xbf16>
    %cst_276 = arith.constant dense<0.000000e+00> : vector<16x128xf32>
    %766 = tpu.matmul %765, %21, %cst_276 {dimension_numbers = #tpu.dot_dimension_numbers<[1], [0], [0], [1], [0, 0, 1, 1], [], []>} : vector<16x32xbf16>, vector<32x128xbf16>, vector<16x128xf32> -> vector<16x128xf32>
    %767 = arith.addf %764, %766 : vector<16x128xf32>
    %c0_277 = arith.constant 0 : index
    %c0_278 = arith.constant 0 : index
    %768 = vector.load %arg13[%c0_277, %c0_278] : memref<16x32xf32, #tpu.memory_space<vmem>>, vector<16x32xf32>
    %769 = vector.extract_strided_slice %767 {offsets = [0, 0], sizes = [16, 32], strides = [1, 1]} : vector<16x128xf32> to vector<16x32xf32>
    %770 = arith.negf %769 : vector<16x32xf32>
    %771 = math.exp %770 : vector<16x32xf32>
    %cst_279 = arith.constant 1.000000e+00 : f32
    %772 = vector.broadcast %cst_279 : f32 to vector<16x32xf32>
    %773 = arith.addf %772, %771 : vector<16x32xf32>
    %774 = arith.divf %772, %773 : vector<16x32xf32>
    %775 = vector.extract_strided_slice %767 {offsets = [0, 32], sizes = [16, 32], strides = [1, 1]} : vector<16x128xf32> to vector<16x32xf32>
    %776 = arith.negf %775 : vector<16x32xf32>
    %777 = math.exp %776 : vector<16x32xf32>
    %cst_280 = arith.constant 1.000000e+00 : f32
    %778 = vector.broadcast %cst_280 : f32 to vector<16x32xf32>
    %779 = arith.addf %778, %777 : vector<16x32xf32>
    %780 = arith.divf %778, %779 : vector<16x32xf32>
    %781 = vector.extract_strided_slice %767 {offsets = [0, 64], sizes = [16, 32], strides = [1, 1]} : vector<16x128xf32> to vector<16x32xf32>
    %782 = math.tanh %781 : vector<16x32xf32>
    %783 = vector.extract_strided_slice %767 {offsets = [0, 96], sizes = [16, 32], strides = [1, 1]} : vector<16x128xf32> to vector<16x32xf32>
    %784 = arith.negf %783 : vector<16x32xf32>
    %785 = math.exp %784 : vector<16x32xf32>
    %cst_281 = arith.constant 1.000000e+00 : f32
    %786 = vector.broadcast %cst_281 : f32 to vector<16x32xf32>
    %787 = arith.addf %786, %785 : vector<16x32xf32>
    %788 = arith.divf %786, %787 : vector<16x32xf32>
    %789 = arith.mulf %780, %768 : vector<16x32xf32>
    %790 = arith.mulf %774, %782 : vector<16x32xf32>
    %791 = arith.addf %789, %790 : vector<16x32xf32>
    %792 = math.tanh %791 : vector<16x32xf32>
    %793 = arith.mulf %788, %792 : vector<16x32xf32>
    %794 = vector.broadcast %715 : i32 to vector<16x1xi32>
    %795 = arith.cmpi slt, %794, %19 : vector<16x1xi32>
    %796 = vector.shape_cast %795 : vector<16x1xi1> to vector<16x1xi1>
    %797 = vector.broadcast %796 : vector<16x1xi1> to vector<16x32xi1>
    %798 = arith.select %797, %793, %762 : vector<16x32xi1>, vector<16x32xf32>
    %799 = vector.shape_cast %795 : vector<16x1xi1> to vector<16x1xi1>
    %800 = vector.broadcast %799 : vector<16x1xi1> to vector<16x32xi1>
    %801 = arith.select %800, %791, %768 : vector<16x32xi1>, vector<16x32xf32>
    %c0_282 = arith.constant 0 : index
    %c0_283 = arith.constant 0 : index
    %802 = vector.load %arg12[%c0_282, %c0_283] : memref<16x32xf32, #tpu.memory_space<vmem>>, vector<16x32xf32>
    tpu.vector_store %arg12[%c0_282, %c0_283], %798 {strides = array<i32>} : memref<16x32xf32, #tpu.memory_space<vmem>>, vector<16x32xf32>,
    %c0_284 = arith.constant 0 : index
    %c0_285 = arith.constant 0 : index
    %803 = vector.load %arg13[%c0_284, %c0_285] : memref<16x32xf32, #tpu.memory_space<vmem>>, vector<16x32xf32>
    tpu.vector_store %arg13[%c0_284, %c0_285], %801 {strides = array<i32>} : memref<16x32xf32, #tpu.memory_space<vmem>>, vector<16x32xf32>,
    %804 = arith.truncf %754 : vector<16x32xf32> to vector<16x32xbf16>
    %805 = arith.index_cast %c7_i32_256 : i32 to index
    %c0_286 = arith.constant 0 : index
    %c0_287 = arith.constant 0 : index
    %806 = vector.load %arg7[%805, %c0_286, %c0_287] : memref<8x16x64xbf16, #tpu.memory_space<vmem>>, vector<1x16x32xbf16>
    %807 = vector.shape_cast %806 : vector<1x16x32xbf16> to vector<16x32xbf16>
    %808 = vector.shape_cast %804 : vector<16x32xbf16> to vector<1x16x32xbf16>
    tpu.vector_store %arg7[%805, %c0_286, %c0_287], %808 {strides = array<i32>} : memref<8x16x64xbf16, #tpu.memory_space<vmem>>, vector<1x16x32xbf16>,
    %809 = arith.truncf %798 : vector<16x32xf32> to vector<16x32xbf16>
    %810 = arith.index_cast %715 : i32 to index
    %c0_288 = arith.constant 0 : index
    %c32_289 = arith.constant 32 : index
    %811 = vector.load %arg7[%810, %c0_288, %c32_289] : memref<8x16x64xbf16, #tpu.memory_space<vmem>>, vector<1x16x32xbf16>
    %812 = vector.shape_cast %811 : vector<1x16x32xbf16> to vector<16x32xbf16>
    %813 = vector.shape_cast %809 : vector<16x32xbf16> to vector<1x16x32xbf16>
    tpu.vector_store %arg7[%810, %c0_288, %c32_289], %813 {strides = array<i32>} : memref<8x16x64xbf16, #tpu.memory_space<vmem>>, vector<1x16x32xbf16>,
    %c8_i32 = arith.constant 8 : i32
    return
  }
  func.func @transform_0(%arg0: i32) -> (i32, i32, i32) {
    %c0_i32 = arith.constant 0 : i32
    %c0_i32_0 = arith.constant 0 : i32
    %c0_i32_1 = arith.constant 0 : i32
    return %c0_i32, %arg0, %c0_i32_0 : i32, i32, i32
  }
  func.func @transform_1(%arg0: i32) -> (i32, i32) {
    %c0_i32 = arith.constant 0 : i32
    %c0_i32_0 = arith.constant 0 : i32
    %c0_i32_1 = arith.constant 0 : i32
    return %c0_i32, %c0_i32_0 : i32, i32
  }
  func.func @transform_2(%arg0: i32) -> (i32, i32) {
    %c0_i32 = arith.constant 0 : i32
    %c0_i32_0 = arith.constant 0 : i32
    %c0_i32_1 = arith.constant 0 : i32
    return %c0_i32, %c0_i32_0 : i32, i32
  }
  func.func @transform_3(%arg0: i32) -> (i32, i32) {
    %c0_i32 = arith.constant 0 : i32
    %c0_i32_0 = arith.constant 0 : i32
    %c0_i32_1 = arith.constant 0 : i32
    return %c0_i32, %c0_i32_0 : i32, i32
  }
  func.func @transform_4(%arg0: i32) -> (i32, i32) {
    %c0_i32 = arith.constant 0 : i32
    %c0_i32_0 = arith.constant 0 : i32
    %c0_i32_1 = arith.constant 0 : i32
    return %c0_i32, %c0_i32_0 : i32, i32
  }
  func.func @transform_5(%arg0: i32) -> (i32, i32) {
    %c0_i32 = arith.constant 0 : i32
    %c0_i32_0 = arith.constant 0 : i32
    return %arg0, %c0_i32 : i32, i32
  }
  func.func @transform_6(%arg0: i32) -> (i32, i32, i32) {
    %c0_i32 = arith.constant 0 : i32
    %c0_i32_0 = arith.constant 0 : i32
    %c0_i32_1 = arith.constant 0 : i32
    return %c0_i32, %arg0, %c0_i32_0 : i32, i32, i32
  }
}

module attributes {stable_mosaic.version = 11 : i64} {
  func.func @_bilstm_head_kernel(%arg0: i32, %arg1: memref<8x16x64xbf16, #tpu.memory_space<vmem>>, %arg2: memref<64x256xbf16, #tpu.memory_space<vmem>>, %arg3: memref<32x128xbf16, #tpu.memory_space<vmem>>, %arg4: memref<32x128xbf16, #tpu.memory_space<vmem>>, %arg5: memref<1x256xf32, #tpu.memory_space<vmem>>, %arg6: memref<16x1xi32, #tpu.memory_space<vmem>>, %arg7: memref<64x128xbf16, #tpu.memory_space<vmem>>, %arg8: memref<1x128xf32, #tpu.memory_space<vmem>>, %arg9: memref<128x4xbf16, #tpu.memory_space<vmem>>, %arg10: memref<1x4xf32, #tpu.memory_space<vmem>>, %arg11: memref<16x4xf32, #tpu.memory_space<vmem>>, %arg12: memref<128x128xf32, #tpu.memory_space<vmem>>, %arg13: memref<128x128xf32, #tpu.memory_space<vmem>>, %arg14: memref<16x32xf32, #tpu.memory_space<vmem>>, %arg15: memref<16x32xf32, #tpu.memory_space<vmem>>, %arg16: memref<16x32xf32, #tpu.memory_space<vmem>>, %arg17: memref<16x32xf32, #tpu.memory_space<vmem>>) attributes {dimension_semantics = [#tpu.dimension_semantics<parallel>], iteration_bounds = array<i64: 1>, scalar_prefetch = 0 : i64, scratch_operands = 6 : i64, tpu.core_type = #tpu.core_type<tc>, window_params = [{transform_indices = @transform_0, window_bounds = array<i64: 8, 16, 64>}, {pipeline_mode = #tpu.pipeline_mode<synchronous>, transform_indices = @transform_1, window_bounds = array<i64: 64, 256>}, {pipeline_mode = #tpu.pipeline_mode<synchronous>, transform_indices = @transform_2, window_bounds = array<i64: 32, 128>}, {pipeline_mode = #tpu.pipeline_mode<synchronous>, transform_indices = @transform_3, window_bounds = array<i64: 32, 128>}, {pipeline_mode = #tpu.pipeline_mode<synchronous>, transform_indices = @transform_4, window_bounds = array<i64: 1, 256>}, {transform_indices = @transform_5, window_bounds = array<i64: 16, 1>}, {pipeline_mode = #tpu.pipeline_mode<synchronous>, transform_indices = @transform_6, window_bounds = array<i64: 64, 128>}, {pipeline_mode = #tpu.pipeline_mode<synchronous>, transform_indices = @transform_7, window_bounds = array<i64: 1, 128>}, {pipeline_mode = #tpu.pipeline_mode<synchronous>, transform_indices = @transform_8, window_bounds = array<i64: 128, 4>}, {pipeline_mode = #tpu.pipeline_mode<synchronous>, transform_indices = @transform_9, window_bounds = array<i64: 1, 4>}, {transform_indices = @transform_10, window_bounds = array<i64: 16, 4>}]} {
    %c0 = arith.constant 0 : index
    %c0_0 = arith.constant 0 : index
    %c0_1 = arith.constant 0 : index
    %0 = vector.load %arg1[%c0, %c0_0, %c0_1] : memref<8x16x64xbf16, #tpu.memory_space<vmem>>, vector<8x16x64xbf16>
    %1 = vector.shape_cast %0 : vector<8x16x64xbf16> to vector<128x64xbf16>
    %c0_2 = arith.constant 0 : index
    %c0_3 = arith.constant 0 : index
    %2 = vector.load %arg2[%c0_2, %c0_3] : memref<64x256xbf16, #tpu.memory_space<vmem>>, vector<64x256xbf16>
    %cst = arith.constant dense<0.000000e+00> : vector<128x256xf32>
    %3 = tpu.matmul %1, %2, %cst {dimension_numbers = #tpu.dot_dimension_numbers<[1], [0], [0], [1], [0, 0, 1, 1], [], []>} : vector<128x64xbf16>, vector<64x256xbf16>, vector<128x256xf32> -> vector<128x256xf32>
    %c0_4 = arith.constant 0 : index
    %c0_5 = arith.constant 0 : index
    %4 = vector.load %arg5[%c0_4, %c0_5] : memref<1x256xf32, #tpu.memory_space<vmem>>, vector<1x256xf32>
    %5 = vector.broadcast %4 : vector<1x256xf32> to vector<128x256xf32>
    %6 = arith.addf %3, %5 : vector<128x256xf32>
    %7 = vector.extract_strided_slice %6 {offsets = [0, 0], sizes = [128, 128], strides = [1, 1]} : vector<128x256xf32> to vector<128x128xf32>
    %c0_6 = arith.constant 0 : index
    %c0_7 = arith.constant 0 : index
    %8 = vector.load %arg12[%c0_6, %c0_7] : memref<128x128xf32, #tpu.memory_space<vmem>>, vector<128x128xf32>
    tpu.vector_store %arg12[%c0_6, %c0_7], %7 {strides = array<i32>} : memref<128x128xf32, #tpu.memory_space<vmem>>, vector<128x128xf32>,
    %9 = vector.extract_strided_slice %6 {offsets = [0, 128], sizes = [128, 128], strides = [1, 1]} : vector<128x256xf32> to vector<128x128xf32>
    %c0_8 = arith.constant 0 : index
    %c0_9 = arith.constant 0 : index
    %10 = vector.load %arg13[%c0_8, %c0_9] : memref<128x128xf32, #tpu.memory_space<vmem>>, vector<128x128xf32>
    tpu.vector_store %arg13[%c0_8, %c0_9], %9 {strides = array<i32>} : memref<128x128xf32, #tpu.memory_space<vmem>>, vector<128x128xf32>,
    %cst_10 = arith.constant 0.000000e+00 : f32
    %11 = vector.broadcast %cst_10 : f32 to vector<16x32xf32>
    %c0_11 = arith.constant 0 : index
    %c0_12 = arith.constant 0 : index
    %12 = vector.load %arg14[%c0_11, %c0_12] : memref<16x32xf32, #tpu.memory_space<vmem>>, vector<16x32xf32>
    tpu.vector_store %arg14[%c0_11, %c0_12], %11 {strides = array<i32>} : memref<16x32xf32, #tpu.memory_space<vmem>>, vector<16x32xf32>,
    %cst_13 = arith.constant 0.000000e+00 : f32
    %13 = vector.broadcast %cst_13 : f32 to vector<16x32xf32>
    %c0_14 = arith.constant 0 : index
    %c0_15 = arith.constant 0 : index
    %14 = vector.load %arg15[%c0_14, %c0_15] : memref<16x32xf32, #tpu.memory_space<vmem>>, vector<16x32xf32>
    tpu.vector_store %arg15[%c0_14, %c0_15], %13 {strides = array<i32>} : memref<16x32xf32, #tpu.memory_space<vmem>>, vector<16x32xf32>,
    %cst_16 = arith.constant 0.000000e+00 : f32
    %15 = vector.broadcast %cst_16 : f32 to vector<16x32xf32>
    %c0_17 = arith.constant 0 : index
    %c0_18 = arith.constant 0 : index
    %16 = vector.load %arg16[%c0_17, %c0_18] : memref<16x32xf32, #tpu.memory_space<vmem>>, vector<16x32xf32>
    tpu.vector_store %arg16[%c0_17, %c0_18], %15 {strides = array<i32>} : memref<16x32xf32, #tpu.memory_space<vmem>>, vector<16x32xf32>,
    %cst_19 = arith.constant 0.000000e+00 : f32
    %17 = vector.broadcast %cst_19 : f32 to vector<16x32xf32>
    %c0_20 = arith.constant 0 : index
    %c0_21 = arith.constant 0 : index
    %18 = vector.load %arg17[%c0_20, %c0_21] : memref<16x32xf32, #tpu.memory_space<vmem>>, vector<16x32xf32>
    tpu.vector_store %arg17[%c0_20, %c0_21], %17 {strides = array<i32>} : memref<16x32xf32, #tpu.memory_space<vmem>>, vector<16x32xf32>,
    %c0_22 = arith.constant 0 : index
    %c0_23 = arith.constant 0 : index
    %19 = vector.load %arg6[%c0_22, %c0_23] : memref<16x1xi32, #tpu.memory_space<vmem>>, vector<16x1xi32>
    %c0_24 = arith.constant 0 : index
    %c0_25 = arith.constant 0 : index
    %20 = vector.load %arg3[%c0_24, %c0_25] : memref<32x128xbf16, #tpu.memory_space<vmem>>, vector<32x128xbf16>
    %c0_26 = arith.constant 0 : index
    %c0_27 = arith.constant 0 : index
    %21 = vector.load %arg4[%c0_26, %c0_27] : memref<32x128xbf16, #tpu.memory_space<vmem>>, vector<32x128xbf16>
    %c0_i32 = arith.constant 0 : i32
    %c7_i32 = arith.constant 7 : i32
    %22 = arith.subi %c7_i32, %c0_i32 : i32
    %c16_i32 = arith.constant 16 : i32
    %23 = arith.muli %c0_i32, %c16_i32 : i32
    %24 = tpu.assume_multiple %23, 16 : i32
    %c0_28 = arith.constant 0 : index
    %c0_29 = arith.constant 0 : index
    %25 = vector.load %arg14[%c0_28, %c0_29] : memref<16x32xf32, #tpu.memory_space<vmem>>, vector<16x32xf32>
    %26 = arith.index_cast %24 : i32 to index
    %c0_30 = arith.constant 0 : index
    %27 = vector.load %arg12[%26, %c0_30] : memref<128x128xf32, #tpu.memory_space<vmem>>, vector<16x128xf32>
    %28 = arith.truncf %25 : vector<16x32xf32> to vector<16x32xbf16>
    %cst_31 = arith.constant dense<0.000000e+00> : vector<16x128xf32>
    %29 = tpu.matmul %28, %20, %cst_31 {dimension_numbers = #tpu.dot_dimension_numbers<[1], [0], [0], [1], [0, 0, 1, 1], [], []>} : vector<16x32xbf16>, vector<32x128xbf16>, vector<16x128xf32> -> vector<16x128xf32>
    %30 = arith.addf %27, %29 : vector<16x128xf32>
    %c0_32 = arith.constant 0 : index
    %c0_33 = arith.constant 0 : index
    %31 = vector.load %arg15[%c0_32, %c0_33] : memref<16x32xf32, #tpu.memory_space<vmem>>, vector<16x32xf32>
    %32 = vector.extract_strided_slice %30 {offsets = [0, 0], sizes = [16, 32], strides = [1, 1]} : vector<16x128xf32> to vector<16x32xf32>
    %33 = arith.negf %32 : vector<16x32xf32>
    %34 = math.exp %33 : vector<16x32xf32>
    %cst_34 = arith.constant 1.000000e+00 : f32
    %35 = vector.broadcast %cst_34 : f32 to vector<16x32xf32>
    %36 = arith.addf %35, %34 : vector<16x32xf32>
    %37 = arith.divf %35, %36 : vector<16x32xf32>
    %38 = vector.extract_strided_slice %30 {offsets = [0, 32], sizes = [16, 32], strides = [1, 1]} : vector<16x128xf32> to vector<16x32xf32>
    %39 = arith.negf %38 : vector<16x32xf32>
    %40 = math.exp %39 : vector<16x32xf32>
    %cst_35 = arith.constant 1.000000e+00 : f32
    %41 = vector.broadcast %cst_35 : f32 to vector<16x32xf32>
    %42 = arith.addf %41, %40 : vector<16x32xf32>
    %43 = arith.divf %41, %42 : vector<16x32xf32>
    %44 = vector.extract_strided_slice %30 {offsets = [0, 64], sizes = [16, 32], strides = [1, 1]} : vector<16x128xf32> to vector<16x32xf32>
    %45 = math.tanh %44 : vector<16x32xf32>
    %46 = vector.extract_strided_slice %30 {offsets = [0, 96], sizes = [16, 32], strides = [1, 1]} : vector<16x128xf32> to vector<16x32xf32>
    %47 = arith.negf %46 : vector<16x32xf32>
    %48 = math.exp %47 : vector<16x32xf32>
    %cst_36 = arith.constant 1.000000e+00 : f32
    %49 = vector.broadcast %cst_36 : f32 to vector<16x32xf32>
    %50 = arith.addf %49, %48 : vector<16x32xf32>
    %51 = arith.divf %49, %50 : vector<16x32xf32>
    %52 = arith.mulf %43, %31 : vector<16x32xf32>
    %53 = arith.mulf %37, %45 : vector<16x32xf32>
    %54 = arith.addf %52, %53 : vector<16x32xf32>
    %55 = math.tanh %54 : vector<16x32xf32>
    %56 = arith.mulf %51, %55 : vector<16x32xf32>
    %57 = vector.broadcast %c0_i32 : i32 to vector<16x1xi32>
    %58 = arith.cmpi slt, %57, %19 : vector<16x1xi32>
    %59 = vector.shape_cast %58 : vector<16x1xi1> to vector<16x1xi1>
    %60 = vector.broadcast %59 : vector<16x1xi1> to vector<16x32xi1>
    %61 = arith.select %60, %56, %25 : vector<16x32xi1>, vector<16x32xf32>
    %62 = vector.shape_cast %58 : vector<16x1xi1> to vector<16x1xi1>
    %63 = vector.broadcast %62 : vector<16x1xi1> to vector<16x32xi1>
    %64 = arith.select %63, %54, %31 : vector<16x32xi1>, vector<16x32xf32>
    %c0_37 = arith.constant 0 : index
    %c0_38 = arith.constant 0 : index
    %65 = vector.load %arg14[%c0_37, %c0_38] : memref<16x32xf32, #tpu.memory_space<vmem>>, vector<16x32xf32>
    tpu.vector_store %arg14[%c0_37, %c0_38], %61 {strides = array<i32>} : memref<16x32xf32, #tpu.memory_space<vmem>>, vector<16x32xf32>,
    %c0_39 = arith.constant 0 : index
    %c0_40 = arith.constant 0 : index
    %66 = vector.load %arg15[%c0_39, %c0_40] : memref<16x32xf32, #tpu.memory_space<vmem>>, vector<16x32xf32>
    tpu.vector_store %arg15[%c0_39, %c0_40], %64 {strides = array<i32>} : memref<16x32xf32, #tpu.memory_space<vmem>>, vector<16x32xf32>,
    %c16_i32_41 = arith.constant 16 : i32
    %67 = arith.muli %22, %c16_i32_41 : i32
    %68 = tpu.assume_multiple %67, 16 : i32
    %c0_42 = arith.constant 0 : index
    %c0_43 = arith.constant 0 : index
    %69 = vector.load %arg16[%c0_42, %c0_43] : memref<16x32xf32, #tpu.memory_space<vmem>>, vector<16x32xf32>
    %70 = arith.index_cast %68 : i32 to index
    %c0_44 = arith.constant 0 : index
    %71 = vector.load %arg13[%70, %c0_44] : memref<128x128xf32, #tpu.memory_space<vmem>>, vector<16x128xf32>
    %72 = arith.truncf %69 : vector<16x32xf32> to vector<16x32xbf16>
    %cst_45 = arith.constant dense<0.000000e+00> : vector<16x128xf32>
    %73 = tpu.matmul %72, %21, %cst_45 {dimension_numbers = #tpu.dot_dimension_numbers<[1], [0], [0], [1], [0, 0, 1, 1], [], []>} : vector<16x32xbf16>, vector<32x128xbf16>, vector<16x128xf32> -> vector<16x128xf32>
    %74 = arith.addf %71, %73 : vector<16x128xf32>
    %c0_46 = arith.constant 0 : index
    %c0_47 = arith.constant 0 : index
    %75 = vector.load %arg17[%c0_46, %c0_47] : memref<16x32xf32, #tpu.memory_space<vmem>>, vector<16x32xf32>
    %76 = vector.extract_strided_slice %74 {offsets = [0, 0], sizes = [16, 32], strides = [1, 1]} : vector<16x128xf32> to vector<16x32xf32>
    %77 = arith.negf %76 : vector<16x32xf32>
    %78 = math.exp %77 : vector<16x32xf32>
    %cst_48 = arith.constant 1.000000e+00 : f32
    %79 = vector.broadcast %cst_48 : f32 to vector<16x32xf32>
    %80 = arith.addf %79, %78 : vector<16x32xf32>
    %81 = arith.divf %79, %80 : vector<16x32xf32>
    %82 = vector.extract_strided_slice %74 {offsets = [0, 32], sizes = [16, 32], strides = [1, 1]} : vector<16x128xf32> to vector<16x32xf32>
    %83 = arith.negf %82 : vector<16x32xf32>
    %84 = math.exp %83 : vector<16x32xf32>
    %cst_49 = arith.constant 1.000000e+00 : f32
    %85 = vector.broadcast %cst_49 : f32 to vector<16x32xf32>
    %86 = arith.addf %85, %84 : vector<16x32xf32>
    %87 = arith.divf %85, %86 : vector<16x32xf32>
    %88 = vector.extract_strided_slice %74 {offsets = [0, 64], sizes = [16, 32], strides = [1, 1]} : vector<16x128xf32> to vector<16x32xf32>
    %89 = math.tanh %88 : vector<16x32xf32>
    %90 = vector.extract_strided_slice %74 {offsets = [0, 96], sizes = [16, 32], strides = [1, 1]} : vector<16x128xf32> to vector<16x32xf32>
    %91 = arith.negf %90 : vector<16x32xf32>
    %92 = math.exp %91 : vector<16x32xf32>
    %cst_50 = arith.constant 1.000000e+00 : f32
    %93 = vector.broadcast %cst_50 : f32 to vector<16x32xf32>
    %94 = arith.addf %93, %92 : vector<16x32xf32>
    %95 = arith.divf %93, %94 : vector<16x32xf32>
    %96 = arith.mulf %87, %75 : vector<16x32xf32>
    %97 = arith.mulf %81, %89 : vector<16x32xf32>
    %98 = arith.addf %96, %97 : vector<16x32xf32>
    %99 = math.tanh %98 : vector<16x32xf32>
    %100 = arith.mulf %95, %99 : vector<16x32xf32>
    %101 = vector.broadcast %22 : i32 to vector<16x1xi32>
    %102 = arith.cmpi slt, %101, %19 : vector<16x1xi32>
    %103 = vector.shape_cast %102 : vector<16x1xi1> to vector<16x1xi1>
    %104 = vector.broadcast %103 : vector<16x1xi1> to vector<16x32xi1>
    %105 = arith.select %104, %100, %69 : vector<16x32xi1>, vector<16x32xf32>
    %106 = vector.shape_cast %102 : vector<16x1xi1> to vector<16x1xi1>
    %107 = vector.broadcast %106 : vector<16x1xi1> to vector<16x32xi1>
    %108 = arith.select %107, %98, %75 : vector<16x32xi1>, vector<16x32xf32>
    %c0_51 = arith.constant 0 : index
    %c0_52 = arith.constant 0 : index
    %109 = vector.load %arg16[%c0_51, %c0_52] : memref<16x32xf32, #tpu.memory_space<vmem>>, vector<16x32xf32>
    tpu.vector_store %arg16[%c0_51, %c0_52], %105 {strides = array<i32>} : memref<16x32xf32, #tpu.memory_space<vmem>>, vector<16x32xf32>,
    %c0_53 = arith.constant 0 : index
    %c0_54 = arith.constant 0 : index
    %110 = vector.load %arg17[%c0_53, %c0_54] : memref<16x32xf32, #tpu.memory_space<vmem>>, vector<16x32xf32>
    tpu.vector_store %arg17[%c0_53, %c0_54], %108 {strides = array<i32>} : memref<16x32xf32, #tpu.memory_space<vmem>>, vector<16x32xf32>,
    %c1_i32 = arith.constant 1 : i32
    %c7_i32_55 = arith.constant 7 : i32
    %111 = arith.subi %c7_i32_55, %c1_i32 : i32
    %c16_i32_56 = arith.constant 16 : i32
    %112 = arith.muli %c1_i32, %c16_i32_56 : i32
    %113 = tpu.assume_multiple %112, 16 : i32
    %c0_57 = arith.constant 0 : index
    %c0_58 = arith.constant 0 : index
    %114 = vector.load %arg14[%c0_57, %c0_58] : memref<16x32xf32, #tpu.memory_space<vmem>>, vector<16x32xf32>
    %115 = arith.index_cast %113 : i32 to index
    %c0_59 = arith.constant 0 : index
    %116 = vector.load %arg12[%115, %c0_59] : memref<128x128xf32, #tpu.memory_space<vmem>>, vector<16x128xf32>
    %117 = arith.truncf %114 : vector<16x32xf32> to vector<16x32xbf16>
    %cst_60 = arith.constant dense<0.000000e+00> : vector<16x128xf32>
    %118 = tpu.matmul %117, %20, %cst_60 {dimension_numbers = #tpu.dot_dimension_numbers<[1], [0], [0], [1], [0, 0, 1, 1], [], []>} : vector<16x32xbf16>, vector<32x128xbf16>, vector<16x128xf32> -> vector<16x128xf32>
    %119 = arith.addf %116, %118 : vector<16x128xf32>
    %c0_61 = arith.constant 0 : index
    %c0_62 = arith.constant 0 : index
    %120 = vector.load %arg15[%c0_61, %c0_62] : memref<16x32xf32, #tpu.memory_space<vmem>>, vector<16x32xf32>
    %121 = vector.extract_strided_slice %119 {offsets = [0, 0], sizes = [16, 32], strides = [1, 1]} : vector<16x128xf32> to vector<16x32xf32>
    %122 = arith.negf %121 : vector<16x32xf32>
    %123 = math.exp %122 : vector<16x32xf32>
    %cst_63 = arith.constant 1.000000e+00 : f32
    %124 = vector.broadcast %cst_63 : f32 to vector<16x32xf32>
    %125 = arith.addf %124, %123 : vector<16x32xf32>
    %126 = arith.divf %124, %125 : vector<16x32xf32>
    %127 = vector.extract_strided_slice %119 {offsets = [0, 32], sizes = [16, 32], strides = [1, 1]} : vector<16x128xf32> to vector<16x32xf32>
    %128 = arith.negf %127 : vector<16x32xf32>
    %129 = math.exp %128 : vector<16x32xf32>
    %cst_64 = arith.constant 1.000000e+00 : f32
    %130 = vector.broadcast %cst_64 : f32 to vector<16x32xf32>
    %131 = arith.addf %130, %129 : vector<16x32xf32>
    %132 = arith.divf %130, %131 : vector<16x32xf32>
    %133 = vector.extract_strided_slice %119 {offsets = [0, 64], sizes = [16, 32], strides = [1, 1]} : vector<16x128xf32> to vector<16x32xf32>
    %134 = math.tanh %133 : vector<16x32xf32>
    %135 = vector.extract_strided_slice %119 {offsets = [0, 96], sizes = [16, 32], strides = [1, 1]} : vector<16x128xf32> to vector<16x32xf32>
    %136 = arith.negf %135 : vector<16x32xf32>
    %137 = math.exp %136 : vector<16x32xf32>
    %cst_65 = arith.constant 1.000000e+00 : f32
    %138 = vector.broadcast %cst_65 : f32 to vector<16x32xf32>
    %139 = arith.addf %138, %137 : vector<16x32xf32>
    %140 = arith.divf %138, %139 : vector<16x32xf32>
    %141 = arith.mulf %132, %120 : vector<16x32xf32>
    %142 = arith.mulf %126, %134 : vector<16x32xf32>
    %143 = arith.addf %141, %142 : vector<16x32xf32>
    %144 = math.tanh %143 : vector<16x32xf32>
    %145 = arith.mulf %140, %144 : vector<16x32xf32>
    %146 = vector.broadcast %c1_i32 : i32 to vector<16x1xi32>
    %147 = arith.cmpi slt, %146, %19 : vector<16x1xi32>
    %148 = vector.shape_cast %147 : vector<16x1xi1> to vector<16x1xi1>
    %149 = vector.broadcast %148 : vector<16x1xi1> to vector<16x32xi1>
    %150 = arith.select %149, %145, %114 : vector<16x32xi1>, vector<16x32xf32>
    %151 = vector.shape_cast %147 : vector<16x1xi1> to vector<16x1xi1>
    %152 = vector.broadcast %151 : vector<16x1xi1> to vector<16x32xi1>
    %153 = arith.select %152, %143, %120 : vector<16x32xi1>, vector<16x32xf32>
    %c0_66 = arith.constant 0 : index
    %c0_67 = arith.constant 0 : index
    %154 = vector.load %arg14[%c0_66, %c0_67] : memref<16x32xf32, #tpu.memory_space<vmem>>, vector<16x32xf32>
    tpu.vector_store %arg14[%c0_66, %c0_67], %150 {strides = array<i32>} : memref<16x32xf32, #tpu.memory_space<vmem>>, vector<16x32xf32>,
    %c0_68 = arith.constant 0 : index
    %c0_69 = arith.constant 0 : index
    %155 = vector.load %arg15[%c0_68, %c0_69] : memref<16x32xf32, #tpu.memory_space<vmem>>, vector<16x32xf32>
    tpu.vector_store %arg15[%c0_68, %c0_69], %153 {strides = array<i32>} : memref<16x32xf32, #tpu.memory_space<vmem>>, vector<16x32xf32>,
    %c16_i32_70 = arith.constant 16 : i32
    %156 = arith.muli %111, %c16_i32_70 : i32
    %157 = tpu.assume_multiple %156, 16 : i32
    %c0_71 = arith.constant 0 : index
    %c0_72 = arith.constant 0 : index
    %158 = vector.load %arg16[%c0_71, %c0_72] : memref<16x32xf32, #tpu.memory_space<vmem>>, vector<16x32xf32>
    %159 = arith.index_cast %157 : i32 to index
    %c0_73 = arith.constant 0 : index
    %160 = vector.load %arg13[%159, %c0_73] : memref<128x128xf32, #tpu.memory_space<vmem>>, vector<16x128xf32>
    %161 = arith.truncf %158 : vector<16x32xf32> to vector<16x32xbf16>
    %cst_74 = arith.constant dense<0.000000e+00> : vector<16x128xf32>
    %162 = tpu.matmul %161, %21, %cst_74 {dimension_numbers = #tpu.dot_dimension_numbers<[1], [0], [0], [1], [0, 0, 1, 1], [], []>} : vector<16x32xbf16>, vector<32x128xbf16>, vector<16x128xf32> -> vector<16x128xf32>
    %163 = arith.addf %160, %162 : vector<16x128xf32>
    %c0_75 = arith.constant 0 : index
    %c0_76 = arith.constant 0 : index
    %164 = vector.load %arg17[%c0_75, %c0_76] : memref<16x32xf32, #tpu.memory_space<vmem>>, vector<16x32xf32>
    %165 = vector.extract_strided_slice %163 {offsets = [0, 0], sizes = [16, 32], strides = [1, 1]} : vector<16x128xf32> to vector<16x32xf32>
    %166 = arith.negf %165 : vector<16x32xf32>
    %167 = math.exp %166 : vector<16x32xf32>
    %cst_77 = arith.constant 1.000000e+00 : f32
    %168 = vector.broadcast %cst_77 : f32 to vector<16x32xf32>
    %169 = arith.addf %168, %167 : vector<16x32xf32>
    %170 = arith.divf %168, %169 : vector<16x32xf32>
    %171 = vector.extract_strided_slice %163 {offsets = [0, 32], sizes = [16, 32], strides = [1, 1]} : vector<16x128xf32> to vector<16x32xf32>
    %172 = arith.negf %171 : vector<16x32xf32>
    %173 = math.exp %172 : vector<16x32xf32>
    %cst_78 = arith.constant 1.000000e+00 : f32
    %174 = vector.broadcast %cst_78 : f32 to vector<16x32xf32>
    %175 = arith.addf %174, %173 : vector<16x32xf32>
    %176 = arith.divf %174, %175 : vector<16x32xf32>
    %177 = vector.extract_strided_slice %163 {offsets = [0, 64], sizes = [16, 32], strides = [1, 1]} : vector<16x128xf32> to vector<16x32xf32>
    %178 = math.tanh %177 : vector<16x32xf32>
    %179 = vector.extract_strided_slice %163 {offsets = [0, 96], sizes = [16, 32], strides = [1, 1]} : vector<16x128xf32> to vector<16x32xf32>
    %180 = arith.negf %179 : vector<16x32xf32>
    %181 = math.exp %180 : vector<16x32xf32>
    %cst_79 = arith.constant 1.000000e+00 : f32
    %182 = vector.broadcast %cst_79 : f32 to vector<16x32xf32>
    %183 = arith.addf %182, %181 : vector<16x32xf32>
    %184 = arith.divf %182, %183 : vector<16x32xf32>
    %185 = arith.mulf %176, %164 : vector<16x32xf32>
    %186 = arith.mulf %170, %178 : vector<16x32xf32>
    %187 = arith.addf %185, %186 : vector<16x32xf32>
    %188 = math.tanh %187 : vector<16x32xf32>
    %189 = arith.mulf %184, %188 : vector<16x32xf32>
    %190 = vector.broadcast %111 : i32 to vector<16x1xi32>
    %191 = arith.cmpi slt, %190, %19 : vector<16x1xi32>
    %192 = vector.shape_cast %191 : vector<16x1xi1> to vector<16x1xi1>
    %193 = vector.broadcast %192 : vector<16x1xi1> to vector<16x32xi1>
    %194 = arith.select %193, %189, %158 : vector<16x32xi1>, vector<16x32xf32>
    %195 = vector.shape_cast %191 : vector<16x1xi1> to vector<16x1xi1>
    %196 = vector.broadcast %195 : vector<16x1xi1> to vector<16x32xi1>
    %197 = arith.select %196, %187, %164 : vector<16x32xi1>, vector<16x32xf32>
    %c0_80 = arith.constant 0 : index
    %c0_81 = arith.constant 0 : index
    %198 = vector.load %arg16[%c0_80, %c0_81] : memref<16x32xf32, #tpu.memory_space<vmem>>, vector<16x32xf32>
    tpu.vector_store %arg16[%c0_80, %c0_81], %194 {strides = array<i32>} : memref<16x32xf32, #tpu.memory_space<vmem>>, vector<16x32xf32>,
    %c0_82 = arith.constant 0 : index
    %c0_83 = arith.constant 0 : index
    %199 = vector.load %arg17[%c0_82, %c0_83] : memref<16x32xf32, #tpu.memory_space<vmem>>, vector<16x32xf32>
    tpu.vector_store %arg17[%c0_82, %c0_83], %197 {strides = array<i32>} : memref<16x32xf32, #tpu.memory_space<vmem>>, vector<16x32xf32>,
    %c2_i32 = arith.constant 2 : i32
    %c7_i32_84 = arith.constant 7 : i32
    %200 = arith.subi %c7_i32_84, %c2_i32 : i32
    %c16_i32_85 = arith.constant 16 : i32
    %201 = arith.muli %c2_i32, %c16_i32_85 : i32
    %202 = tpu.assume_multiple %201, 16 : i32
    %c0_86 = arith.constant 0 : index
    %c0_87 = arith.constant 0 : index
    %203 = vector.load %arg14[%c0_86, %c0_87] : memref<16x32xf32, #tpu.memory_space<vmem>>, vector<16x32xf32>
    %204 = arith.index_cast %202 : i32 to index
    %c0_88 = arith.constant 0 : index
    %205 = vector.load %arg12[%204, %c0_88] : memref<128x128xf32, #tpu.memory_space<vmem>>, vector<16x128xf32>
    %206 = arith.truncf %203 : vector<16x32xf32> to vector<16x32xbf16>
    %cst_89 = arith.constant dense<0.000000e+00> : vector<16x128xf32>
    %207 = tpu.matmul %206, %20, %cst_89 {dimension_numbers = #tpu.dot_dimension_numbers<[1], [0], [0], [1], [0, 0, 1, 1], [], []>} : vector<16x32xbf16>, vector<32x128xbf16>, vector<16x128xf32> -> vector<16x128xf32>
    %208 = arith.addf %205, %207 : vector<16x128xf32>
    %c0_90 = arith.constant 0 : index
    %c0_91 = arith.constant 0 : index
    %209 = vector.load %arg15[%c0_90, %c0_91] : memref<16x32xf32, #tpu.memory_space<vmem>>, vector<16x32xf32>
    %210 = vector.extract_strided_slice %208 {offsets = [0, 0], sizes = [16, 32], strides = [1, 1]} : vector<16x128xf32> to vector<16x32xf32>
    %211 = arith.negf %210 : vector<16x32xf32>
    %212 = math.exp %211 : vector<16x32xf32>
    %cst_92 = arith.constant 1.000000e+00 : f32
    %213 = vector.broadcast %cst_92 : f32 to vector<16x32xf32>
    %214 = arith.addf %213, %212 : vector<16x32xf32>
    %215 = arith.divf %213, %214 : vector<16x32xf32>
    %216 = vector.extract_strided_slice %208 {offsets = [0, 32], sizes = [16, 32], strides = [1, 1]} : vector<16x128xf32> to vector<16x32xf32>
    %217 = arith.negf %216 : vector<16x32xf32>
    %218 = math.exp %217 : vector<16x32xf32>
    %cst_93 = arith.constant 1.000000e+00 : f32
    %219 = vector.broadcast %cst_93 : f32 to vector<16x32xf32>
    %220 = arith.addf %219, %218 : vector<16x32xf32>
    %221 = arith.divf %219, %220 : vector<16x32xf32>
    %222 = vector.extract_strided_slice %208 {offsets = [0, 64], sizes = [16, 32], strides = [1, 1]} : vector<16x128xf32> to vector<16x32xf32>
    %223 = math.tanh %222 : vector<16x32xf32>
    %224 = vector.extract_strided_slice %208 {offsets = [0, 96], sizes = [16, 32], strides = [1, 1]} : vector<16x128xf32> to vector<16x32xf32>
    %225 = arith.negf %224 : vector<16x32xf32>
    %226 = math.exp %225 : vector<16x32xf32>
    %cst_94 = arith.constant 1.000000e+00 : f32
    %227 = vector.broadcast %cst_94 : f32 to vector<16x32xf32>
    %228 = arith.addf %227, %226 : vector<16x32xf32>
    %229 = arith.divf %227, %228 : vector<16x32xf32>
    %230 = arith.mulf %221, %209 : vector<16x32xf32>
    %231 = arith.mulf %215, %223 : vector<16x32xf32>
    %232 = arith.addf %230, %231 : vector<16x32xf32>
    %233 = math.tanh %232 : vector<16x32xf32>
    %234 = arith.mulf %229, %233 : vector<16x32xf32>
    %235 = vector.broadcast %c2_i32 : i32 to vector<16x1xi32>
    %236 = arith.cmpi slt, %235, %19 : vector<16x1xi32>
    %237 = vector.shape_cast %236 : vector<16x1xi1> to vector<16x1xi1>
    %238 = vector.broadcast %237 : vector<16x1xi1> to vector<16x32xi1>
    %239 = arith.select %238, %234, %203 : vector<16x32xi1>, vector<16x32xf32>
    %240 = vector.shape_cast %236 : vector<16x1xi1> to vector<16x1xi1>
    %241 = vector.broadcast %240 : vector<16x1xi1> to vector<16x32xi1>
    %242 = arith.select %241, %232, %209 : vector<16x32xi1>, vector<16x32xf32>
    %c0_95 = arith.constant 0 : index
    %c0_96 = arith.constant 0 : index
    %243 = vector.load %arg14[%c0_95, %c0_96] : memref<16x32xf32, #tpu.memory_space<vmem>>, vector<16x32xf32>
    tpu.vector_store %arg14[%c0_95, %c0_96], %239 {strides = array<i32>} : memref<16x32xf32, #tpu.memory_space<vmem>>, vector<16x32xf32>,
    %c0_97 = arith.constant 0 : index
    %c0_98 = arith.constant 0 : index
    %244 = vector.load %arg15[%c0_97, %c0_98] : memref<16x32xf32, #tpu.memory_space<vmem>>, vector<16x32xf32>
    tpu.vector_store %arg15[%c0_97, %c0_98], %242 {strides = array<i32>} : memref<16x32xf32, #tpu.memory_space<vmem>>, vector<16x32xf32>,
    %c16_i32_99 = arith.constant 16 : i32
    %245 = arith.muli %200, %c16_i32_99 : i32
    %246 = tpu.assume_multiple %245, 16 : i32
    %c0_100 = arith.constant 0 : index
    %c0_101 = arith.constant 0 : index
    %247 = vector.load %arg16[%c0_100, %c0_101] : memref<16x32xf32, #tpu.memory_space<vmem>>, vector<16x32xf32>
    %248 = arith.index_cast %246 : i32 to index
    %c0_102 = arith.constant 0 : index
    %249 = vector.load %arg13[%248, %c0_102] : memref<128x128xf32, #tpu.memory_space<vmem>>, vector<16x128xf32>
    %250 = arith.truncf %247 : vector<16x32xf32> to vector<16x32xbf16>
    %cst_103 = arith.constant dense<0.000000e+00> : vector<16x128xf32>
    %251 = tpu.matmul %250, %21, %cst_103 {dimension_numbers = #tpu.dot_dimension_numbers<[1], [0], [0], [1], [0, 0, 1, 1], [], []>} : vector<16x32xbf16>, vector<32x128xbf16>, vector<16x128xf32> -> vector<16x128xf32>
    %252 = arith.addf %249, %251 : vector<16x128xf32>
    %c0_104 = arith.constant 0 : index
    %c0_105 = arith.constant 0 : index
    %253 = vector.load %arg17[%c0_104, %c0_105] : memref<16x32xf32, #tpu.memory_space<vmem>>, vector<16x32xf32>
    %254 = vector.extract_strided_slice %252 {offsets = [0, 0], sizes = [16, 32], strides = [1, 1]} : vector<16x128xf32> to vector<16x32xf32>
    %255 = arith.negf %254 : vector<16x32xf32>
    %256 = math.exp %255 : vector<16x32xf32>
    %cst_106 = arith.constant 1.000000e+00 : f32
    %257 = vector.broadcast %cst_106 : f32 to vector<16x32xf32>
    %258 = arith.addf %257, %256 : vector<16x32xf32>
    %259 = arith.divf %257, %258 : vector<16x32xf32>
    %260 = vector.extract_strided_slice %252 {offsets = [0, 32], sizes = [16, 32], strides = [1, 1]} : vector<16x128xf32> to vector<16x32xf32>
    %261 = arith.negf %260 : vector<16x32xf32>
    %262 = math.exp %261 : vector<16x32xf32>
    %cst_107 = arith.constant 1.000000e+00 : f32
    %263 = vector.broadcast %cst_107 : f32 to vector<16x32xf32>
    %264 = arith.addf %263, %262 : vector<16x32xf32>
    %265 = arith.divf %263, %264 : vector<16x32xf32>
    %266 = vector.extract_strided_slice %252 {offsets = [0, 64], sizes = [16, 32], strides = [1, 1]} : vector<16x128xf32> to vector<16x32xf32>
    %267 = math.tanh %266 : vector<16x32xf32>
    %268 = vector.extract_strided_slice %252 {offsets = [0, 96], sizes = [16, 32], strides = [1, 1]} : vector<16x128xf32> to vector<16x32xf32>
    %269 = arith.negf %268 : vector<16x32xf32>
    %270 = math.exp %269 : vector<16x32xf32>
    %cst_108 = arith.constant 1.000000e+00 : f32
    %271 = vector.broadcast %cst_108 : f32 to vector<16x32xf32>
    %272 = arith.addf %271, %270 : vector<16x32xf32>
    %273 = arith.divf %271, %272 : vector<16x32xf32>
    %274 = arith.mulf %265, %253 : vector<16x32xf32>
    %275 = arith.mulf %259, %267 : vector<16x32xf32>
    %276 = arith.addf %274, %275 : vector<16x32xf32>
    %277 = math.tanh %276 : vector<16x32xf32>
    %278 = arith.mulf %273, %277 : vector<16x32xf32>
    %279 = vector.broadcast %200 : i32 to vector<16x1xi32>
    %280 = arith.cmpi slt, %279, %19 : vector<16x1xi32>
    %281 = vector.shape_cast %280 : vector<16x1xi1> to vector<16x1xi1>
    %282 = vector.broadcast %281 : vector<16x1xi1> to vector<16x32xi1>
    %283 = arith.select %282, %278, %247 : vector<16x32xi1>, vector<16x32xf32>
    %284 = vector.shape_cast %280 : vector<16x1xi1> to vector<16x1xi1>
    %285 = vector.broadcast %284 : vector<16x1xi1> to vector<16x32xi1>
    %286 = arith.select %285, %276, %253 : vector<16x32xi1>, vector<16x32xf32>
    %c0_109 = arith.constant 0 : index
    %c0_110 = arith.constant 0 : index
    %287 = vector.load %arg16[%c0_109, %c0_110] : memref<16x32xf32, #tpu.memory_space<vmem>>, vector<16x32xf32>
    tpu.vector_store %arg16[%c0_109, %c0_110], %283 {strides = array<i32>} : memref<16x32xf32, #tpu.memory_space<vmem>>, vector<16x32xf32>,
    %c0_111 = arith.constant 0 : index
    %c0_112 = arith.constant 0 : index
    %288 = vector.load %arg17[%c0_111, %c0_112] : memref<16x32xf32, #tpu.memory_space<vmem>>, vector<16x32xf32>
    tpu.vector_store %arg17[%c0_111, %c0_112], %286 {strides = array<i32>} : memref<16x32xf32, #tpu.memory_space<vmem>>, vector<16x32xf32>,
    %c3_i32 = arith.constant 3 : i32
    %c7_i32_113 = arith.constant 7 : i32
    %289 = arith.subi %c7_i32_113, %c3_i32 : i32
    %c16_i32_114 = arith.constant 16 : i32
    %290 = arith.muli %c3_i32, %c16_i32_114 : i32
    %291 = tpu.assume_multiple %290, 16 : i32
    %c0_115 = arith.constant 0 : index
    %c0_116 = arith.constant 0 : index
    %292 = vector.load %arg14[%c0_115, %c0_116] : memref<16x32xf32, #tpu.memory_space<vmem>>, vector<16x32xf32>
    %293 = arith.index_cast %291 : i32 to index
    %c0_117 = arith.constant 0 : index
    %294 = vector.load %arg12[%293, %c0_117] : memref<128x128xf32, #tpu.memory_space<vmem>>, vector<16x128xf32>
    %295 = arith.truncf %292 : vector<16x32xf32> to vector<16x32xbf16>
    %cst_118 = arith.constant dense<0.000000e+00> : vector<16x128xf32>
    %296 = tpu.matmul %295, %20, %cst_118 {dimension_numbers = #tpu.dot_dimension_numbers<[1], [0], [0], [1], [0, 0, 1, 1], [], []>} : vector<16x32xbf16>, vector<32x128xbf16>, vector<16x128xf32> -> vector<16x128xf32>
    %297 = arith.addf %294, %296 : vector<16x128xf32>
    %c0_119 = arith.constant 0 : index
    %c0_120 = arith.constant 0 : index
    %298 = vector.load %arg15[%c0_119, %c0_120] : memref<16x32xf32, #tpu.memory_space<vmem>>, vector<16x32xf32>
    %299 = vector.extract_strided_slice %297 {offsets = [0, 0], sizes = [16, 32], strides = [1, 1]} : vector<16x128xf32> to vector<16x32xf32>
    %300 = arith.negf %299 : vector<16x32xf32>
    %301 = math.exp %300 : vector<16x32xf32>
    %cst_121 = arith.constant 1.000000e+00 : f32
    %302 = vector.broadcast %cst_121 : f32 to vector<16x32xf32>
    %303 = arith.addf %302, %301 : vector<16x32xf32>
    %304 = arith.divf %302, %303 : vector<16x32xf32>
    %305 = vector.extract_strided_slice %297 {offsets = [0, 32], sizes = [16, 32], strides = [1, 1]} : vector<16x128xf32> to vector<16x32xf32>
    %306 = arith.negf %305 : vector<16x32xf32>
    %307 = math.exp %306 : vector<16x32xf32>
    %cst_122 = arith.constant 1.000000e+00 : f32
    %308 = vector.broadcast %cst_122 : f32 to vector<16x32xf32>
    %309 = arith.addf %308, %307 : vector<16x32xf32>
    %310 = arith.divf %308, %309 : vector<16x32xf32>
    %311 = vector.extract_strided_slice %297 {offsets = [0, 64], sizes = [16, 32], strides = [1, 1]} : vector<16x128xf32> to vector<16x32xf32>
    %312 = math.tanh %311 : vector<16x32xf32>
    %313 = vector.extract_strided_slice %297 {offsets = [0, 96], sizes = [16, 32], strides = [1, 1]} : vector<16x128xf32> to vector<16x32xf32>
    %314 = arith.negf %313 : vector<16x32xf32>
    %315 = math.exp %314 : vector<16x32xf32>
    %cst_123 = arith.constant 1.000000e+00 : f32
    %316 = vector.broadcast %cst_123 : f32 to vector<16x32xf32>
    %317 = arith.addf %316, %315 : vector<16x32xf32>
    %318 = arith.divf %316, %317 : vector<16x32xf32>
    %319 = arith.mulf %310, %298 : vector<16x32xf32>
    %320 = arith.mulf %304, %312 : vector<16x32xf32>
    %321 = arith.addf %319, %320 : vector<16x32xf32>
    %322 = math.tanh %321 : vector<16x32xf32>
    %323 = arith.mulf %318, %322 : vector<16x32xf32>
    %324 = vector.broadcast %c3_i32 : i32 to vector<16x1xi32>
    %325 = arith.cmpi slt, %324, %19 : vector<16x1xi32>
    %326 = vector.shape_cast %325 : vector<16x1xi1> to vector<16x1xi1>
    %327 = vector.broadcast %326 : vector<16x1xi1> to vector<16x32xi1>
    %328 = arith.select %327, %323, %292 : vector<16x32xi1>, vector<16x32xf32>
    %329 = vector.shape_cast %325 : vector<16x1xi1> to vector<16x1xi1>
    %330 = vector.broadcast %329 : vector<16x1xi1> to vector<16x32xi1>
    %331 = arith.select %330, %321, %298 : vector<16x32xi1>, vector<16x32xf32>
    %c0_124 = arith.constant 0 : index
    %c0_125 = arith.constant 0 : index
    %332 = vector.load %arg14[%c0_124, %c0_125] : memref<16x32xf32, #tpu.memory_space<vmem>>, vector<16x32xf32>
    tpu.vector_store %arg14[%c0_124, %c0_125], %328 {strides = array<i32>} : memref<16x32xf32, #tpu.memory_space<vmem>>, vector<16x32xf32>,
    %c0_126 = arith.constant 0 : index
    %c0_127 = arith.constant 0 : index
    %333 = vector.load %arg15[%c0_126, %c0_127] : memref<16x32xf32, #tpu.memory_space<vmem>>, vector<16x32xf32>
    tpu.vector_store %arg15[%c0_126, %c0_127], %331 {strides = array<i32>} : memref<16x32xf32, #tpu.memory_space<vmem>>, vector<16x32xf32>,
    %c16_i32_128 = arith.constant 16 : i32
    %334 = arith.muli %289, %c16_i32_128 : i32
    %335 = tpu.assume_multiple %334, 16 : i32
    %c0_129 = arith.constant 0 : index
    %c0_130 = arith.constant 0 : index
    %336 = vector.load %arg16[%c0_129, %c0_130] : memref<16x32xf32, #tpu.memory_space<vmem>>, vector<16x32xf32>
    %337 = arith.index_cast %335 : i32 to index
    %c0_131 = arith.constant 0 : index
    %338 = vector.load %arg13[%337, %c0_131] : memref<128x128xf32, #tpu.memory_space<vmem>>, vector<16x128xf32>
    %339 = arith.truncf %336 : vector<16x32xf32> to vector<16x32xbf16>
    %cst_132 = arith.constant dense<0.000000e+00> : vector<16x128xf32>
    %340 = tpu.matmul %339, %21, %cst_132 {dimension_numbers = #tpu.dot_dimension_numbers<[1], [0], [0], [1], [0, 0, 1, 1], [], []>} : vector<16x32xbf16>, vector<32x128xbf16>, vector<16x128xf32> -> vector<16x128xf32>
    %341 = arith.addf %338, %340 : vector<16x128xf32>
    %c0_133 = arith.constant 0 : index
    %c0_134 = arith.constant 0 : index
    %342 = vector.load %arg17[%c0_133, %c0_134] : memref<16x32xf32, #tpu.memory_space<vmem>>, vector<16x32xf32>
    %343 = vector.extract_strided_slice %341 {offsets = [0, 0], sizes = [16, 32], strides = [1, 1]} : vector<16x128xf32> to vector<16x32xf32>
    %344 = arith.negf %343 : vector<16x32xf32>
    %345 = math.exp %344 : vector<16x32xf32>
    %cst_135 = arith.constant 1.000000e+00 : f32
    %346 = vector.broadcast %cst_135 : f32 to vector<16x32xf32>
    %347 = arith.addf %346, %345 : vector<16x32xf32>
    %348 = arith.divf %346, %347 : vector<16x32xf32>
    %349 = vector.extract_strided_slice %341 {offsets = [0, 32], sizes = [16, 32], strides = [1, 1]} : vector<16x128xf32> to vector<16x32xf32>
    %350 = arith.negf %349 : vector<16x32xf32>
    %351 = math.exp %350 : vector<16x32xf32>
    %cst_136 = arith.constant 1.000000e+00 : f32
    %352 = vector.broadcast %cst_136 : f32 to vector<16x32xf32>
    %353 = arith.addf %352, %351 : vector<16x32xf32>
    %354 = arith.divf %352, %353 : vector<16x32xf32>
    %355 = vector.extract_strided_slice %341 {offsets = [0, 64], sizes = [16, 32], strides = [1, 1]} : vector<16x128xf32> to vector<16x32xf32>
    %356 = math.tanh %355 : vector<16x32xf32>
    %357 = vector.extract_strided_slice %341 {offsets = [0, 96], sizes = [16, 32], strides = [1, 1]} : vector<16x128xf32> to vector<16x32xf32>
    %358 = arith.negf %357 : vector<16x32xf32>
    %359 = math.exp %358 : vector<16x32xf32>
    %cst_137 = arith.constant 1.000000e+00 : f32
    %360 = vector.broadcast %cst_137 : f32 to vector<16x32xf32>
    %361 = arith.addf %360, %359 : vector<16x32xf32>
    %362 = arith.divf %360, %361 : vector<16x32xf32>
    %363 = arith.mulf %354, %342 : vector<16x32xf32>
    %364 = arith.mulf %348, %356 : vector<16x32xf32>
    %365 = arith.addf %363, %364 : vector<16x32xf32>
    %366 = math.tanh %365 : vector<16x32xf32>
    %367 = arith.mulf %362, %366 : vector<16x32xf32>
    %368 = vector.broadcast %289 : i32 to vector<16x1xi32>
    %369 = arith.cmpi slt, %368, %19 : vector<16x1xi32>
    %370 = vector.shape_cast %369 : vector<16x1xi1> to vector<16x1xi1>
    %371 = vector.broadcast %370 : vector<16x1xi1> to vector<16x32xi1>
    %372 = arith.select %371, %367, %336 : vector<16x32xi1>, vector<16x32xf32>
    %373 = vector.shape_cast %369 : vector<16x1xi1> to vector<16x1xi1>
    %374 = vector.broadcast %373 : vector<16x1xi1> to vector<16x32xi1>
    %375 = arith.select %374, %365, %342 : vector<16x32xi1>, vector<16x32xf32>
    %c0_138 = arith.constant 0 : index
    %c0_139 = arith.constant 0 : index
    %376 = vector.load %arg16[%c0_138, %c0_139] : memref<16x32xf32, #tpu.memory_space<vmem>>, vector<16x32xf32>
    tpu.vector_store %arg16[%c0_138, %c0_139], %372 {strides = array<i32>} : memref<16x32xf32, #tpu.memory_space<vmem>>, vector<16x32xf32>,
    %c0_140 = arith.constant 0 : index
    %c0_141 = arith.constant 0 : index
    %377 = vector.load %arg17[%c0_140, %c0_141] : memref<16x32xf32, #tpu.memory_space<vmem>>, vector<16x32xf32>
    tpu.vector_store %arg17[%c0_140, %c0_141], %375 {strides = array<i32>} : memref<16x32xf32, #tpu.memory_space<vmem>>, vector<16x32xf32>,
    %c4_i32 = arith.constant 4 : i32
    %c7_i32_142 = arith.constant 7 : i32
    %378 = arith.subi %c7_i32_142, %c4_i32 : i32
    %c16_i32_143 = arith.constant 16 : i32
    %379 = arith.muli %c4_i32, %c16_i32_143 : i32
    %380 = tpu.assume_multiple %379, 16 : i32
    %c0_144 = arith.constant 0 : index
    %c0_145 = arith.constant 0 : index
    %381 = vector.load %arg14[%c0_144, %c0_145] : memref<16x32xf32, #tpu.memory_space<vmem>>, vector<16x32xf32>
    %382 = arith.index_cast %380 : i32 to index
    %c0_146 = arith.constant 0 : index
    %383 = vector.load %arg12[%382, %c0_146] : memref<128x128xf32, #tpu.memory_space<vmem>>, vector<16x128xf32>
    %384 = arith.truncf %381 : vector<16x32xf32> to vector<16x32xbf16>
    %cst_147 = arith.constant dense<0.000000e+00> : vector<16x128xf32>
    %385 = tpu.matmul %384, %20, %cst_147 {dimension_numbers = #tpu.dot_dimension_numbers<[1], [0], [0], [1], [0, 0, 1, 1], [], []>} : vector<16x32xbf16>, vector<32x128xbf16>, vector<16x128xf32> -> vector<16x128xf32>
    %386 = arith.addf %383, %385 : vector<16x128xf32>
    %c0_148 = arith.constant 0 : index
    %c0_149 = arith.constant 0 : index
    %387 = vector.load %arg15[%c0_148, %c0_149] : memref<16x32xf32, #tpu.memory_space<vmem>>, vector<16x32xf32>
    %388 = vector.extract_strided_slice %386 {offsets = [0, 0], sizes = [16, 32], strides = [1, 1]} : vector<16x128xf32> to vector<16x32xf32>
    %389 = arith.negf %388 : vector<16x32xf32>
    %390 = math.exp %389 : vector<16x32xf32>
    %cst_150 = arith.constant 1.000000e+00 : f32
    %391 = vector.broadcast %cst_150 : f32 to vector<16x32xf32>
    %392 = arith.addf %391, %390 : vector<16x32xf32>
    %393 = arith.divf %391, %392 : vector<16x32xf32>
    %394 = vector.extract_strided_slice %386 {offsets = [0, 32], sizes = [16, 32], strides = [1, 1]} : vector<16x128xf32> to vector<16x32xf32>
    %395 = arith.negf %394 : vector<16x32xf32>
    %396 = math.exp %395 : vector<16x32xf32>
    %cst_151 = arith.constant 1.000000e+00 : f32
    %397 = vector.broadcast %cst_151 : f32 to vector<16x32xf32>
    %398 = arith.addf %397, %396 : vector<16x32xf32>
    %399 = arith.divf %397, %398 : vector<16x32xf32>
    %400 = vector.extract_strided_slice %386 {offsets = [0, 64], sizes = [16, 32], strides = [1, 1]} : vector<16x128xf32> to vector<16x32xf32>
    %401 = math.tanh %400 : vector<16x32xf32>
    %402 = vector.extract_strided_slice %386 {offsets = [0, 96], sizes = [16, 32], strides = [1, 1]} : vector<16x128xf32> to vector<16x32xf32>
    %403 = arith.negf %402 : vector<16x32xf32>
    %404 = math.exp %403 : vector<16x32xf32>
    %cst_152 = arith.constant 1.000000e+00 : f32
    %405 = vector.broadcast %cst_152 : f32 to vector<16x32xf32>
    %406 = arith.addf %405, %404 : vector<16x32xf32>
    %407 = arith.divf %405, %406 : vector<16x32xf32>
    %408 = arith.mulf %399, %387 : vector<16x32xf32>
    %409 = arith.mulf %393, %401 : vector<16x32xf32>
    %410 = arith.addf %408, %409 : vector<16x32xf32>
    %411 = math.tanh %410 : vector<16x32xf32>
    %412 = arith.mulf %407, %411 : vector<16x32xf32>
    %413 = vector.broadcast %c4_i32 : i32 to vector<16x1xi32>
    %414 = arith.cmpi slt, %413, %19 : vector<16x1xi32>
    %415 = vector.shape_cast %414 : vector<16x1xi1> to vector<16x1xi1>
    %416 = vector.broadcast %415 : vector<16x1xi1> to vector<16x32xi1>
    %417 = arith.select %416, %412, %381 : vector<16x32xi1>, vector<16x32xf32>
    %418 = vector.shape_cast %414 : vector<16x1xi1> to vector<16x1xi1>
    %419 = vector.broadcast %418 : vector<16x1xi1> to vector<16x32xi1>
    %420 = arith.select %419, %410, %387 : vector<16x32xi1>, vector<16x32xf32>
    %c0_153 = arith.constant 0 : index
    %c0_154 = arith.constant 0 : index
    %421 = vector.load %arg14[%c0_153, %c0_154] : memref<16x32xf32, #tpu.memory_space<vmem>>, vector<16x32xf32>
    tpu.vector_store %arg14[%c0_153, %c0_154], %417 {strides = array<i32>} : memref<16x32xf32, #tpu.memory_space<vmem>>, vector<16x32xf32>,
    %c0_155 = arith.constant 0 : index
    %c0_156 = arith.constant 0 : index
    %422 = vector.load %arg15[%c0_155, %c0_156] : memref<16x32xf32, #tpu.memory_space<vmem>>, vector<16x32xf32>
    tpu.vector_store %arg15[%c0_155, %c0_156], %420 {strides = array<i32>} : memref<16x32xf32, #tpu.memory_space<vmem>>, vector<16x32xf32>,
    %c16_i32_157 = arith.constant 16 : i32
    %423 = arith.muli %378, %c16_i32_157 : i32
    %424 = tpu.assume_multiple %423, 16 : i32
    %c0_158 = arith.constant 0 : index
    %c0_159 = arith.constant 0 : index
    %425 = vector.load %arg16[%c0_158, %c0_159] : memref<16x32xf32, #tpu.memory_space<vmem>>, vector<16x32xf32>
    %426 = arith.index_cast %424 : i32 to index
    %c0_160 = arith.constant 0 : index
    %427 = vector.load %arg13[%426, %c0_160] : memref<128x128xf32, #tpu.memory_space<vmem>>, vector<16x128xf32>
    %428 = arith.truncf %425 : vector<16x32xf32> to vector<16x32xbf16>
    %cst_161 = arith.constant dense<0.000000e+00> : vector<16x128xf32>
    %429 = tpu.matmul %428, %21, %cst_161 {dimension_numbers = #tpu.dot_dimension_numbers<[1], [0], [0], [1], [0, 0, 1, 1], [], []>} : vector<16x32xbf16>, vector<32x128xbf16>, vector<16x128xf32> -> vector<16x128xf32>
    %430 = arith.addf %427, %429 : vector<16x128xf32>
    %c0_162 = arith.constant 0 : index
    %c0_163 = arith.constant 0 : index
    %431 = vector.load %arg17[%c0_162, %c0_163] : memref<16x32xf32, #tpu.memory_space<vmem>>, vector<16x32xf32>
    %432 = vector.extract_strided_slice %430 {offsets = [0, 0], sizes = [16, 32], strides = [1, 1]} : vector<16x128xf32> to vector<16x32xf32>
    %433 = arith.negf %432 : vector<16x32xf32>
    %434 = math.exp %433 : vector<16x32xf32>
    %cst_164 = arith.constant 1.000000e+00 : f32
    %435 = vector.broadcast %cst_164 : f32 to vector<16x32xf32>
    %436 = arith.addf %435, %434 : vector<16x32xf32>
    %437 = arith.divf %435, %436 : vector<16x32xf32>
    %438 = vector.extract_strided_slice %430 {offsets = [0, 32], sizes = [16, 32], strides = [1, 1]} : vector<16x128xf32> to vector<16x32xf32>
    %439 = arith.negf %438 : vector<16x32xf32>
    %440 = math.exp %439 : vector<16x32xf32>
    %cst_165 = arith.constant 1.000000e+00 : f32
    %441 = vector.broadcast %cst_165 : f32 to vector<16x32xf32>
    %442 = arith.addf %441, %440 : vector<16x32xf32>
    %443 = arith.divf %441, %442 : vector<16x32xf32>
    %444 = vector.extract_strided_slice %430 {offsets = [0, 64], sizes = [16, 32], strides = [1, 1]} : vector<16x128xf32> to vector<16x32xf32>
    %445 = math.tanh %444 : vector<16x32xf32>
    %446 = vector.extract_strided_slice %430 {offsets = [0, 96], sizes = [16, 32], strides = [1, 1]} : vector<16x128xf32> to vector<16x32xf32>
    %447 = arith.negf %446 : vector<16x32xf32>
    %448 = math.exp %447 : vector<16x32xf32>
    %cst_166 = arith.constant 1.000000e+00 : f32
    %449 = vector.broadcast %cst_166 : f32 to vector<16x32xf32>
    %450 = arith.addf %449, %448 : vector<16x32xf32>
    %451 = arith.divf %449, %450 : vector<16x32xf32>
    %452 = arith.mulf %443, %431 : vector<16x32xf32>
    %453 = arith.mulf %437, %445 : vector<16x32xf32>
    %454 = arith.addf %452, %453 : vector<16x32xf32>
    %455 = math.tanh %454 : vector<16x32xf32>
    %456 = arith.mulf %451, %455 : vector<16x32xf32>
    %457 = vector.broadcast %378 : i32 to vector<16x1xi32>
    %458 = arith.cmpi slt, %457, %19 : vector<16x1xi32>
    %459 = vector.shape_cast %458 : vector<16x1xi1> to vector<16x1xi1>
    %460 = vector.broadcast %459 : vector<16x1xi1> to vector<16x32xi1>
    %461 = arith.select %460, %456, %425 : vector<16x32xi1>, vector<16x32xf32>
    %462 = vector.shape_cast %458 : vector<16x1xi1> to vector<16x1xi1>
    %463 = vector.broadcast %462 : vector<16x1xi1> to vector<16x32xi1>
    %464 = arith.select %463, %454, %431 : vector<16x32xi1>, vector<16x32xf32>
    %c0_167 = arith.constant 0 : index
    %c0_168 = arith.constant 0 : index
    %465 = vector.load %arg16[%c0_167, %c0_168] : memref<16x32xf32, #tpu.memory_space<vmem>>, vector<16x32xf32>
    tpu.vector_store %arg16[%c0_167, %c0_168], %461 {strides = array<i32>} : memref<16x32xf32, #tpu.memory_space<vmem>>, vector<16x32xf32>,
    %c0_169 = arith.constant 0 : index
    %c0_170 = arith.constant 0 : index
    %466 = vector.load %arg17[%c0_169, %c0_170] : memref<16x32xf32, #tpu.memory_space<vmem>>, vector<16x32xf32>
    tpu.vector_store %arg17[%c0_169, %c0_170], %464 {strides = array<i32>} : memref<16x32xf32, #tpu.memory_space<vmem>>, vector<16x32xf32>,
    %c5_i32 = arith.constant 5 : i32
    %c7_i32_171 = arith.constant 7 : i32
    %467 = arith.subi %c7_i32_171, %c5_i32 : i32
    %c16_i32_172 = arith.constant 16 : i32
    %468 = arith.muli %c5_i32, %c16_i32_172 : i32
    %469 = tpu.assume_multiple %468, 16 : i32
    %c0_173 = arith.constant 0 : index
    %c0_174 = arith.constant 0 : index
    %470 = vector.load %arg14[%c0_173, %c0_174] : memref<16x32xf32, #tpu.memory_space<vmem>>, vector<16x32xf32>
    %471 = arith.index_cast %469 : i32 to index
    %c0_175 = arith.constant 0 : index
    %472 = vector.load %arg12[%471, %c0_175] : memref<128x128xf32, #tpu.memory_space<vmem>>, vector<16x128xf32>
    %473 = arith.truncf %470 : vector<16x32xf32> to vector<16x32xbf16>
    %cst_176 = arith.constant dense<0.000000e+00> : vector<16x128xf32>
    %474 = tpu.matmul %473, %20, %cst_176 {dimension_numbers = #tpu.dot_dimension_numbers<[1], [0], [0], [1], [0, 0, 1, 1], [], []>} : vector<16x32xbf16>, vector<32x128xbf16>, vector<16x128xf32> -> vector<16x128xf32>
    %475 = arith.addf %472, %474 : vector<16x128xf32>
    %c0_177 = arith.constant 0 : index
    %c0_178 = arith.constant 0 : index
    %476 = vector.load %arg15[%c0_177, %c0_178] : memref<16x32xf32, #tpu.memory_space<vmem>>, vector<16x32xf32>
    %477 = vector.extract_strided_slice %475 {offsets = [0, 0], sizes = [16, 32], strides = [1, 1]} : vector<16x128xf32> to vector<16x32xf32>
    %478 = arith.negf %477 : vector<16x32xf32>
    %479 = math.exp %478 : vector<16x32xf32>
    %cst_179 = arith.constant 1.000000e+00 : f32
    %480 = vector.broadcast %cst_179 : f32 to vector<16x32xf32>
    %481 = arith.addf %480, %479 : vector<16x32xf32>
    %482 = arith.divf %480, %481 : vector<16x32xf32>
    %483 = vector.extract_strided_slice %475 {offsets = [0, 32], sizes = [16, 32], strides = [1, 1]} : vector<16x128xf32> to vector<16x32xf32>
    %484 = arith.negf %483 : vector<16x32xf32>
    %485 = math.exp %484 : vector<16x32xf32>
    %cst_180 = arith.constant 1.000000e+00 : f32
    %486 = vector.broadcast %cst_180 : f32 to vector<16x32xf32>
    %487 = arith.addf %486, %485 : vector<16x32xf32>
    %488 = arith.divf %486, %487 : vector<16x32xf32>
    %489 = vector.extract_strided_slice %475 {offsets = [0, 64], sizes = [16, 32], strides = [1, 1]} : vector<16x128xf32> to vector<16x32xf32>
    %490 = math.tanh %489 : vector<16x32xf32>
    %491 = vector.extract_strided_slice %475 {offsets = [0, 96], sizes = [16, 32], strides = [1, 1]} : vector<16x128xf32> to vector<16x32xf32>
    %492 = arith.negf %491 : vector<16x32xf32>
    %493 = math.exp %492 : vector<16x32xf32>
    %cst_181 = arith.constant 1.000000e+00 : f32
    %494 = vector.broadcast %cst_181 : f32 to vector<16x32xf32>
    %495 = arith.addf %494, %493 : vector<16x32xf32>
    %496 = arith.divf %494, %495 : vector<16x32xf32>
    %497 = arith.mulf %488, %476 : vector<16x32xf32>
    %498 = arith.mulf %482, %490 : vector<16x32xf32>
    %499 = arith.addf %497, %498 : vector<16x32xf32>
    %500 = math.tanh %499 : vector<16x32xf32>
    %501 = arith.mulf %496, %500 : vector<16x32xf32>
    %502 = vector.broadcast %c5_i32 : i32 to vector<16x1xi32>
    %503 = arith.cmpi slt, %502, %19 : vector<16x1xi32>
    %504 = vector.shape_cast %503 : vector<16x1xi1> to vector<16x1xi1>
    %505 = vector.broadcast %504 : vector<16x1xi1> to vector<16x32xi1>
    %506 = arith.select %505, %501, %470 : vector<16x32xi1>, vector<16x32xf32>
    %507 = vector.shape_cast %503 : vector<16x1xi1> to vector<16x1xi1>
    %508 = vector.broadcast %507 : vector<16x1xi1> to vector<16x32xi1>
    %509 = arith.select %508, %499, %476 : vector<16x32xi1>, vector<16x32xf32>
    %c0_182 = arith.constant 0 : index
    %c0_183 = arith.constant 0 : index
    %510 = vector.load %arg14[%c0_182, %c0_183] : memref<16x32xf32, #tpu.memory_space<vmem>>, vector<16x32xf32>
    tpu.vector_store %arg14[%c0_182, %c0_183], %506 {strides = array<i32>} : memref<16x32xf32, #tpu.memory_space<vmem>>, vector<16x32xf32>,
    %c0_184 = arith.constant 0 : index
    %c0_185 = arith.constant 0 : index
    %511 = vector.load %arg15[%c0_184, %c0_185] : memref<16x32xf32, #tpu.memory_space<vmem>>, vector<16x32xf32>
    tpu.vector_store %arg15[%c0_184, %c0_185], %509 {strides = array<i32>} : memref<16x32xf32, #tpu.memory_space<vmem>>, vector<16x32xf32>,
    %c16_i32_186 = arith.constant 16 : i32
    %512 = arith.muli %467, %c16_i32_186 : i32
    %513 = tpu.assume_multiple %512, 16 : i32
    %c0_187 = arith.constant 0 : index
    %c0_188 = arith.constant 0 : index
    %514 = vector.load %arg16[%c0_187, %c0_188] : memref<16x32xf32, #tpu.memory_space<vmem>>, vector<16x32xf32>
    %515 = arith.index_cast %513 : i32 to index
    %c0_189 = arith.constant 0 : index
    %516 = vector.load %arg13[%515, %c0_189] : memref<128x128xf32, #tpu.memory_space<vmem>>, vector<16x128xf32>
    %517 = arith.truncf %514 : vector<16x32xf32> to vector<16x32xbf16>
    %cst_190 = arith.constant dense<0.000000e+00> : vector<16x128xf32>
    %518 = tpu.matmul %517, %21, %cst_190 {dimension_numbers = #tpu.dot_dimension_numbers<[1], [0], [0], [1], [0, 0, 1, 1], [], []>} : vector<16x32xbf16>, vector<32x128xbf16>, vector<16x128xf32> -> vector<16x128xf32>
    %519 = arith.addf %516, %518 : vector<16x128xf32>
    %c0_191 = arith.constant 0 : index
    %c0_192 = arith.constant 0 : index
    %520 = vector.load %arg17[%c0_191, %c0_192] : memref<16x32xf32, #tpu.memory_space<vmem>>, vector<16x32xf32>
    %521 = vector.extract_strided_slice %519 {offsets = [0, 0], sizes = [16, 32], strides = [1, 1]} : vector<16x128xf32> to vector<16x32xf32>
    %522 = arith.negf %521 : vector<16x32xf32>
    %523 = math.exp %522 : vector<16x32xf32>
    %cst_193 = arith.constant 1.000000e+00 : f32
    %524 = vector.broadcast %cst_193 : f32 to vector<16x32xf32>
    %525 = arith.addf %524, %523 : vector<16x32xf32>
    %526 = arith.divf %524, %525 : vector<16x32xf32>
    %527 = vector.extract_strided_slice %519 {offsets = [0, 32], sizes = [16, 32], strides = [1, 1]} : vector<16x128xf32> to vector<16x32xf32>
    %528 = arith.negf %527 : vector<16x32xf32>
    %529 = math.exp %528 : vector<16x32xf32>
    %cst_194 = arith.constant 1.000000e+00 : f32
    %530 = vector.broadcast %cst_194 : f32 to vector<16x32xf32>
    %531 = arith.addf %530, %529 : vector<16x32xf32>
    %532 = arith.divf %530, %531 : vector<16x32xf32>
    %533 = vector.extract_strided_slice %519 {offsets = [0, 64], sizes = [16, 32], strides = [1, 1]} : vector<16x128xf32> to vector<16x32xf32>
    %534 = math.tanh %533 : vector<16x32xf32>
    %535 = vector.extract_strided_slice %519 {offsets = [0, 96], sizes = [16, 32], strides = [1, 1]} : vector<16x128xf32> to vector<16x32xf32>
    %536 = arith.negf %535 : vector<16x32xf32>
    %537 = math.exp %536 : vector<16x32xf32>
    %cst_195 = arith.constant 1.000000e+00 : f32
    %538 = vector.broadcast %cst_195 : f32 to vector<16x32xf32>
    %539 = arith.addf %538, %537 : vector<16x32xf32>
    %540 = arith.divf %538, %539 : vector<16x32xf32>
    %541 = arith.mulf %532, %520 : vector<16x32xf32>
    %542 = arith.mulf %526, %534 : vector<16x32xf32>
    %543 = arith.addf %541, %542 : vector<16x32xf32>
    %544 = math.tanh %543 : vector<16x32xf32>
    %545 = arith.mulf %540, %544 : vector<16x32xf32>
    %546 = vector.broadcast %467 : i32 to vector<16x1xi32>
    %547 = arith.cmpi slt, %546, %19 : vector<16x1xi32>
    %548 = vector.shape_cast %547 : vector<16x1xi1> to vector<16x1xi1>
    %549 = vector.broadcast %548 : vector<16x1xi1> to vector<16x32xi1>
    %550 = arith.select %549, %545, %514 : vector<16x32xi1>, vector<16x32xf32>
    %551 = vector.shape_cast %547 : vector<16x1xi1> to vector<16x1xi1>
    %552 = vector.broadcast %551 : vector<16x1xi1> to vector<16x32xi1>
    %553 = arith.select %552, %543, %520 : vector<16x32xi1>, vector<16x32xf32>
    %c0_196 = arith.constant 0 : index
    %c0_197 = arith.constant 0 : index
    %554 = vector.load %arg16[%c0_196, %c0_197] : memref<16x32xf32, #tpu.memory_space<vmem>>, vector<16x32xf32>
    tpu.vector_store %arg16[%c0_196, %c0_197], %550 {strides = array<i32>} : memref<16x32xf32, #tpu.memory_space<vmem>>, vector<16x32xf32>,
    %c0_198 = arith.constant 0 : index
    %c0_199 = arith.constant 0 : index
    %555 = vector.load %arg17[%c0_198, %c0_199] : memref<16x32xf32, #tpu.memory_space<vmem>>, vector<16x32xf32>
    tpu.vector_store %arg17[%c0_198, %c0_199], %553 {strides = array<i32>} : memref<16x32xf32, #tpu.memory_space<vmem>>, vector<16x32xf32>,
    %c6_i32 = arith.constant 6 : i32
    %c7_i32_200 = arith.constant 7 : i32
    %556 = arith.subi %c7_i32_200, %c6_i32 : i32
    %c16_i32_201 = arith.constant 16 : i32
    %557 = arith.muli %c6_i32, %c16_i32_201 : i32
    %558 = tpu.assume_multiple %557, 16 : i32
    %c0_202 = arith.constant 0 : index
    %c0_203 = arith.constant 0 : index
    %559 = vector.load %arg14[%c0_202, %c0_203] : memref<16x32xf32, #tpu.memory_space<vmem>>, vector<16x32xf32>
    %560 = arith.index_cast %558 : i32 to index
    %c0_204 = arith.constant 0 : index
    %561 = vector.load %arg12[%560, %c0_204] : memref<128x128xf32, #tpu.memory_space<vmem>>, vector<16x128xf32>
    %562 = arith.truncf %559 : vector<16x32xf32> to vector<16x32xbf16>
    %cst_205 = arith.constant dense<0.000000e+00> : vector<16x128xf32>
    %563 = tpu.matmul %562, %20, %cst_205 {dimension_numbers = #tpu.dot_dimension_numbers<[1], [0], [0], [1], [0, 0, 1, 1], [], []>} : vector<16x32xbf16>, vector<32x128xbf16>, vector<16x128xf32> -> vector<16x128xf32>
    %564 = arith.addf %561, %563 : vector<16x128xf32>
    %c0_206 = arith.constant 0 : index
    %c0_207 = arith.constant 0 : index
    %565 = vector.load %arg15[%c0_206, %c0_207] : memref<16x32xf32, #tpu.memory_space<vmem>>, vector<16x32xf32>
    %566 = vector.extract_strided_slice %564 {offsets = [0, 0], sizes = [16, 32], strides = [1, 1]} : vector<16x128xf32> to vector<16x32xf32>
    %567 = arith.negf %566 : vector<16x32xf32>
    %568 = math.exp %567 : vector<16x32xf32>
    %cst_208 = arith.constant 1.000000e+00 : f32
    %569 = vector.broadcast %cst_208 : f32 to vector<16x32xf32>
    %570 = arith.addf %569, %568 : vector<16x32xf32>
    %571 = arith.divf %569, %570 : vector<16x32xf32>
    %572 = vector.extract_strided_slice %564 {offsets = [0, 32], sizes = [16, 32], strides = [1, 1]} : vector<16x128xf32> to vector<16x32xf32>
    %573 = arith.negf %572 : vector<16x32xf32>
    %574 = math.exp %573 : vector<16x32xf32>
    %cst_209 = arith.constant 1.000000e+00 : f32
    %575 = vector.broadcast %cst_209 : f32 to vector<16x32xf32>
    %576 = arith.addf %575, %574 : vector<16x32xf32>
    %577 = arith.divf %575, %576 : vector<16x32xf32>
    %578 = vector.extract_strided_slice %564 {offsets = [0, 64], sizes = [16, 32], strides = [1, 1]} : vector<16x128xf32> to vector<16x32xf32>
    %579 = math.tanh %578 : vector<16x32xf32>
    %580 = vector.extract_strided_slice %564 {offsets = [0, 96], sizes = [16, 32], strides = [1, 1]} : vector<16x128xf32> to vector<16x32xf32>
    %581 = arith.negf %580 : vector<16x32xf32>
    %582 = math.exp %581 : vector<16x32xf32>
    %cst_210 = arith.constant 1.000000e+00 : f32
    %583 = vector.broadcast %cst_210 : f32 to vector<16x32xf32>
    %584 = arith.addf %583, %582 : vector<16x32xf32>
    %585 = arith.divf %583, %584 : vector<16x32xf32>
    %586 = arith.mulf %577, %565 : vector<16x32xf32>
    %587 = arith.mulf %571, %579 : vector<16x32xf32>
    %588 = arith.addf %586, %587 : vector<16x32xf32>
    %589 = math.tanh %588 : vector<16x32xf32>
    %590 = arith.mulf %585, %589 : vector<16x32xf32>
    %591 = vector.broadcast %c6_i32 : i32 to vector<16x1xi32>
    %592 = arith.cmpi slt, %591, %19 : vector<16x1xi32>
    %593 = vector.shape_cast %592 : vector<16x1xi1> to vector<16x1xi1>
    %594 = vector.broadcast %593 : vector<16x1xi1> to vector<16x32xi1>
    %595 = arith.select %594, %590, %559 : vector<16x32xi1>, vector<16x32xf32>
    %596 = vector.shape_cast %592 : vector<16x1xi1> to vector<16x1xi1>
    %597 = vector.broadcast %596 : vector<16x1xi1> to vector<16x32xi1>
    %598 = arith.select %597, %588, %565 : vector<16x32xi1>, vector<16x32xf32>
    %c0_211 = arith.constant 0 : index
    %c0_212 = arith.constant 0 : index
    %599 = vector.load %arg14[%c0_211, %c0_212] : memref<16x32xf32, #tpu.memory_space<vmem>>, vector<16x32xf32>
    tpu.vector_store %arg14[%c0_211, %c0_212], %595 {strides = array<i32>} : memref<16x32xf32, #tpu.memory_space<vmem>>, vector<16x32xf32>,
    %c0_213 = arith.constant 0 : index
    %c0_214 = arith.constant 0 : index
    %600 = vector.load %arg15[%c0_213, %c0_214] : memref<16x32xf32, #tpu.memory_space<vmem>>, vector<16x32xf32>
    tpu.vector_store %arg15[%c0_213, %c0_214], %598 {strides = array<i32>} : memref<16x32xf32, #tpu.memory_space<vmem>>, vector<16x32xf32>,
    %c16_i32_215 = arith.constant 16 : i32
    %601 = arith.muli %556, %c16_i32_215 : i32
    %602 = tpu.assume_multiple %601, 16 : i32
    %c0_216 = arith.constant 0 : index
    %c0_217 = arith.constant 0 : index
    %603 = vector.load %arg16[%c0_216, %c0_217] : memref<16x32xf32, #tpu.memory_space<vmem>>, vector<16x32xf32>
    %604 = arith.index_cast %602 : i32 to index
    %c0_218 = arith.constant 0 : index
    %605 = vector.load %arg13[%604, %c0_218] : memref<128x128xf32, #tpu.memory_space<vmem>>, vector<16x128xf32>
    %606 = arith.truncf %603 : vector<16x32xf32> to vector<16x32xbf16>
    %cst_219 = arith.constant dense<0.000000e+00> : vector<16x128xf32>
    %607 = tpu.matmul %606, %21, %cst_219 {dimension_numbers = #tpu.dot_dimension_numbers<[1], [0], [0], [1], [0, 0, 1, 1], [], []>} : vector<16x32xbf16>, vector<32x128xbf16>, vector<16x128xf32> -> vector<16x128xf32>
    %608 = arith.addf %605, %607 : vector<16x128xf32>
    %c0_220 = arith.constant 0 : index
    %c0_221 = arith.constant 0 : index
    %609 = vector.load %arg17[%c0_220, %c0_221] : memref<16x32xf32, #tpu.memory_space<vmem>>, vector<16x32xf32>
    %610 = vector.extract_strided_slice %608 {offsets = [0, 0], sizes = [16, 32], strides = [1, 1]} : vector<16x128xf32> to vector<16x32xf32>
    %611 = arith.negf %610 : vector<16x32xf32>
    %612 = math.exp %611 : vector<16x32xf32>
    %cst_222 = arith.constant 1.000000e+00 : f32
    %613 = vector.broadcast %cst_222 : f32 to vector<16x32xf32>
    %614 = arith.addf %613, %612 : vector<16x32xf32>
    %615 = arith.divf %613, %614 : vector<16x32xf32>
    %616 = vector.extract_strided_slice %608 {offsets = [0, 32], sizes = [16, 32], strides = [1, 1]} : vector<16x128xf32> to vector<16x32xf32>
    %617 = arith.negf %616 : vector<16x32xf32>
    %618 = math.exp %617 : vector<16x32xf32>
    %cst_223 = arith.constant 1.000000e+00 : f32
    %619 = vector.broadcast %cst_223 : f32 to vector<16x32xf32>
    %620 = arith.addf %619, %618 : vector<16x32xf32>
    %621 = arith.divf %619, %620 : vector<16x32xf32>
    %622 = vector.extract_strided_slice %608 {offsets = [0, 64], sizes = [16, 32], strides = [1, 1]} : vector<16x128xf32> to vector<16x32xf32>
    %623 = math.tanh %622 : vector<16x32xf32>
    %624 = vector.extract_strided_slice %608 {offsets = [0, 96], sizes = [16, 32], strides = [1, 1]} : vector<16x128xf32> to vector<16x32xf32>
    %625 = arith.negf %624 : vector<16x32xf32>
    %626 = math.exp %625 : vector<16x32xf32>
    %cst_224 = arith.constant 1.000000e+00 : f32
    %627 = vector.broadcast %cst_224 : f32 to vector<16x32xf32>
    %628 = arith.addf %627, %626 : vector<16x32xf32>
    %629 = arith.divf %627, %628 : vector<16x32xf32>
    %630 = arith.mulf %621, %609 : vector<16x32xf32>
    %631 = arith.mulf %615, %623 : vector<16x32xf32>
    %632 = arith.addf %630, %631 : vector<16x32xf32>
    %633 = math.tanh %632 : vector<16x32xf32>
    %634 = arith.mulf %629, %633 : vector<16x32xf32>
    %635 = vector.broadcast %556 : i32 to vector<16x1xi32>
    %636 = arith.cmpi slt, %635, %19 : vector<16x1xi32>
    %637 = vector.shape_cast %636 : vector<16x1xi1> to vector<16x1xi1>
    %638 = vector.broadcast %637 : vector<16x1xi1> to vector<16x32xi1>
    %639 = arith.select %638, %634, %603 : vector<16x32xi1>, vector<16x32xf32>
    %640 = vector.shape_cast %636 : vector<16x1xi1> to vector<16x1xi1>
    %641 = vector.broadcast %640 : vector<16x1xi1> to vector<16x32xi1>
    %642 = arith.select %641, %632, %609 : vector<16x32xi1>, vector<16x32xf32>
    %c0_225 = arith.constant 0 : index
    %c0_226 = arith.constant 0 : index
    %643 = vector.load %arg16[%c0_225, %c0_226] : memref<16x32xf32, #tpu.memory_space<vmem>>, vector<16x32xf32>
    tpu.vector_store %arg16[%c0_225, %c0_226], %639 {strides = array<i32>} : memref<16x32xf32, #tpu.memory_space<vmem>>, vector<16x32xf32>,
    %c0_227 = arith.constant 0 : index
    %c0_228 = arith.constant 0 : index
    %644 = vector.load %arg17[%c0_227, %c0_228] : memref<16x32xf32, #tpu.memory_space<vmem>>, vector<16x32xf32>
    tpu.vector_store %arg17[%c0_227, %c0_228], %642 {strides = array<i32>} : memref<16x32xf32, #tpu.memory_space<vmem>>, vector<16x32xf32>,
    %c7_i32_229 = arith.constant 7 : i32
    %c7_i32_230 = arith.constant 7 : i32
    %645 = arith.subi %c7_i32_230, %c7_i32_229 : i32
    %c16_i32_231 = arith.constant 16 : i32
    %646 = arith.muli %c7_i32_229, %c16_i32_231 : i32
    %647 = tpu.assume_multiple %646, 16 : i32
    %c0_232 = arith.constant 0 : index
    %c0_233 = arith.constant 0 : index
    %648 = vector.load %arg14[%c0_232, %c0_233] : memref<16x32xf32, #tpu.memory_space<vmem>>, vector<16x32xf32>
    %649 = arith.index_cast %647 : i32 to index
    %c0_234 = arith.constant 0 : index
    %650 = vector.load %arg12[%649, %c0_234] : memref<128x128xf32, #tpu.memory_space<vmem>>, vector<16x128xf32>
    %651 = arith.truncf %648 : vector<16x32xf32> to vector<16x32xbf16>
    %cst_235 = arith.constant dense<0.000000e+00> : vector<16x128xf32>
    %652 = tpu.matmul %651, %20, %cst_235 {dimension_numbers = #tpu.dot_dimension_numbers<[1], [0], [0], [1], [0, 0, 1, 1], [], []>} : vector<16x32xbf16>, vector<32x128xbf16>, vector<16x128xf32> -> vector<16x128xf32>
    %653 = arith.addf %650, %652 : vector<16x128xf32>
    %c0_236 = arith.constant 0 : index
    %c0_237 = arith.constant 0 : index
    %654 = vector.load %arg15[%c0_236, %c0_237] : memref<16x32xf32, #tpu.memory_space<vmem>>, vector<16x32xf32>
    %655 = vector.extract_strided_slice %653 {offsets = [0, 0], sizes = [16, 32], strides = [1, 1]} : vector<16x128xf32> to vector<16x32xf32>
    %656 = arith.negf %655 : vector<16x32xf32>
    %657 = math.exp %656 : vector<16x32xf32>
    %cst_238 = arith.constant 1.000000e+00 : f32
    %658 = vector.broadcast %cst_238 : f32 to vector<16x32xf32>
    %659 = arith.addf %658, %657 : vector<16x32xf32>
    %660 = arith.divf %658, %659 : vector<16x32xf32>
    %661 = vector.extract_strided_slice %653 {offsets = [0, 32], sizes = [16, 32], strides = [1, 1]} : vector<16x128xf32> to vector<16x32xf32>
    %662 = arith.negf %661 : vector<16x32xf32>
    %663 = math.exp %662 : vector<16x32xf32>
    %cst_239 = arith.constant 1.000000e+00 : f32
    %664 = vector.broadcast %cst_239 : f32 to vector<16x32xf32>
    %665 = arith.addf %664, %663 : vector<16x32xf32>
    %666 = arith.divf %664, %665 : vector<16x32xf32>
    %667 = vector.extract_strided_slice %653 {offsets = [0, 64], sizes = [16, 32], strides = [1, 1]} : vector<16x128xf32> to vector<16x32xf32>
    %668 = math.tanh %667 : vector<16x32xf32>
    %669 = vector.extract_strided_slice %653 {offsets = [0, 96], sizes = [16, 32], strides = [1, 1]} : vector<16x128xf32> to vector<16x32xf32>
    %670 = arith.negf %669 : vector<16x32xf32>
    %671 = math.exp %670 : vector<16x32xf32>
    %cst_240 = arith.constant 1.000000e+00 : f32
    %672 = vector.broadcast %cst_240 : f32 to vector<16x32xf32>
    %673 = arith.addf %672, %671 : vector<16x32xf32>
    %674 = arith.divf %672, %673 : vector<16x32xf32>
    %675 = arith.mulf %666, %654 : vector<16x32xf32>
    %676 = arith.mulf %660, %668 : vector<16x32xf32>
    %677 = arith.addf %675, %676 : vector<16x32xf32>
    %678 = math.tanh %677 : vector<16x32xf32>
    %679 = arith.mulf %674, %678 : vector<16x32xf32>
    %680 = vector.broadcast %c7_i32_229 : i32 to vector<16x1xi32>
    %681 = arith.cmpi slt, %680, %19 : vector<16x1xi32>
    %682 = vector.shape_cast %681 : vector<16x1xi1> to vector<16x1xi1>
    %683 = vector.broadcast %682 : vector<16x1xi1> to vector<16x32xi1>
    %684 = arith.select %683, %679, %648 : vector<16x32xi1>, vector<16x32xf32>
    %685 = vector.shape_cast %681 : vector<16x1xi1> to vector<16x1xi1>
    %686 = vector.broadcast %685 : vector<16x1xi1> to vector<16x32xi1>
    %687 = arith.select %686, %677, %654 : vector<16x32xi1>, vector<16x32xf32>
    %c0_241 = arith.constant 0 : index
    %c0_242 = arith.constant 0 : index
    %688 = vector.load %arg14[%c0_241, %c0_242] : memref<16x32xf32, #tpu.memory_space<vmem>>, vector<16x32xf32>
    tpu.vector_store %arg14[%c0_241, %c0_242], %684 {strides = array<i32>} : memref<16x32xf32, #tpu.memory_space<vmem>>, vector<16x32xf32>,
    %c0_243 = arith.constant 0 : index
    %c0_244 = arith.constant 0 : index
    %689 = vector.load %arg15[%c0_243, %c0_244] : memref<16x32xf32, #tpu.memory_space<vmem>>, vector<16x32xf32>
    tpu.vector_store %arg15[%c0_243, %c0_244], %687 {strides = array<i32>} : memref<16x32xf32, #tpu.memory_space<vmem>>, vector<16x32xf32>,
    %c16_i32_245 = arith.constant 16 : i32
    %690 = arith.muli %645, %c16_i32_245 : i32
    %691 = tpu.assume_multiple %690, 16 : i32
    %c0_246 = arith.constant 0 : index
    %c0_247 = arith.constant 0 : index
    %692 = vector.load %arg16[%c0_246, %c0_247] : memref<16x32xf32, #tpu.memory_space<vmem>>, vector<16x32xf32>
    %693 = arith.index_cast %691 : i32 to index
    %c0_248 = arith.constant 0 : index
    %694 = vector.load %arg13[%693, %c0_248] : memref<128x128xf32, #tpu.memory_space<vmem>>, vector<16x128xf32>
    %695 = arith.truncf %692 : vector<16x32xf32> to vector<16x32xbf16>
    %cst_249 = arith.constant dense<0.000000e+00> : vector<16x128xf32>
    %696 = tpu.matmul %695, %21, %cst_249 {dimension_numbers = #tpu.dot_dimension_numbers<[1], [0], [0], [1], [0, 0, 1, 1], [], []>} : vector<16x32xbf16>, vector<32x128xbf16>, vector<16x128xf32> -> vector<16x128xf32>
    %697 = arith.addf %694, %696 : vector<16x128xf32>
    %c0_250 = arith.constant 0 : index
    %c0_251 = arith.constant 0 : index
    %698 = vector.load %arg17[%c0_250, %c0_251] : memref<16x32xf32, #tpu.memory_space<vmem>>, vector<16x32xf32>
    %699 = vector.extract_strided_slice %697 {offsets = [0, 0], sizes = [16, 32], strides = [1, 1]} : vector<16x128xf32> to vector<16x32xf32>
    %700 = arith.negf %699 : vector<16x32xf32>
    %701 = math.exp %700 : vector<16x32xf32>
    %cst_252 = arith.constant 1.000000e+00 : f32
    %702 = vector.broadcast %cst_252 : f32 to vector<16x32xf32>
    %703 = arith.addf %702, %701 : vector<16x32xf32>
    %704 = arith.divf %702, %703 : vector<16x32xf32>
    %705 = vector.extract_strided_slice %697 {offsets = [0, 32], sizes = [16, 32], strides = [1, 1]} : vector<16x128xf32> to vector<16x32xf32>
    %706 = arith.negf %705 : vector<16x32xf32>
    %707 = math.exp %706 : vector<16x32xf32>
    %cst_253 = arith.constant 1.000000e+00 : f32
    %708 = vector.broadcast %cst_253 : f32 to vector<16x32xf32>
    %709 = arith.addf %708, %707 : vector<16x32xf32>
    %710 = arith.divf %708, %709 : vector<16x32xf32>
    %711 = vector.extract_strided_slice %697 {offsets = [0, 64], sizes = [16, 32], strides = [1, 1]} : vector<16x128xf32> to vector<16x32xf32>
    %712 = math.tanh %711 : vector<16x32xf32>
    %713 = vector.extract_strided_slice %697 {offsets = [0, 96], sizes = [16, 32], strides = [1, 1]} : vector<16x128xf32> to vector<16x32xf32>
    %714 = arith.negf %713 : vector<16x32xf32>
    %715 = math.exp %714 : vector<16x32xf32>
    %cst_254 = arith.constant 1.000000e+00 : f32
    %716 = vector.broadcast %cst_254 : f32 to vector<16x32xf32>
    %717 = arith.addf %716, %715 : vector<16x32xf32>
    %718 = arith.divf %716, %717 : vector<16x32xf32>
    %719 = arith.mulf %710, %698 : vector<16x32xf32>
    %720 = arith.mulf %704, %712 : vector<16x32xf32>
    %721 = arith.addf %719, %720 : vector<16x32xf32>
    %722 = math.tanh %721 : vector<16x32xf32>
    %723 = arith.mulf %718, %722 : vector<16x32xf32>
    %724 = vector.broadcast %645 : i32 to vector<16x1xi32>
    %725 = arith.cmpi slt, %724, %19 : vector<16x1xi32>
    %726 = vector.shape_cast %725 : vector<16x1xi1> to vector<16x1xi1>
    %727 = vector.broadcast %726 : vector<16x1xi1> to vector<16x32xi1>
    %728 = arith.select %727, %723, %692 : vector<16x32xi1>, vector<16x32xf32>
    %729 = vector.shape_cast %725 : vector<16x1xi1> to vector<16x1xi1>
    %730 = vector.broadcast %729 : vector<16x1xi1> to vector<16x32xi1>
    %731 = arith.select %730, %721, %698 : vector<16x32xi1>, vector<16x32xf32>
    %c0_255 = arith.constant 0 : index
    %c0_256 = arith.constant 0 : index
    %732 = vector.load %arg16[%c0_255, %c0_256] : memref<16x32xf32, #tpu.memory_space<vmem>>, vector<16x32xf32>
    tpu.vector_store %arg16[%c0_255, %c0_256], %728 {strides = array<i32>} : memref<16x32xf32, #tpu.memory_space<vmem>>, vector<16x32xf32>,
    %c0_257 = arith.constant 0 : index
    %c0_258 = arith.constant 0 : index
    %733 = vector.load %arg17[%c0_257, %c0_258] : memref<16x32xf32, #tpu.memory_space<vmem>>, vector<16x32xf32>
    tpu.vector_store %arg17[%c0_257, %c0_258], %731 {strides = array<i32>} : memref<16x32xf32, #tpu.memory_space<vmem>>, vector<16x32xf32>,
    %c8_i32 = arith.constant 8 : i32
    %c0_259 = arith.constant 0 : index
    %c0_260 = arith.constant 0 : index
    %734 = vector.load %arg14[%c0_259, %c0_260] : memref<16x32xf32, #tpu.memory_space<vmem>>, vector<16x32xf32>
    %735 = arith.truncf %734 : vector<16x32xf32> to vector<16x32xbf16>
    %c0_261 = arith.constant 0 : index
    %c0_262 = arith.constant 0 : index
    %736 = vector.load %arg16[%c0_261, %c0_262] : memref<16x32xf32, #tpu.memory_space<vmem>>, vector<16x32xf32>
    %737 = arith.truncf %736 : vector<16x32xf32> to vector<16x32xbf16>
    %c0_263 = arith.constant 0 : index
    %c0_264 = arith.constant 0 : index
    %738 = vector.load %arg7[%c0_263, %c0_264] : memref<64x128xbf16, #tpu.memory_space<vmem>>, vector<32x128xbf16>
    %cst_265 = arith.constant dense<0.000000e+00> : vector<16x128xf32>
    %739 = tpu.matmul %735, %738, %cst_265 {dimension_numbers = #tpu.dot_dimension_numbers<[1], [0], [0], [1], [0, 0, 1, 1], [], []>} : vector<16x32xbf16>, vector<32x128xbf16>, vector<16x128xf32> -> vector<16x128xf32>
    %c32 = arith.constant 32 : index
    %c0_266 = arith.constant 0 : index
    %740 = vector.load %arg7[%c32, %c0_266] : memref<64x128xbf16, #tpu.memory_space<vmem>>, vector<32x128xbf16>
    %cst_267 = arith.constant dense<0.000000e+00> : vector<16x128xf32>
    %741 = tpu.matmul %737, %740, %cst_267 {dimension_numbers = #tpu.dot_dimension_numbers<[1], [0], [0], [1], [0, 0, 1, 1], [], []>} : vector<16x32xbf16>, vector<32x128xbf16>, vector<16x128xf32> -> vector<16x128xf32>
    %742 = arith.addf %739, %741 : vector<16x128xf32>
    %c0_268 = arith.constant 0 : index
    %c0_269 = arith.constant 0 : index
    %743 = vector.load %arg8[%c0_268, %c0_269] : memref<1x128xf32, #tpu.memory_space<vmem>>, vector<1x128xf32>
    %744 = vector.broadcast %743 : vector<1x128xf32> to vector<16x128xf32>
    %745 = arith.addf %742, %744 : vector<16x128xf32>
    %746 = arith.truncf %745 : vector<16x128xf32> to vector<16x128xbf16>
    %c0_270 = arith.constant 0 : index
    %c0_271 = arith.constant 0 : index
    %747 = vector.load %arg9[%c0_270, %c0_271] : memref<128x4xbf16, #tpu.memory_space<vmem>>, vector<128x4xbf16>
    %cst_272 = arith.constant dense<0.000000e+00> : vector<16x4xf32>
    %748 = tpu.matmul %746, %747, %cst_272 {dimension_numbers = #tpu.dot_dimension_numbers<[1], [0], [0], [1], [0, 0, 1, 1], [], []>} : vector<16x128xbf16>, vector<128x4xbf16>, vector<16x4xf32> -> vector<16x4xf32>
    %c0_273 = arith.constant 0 : index
    %c0_274 = arith.constant 0 : index
    %749 = vector.load %arg10[%c0_273, %c0_274] : memref<1x4xf32, #tpu.memory_space<vmem>>, vector<1x4xf32>
    %750 = vector.broadcast %749 : vector<1x4xf32> to vector<16x4xf32>
    %751 = arith.addf %748, %750 : vector<16x4xf32>
    %c0_275 = arith.constant 0 : index
    %c0_276 = arith.constant 0 : index
    %752 = vector.load %arg11[%c0_275, %c0_276] : memref<16x4xf32, #tpu.memory_space<vmem>>, vector<16x4xf32>
    tpu.vector_store %arg11[%c0_275, %c0_276], %751 {strides = array<i32>} : memref<16x4xf32, #tpu.memory_space<vmem>>, vector<16x4xf32>,
    return
  }
  func.func @transform_0(%arg0: i32) -> (i32, i32, i32) {
    %c0_i32 = arith.constant 0 : i32
    %c0_i32_0 = arith.constant 0 : i32
    %c0_i32_1 = arith.constant 0 : i32
    return %c0_i32, %arg0, %c0_i32_0 : i32, i32, i32
  }
  func.func @transform_1(%arg0: i32) -> (i32, i32) {
    %c0_i32 = arith.constant 0 : i32
    %c0_i32_0 = arith.constant 0 : i32
    %c0_i32_1 = arith.constant 0 : i32
    return %c0_i32, %c0_i32_0 : i32, i32
  }
  func.func @transform_2(%arg0: i32) -> (i32, i32) {
    %c0_i32 = arith.constant 0 : i32
    %c0_i32_0 = arith.constant 0 : i32
    %c0_i32_1 = arith.constant 0 : i32
    return %c0_i32, %c0_i32_0 : i32, i32
  }
  func.func @transform_3(%arg0: i32) -> (i32, i32) {
    %c0_i32 = arith.constant 0 : i32
    %c0_i32_0 = arith.constant 0 : i32
    %c0_i32_1 = arith.constant 0 : i32
    return %c0_i32, %c0_i32_0 : i32, i32
  }
  func.func @transform_4(%arg0: i32) -> (i32, i32) {
    %c0_i32 = arith.constant 0 : i32
    %c0_i32_0 = arith.constant 0 : i32
    %c0_i32_1 = arith.constant 0 : i32
    return %c0_i32, %c0_i32_0 : i32, i32
  }
  func.func @transform_5(%arg0: i32) -> (i32, i32) {
    %c0_i32 = arith.constant 0 : i32
    %c0_i32_0 = arith.constant 0 : i32
    return %arg0, %c0_i32 : i32, i32
  }
  func.func @transform_6(%arg0: i32) -> (i32, i32) {
    %c0_i32 = arith.constant 0 : i32
    %c0_i32_0 = arith.constant 0 : i32
    %c0_i32_1 = arith.constant 0 : i32
    return %c0_i32, %c0_i32_0 : i32, i32
  }
  func.func @transform_7(%arg0: i32) -> (i32, i32) {
    %c0_i32 = arith.constant 0 : i32
    %c0_i32_0 = arith.constant 0 : i32
    %c0_i32_1 = arith.constant 0 : i32
    return %c0_i32, %c0_i32_0 : i32, i32
  }
  func.func @transform_8(%arg0: i32) -> (i32, i32) {
    %c0_i32 = arith.constant 0 : i32
    %c0_i32_0 = arith.constant 0 : i32
    %c0_i32_1 = arith.constant 0 : i32
    return %c0_i32, %c0_i32_0 : i32, i32
  }
  func.func @transform_9(%arg0: i32) -> (i32, i32) {
    %c0_i32 = arith.constant 0 : i32
    %c0_i32_0 = arith.constant 0 : i32
    %c0_i32_1 = arith.constant 0 : i32
    return %c0_i32, %c0_i32_0 : i32, i32
  }
  func.func @transform_10(%arg0: i32) -> (i32, i32) {
    %c0_i32 = arith.constant 0 : i32
    %c0_i32_0 = arith.constant 0 : i32
    return %arg0, %c0_i32 : i32, i32
  }
}

</mosaic_0001>

<bundles_post_ra>
// kernel: s2dc_forward.2
= control target key start
LH: loop header
LB: loop body
LE: loop exit
PB: predicated region body
PF: predicated region fallthrough
CT: control target
= control target key end

     0   :  { %v5051_v0 = vmov 0.0   ;;  %v3547_v2 = vmov 0   ;;  %vm274_vm0 = vcmask 261120   ;;  %vm3548_vm1 = vmmov 0   ;;  %s3551_s30 = smov 96   ;;  %s5044_s1 = inlined_call_operand.vmem [shape: bf16[16,256], index: 1, kind: input, shape index: {}]   ;;  %s5045_s2 = inlined_call_operand.vmem [shape: bf16[32,128], index: 2, kind: input, shape index: {}]   ;;  %s5046_s0 = inlined_call_operand.vmem [shape: bf16[8,16,16], index: 0, kind: input, shape index: {}]   ;;  %s5047_s3 = inlined_call_operand.vmem [shape: bf16[32,128], index: 3, kind: input, shape index: {}]   ;;  %s5048_s4 = inlined_call_operand.vmem [shape: f32[1,256], index: 4, kind: input, shape index: {}]   ;;  %s5049_s5 = inlined_call_operand.vmem [shape: s32[16,1], index: 5, kind: input, shape index: {}]   ;;  %s5050_s6 = inlined_call_operand.vmem [shape: bf16[8,16,64], index: 6, kind: output, shape index: {}]  }
   0x1   :  { %3130 = vmatprep.subr.bf16.mxu1 %v5051_v0  ;;  %v3266_v1 = vld [vmem:[%s5044_s1 + $0x4] ss:$8 sps:$4 sm:$0xff]   ;;  %161 = vmatprep.mubr.bf16.mxu0 %v3547_v2  ;;  %275 = vst.msk [vmem:[#allocation4] sm:$0xff] %vm274_vm0, %v5051_v0  ;;  %276 = vst.msk [vmem:[#allocation4 + $0x8] sm:$0xff] %vm274_vm0, %v5051_v0  ;;  %v3269_v4 = vld [vmem:[%s5044_s1] ss:$8 sps:$4 sm:$0xff]   ;;  %v44_v22 = vlaneseq }
   0x2   :  { %v3595_v3 = vld [vmem:[%s5045_s2 + $0x8] sm:$0xff]   ;;  %3134 = vmatprep.mubr.msk.bf16.mxu1 %vm3548_vm1, %v5051_v0  ;;  %277 = vst.msk [vmem:[#allocation5] sm:$0xff] %vm274_vm0, %v5051_v0  ;;  %278 = vst.msk [vmem:[#allocation5 + $0x8] sm:$0xff] %vm274_vm0, %v5051_v0  ;;  %3264 = vset.pattern.permute.xlu0 %v3547_v2  ;;  %v3270_v5 = vld [vmem:[%s5046_s0] sm:$0xff]   ;;  %vm104_vm2 = vcmask 130048  }
   0x3   :  { %279 = vst.msk [vmem:[#allocation6] sm:$0xff] %vm274_vm0, %v5051_v0  ;;  %280 = vst.msk [vmem:[#allocation6 + $0x8] sm:$0xff] %vm274_vm0, %v5051_v0  ;;  %143 = vmatprep.subr.bf16.mxu0 %v3266_v1  ;;  %3265 = vset.pattern.permute.xlu1 %v3547_v2  ;;  %v3628_v6 = vld [vmem:[%s5045_s2] sm:$0xff]   ;;  %v3645_v10 = vld [vmem:[%s5047_s3 + $0x8] sm:$0xff]   ;;  %v45_v23 = vshrl.u32 %v44_v22, 7 }
   0x4   :  { %281 = vst.msk [vmem:[#allocation7] sm:$0xff] %vm274_vm0, %v5051_v0  ;;  %282 = vst.msk [vmem:[#allocation7 + $0x8] sm:$0xff] %vm274_vm0, %v5051_v0  ;;  %3131 = vmatpush3.bf16.msra.mxu1 %v3595_v3  ;;  %144 = vmatpush1.bf16.msra.mxu0 %v3269_v4  ;;  %v3272_v11 = vld [vmem:[%s5046_s0 + $0x8] sm:$0xff]   ;;  %v3656_v12 = vld [vmem:[%s5047_s3] sm:$0xff]  }
   0x5   :  { %3132 = vmatprep.subr.bf16.mxu1 %v5051_v0  ;;  %3194 = vmatprep.subr.bf16.mxu0 %v5051_v0  ;;  %v3273_v16 = vld [vmem:[%s5046_s0 + $0x10] sm:$0xff]   ;;  %v3274_v17 = vld [vmem:[%s5046_s0 + $0x18] sm:$0xff]   ;;  %v3275_v18 = vld [vmem:[%s5046_s0 + $0x20] sm:$0xff]   ;;  %v46_v24 = vsub.s32 0, %v45_v23  ;;  %v50_v25 = vsub.s32 1, %v45_v23 }
   0x6   :  { %v3276_v19 = vld [vmem:[%s5046_s0 + $0x28] sm:$0xff]   ;;  %v3278_v20 = vld [vmem:[%s5046_s0 + $0x30] sm:$0xff]   ;;  %v3280_v21 = vld [vmem:[%s5046_s0 + $0x38] sm:$0xff]   ;;  %s3549_s0 = smov 64  }
   0x7   :  { %2930 = vmatmul.mubr.msk.bf16.vlgmr.msra.gmra.mxu0 %vm104_vm2, %v3270_v5  ;;  %v42_v26 = vld [vmem:[%s5048_s4] sm:$0x3]  ;;  %s3550_s4 = smov 32  }
   0x8   :  { %3133 = vmatpush3.bf16.msra.mxu1 %v3628_v6  ;;  %v3633_v7 = vld [vmem:[#allocation4] sm:$0xff]  ;;  %v3635_v8 = vld [vmem:[#allocation4 + $0x8] sm:$0xff]  ;;  %171 = vmatprep.mubr.bf16.mxu0 %v3547_v2  ;;  %v3714_v27 = vrot.slane %v42_v26, %v46_v24  ;;  %v3716_v28 = vrot.slane %v42_v26, %v50_v25 }
   0x9   :  { %3138 = vmatprep.subr.bf16.mxu1 %v5051_v0  ;;  %v297_v9 = vpack.c.bf16 %v3635_v8, %v3633_v7  ;;  %3195 = vmatpush3.bf16.msra.mxu0 %v3595_v3 }
   0xa   :  { %3196 = vmatprep.subr.bf16.mxu0 %v5051_v0  ;;  %v3661_v13 = vld [vmem:[#allocation6] sm:$0xff]  ;;  %v3663_v14 = vld [vmem:[#allocation6 + $0x8] sm:$0xff] }
   0xb   :  { %3135 = vmatmul.mubr.msk.bf16.vlgmr.msra.gmra.mxu1 %vm274_vm0, %v297_v9  ;;  %v463_v15 = vpack.c.bf16 %v3663_v14, %v3661_v13 }
   0xc   :  { %3139 = vmatpush3.bf16.msra.mxu1 %v3645_v10  ;;  %3142 = vmatprep.mubr.msk.bf16.mxu1 %vm3548_vm1, %v5051_v0 }
   0xd   :  { %3140 = vmatprep.subr.bf16.mxu1 %v5051_v0  ;;  %3197 = vmatpush3.bf16.msra.mxu0 %v3628_v6 }
   0xe   :  { %3210 = vmatprep.subr.bf16.mxu0 %v5051_v0 }
   0xf   :  { %2931 = vmatmul.mubr.msk.bf16.gmra.mxu0 %vm104_vm2, %v3272_v11  ;;  %v356_v11 = vld [vmem:[#allocation5] sm:$0xff] }
  0x10   :  { %181 = vmatprep.mubr.bf16.mxu0 %v3547_v2  ;;  %3141 = vmatpush3.bf16.msra.mxu1 %v3656_v12 }
  0x11   :  { %3146 = vmatprep.subr.bf16.mxu1 %v5051_v0 }
  0x13   :  { %3143 = vmatmul.mubr.msk.bf16.vlgmr.msra.gmra.mxu1 %vm274_vm0, %v463_v15 }
  0x14   :  { %3147 = vmatpush3.bf16.msra.mxu1 %v3595_v3  ;;  %3150 = vmatprep.mubr.msk.bf16.mxu1 %vm3548_vm1, %v5051_v0 }
  0x15   :  { %3148 = vmatprep.subr.bf16.mxu1 %v5051_v0 }
  0x17   :  { %2932 = vmatmul.mubr.msk.bf16.gmra.mxu0 %vm104_vm2, %v3273_v16 }
  0x18   :  { %191 = vmatprep.mubr.bf16.mxu0 %v3547_v2  ;;  %3149 = vmatpush3.bf16.msra.mxu1 %v3628_v6 }
  0x19   :  { %3154 = vmatprep.subr.bf16.mxu1 %v5051_v0 }
  0x1f   :  { %2933 = vmatmul.mubr.msk.bf16.gmra.mxu0 %vm104_vm2, %v3274_v17 }
  0x20   :  { %201 = vmatprep.mubr.bf16.mxu0 %v3547_v2 }
  0x27   :  { %2934 = vmatmul.mubr.msk.bf16.gmra.mxu0 %vm104_vm2, %v3275_v18 }
  0x28   :  { %211 = vmatprep.mubr.bf16.mxu0 %v3547_v2 }
  0x2f   :  { %2935 = vmatmul.mubr.msk.bf16.gmra.mxu0 %vm104_vm2, %v3276_v19 }
  0x30   :  { %221 = vmatprep.mubr.bf16.mxu0 %v3547_v2 }
  0x37   :  { %2936 = vmatmul.mubr.msk.bf16.gmra.mxu0 %vm104_vm2, %v3278_v20 }
  0x38   :  { %231 = vmatprep.mubr.bf16.mxu0 %v3547_v2 }
  0x3f   :  { %2937 = vmatmul.mubr.msk.bf16.gmra.mxu0 %vm104_vm2, %v3280_v21 }
  0x40   :  { %3198 = vmatprep.mubr.msk.bf16.mxu0 %vm3548_vm1, %v5051_v0 }
  0xc7   :  { %v163_v29 = vpop.f32.mrf.mxu0 }
  0xc8   :  { %v164_v31 = vadd.f32 %v163_v29, %v3714_v27 }
  0xc9   :  { %v165_v30 = vpop.f32.mrf.mxu0 }
  0xca   :  { %v3720_v32 = vadd.f32 %v165_v30, %v3716_v28 }
  0xcb   :  { %v347_v33 = vpop.f32.mrf.mxu1  ;;  %v167_v34 = vpop.f32.mrf.mxu0 }
  0xcc   :  { %v3722_v35 = vadd.f32 %v347_v33, %v164_v31  ;;  %v168_v38 = vadd.f32 %v167_v34, %v3714_v27 }
  0xcd   :  { %v3136_v36 = vpop.f32.mrf.mxu1  ;;  %v169_v37 = vpop.f32.mrf.mxu0 }
  0xce   :  { %3281 = vtanh.f32 %v3722_v35  ;;  %v3727_v39 = vadd.f32 %v169_v37, %v3716_v28 }
  0xcf   :  { %v350_v40 = vpop.f32.mrf.mxu1  ;;  %v173_v41 = vpop.f32.mrf.mxu0 }
  0xd0   :  { %v3729_v42 = vadd.f32 %v350_v40, %v168_v38  ;;  %v3732_v43 = vadd.f32 %v173_v41, %v3714_v27 }
  0xd1   :  { %v175_v44 = vpop.f32.mrf.mxu0  ;;  %v3137_v45 = vpop.f32.mrf.mxu1 }
  0xd2   :  { %3283 = vtanh.f32 %v3729_v42  ;;  %v3736_v46 = vadd.f32 %v175_v44, %v3716_v28 }
  0xd3   :  { %v177_v47 = vpop.f32.mrf.mxu0  ;;  %v513_v48 = vpop.f32.mrf.mxu1 }
  0xd4   :  { %v3739_v49 = vadd.f32 %v177_v47, %v3714_v27 }
  0xd5   :  { %v179_v50 = vpop.f32.mrf.mxu0  ;;  %v3144_v51 = vpop.f32.mrf.mxu1 }
  0xd6   :  { %v3742_v52 = vadd.f32 %v179_v50, %v3716_v28 }
  0xd7   :  { %v183_v53 = vpop.f32.mrf.mxu0  ;;  %v516_v54 = vpop.f32.mrf.mxu1 }
  0xd8   :  { %v3745_v55 = vadd.f32 %v183_v53, %v3714_v27 }
  0xd9   :  { %v185_v56 = vpop.f32.mrf.mxu0  ;;  %v3145_v57 = vpop.f32.mrf.mxu1 }
  0xda   :  { %v3748_v58 = vadd.f32 %v185_v56, %v3716_v28 }
  0xdb   :  { %v3282_v59 = vpop.eup %3281  ;;  %v187_v60 = vpop.f32.mrf.mxu0 }
  0xdc   :  { %v3751_v61 = vadd.f32 %v187_v60, %v3714_v27  ;;  %384 = vrot.lane.b32.xlu0 %v3282_v59, %s3549_s0 }
  0xdd   :  { %v189_v62 = vpop.f32.mrf.mxu0 }
  0xde   :  { %v3755_v63 = vadd.f32 %v189_v62, %v3716_v28 }
  0xdf   :  { %v3284_v1 = vpop.eup %3283  ;;  %v193_v4 = vpop.f32.mrf.mxu0 }
  0xe0   :  { %v3758_v5 = vadd.f32 %v193_v4, %v3714_v27  ;;  %386 = vrot.lane.b32.xlu0 %v3284_v1, %s3549_s0 }
  0xe1   :  { %v195_v9 = vpop.f32.mrf.mxu0 }
  0xe2   :  { %v3762_v15 = vadd.f32 %v195_v9, %v3716_v28 }
  0xe3   :  { %v197_v16 = vpop.f32.mrf.mxu0 }
  0xe4   :  { %v3765_v17 = vadd.f32 %v197_v16, %v3714_v27  ;;  %374 = vrot.lane.b32.xlu0 %v356_v11, %s3550_s4 }
  0xe5   :  { %v199_v18 = vpop.f32.mrf.mxu0 }
  0xe6   :  { %v3769_v19 = vadd.f32 %v199_v18, %v3716_v28 }
  0xe7   :  { %v203_v20 = vpop.f32.mrf.mxu0 }
  0xe8   :  { %v3772_v21 = vadd.f32 %v203_v20, %v3714_v27 }
  0xe9   :  { %v205_v22 = vpop.f32.mrf.mxu0 }
  0xea   :  { %v3775_v23 = vadd.f32 %v205_v22, %v3716_v28 }
  0xeb   :  { %v207_v24 = vpop.f32.mrf.mxu0 }
  0xec   :  { %v3778_v25 = vadd.f32 %v207_v24, %v3714_v27  ;;  %v357_v24 = vld [vmem:[#allocation5 + $0x8] sm:$0xff] }
  0xed   :  { %v209_v26 = vpop.f32.mrf.mxu0 }
  0xee   :  { %v3781_v29 = vadd.f32 %v209_v26, %v3716_v28 }
  0xef   :  { %v213_v30 = vpop.f32.mrf.mxu0 }
  0xf0   :  { %v3784_v31 = vadd.f32 %v213_v30, %v3714_v27 }
  0xf1   :  { %v215_v33 = vpop.f32.mrf.mxu0 }
  0xf2   :  { %v3787_v34 = vadd.f32 %v215_v33, %v3716_v28 }
  0xf3   :  { %v217_v36 = vpop.f32.mrf.mxu0 }
  0xf4   :  { %v3790_v37 = vadd.f32 %v217_v36, %v3714_v27 }
  0xf5   :  { %v219_v38 = vpop.f32.mrf.mxu0 }
  0xf6   :  { %v3793_v40 = vadd.f32 %v219_v38, %v3716_v28 }
  0xf7   :  { %v223_v41 = vpop.f32.mrf.mxu0 }
  0xf8   :  { %v3796_v44 = vadd.f32 %v223_v41, %v3714_v27 }
  0xf9   :  { %v225_v45 = vpop.f32.mrf.mxu0 }
  0xfa   :  { %v3799_v47 = vadd.f32 %v225_v45, %v3716_v28  ;;  %v522_v45 = vld [vmem:[#allocation7] sm:$0xff] }
  0xfb   :  { %v227_v50 = vpop.f32.mrf.mxu0 }
  0xfc   :  { %v3802_v51 = vadd.f32 %v227_v50, %v3714_v27  ;;  %v523_v50 = vld [vmem:[#allocation7 + $0x8] sm:$0xff] }
  0xfd   :  { %v229_v53 = vpop.f32.mrf.mxu0 }
  0xfe   :  { %v3805_v56 = vadd.f32 %v229_v53, %v3716_v28 }
  0xff   :  { %v233_v57 = vpop.f32.mrf.mxu0 }
 0x100   :  { %v3808_v59 = vadd.f32 %v233_v57, %v3714_v27 }
 0x101   :  { %v235_v60 = vpop.f32.mrf.mxu0 }
 0x102   :  { %v236_v62 = vadd.f32 %v235_v60, %v3716_v28 }
 0x103   :  { %v237_v1 = vpop.f32.mrf.mxu0 }
 0x104   :  { %v520_v4 = vadd.f32 %v513_v48, %v236_v62  ;;  %v3812_v9 = vadd.f32 %v237_v1, %v3714_v27  ;;  %v2941_v48 = vmul.f32 -1.442695, %v3722_v35  ;;  %v2942_v27 = vmul.f32 -1.442695, %v3729_v42 }
 0x105   :  { %v239_v11 = vpop.f32.mrf.mxu0 }
 0x106   :  { %3285 = vtanh.f32 %v520_v4  ;;  %v240_v16 = vadd.f32 %v239_v11, %v3716_v28  ;;  %v2946_v53 = vmul.f32 -1.442695, %v520_v4  ;;  %v3842_v4 = vld [vmem:[%s5049_s5 + $0x8] sm:$0xff] }
 0x107   :  { %vm415_vm4 = vcmp.gt.s32.totalorder %v3842_v4, 0  ;;  %vm581_vm6 = vcmp.gt.s32.totalorder %v3842_v4, 7  ;;  %vm766_vm12 = vcmp.gt.s32.totalorder %v3842_v4, 1  ;;  %vm920_vm14 = vcmp.gt.s32.totalorder %v3842_v4, 6 }
 0x108   :  { %v521_v18 = vadd.f32 %v516_v54, %v240_v16  ;;  %v3833_v16 = vld [vmem:[%s5049_s5] sm:$0xff] }
 0x109   :  { %vm414_vm3 = vcmp.gt.s32.totalorder %v3833_v16, 0  ;;  %vm580_vm5 = vcmp.gt.s32.totalorder %v3833_v16, 7  ;;  %vm765_vm11 = vcmp.gt.s32.totalorder %v3833_v16, 1  ;;  %vm919_vm13 = vcmp.gt.s32.totalorder %v3833_v16, 6 }
 0x10a   :  { %3287 = vtanh.f32 %v521_v18  ;;  %v2947_v57 = vmul.f32 -1.442695, %v521_v18 }
 0x10b   :  { %3289 = vpow2.f32 %v2941_v48 }
 0x10c   :  { %3291 = vpow2.f32 %v2942_v27  ;;  %v416_v27 = vsel %vm414_vm3, 1, %v3547_v2 }
 0x113   :  { %v3286_v20 = vpop.eup %3285 }
 0x114   :  { %550 = vrot.lane.b32.xlu1 %v3286_v20, %s3549_s0 }
 0x117   :  { %v3288_v22 = vpop.eup %3287 }
 0x118   :  { %552 = vrot.lane.b32.xlu1 %v3288_v22, %s3549_s0  ;;  %v3290_v26 = vpop.eup %3289 }
 0x119   :  { %v364_v30 = vadd.f32 1.0, %v3290_v26  ;;  %v3292_v28 = vpop.eup %3291 }
 0x11a   :  { %v365_v54 = vadd.f32 1.0, %v3292_v28 }
 0x11b   :  { %3293 = vrcp.f32 %v364_v30  ;;  %v417_v30 = vsel %vm415_vm4, 1, %v3547_v2 }
 0x11c   :  { %376 = vrot.lane.b32.xlu1 %v357_v24, %s3550_s4  ;;  %3295 = vrcp.f32 %v365_v54 }
 0x11d   :  { %3297 = vpow2.f32 %v2946_v53 }
 0x11e   :  { %3299 = vpow2.f32 %v2947_v57  ;;  %v583_v57 = vsel %vm581_vm6, 1, %v3547_v2  ;;  %vm1104_vm6 = vcmp.gt.s32.totalorder %v3842_v4, 2 }
 0x128   :  { %v3820_v33 = vpop.eup %3293 }
 0x129   :  { %v3824_v41 = vpop.eup %3295 }
 0x12a   :  { %v3298_v60 = vpop.eup %3297 }
 0x12b   :  { %v530_v62 = vadd.f32 1.0, %v3298_v60  ;;  %v3300_v1 = vpop.eup %3299 }
 0x12c   :  { %v531_v11 = vadd.f32 1.0, %v3300_v1 }
 0x12d   :  { %3301 = vrcp.f32 %v530_v62 }
 0x12e   :  { %3303 = vrcp.f32 %v531_v11 }
 0x13a   :  { %v3835_v20 = vpop.eup %3301 }
 0x13b   :  { %v3845_v18 = vpop.eup %3303 }
 0x14e   :  { %v385_v36 = vpop.permute.xlu0 %384 }
 0x14f   :  { %v390_v38 = vmul.f32 %v3820_v33, %v385_v36 }
 0x151   :  { %394 = vrot.lane.b32.xlu0 %v390_v38, %s3550_s4 }
 0x152   :  { %v387_v35 = vpop.permute.xlu0 %386 }
 0x153   :  { %v391_v42 = vmul.f32 %v3824_v41, %v387_v35 }
 0x155   :  { %396 = vrot.lane.b32.xlu1 %v391_v42, %s3550_s4  ;;  %540 = vrot.lane.b32.xlu0 %v522_v45, %s3550_s4 }
 0x156   :  { %v3856_v28 = vpop.permute.xlu0 %374 }
 0x157   :  { %v380_v54 = vmul.f32 %v3820_v33, %v3856_v28 }
 0x159   :  { %542 = vrot.lane.b32.xlu1 %v523_v50, %s3550_s4 }
 0x186   :  { %v551_v22 = vpop.permute.xlu1 %550 }
 0x187   :  { %v556_v24 = vmul.f32 %v3835_v20, %v551_v22 }
 0x189   :  { %560 = vrot.lane.b32.xlu0 %v556_v24, %s3550_s4 }
 0x18a   :  { %v553_v48 = vpop.permute.xlu1 %552 }
 0x18b   :  { %v557_v26 = vmul.f32 %v3845_v18, %v553_v48 }
 0x18d   :  { %562 = vrot.lane.b32.xlu1 %v557_v26, %s3550_s4  ;;  %419 = vperm.xlu0 %3264, %v416_v27  }
 0x18e   :  { %v3860_v36 = vpop.permute.xlu1 %376 }
 0x18f   :  { %v381_v45 = vmul.f32 %v3824_v41, %v3860_v36 }
 0x191   :  { %422 = vperm.xlu1 %3265, %v417_v30   ;;  %430 = vrot.lane.b32.xlu0 %v3635_v8, %s3551_s30 }
 0x195   :  { %428 = vrot.lane.b32.xlu1 %v3633_v7, %s3551_s30  ;;  %v582_v7 = vsel %vm580_vm5, 1, %v3547_v2  ;;  %vm1103_vm5 = vcmp.gt.s32.totalorder %v3833_v16, 2 }
 0x1c3   :  { %v395_v38 = vpop.permute.xlu0 %394 }
 0x1c4   :  { %v400_v35 = vadd.f32 %v395_v38, %v380_v54 }
 0x1c6   :  { %3305 = vtanh.f32 %v400_v35 }
 0x1c7   :  { %v397_v42 = vpop.permute.xlu1 %396  ;;  %v541_v60 = vpop.permute.xlu0 %540 }
 0x1c8   :  { %v401_v50 = vadd.f32 %v397_v42, %v381_v45  ;;  %v546_v62 = vmul.f32 %v3835_v20, %v541_v60 }
 0x1ca   :  { %3307 = vtanh.f32 %v401_v50 }
 0x1cb   :  { %v543_v1 = vpop.permute.xlu1 %542 }
 0x1cc   :  { %v547_v24 = vmul.f32 %v3845_v18, %v543_v1 }
 0x1d3   :  { %v3306_v8 = vpop.eup %3305 }
 0x1d4   :  { %406 = vrot.lane.b32.xlu1 %v3306_v8, %s3549_s0 }
 0x1d7   :  { %v3308_v53 = vpop.eup %3307 }
 0x1d8   :  { %408 = vrot.lane.b32.xlu0 %v3308_v53, %s3549_s0  ;;  %585 = vperm.xlu1 %3265, %v582_v7  }
 0x1dc   :  { %588 = vperm.xlu0 %3264, %v583_v57  }
 0x1fb   :  { %v561_v11 = vpop.permute.xlu0 %560 }
 0x1fc   :  { %v566_v22 = vadd.f32 %v561_v11, %v546_v62 }
 0x1fe   :  { %3309 = vtanh.f32 %v566_v22 }
 0x1ff   :  { %v563_v48 = vpop.permute.xlu1 %562 }
 0x200   :  { %v567_v27 = vadd.f32 %v563_v48, %v547_v24 }
 0x202   :  { %3311 = vtanh.f32 %v567_v27 }
 0x208   :  { %v3880_v38 = vpop.permute.xlu0 %419 }
 0x209   :  { %5067 = vst [vmem:[#allocation9_spill] sm:$0xff] %v3880_v38  ;;  %vm5054_vm7 = vcmp.eq.s32.totalorder %v3880_v38, 1 }
 0x20b   :  { %v3310_v26 = vpop.eup %3309 }
 0x20c   :  { %572 = vrot.lane.b32.xlu1 %v3310_v26, %s3549_s0  ;;  %v3878_v54 = vpop.permute.xlu1 %422  ;;  %v431_v42 = vpop.permute.xlu0 %430 }
 0x20d   :  { %5066 = vst [vmem:[#allocation8_spill] sm:$0xff] %v3878_v54  ;;  %vm5053_vm8 = vcmp.eq.s32.totalorder %v3878_v54, 1 }
 0x20f   :  { %v3312_v30 = vpop.eup %3311 }
 0x210   :  { %574 = vrot.lane.b32.xlu0 %v3312_v30, %s3549_s0  ;;  %594 = vrot.lane.b32.xlu1 %v3661_v13, %s3551_s30  ;;  %v429_v45 = vpop.permute.xlu1 %428 }
 0x214   :  { %596 = vrot.lane.b32.xlu0 %v3663_v14, %s3551_s30 }
 0x246   :  { %v407_v8 = vpop.permute.xlu1 %406 }
 0x247   :  { %v412_v7 = vmul.f32 %v3820_v33, %v407_v8 }
 0x249   :  { %v3886_v53 = vsel %vm5054_vm7, %v412_v7, %v429_v45 }
 0x24a   :  { %v409_v57 = vpop.permute.xlu0 %408  ;;  %440 = vrot.lane.b32.xlu1 %v3886_v53, %s3550_s4 }
 0x24b   :  { %v413_v13 = vmul.f32 %v3824_v41, %v409_v57 }
 0x24d   :  { %v3894_v14 = vsel %vm5053_vm8, %v413_v13, %v431_v42 }
 0x24e   :  { %442 = vrot.lane.b32.xlu0 %v3894_v14, %s3550_s4 }
 0x253   :  { %v3898_v33 = vpop.permute.xlu1 %585 }
 0x254   :  { %vm590_vm9 = vcmp.eq.s32.totalorder %v3898_v33, 1 }
 0x255   :  { %v602_v8 = vsel %vm590_vm9, %v566_v22, %v541_v60 }
 0x257   :  { %v3900_v62 = vpop.permute.xlu0 %588 }
 0x258   :  { %vm591_vm10 = vcmp.eq.s32.totalorder %v3900_v62, 1 }
 0x259   :  { %v603_v7 = vsel %vm591_vm10, %v567_v27, %v543_v1 }
 0x27e   :  { %v573_v11 = vpop.permute.xlu1 %572 }
 0x27f   :  { %v578_v24 = vmul.f32 %v3835_v20, %v573_v11  ;;  %v436_v20 = vsel %vm5054_vm7, %v400_v35, %v3856_v28 }
 0x282   :  { %v575_v48 = vpop.permute.xlu0 %574  ;;  %v595_v41 = vpop.permute.xlu1 %594 }
 0x283   :  { %v3906_v26 = vsel %vm590_vm9, %v578_v24, %v595_v41  ;;  %v579_v30 = vmul.f32 %v3845_v18, %v575_v48  ;;  %v437_v18 = vsel %vm5053_vm8, %v401_v50, %v3860_v36 }
 0x284   :  { %606 = vrot.lane.b32.xlu1 %v3906_v26, %s3550_s4 }
 0x286   :  { %v597_v45 = vpop.permute.xlu0 %596 }
 0x287   :  { %v3914_v42 = vsel %vm591_vm10, %v579_v30, %v597_v45 }
 0x288   :  { %608 = vrot.lane.b32.xlu0 %v3914_v42, %s3550_s4  ;;  %450 = vrot.lane.b32.xlu1 %v436_v20, %s3551_s30 }
 0x28c   :  { %452 = vrot.lane.b32.xlu0 %v437_v18, %s3551_s30  ;;  %616 = vrot.lane.b32.xlu1 %v602_v8, %s3551_s30 }
 0x290   :  { %618 = vrot.lane.b32.xlu0 %v603_v7, %s3551_s30 }
 0x2bc   :  { %v441_v28 = vpop.permute.xlu1 %440 }
 0x2bd   :  { %446 = vst.msk [vmem:[#allocation4] sm:$0xff] %vm274_vm0, %v441_v28 }
 0x2c0   :  { %v443_v35 = vpop.permute.xlu0 %442 }
 0x2c1   :  { %447 = vst.msk [vmem:[#allocation4 + $0x8] sm:$0xff] %vm274_vm0, %v443_v35 }
 0x2c4   :  { %v3934_v57 = vld [vmem:[#allocation4] sm:$0xff] }
 0x2c8   :  { %v3936_v36 = vld [vmem:[#allocation4 + $0x8] sm:$0xff] }
 0x2c9   :  { %v660_v50 = vpack.c.bf16 %v3936_v36, %v3934_v57 }
 0x2cb   :  { %3151 = vmatmul.mubr.msk.bf16.vlgmr.msra.gmra.mxu1 %vm274_vm0, %v660_v50 }
 0x2cc   :  { %3155 = vmatpush3.bf16.msra.mxu1 %v3645_v10  ;;  %3158 = vmatprep.mubr.msk.bf16.mxu1 %vm3548_vm1, %v5051_v0 }
 0x2cd   :  { %3156 = vmatprep.subr.bf16.mxu1 %v5051_v0 }
 0x2d0   :  { %3157 = vmatpush3.bf16.msra.mxu1 %v3656_v12 }
 0x2d1   :  { %3162 = vmatprep.subr.bf16.mxu1 %v5051_v0 }
 0x2f6   :  { %v607_v60 = vpop.permute.xlu1 %606 }
 0x2f7   :  { %612 = vst.msk [vmem:[#allocation6] sm:$0xff] %vm274_vm0, %v607_v60 }
 0x2fa   :  { %v609_v1 = vpop.permute.xlu0 %608  ;;  %v451_v22 = vpop.permute.xlu1 %450 }
 0x2fb   :  { %613 = vst.msk [vmem:[#allocation6 + $0x8] sm:$0xff] %vm274_vm0, %v609_v1  ;;  %456 = vst.msk [vmem:[#allocation5] sm:$0xff] %vm274_vm0, %v451_v22 }
 0x2fe   :  { %v453_v27 = vpop.permute.xlu0 %452  ;;  %v617_v13 = vpop.permute.xlu1 %616  ;;  %v3952_v24 = vld [vmem:[#allocation6] sm:$0xff] }
 0x2ff   :  { %457 = vst.msk [vmem:[#allocation5 + $0x8] sm:$0xff] %vm274_vm0, %v453_v27  ;;  %622 = vst.msk [vmem:[#allocation7] sm:$0xff] %vm274_vm0, %v617_v13 }
 0x302   :  { %v619_v11 = vpop.permute.xlu0 %618  ;;  %v3954_v48 = vld [vmem:[#allocation6 + $0x8] sm:$0xff]  ;;  %v707_v13 = vld [vmem:[#allocation5] sm:$0xff] }
 0x303   :  { %623 = vst.msk [vmem:[#allocation7 + $0x8] sm:$0xff] %vm274_vm0, %v619_v11  ;;  %v814_v41 = vpack.c.bf16 %v3954_v48, %v3952_v24 }
 0x305   :  { %3159 = vmatmul.mubr.msk.bf16.vlgmr.msra.gmra.mxu1 %vm274_vm0, %v814_v41 }
 0x306   :  { %3163 = vmatpush3.bf16.msra.mxu1 %v3595_v3  ;;  %3166 = vmatprep.mubr.msk.bf16.mxu1 %vm3548_vm1, %v5051_v0  ;;  %v708_v11 = vld [vmem:[#allocation5 + $0x8] sm:$0xff] }
 0x307   :  { %3164 = vmatprep.subr.bf16.mxu1 %v5051_v0 }
 0x30a   :  { %3165 = vmatpush3.bf16.msra.mxu1 %v3628_v6 }
 0x30b   :  { %3170 = vmatprep.subr.bf16.mxu1 %v5051_v0 }
 0x38b   :  { %v698_v30 = vpop.f32.mrf.mxu1 }
 0x38c   :  { %v705_v45 = vadd.f32 %v698_v30, %v3732_v43 }
 0x38d   :  { %v3152_v20 = vpop.f32.mrf.mxu1 }
 0x38e   :  { %3313 = vtanh.f32 %v705_v45 }
 0x38f   :  { %v701_v18 = vpop.f32.mrf.mxu1 }
 0x390   :  { %v706_v8 = vadd.f32 %v701_v18, %v3739_v49 }
 0x391   :  { %v3153_v7 = vpop.f32.mrf.mxu1 }
 0x392   :  { %3315 = vtanh.f32 %v706_v8  ;;  %v2956_v41 = vmul.f32 -1.442695, %v706_v8  ;;  %v861_v8 = vld [vmem:[#allocation7] sm:$0xff] }
 0x39b   :  { %v3314_v3 = vpop.eup %3313 }
 0x39c   :  { %735 = vrot.lane.b32.xlu1 %v3314_v3, %s3549_s0 }
 0x39f   :  { %v3316_v28 = vpop.eup %3315 }
 0x3a0   :  { %737 = vrot.lane.b32.xlu0 %v3316_v28, %s3549_s0 }
 0x3c5   :  { %v852_v35 = vpop.f32.mrf.mxu1 }
 0x3c6   :  { %v859_v50 = vadd.f32 %v852_v35, %v3799_v47  ;;  %v2955_v47 = vmul.f32 -1.442695, %v705_v45 }
 0x3c7   :  { %v3160_v60 = vpop.f32.mrf.mxu1 }
 0x3c8   :  { %3317 = vtanh.f32 %v859_v50 }
 0x3c9   :  { %v855_v1 = vpop.f32.mrf.mxu1 }
 0x3ca   :  { %v860_v43 = vadd.f32 %v855_v1, %v3805_v56  ;;  %v862_v1 = vld [vmem:[#allocation7 + $0x8] sm:$0xff] }
 0x3cb   :  { %v3161_v22 = vpop.f32.mrf.mxu1 }
 0x3cc   :  { %3319 = vtanh.f32 %v860_v43  ;;  %v2958_v22 = vmul.f32 -1.442695, %v859_v50 }
 0x3cd   :  { %3321 = vpow2.f32 %v2955_v47 }
 0x3ce   :  { %3323 = vpow2.f32 %v2956_v41 }
 0x3d5   :  { %v3318_v27 = vpop.eup %3317 }
 0x3d6   :  { %889 = vrot.lane.b32.xlu1 %v3318_v27, %s3549_s0  ;;  %v2959_v27 = vmul.f32 -1.442695, %v860_v43  ;;  %v767_v43 = vsel %vm765_vm11, 1, %v3547_v2  ;;  %vm1257_vm11 = vcmp.gt.s32.totalorder %v3833_v16, 5 }
 0x3d9   :  { %v3320_v49 = vpop.eup %3319 }
 0x3da   :  { %891 = vrot.lane.b32.xlu0 %v3320_v49, %s3549_s0  ;;  %725 = vrot.lane.b32.xlu1 %v707_v13, %s3550_s4  ;;  %v3322_v30 = vpop.eup %3321 }
 0x3db   :  { %v715_v56 = vadd.f32 1.0, %v3322_v30  ;;  %v3324_v20 = vpop.eup %3323 }
 0x3dc   :  { %v716_v18 = vadd.f32 1.0, %v3324_v20 }
 0x3dd   :  { %3325 = vrcp.f32 %v715_v56 }
 0x3de   :  { %727 = vrot.lane.b32.xlu0 %v708_v11, %s3550_s4  ;;  %3327 = vrcp.f32 %v716_v18 }
 0x3df   :  { %3329 = vpow2.f32 %v2958_v22 }
 0x3e0   :  { %3331 = vpow2.f32 %v2959_v27 }
 0x3ea   :  { %v3976_v7 = vpop.eup %3325 }
 0x3eb   :  { %v3980_v35 = vpop.eup %3327 }
 0x3ec   :  { %v3330_v49 = vpop.eup %3329 }
 0x3ed   :  { %v869_v13 = vadd.f32 1.0, %v3330_v49  ;;  %v3332_v11 = vpop.eup %3331 }
 0x3ee   :  { %v870_v47 = vadd.f32 1.0, %v3332_v11  ;;  %v922_v11 = vsel %vm920_vm14, 1, %v3547_v2 }
 0x3ef   :  { %3333 = vrcp.f32 %v869_v13 }
 0x3f0   :  { %3335 = vrcp.f32 %v870_v47 }
 0x3fc   :  { %v3986_v41 = vpop.eup %3333 }
 0x3fd   :  { %v3991_v20 = vpop.eup %3335 }
 0x40e   :  { %v736_v3 = vpop.permute.xlu1 %735 }
 0x40f   :  { %v741_v28 = vmul.f32 %v3976_v7, %v736_v3  ;;  %v768_v3 = vsel %vm766_vm12, 1, %v3547_v2  ;;  %vm1258_vm12 = vcmp.gt.s32.totalorder %v3842_v4, 5 }
 0x411   :  { %745 = vrot.lane.b32.xlu1 %v741_v28, %s3550_s4 }
 0x412   :  { %v738_v60 = vpop.permute.xlu0 %737 }
 0x413   :  { %v742_v45 = vmul.f32 %v3980_v35, %v738_v60 }
 0x415   :  { %747 = vrot.lane.b32.xlu0 %v742_v45, %s3550_s4  ;;  %879 = vrot.lane.b32.xlu1 %v861_v8, %s3550_s4 }
 0x419   :  { %881 = vrot.lane.b32.xlu0 %v862_v1, %s3550_s4 }
 0x448   :  { %v890_v30 = vpop.permute.xlu1 %889 }
 0x449   :  { %v895_v56 = vmul.f32 %v3986_v41, %v890_v30 }
 0x44b   :  { %899 = vrot.lane.b32.xlu1 %v895_v56, %s3550_s4 }
 0x44c   :  { %v892_v50 = vpop.permute.xlu0 %891  ;;  %v4002_v28 = vpop.permute.xlu1 %725 }
 0x44d   :  { %v896_v18 = vmul.f32 %v3991_v20, %v892_v50  ;;  %v731_v60 = vmul.f32 %v3976_v7, %v4002_v28 }
 0x44f   :  { %901 = vrot.lane.b32.xlu0 %v896_v18, %s3550_s4  ;;  %770 = vperm.xlu1 %3265, %v767_v43  }
 0x450   :  { %v4006_v45 = vpop.permute.xlu0 %727 }
 0x451   :  { %v732_v22 = vmul.f32 %v3980_v35, %v4006_v45 }
 0x453   :  { %773 = vperm.xlu0 %3264, %v768_v3   ;;  %779 = vrot.lane.b32.xlu1 %v3934_v57, %s3551_s30 }
 0x457   :  { %781 = vrot.lane.b32.xlu0 %v3936_v36, %s3551_s30  ;;  %v921_v36 = vsel %vm919_vm13, 1, %v3547_v2 }
 0x483   :  { %v746_v8 = vpop.permute.xlu1 %745 }
 0x484   :  { %v751_v1 = vadd.f32 %v746_v8, %v731_v60 }
 0x486   :  { %3337 = vtanh.f32 %v751_v1 }
 0x487   :  { %v748_v27 = vpop.permute.xlu0 %747  ;;  %v880_v47 = vpop.permute.xlu1 %879 }
 0x488   :  { %v752_v49 = vadd.f32 %v748_v27, %v732_v22  ;;  %v885_v30 = vmul.f32 %v3986_v41, %v880_v47 }
 0x48a   :  { %3339 = vtanh.f32 %v752_v49 }
 0x48b   :  { %v882_v56 = vpop.permute.xlu0 %881 }
 0x48c   :  { %v886_v18 = vmul.f32 %v3991_v20, %v882_v56 }
 0x493   :  { %v3338_v57 = vpop.eup %3337 }
 0x494   :  { %757 = vrot.lane.b32.xlu1 %v3338_v57, %s3549_s0 }
 0x497   :  { %v3340_v13 = vpop.eup %3339 }
 0x498   :  { %759 = vrot.lane.b32.xlu0 %v3340_v13, %s3549_s0  ;;  %924 = vperm.xlu1 %3265, %v921_v36  }
 0x49c   :  { %927 = vperm.xlu0 %3264, %v922_v11  }
 0x4bd   :  { %v900_v50 = vpop.permute.xlu1 %899 }
 0x4be   :  { %v905_v43 = vadd.f32 %v900_v50, %v885_v30 }
 0x4c0   :  { %3341 = vtanh.f32 %v905_v43 }
 0x4c1   :  { %v902_v3 = vpop.permute.xlu0 %901 }
 0x4c2   :  { %v906_v60 = vadd.f32 %v902_v3, %v886_v18 }
 0x4c4   :  { %3343 = vtanh.f32 %v906_v60 }
 0x4ca   :  { %v4024_v27 = vpop.permute.xlu1 %770 }
 0x4cb   :  { %vm775_vm15 = vcmp.eq.s32.totalorder %v4024_v27, 1 }
 0x4cd   :  { %v3342_v8 = vpop.eup %3341 }
 0x4ce   :  { %911 = vrot.lane.b32.xlu1 %v3342_v8, %s3549_s0  ;;  %v4026_v57 = vpop.permute.xlu0 %773  ;;  %v780_v36 = vpop.permute.xlu1 %779 }
 0x4cf   :  { %vm776_vm2 = vcmp.eq.s32.totalorder %v4026_v57, 1 }
 0x4d1   :  { %v3344_v22 = vpop.eup %3343 }
 0x4d2   :  { %913 = vrot.lane.b32.xlu0 %v3344_v22, %s3549_s0  ;;  %933 = vrot.lane.b32.xlu1 %v3952_v24, %s3551_s30  ;;  %v782_v13 = vpop.permute.xlu0 %781 }
 0x4d6   :  { %935 = vrot.lane.b32.xlu0 %v3954_v48, %s3551_s30 }
 0x506   :  { %v758_v11 = vpop.permute.xlu1 %757 }
 0x507   :  { %v763_v30 = vmul.f32 %v3976_v7, %v758_v11 }
 0x509   :  { %v4032_v50 = vsel %vm775_vm15, %v763_v30, %v780_v36 }
 0x50a   :  { %v760_v18 = vpop.permute.xlu0 %759  ;;  %791 = vrot.lane.b32.xlu1 %v4032_v50, %s3550_s4 }
 0x50b   :  { %v764_v24 = vmul.f32 %v3980_v35, %v760_v18 }
 0x50d   :  { %v4040_v48 = vsel %vm776_vm2, %v764_v24, %v782_v13 }
 0x50e   :  { %793 = vrot.lane.b32.xlu0 %v4040_v48, %s3550_s4 }
 0x513   :  { %v4044_v7 = vpop.permute.xlu1 %924 }
 0x514   :  { %vm929_vm3 = vcmp.eq.s32.totalorder %v4044_v7, 1 }
 0x515   :  { %v941_v24 = vsel %vm929_vm3, %v905_v43, %v880_v47 }
 0x517   :  { %v4046_v3 = vpop.permute.xlu0 %927 }
 0x518   :  { %vm930_vm4 = vcmp.eq.s32.totalorder %v4046_v3, 1 }
 0x540   :  { %v912_v8 = vpop.permute.xlu1 %911 }
 0x541   :  { %v917_v22 = vmul.f32 %v3986_v41, %v912_v8  ;;  %v787_v41 = vsel %vm775_vm15, %v751_v1, %v4002_v28  ;;  %v942_v8 = vsel %vm930_vm4, %v906_v60, %v882_v56 }
 0x544   :  { %v914_v36 = vpop.permute.xlu0 %913  ;;  %v934_v35 = vpop.permute.xlu1 %933 }
 0x545   :  { %v4052_v11 = vsel %vm929_vm3, %v917_v22, %v934_v35  ;;  %v918_v13 = vmul.f32 %v3991_v20, %v914_v36  ;;  %v788_v20 = vsel %vm776_vm2, %v752_v49, %v4006_v45 }
 0x546   :  { %945 = vrot.lane.b32.xlu1 %v4052_v11, %s3550_s4 }
 0x548   :  { %v936_v30 = vpop.permute.xlu0 %935 }
 0x549   :  { %v4060_v18 = vsel %vm930_vm4, %v918_v13, %v936_v30  ;;  %v4109_v30 = vld [vmem:[%s5045_s2 + $0x8] sm:$0xff]  }
 0x54a   :  { %947 = vrot.lane.b32.xlu0 %v4060_v18, %s3550_s4  ;;  %801 = vrot.lane.b32.xlu1 %v787_v41, %s3551_s30 }
 0x54e   :  { %803 = vrot.lane.b32.xlu0 %v788_v20, %s3551_s30  ;;  %955 = vrot.lane.b32.xlu1 %v941_v24, %s3551_s30 }
 0x552   :  { %957 = vrot.lane.b32.xlu0 %v942_v8, %s3551_s30 }
 0x57c   :  { %v792_v28 = vpop.permute.xlu1 %791 }
 0x57d   :  { %797 = vst.msk [vmem:[#allocation4] sm:$0xff] %vm274_vm0, %v792_v28 }
 0x580   :  { %v794_v1 = vpop.permute.xlu0 %793 }
 0x581   :  { %798 = vst.msk [vmem:[#allocation4 + $0x8] sm:$0xff] %vm274_vm0, %v794_v1 }
 0x584   :  { %v4080_v22 = vld [vmem:[#allocation4] sm:$0xff] }
 0x588   :  { %v4082_v45 = vld [vmem:[#allocation4 + $0x8] sm:$0xff] }
 0x589   :  { %v998_v49 = vpack.c.bf16 %v4082_v45, %v4080_v22 }
 0x58b   :  { %3167 = vmatmul.mubr.msk.bf16.vlgmr.msra.gmra.mxu1 %vm274_vm0, %v998_v49 }
 0x58c   :  { %3171 = vmatpush3.bf16.msra.mxu1 %v3645_v10  ;;  %3174 = vmatprep.mubr.msk.bf16.mxu1 %vm3548_vm1, %v5051_v0 }
 0x58d   :  { %3172 = vmatprep.subr.bf16.mxu1 %v5051_v0 }
 0x590   :  { %3173 = vmatpush3.bf16.msra.mxu1 %v3656_v12 }
 0x591   :  { %3178 = vmatprep.subr.bf16.mxu1 %v5051_v0 }
 0x5b8   :  { %v946_v47 = vpop.permute.xlu1 %945 }
 0x5b9   :  { %951 = vst.msk [vmem:[#allocation6] sm:$0xff] %vm274_vm0, %v946_v47 }
 0x5bc   :  { %v948_v56 = vpop.permute.xlu0 %947  ;;  %v802_v43 = vpop.permute.xlu1 %801 }
 0x5bd   :  { %952 = vst.msk [vmem:[#allocation6 + $0x8] sm:$0xff] %vm274_vm0, %v948_v56  ;;  %807 = vst.msk [vmem:[#allocation5] sm:$0xff] %vm274_vm0, %v802_v43 }
 0x5c0   :  { %v804_v60 = vpop.permute.xlu0 %803  ;;  %v956_v10 = vpop.permute.xlu1 %955  ;;  %v4098_v35 = vld [vmem:[#allocation6] sm:$0xff] }
 0x5c1   :  { %808 = vst.msk [vmem:[#allocation5 + $0x8] sm:$0xff] %vm274_vm0, %v804_v60  ;;  %961 = vst.msk [vmem:[#allocation7] sm:$0xff] %vm274_vm0, %v956_v10 }
 0x5c4   :  { %v958_v36 = vpop.permute.xlu0 %957  ;;  %v4100_v12 = vld [vmem:[#allocation6 + $0x8] sm:$0xff] }
 0x5c5   :  { %962 = vst.msk [vmem:[#allocation7 + $0x8] sm:$0xff] %vm274_vm0, %v958_v36  ;;  %v1152_v13 = vpack.c.bf16 %v4100_v12, %v4098_v35 }
 0x5c7   :  { %3175 = vmatmul.mubr.msk.bf16.vlgmr.msra.gmra.mxu1 %vm274_vm0, %v1152_v13  ;;  %v1045_v13 = vld [vmem:[#allocation5] sm:$0xff] }
 0x5c8   :  { %3179 = vmatpush3.bf16.msra.mxu1 %v4109_v30  ;;  %3182 = vmatprep.mubr.msk.bf16.mxu1 %vm3548_vm1, %v5051_v0 }
 0x5c9   :  { %3180 = vmatprep.subr.bf16.mxu1 %v5051_v0 }
 0x5cc   :  { %3181 = vmatpush3.bf16.msra.mxu1 %v3628_v6 }
 0x5cd   :  { %3186 = vmatprep.subr.bf16.mxu1 %v5051_v0 }
 0x64b   :  { %v1036_v41 = vpop.f32.mrf.mxu1 }
 0x64c   :  { %v1043_v20 = vadd.f32 %v1036_v41, %v3745_v55  ;;  %v1046_v41 = vld [vmem:[#allocation5 + $0x8] sm:$0xff] }
 0x64d   :  { %v3168_v24 = vpop.f32.mrf.mxu1 }
 0x64e   :  { %3345 = vtanh.f32 %v1043_v20 }
 0x64f   :  { %v1039_v8 = vpop.f32.mrf.mxu1 }
 0x650   :  { %v1044_v28 = vadd.f32 %v1039_v8, %v3751_v61 }
 0x651   :  { %v3169_v1 = vpop.f32.mrf.mxu1 }
 0x652   :  { %3347 = vtanh.f32 %v1044_v28  ;;  %v2970_v24 = vmul.f32 -1.442695, %v1044_v28  ;;  %v1199_v28 = vld [vmem:[#allocation7] sm:$0xff] }
 0x65b   :  { %v3346_v49 = vpop.eup %3345 }
 0x65c   :  { %1073 = vrot.lane.b32.xlu1 %v3346_v49, %s3549_s0 }
 0x65f   :  { %v3348_v47 = vpop.eup %3347 }
 0x660   :  { %1075 = vrot.lane.b32.xlu0 %v3348_v47, %s3549_s0 }
 0x687   :  { %v1190_v56 = vpop.f32.mrf.mxu1 }
 0x688   :  { %v1197_v6 = vadd.f32 %v1190_v56, %v3787_v34  ;;  %v2969_v34 = vmul.f32 -1.442695, %v1043_v20 }
 0x689   :  { %v3176_v43 = vpop.f32.mrf.mxu1 }
 0x68a   :  { %3349 = vtanh.f32 %v1197_v6 }
 0x68b   :  { %v1193_v60 = vpop.f32.mrf.mxu1 }
 0x68c   :  { %v1198_v55 = vadd.f32 %v1193_v60, %v3793_v40 }
 0x68d   :  { %v3177_v10 = vpop.f32.mrf.mxu1 }
 0x68e   :  { %3351 = vtanh.f32 %v1198_v55 }
 0x68f   :  { %3353 = vpow2.f32 %v2969_v34 }
 0x690   :  { %3355 = vpow2.f32 %v2970_v24 }
 0x697   :  { %v3350_v36 = vpop.eup %3349 }
 0x698   :  { %1227 = vrot.lane.b32.xlu1 %v3350_v36, %s3549_s0  ;;  %v1200_v36 = vld [vmem:[#allocation7 + $0x8] sm:$0xff] }
 0x69b   :  { %v3352_v61 = vpop.eup %3351 }
 0x69c   :  { %1229 = vrot.lane.b32.xlu0 %v3352_v61, %s3549_s0  ;;  %1063 = vrot.lane.b32.xlu1 %v1045_v13, %s3550_s4  ;;  %v3354_v8 = vpop.eup %3353  ;;  %v2972_v61 = vmul.f32 -1.442695, %v1197_v6  ;;  %v2973_v13 = vmul.f32 -1.442695, %v1198_v55  ;;  %v1105_v55 = vsel %vm1103_vm5, 1, %v3547_v2 }
 0x69d   :  { %v1053_v40 = vadd.f32 1.0, %v3354_v8  ;;  %v3356_v1 = vpop.eup %3355 }
 0x69e   :  { %v1054_v49 = vadd.f32 1.0, %v3356_v1 }
 0x69f   :  { %3357 = vrcp.f32 %v1053_v40 }
 0x6a0   :  { %1065 = vrot.lane.b32.xlu0 %v1046_v41, %s3550_s4  ;;  %3359 = vrcp.f32 %v1054_v49 }
 0x6a1   :  { %3361 = vpow2.f32 %v2972_v61 }
 0x6a2   :  { %3363 = vpow2.f32 %v2973_v13 }
 0x6ac   :  { %v4127_v47 = vpop.eup %3357 }
 0x6ad   :  { %v4131_v60 = vpop.eup %3359 }
 0x6ae   :  { %v3362_v41 = vpop.eup %3361 }
 0x6af   :  { %v1207_v34 = vadd.f32 1.0, %v3362_v41  ;;  %v3364_v24 = vpop.eup %3363 }
 0x6b0   :  { %v1208_v8 = vadd.f32 1.0, %v3364_v24 }
 0x6b1   :  { %3365 = vrcp.f32 %v1207_v34 }
 0x6b2   :  { %3367 = vrcp.f32 %v1208_v8 }
 0x6be   :  { %v4137_v40 = vpop.eup %3365 }
 0x6ce   :  { %v1074_v56 = vpop.permute.xlu1 %1073 }
 0x6cf   :  { %v1079_v43 = vmul.f32 %v4127_v47, %v1074_v56  ;;  %v4142_v56 = vpop.eup %3367 }
 0x6d1   :  { %1083 = vrot.lane.b32.xlu1 %v1079_v43, %s3550_s4 }
 0x6d2   :  { %v1076_v10 = vpop.permute.xlu0 %1075 }
 0x6d3   :  { %v1080_v20 = vmul.f32 %v4131_v60, %v1076_v10  ;;  %v1106_v10 = vsel %vm1104_vm6, 1, %v3547_v2 }
 0x6d5   :  { %1085 = vrot.lane.b32.xlu0 %v1080_v20, %s3550_s4  ;;  %1217 = vrot.lane.b32.xlu1 %v1199_v28, %s3550_s4 }
 0x6d9   :  { %1219 = vrot.lane.b32.xlu0 %v1200_v36, %s3550_s4 }
 0x70a   :  { %v1228_v1 = vpop.permute.xlu1 %1227 }
 0x70b   :  { %v1233_v49 = vmul.f32 %v4137_v40, %v1228_v1  ;;  %v1260_v1 = vsel %vm1258_vm12, 1, %v3547_v2 }
 0x70d   :  { %1237 = vrot.lane.b32.xlu1 %v1233_v49, %s3550_s4 }
 0x70e   :  { %v1230_v6 = vpop.permute.xlu0 %1229  ;;  %v4153_v20 = vpop.permute.xlu1 %1063 }
 0x70f   :  { %v1234_v43 = vmul.f32 %v4142_v56, %v1230_v6  ;;  %v1069_v28 = vmul.f32 %v4127_v47, %v4153_v20 }
 0x711   :  { %1239 = vrot.lane.b32.xlu0 %v1234_v43, %s3550_s4  ;;  %1108 = vperm.xlu1 %3265, %v1105_v55  }
 0x712   :  { %v4157_v36 = vpop.permute.xlu0 %1065 }
 0x713   :  { %v1070_v41 = vmul.f32 %v4131_v60, %v4157_v36 }
 0x715   :  { %1111 = vperm.xlu0 %3264, %v1106_v10   ;;  %1117 = vrot.lane.b32.xlu1 %v4080_v22, %s3551_s30 }
 0x719   :  { %1119 = vrot.lane.b32.xlu0 %v4082_v45, %s3551_s30  ;;  %v1259_v45 = vsel %vm1257_vm11, 1, %v3547_v2 }
 0x743   :  { %v1084_v61 = vpop.permute.xlu1 %1083 }
 0x744   :  { %v1089_v13 = vadd.f32 %v1084_v61, %v1069_v28 }
 0x746   :  { %3369 = vtanh.f32 %v1089_v13 }
 0x747   :  { %v1086_v34 = vpop.permute.xlu0 %1085  ;;  %v1218_v49 = vpop.permute.xlu1 %1217 }
 0x748   :  { %v1090_v24 = vadd.f32 %v1086_v34, %v1070_v41  ;;  %v1223_v6 = vmul.f32 %v4137_v40, %v1218_v49 }
 0x74a   :  { %3371 = vtanh.f32 %v1090_v24 }
 0x74b   :  { %v1220_v55 = vpop.permute.xlu0 %1219 }
 0x74c   :  { %v1224_v10 = vmul.f32 %v4142_v56, %v1220_v55 }
 0x753   :  { %v3370_v22 = vpop.eup %3369 }
 0x754   :  { %1095 = vrot.lane.b32.xlu1 %v3370_v22, %s3549_s0 }
 0x757   :  { %v3372_v8 = vpop.eup %3371 }
 0x758   :  { %1097 = vrot.lane.b32.xlu0 %v3372_v8, %s3549_s0  ;;  %1262 = vperm.xlu1 %3265, %v1259_v45  }
 0x75c   :  { %1265 = vperm.xlu0 %3264, %v1260_v1  }
 0x77f   :  { %v1238_v43 = vpop.permute.xlu1 %1237 }
 0x780   :  { %v1243_v16 = vadd.f32 %v1238_v43, %v1223_v6 }
 0x782   :  { %3373 = vtanh.f32 %v1243_v16 }
 0x783   :  { %v1240_v28 = vpop.permute.xlu0 %1239 }
 0x784   :  { %v1244_v61 = vadd.f32 %v1240_v28, %v1224_v10 }
 0x786   :  { %3375 = vtanh.f32 %v1244_v61 }
 0x78c   :  { %v4175_v34 = vpop.permute.xlu1 %1108 }
 0x78d   :  { %vm1113_vm13 = vcmp.eq.s32.totalorder %v4175_v34, 1 }
 0x78f   :  { %v3374_v4 = vpop.eup %3373 }
 0x790   :  { %1249 = vrot.lane.b32.xlu1 %v3374_v4, %s3549_s0  ;;  %v4177_v22 = vpop.permute.xlu0 %1111  ;;  %v1118_v45 = vpop.permute.xlu1 %1117 }
 0x791   :  { %vm1114_vm14 = vcmp.eq.s32.totalorder %v4177_v22, 1  ;;  %v3543_v22 = vld [vmem:[%s5045_s2 + $0x8] sm:$0xff]  }
 0x793   :  { %v3376_v41 = vpop.eup %3375 }
 0x794   :  { %1251 = vrot.lane.b32.xlu0 %v3376_v41, %s3549_s0  ;;  %1271 = vrot.lane.b32.xlu1 %v4098_v35, %s3551_s30  ;;  %v1120_v8 = vpop.permute.xlu0 %1119 }
 0x798   :  { %1273 = vrot.lane.b32.xlu0 %v4100_v12, %s3551_s30 }
 0x7c6   :  { %v1096_v1 = vpop.permute.xlu1 %1095 }
 0x7c7   :  { %v1101_v6 = vmul.f32 %v4127_v47, %v1096_v1 }
 0x7c9   :  { %v4183_v43 = vsel %vm1113_vm13, %v1101_v6, %v1118_v45 }
 0x7ca   :  { %v1098_v10 = vpop.permute.xlu0 %1097  ;;  %1129 = vrot.lane.b32.xlu1 %v4183_v43, %s3550_s4 }
 0x7cb   :  { %v1102_v35 = vmul.f32 %v4131_v60, %v1098_v10 }
 0x7cd   :  { %v4191_v12 = vsel %vm1114_vm14, %v1102_v35, %v1120_v8 }
 0x7ce   :  { %5068 = vst [vmem:[#allocation10_spill] sm:$0xff] %v4191_v12  ;;  %1131 = vrot.lane.b32.xlu0 %v4191_v12, %s3550_s4 }
 0x7d3   :  { %v4195_v47 = vpop.permute.xlu1 %1262 }
 0x7d4   :  { %vm1267_vm5 = vcmp.eq.s32.totalorder %v4195_v47, 1 }
 0x7d5   :  { %v1279_v35 = vsel %vm1267_vm5, %v1243_v16, %v1218_v49  ;;  %v4241_v49 = vld [vmem:[%s5047_s3 + $0x8] sm:$0xff]  }
 0x7d7   :  { %v4197_v28 = vpop.permute.xlu0 %1265 }
 0x7d8   :  { %vm1268_vm6 = vcmp.eq.s32.totalorder %v4197_v28, 1 }
 0x802   :  { %v1250_v4 = vpop.permute.xlu1 %1249 }
 0x803   :  { %v1255_v41 = vmul.f32 %v4137_v40, %v1250_v4  ;;  %v1125_v40 = vsel %vm1113_vm13, %v1089_v13, %v4153_v20  ;;  %v1280_v4 = vsel %vm1268_vm6, %v1244_v61, %v1220_v55  ;;  %v4250_v55 = vld [vmem:[%s5047_s3] sm:$0xff]  }
 0x806   :  { %v1252_v45 = vpop.permute.xlu0 %1251  ;;  %v1272_v60 = vpop.permute.xlu1 %1271 }
 0x807   :  { %v4203_v1 = vsel %vm1267_vm5, %v1255_v41, %v1272_v60  ;;  %v1256_v8 = vmul.f32 %v4142_v56, %v1252_v45  ;;  %v1126_v56 = vsel %vm1114_vm14, %v1090_v24, %v4157_v36 }
 0x808   :  { %5069 = vst [vmem:[#allocation11_spill] sm:$0xff] %v4203_v1  ;;  %1283 = vrot.lane.b32.xlu1 %v4203_v1, %s3550_s4 }
 0x80a   :  { %v1274_v6 = vpop.permute.xlu0 %1273 }
 0x80b   :  { %v4211_v10 = vsel %vm1268_vm6, %v1256_v8, %v1274_v6 }
 0x80c   :  { %5070 = vst [vmem:[#allocation12_spill] sm:$0xff] %v4211_v10  ;;  %1285 = vrot.lane.b32.xlu0 %v4211_v10, %s3550_s4  ;;  %1139 = vrot.lane.b32.xlu1 %v1125_v40, %s3551_s30 }
 0x810   :  { %1141 = vrot.lane.b32.xlu0 %v1126_v56, %s3551_s30  ;;  %1293 = vrot.lane.b32.xlu1 %v1279_v35, %s3551_s30 }
 0x814   :  { %1295 = vrot.lane.b32.xlu0 %v1280_v4, %s3551_s30 }
 0x83c   :  { %v1130_v20 = vpop.permute.xlu1 %1129 }
 0x83d   :  { %1135 = vst.msk [vmem:[#allocation4] sm:$0xff] %vm274_vm0, %v1130_v20 }
 0x840   :  { %v1132_v13 = vpop.permute.xlu0 %1131 }
 0x841   :  { %1136 = vst.msk [vmem:[#allocation4 + $0x8] sm:$0xff] %vm274_vm0, %v1132_v13 }
 0x844   :  { %v4231_v41 = vld [vmem:[#allocation4] sm:$0xff] }
 0x848   :  { %v4233_v36 = vld [vmem:[#allocation4 + $0x8] sm:$0xff] }
 0x849   :  { %v1336_v24 = vpack.c.bf16 %v4233_v36, %v4231_v41 }
 0x84b   :  { %3183 = vmatmul.mubr.msk.bf16.vlgmr.msra.gmra.mxu1 %vm274_vm0, %v1336_v24 }
 0x84c   :  { %3187 = vmatpush3.bf16.msra.mxu1 %v4241_v49  ;;  %3190 = vmatprep.mubr.msk.bf16.mxu1 %vm3548_vm1, %v5051_v0 }
 0x84d   :  { %3188 = vmatprep.subr.bf16.mxu1 %v5051_v0 }
 0x850   :  { %3189 = vmatpush3.bf16.msra.mxu1 %v4250_v55 }
 0x851   :  { %3202 = vmatprep.subr.bf16.mxu1 %v5051_v0 }
 0x87a   :  { %v1284_v16 = vpop.permute.xlu1 %1283 }
 0x87b   :  { %1289 = vst.msk [vmem:[#allocation6] sm:$0xff] %vm274_vm0, %v1284_v16 }
 0x87e   :  { %v1286_v61 = vpop.permute.xlu0 %1285  ;;  %v1140_v45 = vpop.permute.xlu1 %1139 }
 0x87f   :  { %1290 = vst.msk [vmem:[#allocation6 + $0x8] sm:$0xff] %vm274_vm0, %v1286_v61  ;;  %1145 = vst.msk [vmem:[#allocation5] sm:$0xff] %vm274_vm0, %v1140_v45 }
 0x882   :  { %v1142_v60 = vpop.permute.xlu0 %1141  ;;  %v1294_v8 = vpop.permute.xlu1 %1293  ;;  %v4259_v40 = vld [vmem:[#allocation6] sm:$0xff] }
 0x883   :  { %1146 = vst.msk [vmem:[#allocation5 + $0x8] sm:$0xff] %vm274_vm0, %v1142_v60  ;;  %1299 = vst.msk [vmem:[#allocation7] sm:$0xff] %vm274_vm0, %v1294_v8 }
 0x886   :  { %v1296_v6 = vpop.permute.xlu0 %1295  ;;  %v4261_v56 = vld [vmem:[#allocation6 + $0x8] sm:$0xff] }
 0x887   :  { %1300 = vst.msk [vmem:[#allocation7 + $0x8] sm:$0xff] %vm274_vm0, %v1296_v6  ;;  %v1490_v35 = vpack.c.bf16 %v4261_v56, %v4259_v40 }
 0x889   :  { %3191 = vmatmul.mubr.msk.bf16.vlgmr.msra.gmra.mxu1 %vm274_vm0, %v1490_v35 }
 0x88a   :  { %3203 = vmatpush3.bf16.msra.mxu1 %v4241_v49  ;;  %3206 = vmatprep.mubr.msk.bf16.mxu1 %vm3548_vm1, %v5051_v0 }
 0x88b   :  { %3204 = vmatprep.subr.bf16.mxu1 %v5051_v0 }
 0x88e   :  { %3205 = vmatpush3.bf16.msra.mxu1 %v4250_v55 }
 0x88f   :  { %3218 = vmatprep.subr.bf16.mxu1 %v5051_v0 }
 0x90b   :  { %v1374_v4 = vpop.f32.mrf.mxu1 }
 0x90c   :  { %v1381_v20 = vadd.f32 %v1374_v4, %v3758_v5 }
 0x90d   :  { %v3184_v13 = vpop.f32.mrf.mxu1 }
 0x90e   :  { %3377 = vtanh.f32 %v1381_v20 }
 0x90f   :  { %v1377_v24 = vpop.f32.mrf.mxu1 }
 0x910   :  { %v1382_v16 = vadd.f32 %v1377_v24, %v3765_v17  ;;  %v1383_v24 = vld [vmem:[#allocation5] sm:$0xff] }
 0x911   :  { %v3185_v61 = vpop.f32.mrf.mxu1 }
 0x912   :  { %3379 = vtanh.f32 %v1382_v16  ;;  %v1384_v61 = vld [vmem:[#allocation5 + $0x8] sm:$0xff] }
 0x91b   :  { %v3378_v45 = vpop.eup %3377 }
 0x91c   :  { %1411 = vrot.lane.b32.xlu1 %v3378_v45, %s3549_s0  ;;  %v1537_v45 = vld [vmem:[#allocation7] sm:$0xff] }
 0x91f   :  { %v3380_v60 = vpop.eup %3379 }
 0x920   :  { %1413 = vrot.lane.b32.xlu0 %v3380_v60, %s3549_s0 }
 0x949   :  { %v1528_v8 = vpop.f32.mrf.mxu1 }
 0x94a   :  { %v1535_v6 = vadd.f32 %v1528_v8, %v3775_v23  ;;  %v1538_v23 = vld [vmem:[#allocation7 + $0x8] sm:$0xff] }
 0x94b   :  { %v3192_v35 = vpop.f32.mrf.mxu1 }
 0x94c   :  { %3381 = vtanh.f32 %v1535_v6 }
 0x94d   :  { %v1531_v0 = vpop.f32.mrf.mxu1 }
 0x94e   :  { %v1536_v5 = vadd.f32 %v1531_v0, %v3781_v29  ;;  %v2983_v0 = vmul.f32 -1.442695, %v1381_v20  ;;  %v2984_v29 = vmul.f32 -1.442695, %v1382_v16  ;;  %v2986_v16 = vmul.f32 -1.442695, %v1535_v6 }
 0x94f   :  { %v3193_v4 = vpop.f32.mrf.mxu1 }
 0x950   :  { %3383 = vtanh.f32 %v1536_v5 }
 0x951   :  { %3385 = vpow2.f32 %v2983_v0 }
 0x952   :  { %3387 = vpow2.f32 %v2984_v29 }
 0x959   :  { %v3382_v13 = vpop.eup %3381 }
 0x95a   :  { %1565 = vrot.lane.b32.xlu1 %v3382_v13, %s3549_s0 }
 0x95d   :  { %v3384_v17 = vpop.eup %3383 }
 0x95e   :  { %1567 = vrot.lane.b32.xlu0 %v3384_v17, %s3549_s0  ;;  %1401 = vrot.lane.b32.xlu1 %v1383_v24, %s3550_s4  ;;  %v3386_v60 = vpop.eup %3385 }
 0x95f   :  { %v1391_v8 = vadd.f32 1.0, %v3386_v60  ;;  %v3388_v35 = vpop.eup %3387 }
 0x960   :  { %v1392_v4 = vadd.f32 1.0, %v3388_v35 }
 0x961   :  { %3389 = vrcp.f32 %v1391_v8 }
 0x962   :  { %1403 = vrot.lane.b32.xlu0 %v1384_v61, %s3550_s4  ;;  %1555 = vrot.lane.b32.xlu1 %v1537_v45, %s3550_s4  ;;  %3391 = vrcp.f32 %v1392_v4 }
 0x963   :  { %3393 = vpow2.f32 %v2986_v16  ;;  %v3541_v16 = vld [vmem:[%s5049_s5 + $0x8] sm:$0xff] }
 0x964   :  { %vm1442_vm12 = vcmp.gt.s32.totalorder %v3541_v16, 3  ;;  %vm1596_vm7 = vcmp.gt.s32.totalorder %v3541_v16, 4 }
 0x966   :  { %1557 = vrot.lane.b32.xlu0 %v1538_v23, %s3550_s4  ;;  %v2987_v23 = vmul.f32 -1.442695, %v1536_v5 }
 0x968   :  { %3395 = vpow2.f32 %v2987_v23  ;;  %v1444_v23 = vsel %vm1442_vm12, 1, %v3547_v2 }
 0x96e   :  { %v4285_v13 = vpop.eup %3389 }
 0x96f   :  { %v4289_v61 = vpop.eup %3391 }
 0x970   :  { %v3394_v0 = vpop.eup %3393 }
 0x971   :  { %v1545_v29 = vadd.f32 1.0, %v3394_v0 }
 0x973   :  { %3397 = vrcp.f32 %v1545_v29  ;;  %v1598_v29 = vsel %vm1596_vm7, 1, %v3547_v2 }
 0x975   :  { %v3396_v60 = vpop.eup %3395 }
 0x976   :  { %v1546_v8 = vadd.f32 1.0, %v3396_v60 }
 0x978   :  { %3399 = vrcp.f32 %v1546_v8 }
 0x980   :  { %v4293_v35 = vpop.eup %3397 }
 0x985   :  { %v4300_v6 = vpop.eup %3399 }
 0x98e   :  { %v1412_v17 = vpop.permute.xlu1 %1411 }
 0x98f   :  { %v1417_v24 = vmul.f32 %v4285_v13, %v1412_v17 }
 0x991   :  { %1421 = vrot.lane.b32.xlu1 %v1417_v24, %s3550_s4  ;;  %v3540_v24 = vld [vmem:[%s5049_s5] sm:$0xff] }
 0x992   :  { %v1414_v45 = vpop.permute.xlu0 %1413  ;;  %vm1441_vm11 = vcmp.gt.s32.totalorder %v3540_v24, 3  ;;  %vm1595_vm8 = vcmp.gt.s32.totalorder %v3540_v24, 4 }
 0x993   :  { %v1418_v20 = vmul.f32 %v4289_v61, %v1414_v45  ;;  %v1443_v45 = vsel %vm1441_vm11, 1, %v3547_v2  ;;  %v1597_v0 = vsel %vm1595_vm8, 1, %v3547_v2 }
 0x995   :  { %1423 = vrot.lane.b32.xlu0 %v1418_v20, %s3550_s4 }
 0x9cc   :  { %v1566_v4 = vpop.permute.xlu1 %1565 }
 0x9cd   :  { %v1571_v17 = vmul.f32 %v4293_v35, %v1566_v4 }
 0x9cf   :  { %1575 = vrot.lane.b32.xlu1 %v1571_v17, %s3550_s4 }
 0x9d0   :  { %v1568_v5 = vpop.permute.xlu0 %1567  ;;  %v1402_v60 = vpop.permute.xlu1 %1401 }
 0x9d1   :  { %v1572_v20 = vmul.f32 %v4300_v6, %v1568_v5  ;;  %v1407_v17 = vmul.f32 %v4285_v13, %v1402_v60 }
 0x9d3   :  { %1577 = vrot.lane.b32.xlu0 %v1572_v20, %s3550_s4  ;;  %1446 = vperm.xlu1 %3265, %v1443_v45  }
 0x9d4   :  { %v1404_v8 = vpop.permute.xlu0 %1403  ;;  %v1556_v4 = vpop.permute.xlu1 %1555 }
 0x9d5   :  { %v1408_v20 = vmul.f32 %v4289_v61, %v1404_v8 }
 0x9d7   :  { %1449 = vperm.xlu0 %3264, %v1444_v23   ;;  %1600 = vperm.xlu1 %3265, %v1597_v0  }
 0x9d8   :  { %v1558_v24 = vpop.permute.xlu0 %1557 }
 0x9d9   :  { %v1562_v54 = vmul.f32 %v4300_v6, %v1558_v24 }
 0x9db   :  { %1603 = vperm.xlu0 %3264, %v1598_v29   ;;  %1455 = vrot.lane.b32.xlu1 %v4231_v41, %s3551_s30 }
 0x9df   :  { %1457 = vrot.lane.b32.xlu0 %v4233_v36, %s3551_s30  ;;  %v1561_v36 = vmul.f32 %v4293_v35, %v1556_v4 }
 0xa03   :  { %v1422_v5 = vpop.permute.xlu1 %1421 }
 0xa04   :  { %v1427_v45 = vadd.f32 %v1422_v5, %v1407_v17 }
 0xa06   :  { %3401 = vtanh.f32 %v1427_v45 }
 0xa07   :  { %v1424_v16 = vpop.permute.xlu0 %1423 }
 0xa08   :  { %v1428_v2 = vadd.f32 %v1424_v16, %v1408_v20 }
 0xa0a   :  { %3403 = vtanh.f32 %v1428_v2 }
 0xa13   :  { %v3402_v23 = vpop.eup %3401 }
 0xa14   :  { %1433 = vrot.lane.b32.xlu1 %v3402_v23, %s3549_s0 }
 0xa17   :  { %v3404_v41 = vpop.eup %3403 }
 0xa18   :  { %1435 = vrot.lane.b32.xlu0 %v3404_v41, %s3549_s0 }
 0xa41   :  { %v1576_v0 = vpop.permute.xlu1 %1575 }
 0xa42   :  { %v1581_v29 = vadd.f32 %v1576_v0, %v1561_v36 }
 0xa44   :  { %3405 = vtanh.f32 %v1581_v29 }
 0xa45   :  { %v1578_v17 = vpop.permute.xlu0 %1577 }
 0xa46   :  { %v1582_v5 = vadd.f32 %v1578_v17, %v1562_v54 }
 0xa48   :  { %3407 = vtanh.f32 %v1582_v5 }
 0xa4e   :  { %v4327_v16 = vpop.permute.xlu1 %1446 }
 0xa4f   :  { %vm1451_vm7 = vcmp.eq.s32.totalorder %v4327_v16, 1 }
 0xa51   :  { %v3406_v38 = vpop.eup %3405 }
 0xa52   :  { %1587 = vrot.lane.b32.xlu1 %v3406_v38, %s3549_s0  ;;  %v4329_v23 = vpop.permute.xlu0 %1449  ;;  %v4331_v41 = vpop.permute.xlu1 %1600 }
 0xa53   :  { %vm1452_vm8 = vcmp.eq.s32.totalorder %v4329_v23, 1  ;;  %vm1605_vm11 = vcmp.eq.s32.totalorder %v4331_v41, 1 }
 0xa55   :  { %v3408_v20 = vpop.eup %3407 }
 0xa56   :  { %1589 = vrot.lane.b32.xlu0 %v3408_v20, %s3549_s0  ;;  %1609 = vrot.lane.b32.xlu1 %v4259_v40, %s3551_s30  ;;  %v4333_v54 = vpop.permute.xlu0 %1603  ;;  %v1456_v36 = vpop.permute.xlu1 %1455 }
 0xa57   :  { %vm1606_vm12 = vcmp.eq.s32.totalorder %v4333_v54, 1 }
 0xa5a   :  { %1611 = vrot.lane.b32.xlu0 %v4261_v56, %s3551_s30  ;;  %v1458_v0 = vpop.permute.xlu0 %1457 }
 0xa86   :  { %v1434_v38 = vpop.permute.xlu1 %1433 }
 0xa87   :  { %v1439_v17 = vmul.f32 %v4285_v13, %v1434_v38 }
 0xa89   :  { %v4339_v40 = vsel %vm1451_vm7, %v1439_v17, %v1456_v36 }
 0xa8a   :  { %5071 = vst [vmem:[#allocation13_spill] sm:$0xff] %v4339_v40  ;;  %v1436_v56 = vpop.permute.xlu0 %1435  ;;  %1467 = vrot.lane.b32.xlu1 %v4339_v40, %s3550_s4 }
 0xa8b   :  { %v1440_v20 = vmul.f32 %v4289_v61, %v1436_v56 }
 0xa8d   :  { %v4347_v10 = vsel %vm1452_vm8, %v1440_v20, %v1458_v0  ;;  %v1464_v20 = vsel %vm1452_vm8, %v1428_v2, %v1404_v8  ;;  %v4395_v2 = vld [vmem:[%s5045_s2] sm:$0xff]  }
 0xa8e   :  { %5072 = vst [vmem:[#allocation14_spill] sm:$0xff] %v4347_v10  ;;  %1469 = vrot.lane.b32.xlu0 %v4347_v10, %s3550_s4 }
 0xac4   :  { %v1588_v13 = vpop.permute.xlu1 %1587 }
 0xac5   :  { %v1593_v38 = vmul.f32 %v4293_v35, %v1588_v13  ;;  %v1463_v35 = vsel %vm1451_vm7, %v1427_v45, %v1402_v60  ;;  %v1618_v13 = vsel %vm1606_vm12, %v1582_v5, %v1558_v24  ;;  %v5075_v24 = vmov 0.0  }
 0xac8   :  { %v1590_v36 = vpop.permute.xlu0 %1589  ;;  %v1610_v17 = vpop.permute.xlu1 %1609 }
 0xac9   :  { %v4355_v40 = vsel %vm1605_vm11, %v1593_v38, %v1610_v17  ;;  %v1594_v61 = vmul.f32 %v4300_v6, %v1590_v36  ;;  %v1617_v6 = vsel %vm1605_vm11, %v1581_v29, %v1556_v4 }
 0xaca   :  { %5073 = vst [vmem:[#allocation15_spill] sm:$0xff] %v4355_v40  ;;  %1621 = vrot.lane.b32.xlu1 %v4355_v40, %s3550_s4 }
 0xacc   :  { %v1612_v0 = vpop.permute.xlu0 %1611 }
 0xacd   :  { %v4363_v56 = vsel %vm1606_vm12, %v1594_v61, %v1612_v0 }
 0xace   :  { %5074 = vst [vmem:[#allocation16_spill] sm:$0xff] %v4363_v56  ;;  %1623 = vrot.lane.b32.xlu0 %v4363_v56, %s3550_s4  ;;  %1477 = vrot.lane.b32.xlu1 %v1463_v35, %s3551_s30 }
 0xad2   :  { %1479 = vrot.lane.b32.xlu0 %v1464_v20, %s3551_s30  ;;  %1631 = vrot.lane.b32.xlu1 %v1617_v6, %s3551_s30 }
 0xad6   :  { %1633 = vrot.lane.b32.xlu0 %v1618_v13, %s3551_s30 }
 0xafc   :  { %v1468_v60 = vpop.permute.xlu1 %1467 }
 0xafd   :  { %1473 = vst.msk [vmem:[#allocation4] sm:$0xff] %vm274_vm0, %v1468_v60 }
 0xb00   :  { %v1470_v45 = vpop.permute.xlu0 %1469 }
 0xb01   :  { %1474 = vst.msk [vmem:[#allocation4 + $0x8] sm:$0xff] %vm274_vm0, %v1470_v45 }
 0xb04   :  { %v4381_v38 = vld [vmem:[#allocation4] sm:$0xff] }
 0xb08   :  { %v4383_v8 = vld [vmem:[#allocation4 + $0x8] sm:$0xff] }
 0xb09   :  { %v1674_v4 = vpack.c.bf16 %v4383_v8, %v4381_v38 }
 0xb0b   :  { %3199 = vmatmul.mubr.msk.bf16.vlgmr.msra.gmra.mxu0 %vm274_vm0, %v1674_v4 }
 0xb0c   :  { %3211 = vmatpush3.bf16.msra.mxu0 %v4109_v30  ;;  %3214 = vmatprep.mubr.msk.bf16.mxu0 %vm3548_vm1, %v5075_v24 }
 0xb0d   :  { %3212 = vmatprep.subr.bf16.mxu0 %v5075_v24 }
 0xb10   :  { %3213 = vmatpush3.bf16.msra.mxu0 %v4395_v2 }
 0xb11   :  { %3226 = vmatprep.subr.bf16.mxu0 %v5075_v24 }
 0xb3c   :  { %v1622_v29 = vpop.permute.xlu1 %1621 }
 0xb3d   :  { %1627 = vst.msk [vmem:[#allocation6] sm:$0xff] %vm274_vm0, %v1622_v29 }
 0xb40   :  { %v1624_v5 = vpop.permute.xlu0 %1623  ;;  %v1478_v36 = vpop.permute.xlu1 %1477 }
 0xb41   :  { %1628 = vst.msk [vmem:[#allocation6 + $0x8] sm:$0xff] %vm274_vm0, %v1624_v5  ;;  %1483 = vst.msk [vmem:[#allocation5] sm:$0xff] %vm274_vm0, %v1478_v36 }
 0xb44   :  { %v1480_v17 = vpop.permute.xlu0 %1479  ;;  %v1632_v61 = vpop.permute.xlu1 %1631  ;;  %v4404_v35 = vld [vmem:[#allocation6] sm:$0xff] }
 0xb45   :  { %1484 = vst.msk [vmem:[#allocation5 + $0x8] sm:$0xff] %vm274_vm0, %v1480_v17  ;;  %1637 = vst.msk [vmem:[#allocation7] sm:$0xff] %vm274_vm0, %v1632_v61 }
 0xb48   :  { %v1634_v0 = vpop.permute.xlu0 %1633  ;;  %v4406_v20 = vld [vmem:[#allocation6 + $0x8] sm:$0xff] }
 0xb49   :  { %1638 = vst.msk [vmem:[#allocation7 + $0x8] sm:$0xff] %vm274_vm0, %v1634_v0  ;;  %v1816_v6 = vpack.c.bf16 %v4406_v20, %v4404_v35 }
 0xb4b   :  { %3207 = vmatmul.mubr.msk.bf16.vlgmr.msra.gmra.mxu1 %vm274_vm0, %v1816_v6 }
 0xb4c   :  { %3219 = vmatpush3.bf16.msra.mxu1 %v4241_v49  ;;  %3222 = vmatprep.mubr.msk.bf16.mxu1 %vm3548_vm1, %v5075_v24 }
 0xb4d   :  { %3220 = vmatprep.subr.bf16.mxu1 %v5075_v24 }
 0xb50   :  { %3221 = vmatpush3.bf16.msra.mxu1 %v4250_v55 }
 0xb51   :  { %3234 = vmatprep.subr.bf16.mxu1 %v5075_v24 }
 0xbcb   :  { %v1712_v13 = vpop.f32.mrf.mxu0 }
 0xbcc   :  { %v1719_v60 = vadd.f32 %v1712_v13, %v3772_v21 }
 0xbcd   :  { %v3200_v45 = vpop.f32.mrf.mxu0 }
 0xbce   :  { %3409 = vtanh.f32 %v1719_v60 }
 0xbcf   :  { %v1715_v4 = vpop.f32.mrf.mxu0 }
 0xbd0   :  { %v1720_v29 = vadd.f32 %v1715_v4, %v3778_v25  ;;  %v1721_v4 = vld [vmem:[#allocation5] sm:$0xff] }
 0xbd1   :  { %v3201_v5 = vpop.f32.mrf.mxu0 }
 0xbd2   :  { %3411 = vtanh.f32 %v1720_v29  ;;  %v1722_v5 = vld [vmem:[#allocation5 + $0x8] sm:$0xff] }
 0xbdb   :  { %v3410_v36 = vpop.eup %3409 }
 0xbdc   :  { %1749 = vrot.lane.b32.xlu1 %v3410_v36, %s3549_s0  ;;  %v1863_v36 = vld [vmem:[#allocation7] sm:$0xff] }
 0xbdf   :  { %v3412_v17 = vpop.eup %3411 }
 0xbe0   :  { %1751 = vrot.lane.b32.xlu0 %v3412_v17, %s3549_s0 }
 0xc0b   :  { %v1854_v61 = vpop.f32.mrf.mxu1 }
 0xc0c   :  { %v1861_v0 = vadd.f32 %v1854_v61, %v3762_v15  ;;  %v1864_v15 = vld [vmem:[#allocation7 + $0x8] sm:$0xff] }
 0xc0d   :  { %v3208_v6 = vpop.f32.mrf.mxu1 }
 0xc0e   :  { %3413 = vtanh.f32 %v1861_v0 }
 0xc0f   :  { %v1857_v56 = vpop.f32.mrf.mxu1 }
 0xc10   :  { %v1862_v21 = vadd.f32 %v1857_v56, %v3769_v19  ;;  %v2997_v19 = vmul.f32 -1.442695, %v1719_v60  ;;  %v2998_v56 = vmul.f32 -1.442695, %v1720_v29  ;;  %v3000_v60 = vmul.f32 -1.442695, %v1861_v0 }
 0xc11   :  { %v3209_v13 = vpop.f32.mrf.mxu1 }
 0xc12   :  { %3415 = vtanh.f32 %v1862_v21  ;;  %v3001_v29 = vmul.f32 -1.442695, %v1862_v21 }
 0xc13   :  { %3417 = vpow2.f32 %v2997_v19 }
 0xc14   :  { %3419 = vpow2.f32 %v2998_v56 }
 0xc1b   :  { %v3414_v45 = vpop.eup %3413 }
 0xc1c   :  { %1891 = vrot.lane.b32.xlu1 %v3414_v45, %s3549_s0 }
 0xc1f   :  { %v3416_v25 = vpop.eup %3415 }
 0xc20   :  { %1893 = vrot.lane.b32.xlu0 %v3416_v25, %s3549_s0  ;;  %1739 = vrot.lane.b32.xlu1 %v1721_v4, %s3550_s4  ;;  %v3418_v17 = vpop.eup %3417 }
 0xc21   :  { %v1729_v61 = vadd.f32 1.0, %v3418_v17  ;;  %v3420_v6 = vpop.eup %3419 }
 0xc22   :  { %v1730_v13 = vadd.f32 1.0, %v3420_v6 }
 0xc23   :  { %3421 = vrcp.f32 %v1729_v61 }
 0xc24   :  { %1741 = vrot.lane.b32.xlu0 %v1722_v5, %s3550_s4  ;;  %1881 = vrot.lane.b32.xlu1 %v1863_v36, %s3550_s4  ;;  %3423 = vrcp.f32 %v1730_v13 }
 0xc25   :  { %3425 = vpow2.f32 %v3000_v60 }
 0xc26   :  { %3427 = vpow2.f32 %v3001_v29 }
 0xc28   :  { %1883 = vrot.lane.b32.xlu0 %v1864_v15, %s3550_s4 }
 0xc30   :  { %v3422_v45 = vpop.eup %3421 }
 0xc31   :  { %v3424_v5 = vpop.eup %3423 }
 0xc32   :  { %v3426_v15 = vpop.eup %3425 }
 0xc33   :  { %v1871_v19 = vadd.f32 1.0, %v3426_v15  ;;  %v3428_v56 = vpop.eup %3427 }
 0xc34   :  { %v1872_v17 = vadd.f32 1.0, %v3428_v56 }
 0xc35   :  { %3429 = vrcp.f32 %v1871_v19 }
 0xc36   :  { %3431 = vrcp.f32 %v1872_v17 }
 0xc42   :  { %v3430_v61 = vpop.eup %3429 }
 0xc4e   :  { %v1750_v25 = vpop.permute.xlu1 %1749 }
 0xc4f   :  { %v1755_v4 = vmul.f32 %v3422_v45, %v1750_v25  ;;  %v3432_v25 = vpop.eup %3431 }
 0xc51   :  { %1759 = vrot.lane.b32.xlu1 %v1755_v4, %s3550_s4 }
 0xc52   :  { %v1752_v36 = vpop.permute.xlu0 %1751 }
 0xc53   :  { %v1756_v40 = vmul.f32 %v3424_v5, %v1752_v36 }
 0xc55   :  { %1761 = vrot.lane.b32.xlu0 %v1756_v40, %s3550_s4 }
 0xc8e   :  { %v1892_v6 = vpop.permute.xlu1 %1891 }
 0xc8f   :  { %v1897_v13 = vmul.f32 %v3430_v61, %v1892_v6 }
 0xc91   :  { %1901 = vrot.lane.b32.xlu1 %v1897_v13, %s3550_s4 }
 0xc92   :  { %v1894_v4 = vpop.permute.xlu0 %1893  ;;  %v1740_v40 = vpop.permute.xlu1 %1739 }
 0xc93   :  { %v1898_v36 = vmul.f32 %v3432_v25, %v1894_v4  ;;  %v1745_v60 = vmul.f32 %v3422_v45, %v1740_v40 }
 0xc95   :  { %1903 = vrot.lane.b32.xlu0 %v1898_v36, %s3550_s4  ;;  %1781 = vrot.lane.b32.xlu1 %v4381_v38, %s3551_s30 }
 0xc96   :  { %v1742_v0 = vpop.permute.xlu0 %1741  ;;  %v1882_v21 = vpop.permute.xlu1 %1881 }
 0xc97   :  { %v1746_v56 = vmul.f32 %v3424_v5, %v1742_v0  ;;  %v1887_v38 = vmul.f32 %v3430_v61, %v1882_v21 }
 0xc99   :  { %1783 = vrot.lane.b32.xlu0 %v4383_v8, %s3551_s30 }
 0xc9a   :  { %v1884_v29 = vpop.permute.xlu0 %1883 }
 0xc9b   :  { %v1888_v10 = vmul.f32 %v3432_v25, %v1884_v29 }
 0xcc3   :  { %v1760_v15 = vpop.permute.xlu1 %1759 }
 0xcc4   :  { %v1765_v19 = vadd.f32 %v1760_v15, %v1745_v60 }
 0xcc6   :  { %3433 = vtanh.f32 %v1765_v19 }
 0xcc7   :  { %v1762_v17 = vpop.permute.xlu0 %1761 }
 0xcc8   :  { %v1766_v6 = vadd.f32 %v1762_v17, %v1746_v56 }
 0xcca   :  { %3435 = vtanh.f32 %v1766_v6 }
 0xcd3   :  { %v3434_v13 = vpop.eup %3433 }
 0xcd4   :  { %1771 = vrot.lane.b32.xlu1 %v3434_v13, %s3549_s0 }
 0xcd7   :  { %v3436_v4 = vpop.eup %3435 }
 0xcd8   :  { %1773 = vrot.lane.b32.xlu0 %v3436_v4, %s3549_s0 }
 0xd03   :  { %v1902_v8 = vpop.permute.xlu1 %1901 }
 0xd04   :  { %v1907_v36 = vadd.f32 %v1902_v8, %v1887_v38 }
 0xd06   :  { %3437 = vtanh.f32 %v1907_v36 }
 0xd07   :  { %v1904_v1 = vpop.permute.xlu0 %1903  ;;  %v1782_v56 = vpop.permute.xlu1 %1781 }
 0xd08   :  { %v1908_v12 = vadd.f32 %v1904_v1, %v1888_v10 }
 0xd0a   :  { %3439 = vtanh.f32 %v1908_v12 }
 0xd0b   :  { %v1784_v17 = vpop.permute.xlu0 %1783 }
 0xd13   :  { %v3438_v60 = vpop.eup %3437 }
 0xd14   :  { %1913 = vrot.lane.b32.xlu1 %v3438_v60, %s3549_s0 }
 0xd17   :  { %v3440_v15 = vpop.eup %3439 }
 0xd18   :  { %1915 = vrot.lane.b32.xlu0 %v3440_v15, %s3549_s0  ;;  %1923 = vrot.lane.b32.xlu1 %v4404_v35, %s3551_s30 }
 0xd1c   :  { %1925 = vrot.lane.b32.xlu0 %v4406_v20, %s3551_s30 }
 0xd46   :  { %v1772_v13 = vpop.permute.xlu1 %1771 }
 0xd47   :  { %v1777_v4 = vmul.f32 %v3422_v45, %v1772_v13  ;;  %v1789_v13 = vsel %vm1605_vm11, %v1765_v19, %v1740_v40 }
 0xd49   :  { %v4448_v1 = vsel %vm1605_vm11, %v1777_v4, %v1782_v56  ;;  %v1931_v4 = vsel %vm1451_vm7, %v1907_v36, %v1882_v21 }
 0xd4a   :  { %v1774_v10 = vpop.permute.xlu0 %1773  ;;  %1793 = vrot.lane.b32.xlu1 %v4448_v1, %s3550_s4 }
 0xd4b   :  { %v1778_v38 = vmul.f32 %v3424_v5, %v1774_v10 }
 0xd4d   :  { %v4454_v8 = vsel %vm1606_vm12, %v1778_v38, %v1784_v17 }
 0xd4e   :  { %1795 = vrot.lane.b32.xlu0 %v4454_v8, %s3550_s4 }
 0xd86   :  { %v1914_v35 = vpop.permute.xlu1 %1913 }
 0xd87   :  { %v1919_v20 = vmul.f32 %v3430_v61, %v1914_v35  ;;  %v1790_v61 = vsel %vm1606_vm12, %v1766_v6, %v1742_v0 }
 0xd8a   :  { %v1916_v60 = vpop.permute.xlu0 %1915  ;;  %v1924_v45 = vpop.permute.xlu1 %1923 }
 0xd8b   :  { %v4460_v15 = vsel %vm1451_vm7, %v1919_v20, %v1924_v45  ;;  %v1920_v56 = vmul.f32 %v3432_v25, %v1916_v60  ;;  %v1932_v25 = vsel %vm1452_vm8, %v1908_v12, %v1884_v29 }
 0xd8c   :  { %1935 = vrot.lane.b32.xlu1 %v4460_v15, %s3550_s4 }
 0xd8e   :  { %v1926_v5 = vpop.permute.xlu0 %1925 }
 0xd8f   :  { %v4466_v17 = vsel %vm1452_vm8, %v1920_v56, %v1926_v5 }
 0xd90   :  { %1937 = vrot.lane.b32.xlu0 %v4466_v17, %s3550_s4  ;;  %1803 = vrot.lane.b32.xlu1 %v1789_v13, %s3551_s30 }
 0xd94   :  { %1805 = vrot.lane.b32.xlu0 %v1790_v61, %s3551_s30  ;;  %1945 = vrot.lane.b32.xlu1 %v1931_v4, %s3551_s30 }
 0xd98   :  { %1947 = vrot.lane.b32.xlu0 %v1932_v25, %s3551_s30 }
 0xdbc   :  { %v1794_v41 = vpop.permute.xlu1 %1793 }
 0xdbd   :  { %1799 = vst.msk [vmem:[#allocation4] sm:$0xff] %vm274_vm0, %v1794_v41 }
 0xdc0   :  { %v1796_v40 = vpop.permute.xlu0 %1795 }
 0xdc1   :  { %1800 = vst.msk [vmem:[#allocation4 + $0x8] sm:$0xff] %vm274_vm0, %v1796_v40 }
 0xdc4   :  { %v4484_v54 = vld [vmem:[#allocation4] sm:$0xff] }
 0xdc8   :  { %v4486_v0 = vld [vmem:[#allocation4 + $0x8] sm:$0xff] }
 0xdc9   :  { %v1986_v16 = vpack.c.bf16 %v4486_v0, %v4484_v54 }
 0xdcb   :  { %3215 = vmatmul.mubr.msk.bf16.vlgmr.msra.gmra.mxu0 %vm274_vm0, %v1986_v16 }
 0xdcc   :  { %3227 = vmatpush3.bf16.msra.mxu0 %v4109_v30  ;;  %3230 = vmatprep.mubr.msk.bf16.mxu0 %vm3548_vm1, %v5075_v24 }
 0xdcd   :  { %3228 = vmatprep.subr.bf16.mxu0 %v5075_v24 }
 0xdd0   :  { %3229 = vmatpush3.bf16.msra.mxu0 %v4395_v2 }
 0xdd1   :  { %3242 = vmatprep.subr.bf16.mxu0 %v5075_v24 }
 0xdfe   :  { %v1936_v12 = vpop.permute.xlu1 %1935 }
 0xdff   :  { %1941 = vst.msk [vmem:[#allocation6] sm:$0xff] %vm274_vm0, %v1936_v12 }
 0xe02   :  { %v1938_v23 = vpop.permute.xlu0 %1937  ;;  %v1804_v21 = vpop.permute.xlu1 %1803 }
 0xe03   :  { %1942 = vst.msk [vmem:[#allocation6 + $0x8] sm:$0xff] %vm274_vm0, %v1938_v23  ;;  %1809 = vst.msk [vmem:[#allocation5] sm:$0xff] %vm274_vm0, %v1804_v21 }
 0xe06   :  { %v1806_v29 = vpop.permute.xlu0 %1805  ;;  %v1946_v30 = vpop.permute.xlu1 %1945  ;;  %v4502_v6 = vld [vmem:[#allocation6] sm:$0xff] }
 0xe07   :  { %1810 = vst.msk [vmem:[#allocation5 + $0x8] sm:$0xff] %vm274_vm0, %v1806_v29  ;;  %1951 = vst.msk [vmem:[#allocation7] sm:$0xff] %vm274_vm0, %v1946_v30 }
 0xe0a   :  { %v1948_v19 = vpop.permute.xlu0 %1947  ;;  %v4504_v36 = vld [vmem:[#allocation6 + $0x8] sm:$0xff]  ;;  %v2033_v40 = vld [vmem:[#allocation5] sm:$0xff] }
 0xe0b   :  { %1952 = vst.msk [vmem:[#allocation7 + $0x8] sm:$0xff] %vm274_vm0, %v1948_v19  ;;  %v2128_v10 = vpack.c.bf16 %v4504_v36, %v4502_v6 }
 0xe0d   :  { %3223 = vmatmul.mubr.msk.bf16.vlgmr.msra.gmra.mxu1 %vm274_vm0, %v2128_v10 }
 0xe0e   :  { %3235 = vmatpush3.bf16.msra.mxu1 %v4241_v49  ;;  %3238 = vmatprep.mubr.msk.bf16.mxu1 %vm3548_vm1, %v5075_v24  ;;  %v2034_v16 = vld [vmem:[#allocation5 + $0x8] sm:$0xff]  ;;  %v2175_v12 = vld [vmem:[#allocation7] sm:$0xff] }
 0xe0f   :  { %3236 = vmatprep.subr.bf16.mxu1 %v5075_v24 }
 0xe12   :  { %3237 = vmatpush3.bf16.msra.mxu1 %v4250_v55  ;;  %v2176_v23 = vld [vmem:[#allocation7 + $0x8] sm:$0xff] }
 0xe13   :  { %3250 = vmatprep.subr.bf16.mxu1 %v5075_v24 }
 0xe8b   :  { %v2024_v38 = vpop.f32.mrf.mxu0 }
 0xe8c   :  { %v2031_v35 = vadd.f32 %v2024_v38, %v3784_v31 }
 0xe8d   :  { %v3216_v20 = vpop.f32.mrf.mxu0 }
 0xe8e   :  { %3441 = vtanh.f32 %v2031_v35 }
 0xe8f   :  { %v2027_v60 = vpop.f32.mrf.mxu0 }
 0xe90   :  { %v2032_v45 = vadd.f32 %v2027_v60, %v3790_v37 }
 0xe91   :  { %v3217_v56 = vpop.f32.mrf.mxu0 }
 0xe92   :  { %3443 = vtanh.f32 %v2032_v45 }
 0xe9b   :  { %v3442_v49 = vpop.eup %3441 }
 0xe9c   :  { %2061 = vrot.lane.b32.xlu1 %v3442_v49, %s3549_s0 }
 0xe9f   :  { %v3444_v5 = vpop.eup %3443 }
 0xea0   :  { %2063 = vrot.lane.b32.xlu0 %v3444_v5, %s3549_s0 }
 0xecd   :  { %v2166_v13 = vpop.f32.mrf.mxu1 }
 0xece   :  { %v2173_v55 = vadd.f32 %v2166_v13, %v3748_v58  ;;  %v3011_v58 = vmul.f32 -1.442695, %v2031_v35 }
 0xecf   :  { %v3224_v61 = vpop.f32.mrf.mxu1 }
 0xed0   :  { %3445 = vtanh.f32 %v2173_v55  ;;  %v3014_v49 = vmul.f32 -1.442695, %v2173_v55 }
 0xed1   :  { %v2169_v4 = vpop.f32.mrf.mxu1 }
 0xed2   :  { %v2174_v31 = vadd.f32 %v2169_v4, %v3755_v63  ;;  %v3012_v63 = vmul.f32 -1.442695, %v2032_v45 }
 0xed3   :  { %v3225_v25 = vpop.f32.mrf.mxu1 }
 0xed4   :  { %3447 = vtanh.f32 %v2174_v31  ;;  %v3015_v45 = vmul.f32 -1.442695, %v2174_v31 }
 0xed5   :  { %3449 = vpow2.f32 %v3011_v58 }
 0xed6   :  { %3451 = vpow2.f32 %v3012_v63 }
 0xedd   :  { %v3446_v41 = vpop.eup %3445 }
 0xede   :  { %2203 = vrot.lane.b32.xlu1 %v3446_v41, %s3549_s0 }
 0xee1   :  { %v3448_v37 = vpop.eup %3447 }
 0xee2   :  { %2205 = vrot.lane.b32.xlu0 %v3448_v37, %s3549_s0  ;;  %2051 = vrot.lane.b32.xlu1 %v2033_v40, %s3550_s4  ;;  %v3450_v21 = vpop.eup %3449 }
 0xee3   :  { %v2041_v29 = vadd.f32 1.0, %v3450_v21  ;;  %v3452_v30 = vpop.eup %3451 }
 0xee4   :  { %v2042_v19 = vadd.f32 1.0, %v3452_v30 }
 0xee5   :  { %3453 = vrcp.f32 %v2041_v29 }
 0xee6   :  { %2053 = vrot.lane.b32.xlu0 %v2034_v16, %s3550_s4  ;;  %2193 = vrot.lane.b32.xlu1 %v2175_v12, %s3550_s4  ;;  %3455 = vrcp.f32 %v2042_v19 }
 0xee7   :  { %3457 = vpow2.f32 %v3014_v49 }
 0xee8   :  { %3459 = vpow2.f32 %v3015_v45 }
 0xeea   :  { %2195 = vrot.lane.b32.xlu0 %v2176_v23, %s3550_s4 }
 0xef2   :  { %v3454_v10 = vpop.eup %3453 }
 0xef3   :  { %v3456_v60 = vpop.eup %3455 }
 0xef4   :  { %v3458_v5 = vpop.eup %3457 }
 0xef5   :  { %v2183_v13 = vadd.f32 1.0, %v3458_v5  ;;  %v3460_v61 = vpop.eup %3459 }
 0xef6   :  { %v2184_v4 = vadd.f32 1.0, %v3460_v61 }
 0xef7   :  { %3461 = vrcp.f32 %v2183_v13 }
 0xef8   :  { %3463 = vrcp.f32 %v2184_v4 }
 0xf04   :  { %v3462_v25 = vpop.eup %3461 }
 0xf05   :  { %v3464_v40 = vpop.eup %3463 }
 0xf0e   :  { %v2062_v38 = vpop.permute.xlu1 %2061 }
 0xf0f   :  { %v2067_v20 = vmul.f32 %v3454_v10, %v2062_v38 }
 0xf11   :  { %2071 = vrot.lane.b32.xlu1 %v2067_v20, %s3550_s4 }
 0xf12   :  { %v2064_v56 = vpop.permute.xlu0 %2063 }
 0xf13   :  { %v2068_v35 = vmul.f32 %v3456_v60, %v2064_v56 }
 0xf15   :  { %2073 = vrot.lane.b32.xlu0 %v2068_v35, %s3550_s4 }
 0xf50   :  { %v2204_v41 = vpop.permute.xlu1 %2203 }
 0xf51   :  { %v2209_v37 = vmul.f32 %v3462_v25, %v2204_v41 }
 0xf53   :  { %2213 = vrot.lane.b32.xlu1 %v2209_v37, %s3550_s4 }
 0xf54   :  { %v2206_v16 = vpop.permute.xlu0 %2205  ;;  %v2052_v55 = vpop.permute.xlu1 %2051 }
 0xf55   :  { %v2210_v12 = vmul.f32 %v3464_v40, %v2206_v16  ;;  %v2057_v23 = vmul.f32 %v3454_v10, %v2052_v55 }
 0xf57   :  { %2215 = vrot.lane.b32.xlu0 %v2210_v12, %s3550_s4  ;;  %2093 = vrot.lane.b32.xlu1 %v4484_v54, %s3551_s30 }
 0xf58   :  { %v2054_v31 = vpop.permute.xlu0 %2053  ;;  %v2194_v58 = vpop.permute.xlu1 %2193 }
 0xf59   :  { %v2058_v30 = vmul.f32 %v3456_v60, %v2054_v31  ;;  %v2199_v54 = vmul.f32 %v3462_v25, %v2194_v58 }
 0xf5b   :  { %2095 = vrot.lane.b32.xlu0 %v4486_v0, %s3551_s30 }
 0xf5c   :  { %v2196_v63 = vpop.permute.xlu0 %2195 }
 0xf5d   :  { %v2200_v49 = vmul.f32 %v3464_v40, %v2196_v63 }
 0xf83   :  { %v2072_v21 = vpop.permute.xlu1 %2071 }
 0xf84   :  { %v2077_v29 = vadd.f32 %v2072_v21, %v2057_v23 }
 0xf86   :  { %3465 = vtanh.f32 %v2077_v29 }
 0xf87   :  { %v2074_v19 = vpop.permute.xlu0 %2073 }
 0xf88   :  { %v2078_v38 = vadd.f32 %v2074_v19, %v2058_v30 }
 0xf8a   :  { %3467 = vtanh.f32 %v2078_v38 }
 0xf93   :  { %v3466_v20 = vpop.eup %3465 }
 0xf94   :  { %2083 = vrot.lane.b32.xlu1 %v3466_v20, %s3549_s0 }
 0xf97   :  { %v3468_v56 = vpop.eup %3467 }
 0xf98   :  { %2085 = vrot.lane.b32.xlu0 %v3468_v56, %s3549_s0 }
 0xfc5   :  { %v2214_v0 = vpop.permute.xlu1 %2213 }
 0xfc6   :  { %v2219_v35 = vadd.f32 %v2214_v0, %v2199_v54  ;;  %v2101_v0 = vsel %vm1267_vm5, %v2077_v29, %v2052_v55 }
 0xfc8   :  { %3469 = vtanh.f32 %v2219_v35 }
 0xfc9   :  { %v2216_v45 = vpop.permute.xlu0 %2215  ;;  %v2094_v4 = vpop.permute.xlu1 %2093 }
 0xfca   :  { %v2220_v5 = vadd.f32 %v2216_v45, %v2200_v49  ;;  %v2243_v49 = vsel %vm1113_vm13, %v2219_v35, %v2194_v58 }
 0xfcc   :  { %3471 = vtanh.f32 %v2220_v5 }
 0xfcd   :  { %v2096_v41 = vpop.permute.xlu0 %2095 }
 0xfd5   :  { %v3470_v13 = vpop.eup %3469 }
 0xfd6   :  { %2225 = vrot.lane.b32.xlu1 %v3470_v13, %s3549_s0 }
 0xfd9   :  { %v3472_v61 = vpop.eup %3471 }
 0xfda   :  { %2227 = vrot.lane.b32.xlu0 %v3472_v61, %s3549_s0  ;;  %2235 = vrot.lane.b32.xlu1 %v4502_v6, %s3551_s30  ;;  %v3544_v61 = vld [vmem:[%s5047_s3 + $0x8] sm:$0xff]  }
 0xfde   :  { %2237 = vrot.lane.b32.xlu0 %v4504_v36, %s3551_s30 }
0x1006   :  { %v2084_v37 = vpop.permute.xlu1 %2083 }
0x1007   :  { %v2089_v16 = vmul.f32 %v3454_v10, %v2084_v37 }
0x1009   :  { %v4546_v12 = vsel %vm1267_vm5, %v2089_v16, %v2094_v4  ;;  %v3545_v4 = vld [vmem:[%s5047_s3] sm:$0xff]  }
0x100a   :  { %v2086_v23 = vpop.permute.xlu0 %2085  ;;  %2105 = vrot.lane.b32.xlu1 %v4546_v12, %s3550_s4 }
0x100b   :  { %v2090_v21 = vmul.f32 %v3456_v60, %v2086_v23 }
0x100d   :  { %v4552_v30 = vsel %vm1268_vm6, %v2090_v21, %v2096_v41 }
0x100e   :  { %2107 = vrot.lane.b32.xlu0 %v4552_v30, %s3550_s4 }
0x1048   :  { %v2226_v6 = vpop.permute.xlu1 %2225 }
0x1049   :  { %v2231_v36 = vmul.f32 %v3462_v25, %v2226_v6  ;;  %v2102_v25 = vsel %vm1268_vm6, %v2078_v38, %v2054_v31 }
0x104c   :  { %v2228_v19 = vpop.permute.xlu0 %2227  ;;  %v2236_v10 = vpop.permute.xlu1 %2235 }
0x104d   :  { %v4558_v20 = vsel %vm1113_vm13, %v2231_v36, %v2236_v10  ;;  %v2232_v56 = vmul.f32 %v3464_v40, %v2228_v19  ;;  %v2244_v40 = vsel %vm1114_vm14, %v2220_v5, %v2196_v63 }
0x104e   :  { %2247 = vrot.lane.b32.xlu1 %v4558_v20, %s3550_s4 }
0x1050   :  { %v2238_v60 = vpop.permute.xlu0 %2237 }
0x1051   :  { %v4564_v54 = vsel %vm1114_vm14, %v2232_v56, %v2238_v60 }
0x1052   :  { %2249 = vrot.lane.b32.xlu0 %v4564_v54, %s3550_s4  ;;  %2115 = vrot.lane.b32.xlu1 %v2101_v0, %s3551_s30 }
0x1056   :  { %2117 = vrot.lane.b32.xlu0 %v2102_v25, %s3551_s30  ;;  %2257 = vrot.lane.b32.xlu1 %v2243_v49, %s3551_s30 }
0x105a   :  { %2259 = vrot.lane.b32.xlu0 %v2244_v40, %s3551_s30 }
0x107c   :  { %v2106_v47 = vpop.permute.xlu1 %2105 }
0x107d   :  { %2111 = vst.msk [vmem:[#allocation4] sm:$0xff] %vm274_vm0, %v2106_v47 }
0x1080   :  { %v2108_v55 = vpop.permute.xlu0 %2107 }
0x1081   :  { %2112 = vst.msk [vmem:[#allocation4 + $0x8] sm:$0xff] %vm274_vm0, %v2108_v55 }
0x1084   :  { %v4582_v28 = vld [vmem:[#allocation4] sm:$0xff] }
0x1088   :  { %v4584_v31 = vld [vmem:[#allocation4 + $0x8] sm:$0xff] }
0x1089   :  { %v2298_v34 = vpack.c.bf16 %v4584_v31, %v4582_v28 }
0x108b   :  { %3231 = vmatmul.mubr.msk.bf16.vlgmr.msra.gmra.mxu0 %vm274_vm0, %v2298_v34 }
0x108c   :  { %3243 = vmatpush3.bf16.msra.mxu0 %v3543_v22  ;;  %3246 = vmatprep.mubr.msk.bf16.mxu0 %vm3548_vm1, %v5075_v24 }
0x108d   :  { %3244 = vmatprep.subr.bf16.mxu0 %v5075_v24 }
0x1090   :  { %3245 = vmatpush3.bf16.msra.mxu0 %v4395_v2 }
0x10c0   :  { %v2248_v58 = vpop.permute.xlu1 %2247 }
0x10c1   :  { %2253 = vst.msk [vmem:[#allocation6] sm:$0xff] %vm274_vm0, %v2248_v58 }
0x10c4   :  { %v2250_v63 = vpop.permute.xlu0 %2249  ;;  %v2116_v29 = vpop.permute.xlu1 %2115 }
0x10c5   :  { %2254 = vst.msk [vmem:[#allocation6 + $0x8] sm:$0xff] %vm274_vm0, %v2250_v63  ;;  %2121 = vst.msk [vmem:[#allocation5] sm:$0xff] %vm274_vm0, %v2116_v29 }
0x10c8   :  { %v2118_v38 = vpop.permute.xlu0 %2117  ;;  %v2258_v35 = vpop.permute.xlu1 %2257  ;;  %v4601_v5 = vld [vmem:[#allocation6] sm:$0xff] }
0x10c9   :  { %2122 = vst.msk [vmem:[#allocation5 + $0x8] sm:$0xff] %vm274_vm0, %v2118_v38  ;;  %2263 = vst.msk [vmem:[#allocation7] sm:$0xff] %vm274_vm0, %v2258_v35 }
0x10cc   :  { %v2260_v45 = vpop.permute.xlu0 %2259  ;;  %v4603_v13 = vld [vmem:[#allocation6 + $0x8] sm:$0xff]  ;;  %v2345_v49 = vld [vmem:[#allocation5] sm:$0xff] }
0x10cd   :  { %2264 = vst.msk [vmem:[#allocation7 + $0x8] sm:$0xff] %vm274_vm0, %v2260_v45  ;;  %v2440_v2 = vpack.c.bf16 %v4603_v13, %v4601_v5 }
0x10cf   :  { %3239 = vmatmul.mubr.msk.bf16.vlgmr.msra.gmra.mxu1 %vm274_vm0, %v2440_v2 }
0x10d0   :  { %3251 = vmatpush3.bf16.msra.mxu1 %v3544_v61  ;;  %3254 = vmatprep.mubr.msk.bf16.mxu1 %vm3548_vm1, %v5075_v24  ;;  %v2346_v40 = vld [vmem:[#allocation5 + $0x8] sm:$0xff]  ;;  %v2487_v47 = vld [vmem:[#allocation7] sm:$0xff]  ;;  %vm636_vm1 = vcmask 257024  }
0x10d1   :  { %3252 = vmatprep.subr.bf16.mxu1 %v5075_v24 }
0x10d4   :  { %3253 = vmatpush3.bf16.msra.mxu1 %v3545_v4  ;;  %v2488_v55 = vld [vmem:[#allocation7 + $0x8] sm:$0xff] }
0x114b   :  { %v2336_v41 = vpop.f32.mrf.mxu0 }
0x114c   :  { %v2343_v37 = vadd.f32 %v2336_v41, %v3796_v44 }
0x114d   :  { %v3232_v16 = vpop.f32.mrf.mxu0 }
0x114e   :  { %3473 = vtanh.f32 %v2343_v37 }
0x114f   :  { %v2339_v23 = vpop.f32.mrf.mxu0 }
0x1150   :  { %v2344_v21 = vadd.f32 %v2339_v23, %v3802_v51 }
0x1151   :  { %v3233_v6 = vpop.f32.mrf.mxu0 }
0x1152   :  { %3475 = vtanh.f32 %v2344_v21 }
0x115b   :  { %v3474_v36 = vpop.eup %3473 }
0x115c   :  { %2373 = vrot.lane.b32.xlu1 %v3474_v36, %s3549_s0 }
0x115f   :  { %v3476_v19 = vpop.eup %3475 }
0x1160   :  { %2375 = vrot.lane.b32.xlu0 %v3476_v19, %s3549_s0 }
0x118f   :  { %v2478_v24 = vpop.f32.mrf.mxu1 }
0x1190   :  { %v2485_v10 = vadd.f32 %v2478_v24, %v3736_v46  ;;  %v3025_v46 = vmul.f32 -1.442695, %v2343_v37 }
0x1191   :  { %v3240_v56 = vpop.f32.mrf.mxu1 }
0x1192   :  { %3477 = vtanh.f32 %v2485_v10  ;;  %v3028_v4 = vmul.f32 -1.442695, %v2485_v10 }
0x1193   :  { %v2481_v60 = vpop.f32.mrf.mxu1 }
0x1194   :  { %v2486_v44 = vadd.f32 %v2481_v60, %v3742_v52  ;;  %v3026_v52 = vmul.f32 -1.442695, %v2344_v21 }
0x1195   :  { %v3241_v0 = vpop.f32.mrf.mxu1 }
0x1196   :  { %3479 = vtanh.f32 %v2486_v44  ;;  %v3029_v41 = vmul.f32 -1.442695, %v2486_v44 }
0x1197   :  { %3481 = vpow2.f32 %v3025_v46 }
0x1198   :  { %3483 = vpow2.f32 %v3026_v52 }
0x119f   :  { %v3478_v25 = vpop.eup %3477 }
0x11a0   :  { %2515 = vrot.lane.b32.xlu1 %v3478_v25, %s3549_s0 }
0x11a3   :  { %v3480_v51 = vpop.eup %3479 }
0x11a4   :  { %2517 = vrot.lane.b32.xlu0 %v3480_v51, %s3549_s0  ;;  %2363 = vrot.lane.b32.xlu1 %v2345_v49, %s3550_s4  ;;  %v3482_v34 = vpop.eup %3481 }
0x11a5   :  { %v2353_v22 = vadd.f32 1.0, %v3482_v34  ;;  %v3484_v58 = vpop.eup %3483 }
0x11a6   :  { %v2354_v63 = vadd.f32 1.0, %v3484_v58 }
0x11a7   :  { %3485 = vrcp.f32 %v2353_v22 }
0x11a8   :  { %2365 = vrot.lane.b32.xlu0 %v2346_v40, %s3550_s4  ;;  %2505 = vrot.lane.b32.xlu1 %v2487_v47, %s3550_s4  ;;  %3487 = vrcp.f32 %v2354_v63 }
0x11a9   :  { %3489 = vpow2.f32 %v3028_v4 }
0x11aa   :  { %3491 = vpow2.f32 %v3029_v41 }
0x11ac   :  { %2507 = vrot.lane.b32.xlu0 %v2488_v55, %s3550_s4 }
0x11b4   :  { %v4630_v29 = vpop.eup %3485 }
0x11b5   :  { %v4634_v45 = vpop.eup %3487 }
0x11b6   :  { %v3490_v37 = vpop.eup %3489 }
0x11b7   :  { %v2495_v16 = vadd.f32 1.0, %v3490_v37  ;;  %v3492_v23 = vpop.eup %3491 }
0x11b8   :  { %v2496_v21 = vadd.f32 1.0, %v3492_v23 }
0x11b9   :  { %3493 = vrcp.f32 %v2495_v16 }
0x11ba   :  { %3495 = vrcp.f32 %v2496_v21 }
0x11c6   :  { %v3494_v6 = vpop.eup %3493 }
0x11c7   :  { %v3496_v24 = vpop.eup %3495 }
0x11ce   :  { %v2374_v38 = vpop.permute.xlu1 %2373 }
0x11cf   :  { %v2379_v35 = vmul.f32 %v4630_v29, %v2374_v38 }
0x11d1   :  { %2383 = vrot.lane.b32.xlu1 %v2379_v35, %s3550_s4 }
0x11d2   :  { %v2376_v2 = vpop.permute.xlu0 %2375 }
0x11d3   :  { %v2380_v61 = vmul.f32 %v4634_v45, %v2376_v2 }
0x11d5   :  { %2385 = vrot.lane.b32.xlu0 %v2380_v61, %s3550_s4 }
0x1212   :  { %v2516_v36 = vpop.permute.xlu1 %2515 }
0x1213   :  { %v2521_v19 = vmul.f32 %v3494_v6, %v2516_v36 }
0x1215   :  { %2525 = vrot.lane.b32.xlu1 %v2521_v19, %s3550_s4 }
0x1216   :  { %v2518_v56 = vpop.permute.xlu0 %2517  ;;  %v2364_v10 = vpop.permute.xlu1 %2363 }
0x1217   :  { %v2522_v60 = vmul.f32 %v3496_v24, %v2518_v56  ;;  %v2369_v25 = vmul.f32 %v4630_v29, %v2364_v10 }
0x1219   :  { %2527 = vrot.lane.b32.xlu0 %v2522_v60, %s3550_s4  ;;  %2405 = vrot.lane.b32.xlu1 %v4582_v28, %s3551_s30 }
0x121a   :  { %v2366_v44 = vpop.permute.xlu0 %2365  ;;  %v2506_v0 = vpop.permute.xlu1 %2505 }
0x121b   :  { %v2370_v47 = vmul.f32 %v4634_v45, %v2366_v44  ;;  %v2511_v22 = vmul.f32 %v3494_v6, %v2506_v0 }
0x121d   :  { %2407 = vrot.lane.b32.xlu0 %v4584_v31, %s3551_s30 }
0x121e   :  { %v2508_v51 = vpop.permute.xlu0 %2507 }
0x121f   :  { %v2512_v38 = vmul.f32 %v3496_v24, %v2508_v51 }
0x1243   :  { %v2384_v49 = vpop.permute.xlu1 %2383 }
0x1244   :  { %v2389_v40 = vadd.f32 %v2384_v49, %v2369_v25 }
0x1246   :  { %3497 = vtanh.f32 %v2389_v40  ;;  %v2413_v46 = vsel %vm929_vm3, %v2389_v40, %v2364_v10 }
0x1247   :  { %v2386_v55 = vpop.permute.xlu0 %2385 }
0x1248   :  { %v2390_v52 = vadd.f32 %v2386_v55, %v2370_v47 }
0x124a   :  { %3499 = vtanh.f32 %v2390_v52  ;;  %v2414_v28 = vsel %vm930_vm4, %v2390_v52, %v2366_v44 }
0x1253   :  { %v3498_v31 = vpop.eup %3497 }
0x1254   :  { %2395 = vrot.lane.b32.xlu1 %v3498_v31, %s3549_s0 }
0x1257   :  { %v3500_v34 = vpop.eup %3499 }
0x1258   :  { %2397 = vrot.lane.b32.xlu0 %v3500_v34, %s3549_s0 }
0x1287   :  { %v2526_v58 = vpop.permute.xlu1 %2525 }
0x1288   :  { %v2531_v63 = vadd.f32 %v2526_v58, %v2511_v22 }
0x128a   :  { %3501 = vtanh.f32 %v2531_v63 }
0x128b   :  { %v2528_v35 = vpop.permute.xlu0 %2527  ;;  %v2406_v41 = vpop.permute.xlu1 %2405 }
0x128c   :  { %v2532_v2 = vadd.f32 %v2528_v35, %v2512_v38 }
0x128e   :  { %3503 = vtanh.f32 %v2532_v2 }
0x128f   :  { %v2408_v37 = vpop.permute.xlu0 %2407 }
0x1297   :  { %v3502_v61 = vpop.eup %3501 }
0x1298   :  { %2537 = vrot.lane.b32.xlu1 %v3502_v61, %s3549_s0 }
0x129b   :  { %v3504_v4 = vpop.eup %3503 }
0x129c   :  { %2539 = vrot.lane.b32.xlu0 %v3504_v4, %s3549_s0  ;;  %2547 = vrot.lane.b32.xlu1 %v4601_v5, %s3551_s30 }
0x12a0   :  { %2549 = vrot.lane.b32.xlu0 %v4603_v13, %s3551_s30 }
0x12c6   :  { %v2396_v16 = vpop.permute.xlu1 %2395 }
0x12c7   :  { %v2401_v23 = vmul.f32 %v4630_v29, %v2396_v16 }
0x12c9   :  { %v4661_v21 = vsel %vm929_vm3, %v2401_v23, %v2406_v41 }
0x12ca   :  { %v2398_v36 = vpop.permute.xlu0 %2397  ;;  %2417 = vrot.lane.b32.xlu1 %v4661_v21, %s3550_s4 }
0x12cb   :  { %v2402_v19 = vmul.f32 %v4634_v45, %v2398_v36 }
0x12cd   :  { %v4668_v5 = vsel %vm930_vm4, %v2402_v19, %v2408_v37 }
0x12ce   :  { %2419 = vrot.lane.b32.xlu0 %v4668_v5, %s3550_s4 }
0x130a   :  { %v2538_v13 = vpop.permute.xlu1 %2537 }
0x130b   :  { %v2543_v56 = vmul.f32 %v3494_v6, %v2538_v13  ;;  %v2555_v6 = vsel %vm775_vm15, %v2531_v63, %v2506_v0 }
0x130e   :  { %v2540_v29 = vpop.permute.xlu0 %2539  ;;  %v2548_v60 = vpop.permute.xlu1 %2547 }
0x130f   :  { %v4674_v7 = vsel %vm775_vm15, %v2543_v56, %v2548_v60  ;;  %v2544_v10 = vmul.f32 %v3496_v24, %v2540_v29  ;;  %v2556_v24 = vsel %vm776_vm2, %v2532_v2, %v2508_v51  ;;  %vm652_vm15 = vcmask 519424  }
0x1310   :  { %2559 = vrot.lane.b32.xlu1 %v4674_v7, %s3550_s4 }
0x1312   :  { %v2550_v45 = vpop.permute.xlu0 %2549 }
0x1313   :  { %v4680_v3 = vsel %vm776_vm2, %v2544_v10, %v2550_v45 }
0x1314   :  { %2561 = vrot.lane.b32.xlu0 %v4680_v3, %s3550_s4  ;;  %2427 = vrot.lane.b32.xlu1 %v2413_v46, %s3551_s30 }
0x1318   :  { %2429 = vrot.lane.b32.xlu0 %v2414_v28, %s3551_s30  ;;  %2569 = vrot.lane.b32.xlu1 %v2555_v6, %s3551_s30 }
0x131c   :  { %2571 = vrot.lane.b32.xlu0 %v2556_v24, %s3551_s30 }
0x133c   :  { %v2418_v44 = vpop.permute.xlu1 %2417 }
0x133d   :  { %2423 = vst.msk [vmem:[#allocation4] sm:$0xff] %vm274_vm0, %v2418_v44 }
0x1340   :  { %v2420_v25 = vpop.permute.xlu0 %2419 }
0x1341   :  { %2424 = vst.msk [vmem:[#allocation4 + $0x8] sm:$0xff] %vm274_vm0, %v2420_v25 }
0x1344   :  { %v4694_v49 = vld [vmem:[#allocation4] sm:$0xff] }
0x1348   :  { %v4696_v40 = vld [vmem:[#allocation4 + $0x8] sm:$0xff] }
0x1349   :  { %v2610_v27 = vpack.c.bf16 %v4696_v40, %v4694_v49 }
0x134b   :  { %3247 = vmatmul.mubr.msk.bf16.vlgmr.msra.gmra.mxu0 %vm274_vm0, %v2610_v27 }
0x1382   :  { %v2560_v0 = vpop.permute.xlu1 %2559 }
0x1383   :  { %2565 = vst.msk [vmem:[#allocation6] sm:$0xff] %vm274_vm0, %v2560_v0 }
0x1386   :  { %v2562_v57 = vpop.permute.xlu0 %2561  ;;  %v2428_v51 = vpop.permute.xlu1 %2427 }
0x1387   :  { %2566 = vst.msk [vmem:[#allocation6 + $0x8] sm:$0xff] %vm274_vm0, %v2562_v57  ;;  %2433 = vst.msk [vmem:[#allocation5] sm:$0xff] %vm274_vm0, %v2428_v51 }
0x138a   :  { %v2430_v47 = vpop.permute.xlu0 %2429  ;;  %v2570_v46 = vpop.permute.xlu1 %2569  ;;  %v4706_v52 = vld [vmem:[#allocation6] sm:$0xff] }
0x138b   :  { %2434 = vst.msk [vmem:[#allocation5 + $0x8] sm:$0xff] %vm274_vm0, %v2430_v47  ;;  %2575 = vst.msk [vmem:[#allocation7] sm:$0xff] %vm274_vm0, %v2570_v46 }
0x138e   :  { %v2572_v55 = vpop.permute.xlu0 %2571  ;;  %v4708_v28 = vld [vmem:[#allocation6 + $0x8] sm:$0xff]  ;;  %v2657_v19 = vld [vmem:[#allocation5] sm:$0xff] }
0x138f   :  { %2576 = vst.msk [vmem:[#allocation7 + $0x8] sm:$0xff] %vm274_vm0, %v2572_v55  ;;  %v2751_v31 = vpack.c.bf16 %v4708_v28, %v4706_v52 }
0x1391   :  { %3255 = vmatmul.mubr.msk.bf16.vlgmr.msra.gmra.mxu1 %vm274_vm0, %v2751_v31 }
0x1392   :  { %v2658_v56 = vld [vmem:[#allocation5 + $0x8] sm:$0xff]  ;;  %v2798_v29 = vld [vmem:[#allocation7] sm:$0xff] }
0x140b   :  { %v2648_v34 = vpop.f32.mrf.mxu0 }
0x140c   :  { %v2655_v22 = vadd.f32 %v2648_v34, %v3808_v59 }
0x140d   :  { %v3248_v58 = vpop.f32.mrf.mxu0 }
0x140e   :  { %3505 = vtanh.f32 %v2655_v22  ;;  %v3039_v13 = vmul.f32 -1.442695, %v2655_v22 }
0x140f   :  { %v2651_v63 = vpop.f32.mrf.mxu0 }
0x1410   :  { %v2656_v38 = vadd.f32 %v2651_v63, %v3812_v9 }
0x1411   :  { %v3249_v35 = vpop.f32.mrf.mxu0 }
0x1412   :  { %3507 = vtanh.f32 %v2656_v38 }
0x141b   :  { %v3506_v2 = vpop.eup %3505 }
0x141c   :  { %2685 = vrot.lane.b32.xlu1 %v3506_v2, %s3549_s0 }
0x141f   :  { %v3508_v61 = vpop.eup %3507 }
0x1420   :  { %2687 = vrot.lane.b32.xlu0 %v3508_v61, %s3549_s0  ;;  %v3050_v61 = vpack.c.bf16 %v3886_v53, %v3886_v53  ;;  %v3054_v53 = vpack.c.bf16 %v4032_v50, %v4032_v50 }
0x1451   :  { %v2789_v4 = vpop.f32.mrf.mxu1 }
0x1452   :  { %v2796_v41 = vadd.f32 %v2789_v4, %v3720_v32  ;;  %v3040_v32 = vmul.f32 -1.442695, %v2656_v38  ;;  %v3051_v4 = vpack.c.bf16 %v3894_v14, %v3894_v14  ;;  %v3055_v14 = vpack.c.bf16 %v4040_v48, %v4040_v48 }
0x1453   :  { %v3256_v37 = vpop.f32.mrf.mxu1 }
0x1454   :  { %3509 = vtanh.f32 %v2796_v41  ;;  %v3042_v51 = vmul.f32 -1.442695, %v2796_v41 }
0x1455   :  { %v2792_v16 = vpop.f32.mrf.mxu1 }
0x1456   :  { %v2797_v59 = vadd.f32 %v2792_v16, %v3727_v39  ;;  %v2799_v39 = vld [vmem:[#allocation7 + $0x8] sm:$0xff] }
0x1457   :  { %v3257_v23 = vpop.f32.mrf.mxu1 }
0x1458   :  { %3511 = vtanh.f32 %v2797_v59  ;;  %v3043_v47 = vmul.f32 -1.442695, %v2797_v59 }
0x1459   :  { %3513 = vpow2.f32 %v3039_v13 }
0x145a   :  { %3515 = vpow2.f32 %v3040_v32 }
0x1461   :  { %v3510_v36 = vpop.eup %3509 }
0x1462   :  { %2826 = vrot.lane.b32.xlu1 %v3510_v36, %s3549_s0 }
0x1465   :  { %v3512_v9 = vpop.eup %3511 }
0x1466   :  { %2828 = vrot.lane.b32.xlu0 %v3512_v9, %s3549_s0  ;;  %2675 = vrot.lane.b32.xlu1 %v2657_v19, %s3550_s4  ;;  %v3514_v60 = vpop.eup %3513 }
0x1467   :  { %v2665_v10 = vadd.f32 1.0, %v3514_v60  ;;  %v3516_v45 = vpop.eup %3515 }
0x1468   :  { %v2666_v6 = vadd.f32 1.0, %v3516_v45 }
0x1469   :  { %3517 = vrcp.f32 %v2665_v10 }
0x146a   :  { %2677 = vrot.lane.b32.xlu0 %v2658_v56, %s3550_s4  ;;  %2816 = vrot.lane.b32.xlu1 %v2798_v29, %s3550_s4  ;;  %3519 = vrcp.f32 %v2666_v6 }
0x146b   :  { %3521 = vpow2.f32 %v3042_v51 }
0x146c   :  { %3523 = vpow2.f32 %v3043_v47  ;;  %v3058_v47 = vpack.c.bf16 %v4183_v43, %v4183_v43 }
0x146e   :  { %2818 = vrot.lane.b32.xlu0 %v2799_v39, %s3550_s4 }
0x1476   :  { %v4726_v24 = vpop.eup %3517 }
0x1477   :  { %v4730_v27 = vpop.eup %3519 }
0x1478   :  { %v3522_v46 = vpop.eup %3521 }
0x1479   :  { %v2806_v55 = vadd.f32 1.0, %v3522_v46  ;;  %v3524_v31 = vpop.eup %3523 }
0x147a   :  { %v2807_v34 = vadd.f32 1.0, %v3524_v31 }
0x147b   :  { %3525 = vrcp.f32 %v2806_v55 }
0x147c   :  { %3527 = vrcp.f32 %v2807_v34  ;;  %v5076_v34 = vld [vmem:[#allocation10_spill] sm:$0xff] }
0x147d   :  { %v3059_v43 = vpack.c.bf16 %v5076_v34, %v5076_v34 }
0x1488   :  { %v4734_v22 = vpop.eup %3525 }
0x1489   :  { %v4738_v38 = vpop.eup %3527 }
0x148e   :  { %v2686_v44 = vpop.permute.xlu1 %2685 }
0x148f   :  { %v2691_v25 = vmul.f32 %v4726_v24, %v2686_v44 }
0x1491   :  { %2695 = vrot.lane.b32.xlu1 %v2691_v25, %s3550_s4 }
0x1492   :  { %v2688_v0 = vpop.permute.xlu0 %2687 }
0x1493   :  { %v2692_v57 = vmul.f32 %v4730_v27, %v2688_v0 }
0x1495   :  { %2697 = vrot.lane.b32.xlu0 %v2692_v57, %s3550_s4 }
0x14d4   :  { %v2827_v58 = vpop.permute.xlu1 %2826 }
0x14d5   :  { %v2832_v63 = vmul.f32 %v4734_v22, %v2827_v58  ;;  %v5077_v58 = vld [vmem:[#allocation11_spill] sm:$0xff] }
0x14d7   :  { %2836 = vrot.lane.b32.xlu1 %v2832_v63, %s3550_s4  ;;  %v3060_v63 = vpack.c.bf16 %v5077_v58, %v5077_v58 }
0x14d8   :  { %v2829_v35 = vpop.permute.xlu0 %2828  ;;  %v2676_v50 = vpop.permute.xlu1 %2675 }
0x14d9   :  { %v2833_v2 = vmul.f32 %v4738_v38, %v2829_v35  ;;  %v2681_v41 = vmul.f32 %v4726_v24, %v2676_v50 }
0x14db   :  { %2838 = vrot.lane.b32.xlu0 %v2833_v2, %s3550_s4  ;;  %2717 = vrot.lane.b32.xlu1 %v4694_v49, %s3551_s30  ;;  %v3052_v49 = vpack.c.bf16 %v3906_v26, %v3906_v26  ;;  %v3056_v26 = vpack.c.bf16 %v4052_v11, %v4052_v11 }
0x14df   :  { %2719 = vrot.lane.b32.xlu0 %v4696_v40, %s3551_s30  ;;  %2858 = vrot.lane.b32.xlu1 %v4706_v52, %s3551_s30  ;;  %v3053_v40 = vpack.c.bf16 %v3914_v42, %v3914_v42  ;;  %v3057_v42 = vpack.c.bf16 %v4060_v18, %v4060_v18  ;;  %v2678_v52 = vpop.permute.xlu0 %2677 }
0x14e0   :  { %v2682_v11 = vmul.f32 %v4730_v27, %v2678_v52 }
0x14e3   :  { %2860 = vrot.lane.b32.xlu0 %v4708_v28, %s3551_s30  ;;  %630 = vrot.lane.b32.xlu1 %v3050_v61, %s3550_s4  ;;  %v4774_v28 = vpop.permute.xlu1 %2816  ;;  %v4777_v37 = vpop.permute.xlu0 %2818  ;;  %v5078_v61 = vld [vmem:[#allocation12_spill] sm:$0xff] }
0x14e4   :  { %v2822_v13 = vmul.f32 %v4734_v22, %v4774_v28  ;;  %v2823_v32 = vmul.f32 %v4738_v38, %v4777_v37 }
0x14e7   :  { %632 = vrot.lane.b32.xlu0 %v3051_v4, %s3550_s4  ;;  %645 = vrot.lane.b32.xlu1 %v3052_v49, %s3549_s0  ;;  %v3061_v4 = vpack.c.bf16 %v5078_v61, %v5078_v61  ;;  %v5079_v49 = vld [vmem:[#allocation13_spill] sm:$0xff] }
0x14eb   :  { %647 = vrot.lane.b32.xlu0 %v3053_v40, %s3549_s0  ;;  %969 = vrot.lane.b32.xlu1 %v3054_v53, %s3550_s4  ;;  %v3062_v40 = vpack.c.bf16 %v5079_v49, %v5079_v49 }
0x14ef   :  { %971 = vrot.lane.b32.xlu0 %v3055_v14, %s3550_s4  ;;  %984 = vrot.lane.b32.xlu1 %v3056_v26, %s3549_s0  ;;  %v5080_v14 = vld [vmem:[#allocation14_spill] sm:$0xff] }
0x14f0   :  { %v3063_v26 = vpack.c.bf16 %v5080_v14, %v5080_v14 }
0x14f3   :  { %986 = vrot.lane.b32.xlu0 %v3057_v42, %s3549_s0  ;;  %v5081_v42 = vld [vmem:[#allocation15_spill] sm:$0xff] }
0x1503   :  { %v2696_v48 = vpop.permute.xlu1 %2695 }
0x1504   :  { %v2701_v16 = vadd.f32 %v2696_v48, %v2681_v41  ;;  %v3066_v48 = vpack.c.bf16 %v4448_v1, %v4448_v1  ;;  %v3070_v1 = vpack.c.bf16 %v4546_v12, %v4546_v12  ;;  %v3074_v12 = vpack.c.bf16 %v4661_v21, %v4661_v21 }
0x1506   :  { %3529 = vtanh.f32 %v2701_v16  ;;  %v4782_v59 = vsel %vm590_vm9, %v2701_v16, %v2676_v50  ;;  %v3064_v50 = vpack.c.bf16 %v5081_v42, %v5081_v42  ;;  %v3067_v16 = vpack.c.bf16 %v4454_v8, %v4454_v8 }
0x1507   :  { %v2698_v18 = vpop.permute.xlu0 %2697  ;;  %v3071_v8 = vpack.c.bf16 %v4552_v30, %v4552_v30  ;;  %v3075_v30 = vpack.c.bf16 %v4668_v5, %v4668_v5  ;;  %v5083_v5 = vld [vmem:[#allocation9_spill] sm:$0xff] }
0x1508   :  { %v2702_v23 = vadd.f32 %v2698_v18, %v2682_v11  ;;  %v3068_v11 = vpack.c.bf16 %v4460_v15, %v4460_v15  ;;  %v3069_v18 = vpack.c.bf16 %v4466_v17, %v4466_v17  ;;  %v3072_v15 = vpack.c.bf16 %v4558_v20, %v4558_v20 }
0x1509   :  { %v3073_v17 = vpack.c.bf16 %v4564_v54, %v4564_v54  ;;  %v3076_v20 = vpack.c.bf16 %v4674_v7, %v4674_v7  ;;  %v3077_v54 = vpack.c.bf16 %v4680_v3, %v4680_v3  ;;  %vm5084_vm2 = vcmp.eq.s32.totalorder %v5083_v5, 1 }
0x150a   :  { %3531 = vtanh.f32 %v2702_v23  ;;  %v4786_v36 = vsel %vm591_vm10, %v2702_v23, %v2678_v52  ;;  %v5082_v52 = vld [vmem:[#allocation16_spill] sm:$0xff] }
0x150b   :  { %v3065_v41 = vpack.c.bf16 %v5082_v52, %v5082_v52 }
0x1513   :  { %v3530_v9 = vpop.eup %3529 }
0x1514   :  { %2707 = vrot.lane.b32.xlu1 %v3530_v9, %s3549_s0 }
0x1517   :  { %v3532_v19 = vpop.eup %3531 }
0x1518   :  { %2709 = vrot.lane.b32.xlu0 %v3532_v19, %s3549_s0  ;;  %v5085_v19 = vld [vmem:[#allocation8_spill] sm:$0xff] }
0x1519   :  { %vm5086_vm3 = vcmp.eq.s32.totalorder %v5085_v19, 1 }
0x1549   :  { %v2837_v56 = vpop.permute.xlu1 %2836 }
0x154a   :  { %v4792_v29 = vadd.f32 %v2837_v56, %v2822_v13 }
0x154c   :  { %3533 = vtanh.f32 %v4792_v29  ;;  %v2866_v7 = vsel %vm5084_vm2, %v4792_v29, %v4774_v28 }
0x154d   :  { %v2839_v39 = vpop.permute.xlu0 %2838  ;;  %v4797_v60 = vpop.permute.xlu1 %2717 }
0x154e   :  { %v4799_v10 = vadd.f32 %v2839_v39, %v2823_v32 }
0x1550   :  { %3535 = vtanh.f32 %v4799_v10 }
0x1551   :  { %v4802_v45 = vpop.permute.xlu0 %2719  ;;  %v4804_v6 = vpop.permute.xlu1 %2858 }
0x1555   :  { %v4806_v44 = vpop.permute.xlu0 %2860  ;;  %v631_v25 = vpop.permute.xlu1 %630 }
0x1556   :  { %637 = vst.msk [vmem:[%s5050_s6] sm:$0xf] %vm636_vm1, %v631_v25 }
0x1559   :  { %v3534_v0 = vpop.eup %3533  ;;  %v633_v57 = vpop.permute.xlu0 %632 }
0x155a   :  { %v646_v51 = vpop.permute.xlu1 %645  ;;  %638 = vst.msk [vmem:[%s5050_s6 + $0x4] sm:$0xf] %vm636_vm1, %v633_v57  ;;  %2848 = vrot.lane.b32.xlu1 %v3534_v0, %s3549_s0 }
0x155b   :  { %2952 = vst.msk [vmem:[%s5050_s6 + $0x38] sm:$0xf] %vm652_vm15, %v646_v51 }
0x155d   :  { %v3536_v46 = vpop.eup %3535  ;;  %v648_v55 = vpop.permute.xlu0 %647 }
0x155e   :  { %v970_v31 = vpop.permute.xlu1 %969  ;;  %2953 = vst.msk [vmem:[%s5050_s6 + $0x3c] sm:$0xf] %vm652_vm15, %v648_v55  ;;  %2850 = vrot.lane.b32.xlu0 %v3536_v46, %s3549_s0  ;;  %1307 = vrot.lane.b32.xlu1 %v3058_v47, %s3550_s4 }
0x155f   :  { %2962 = vst.msk [vmem:[%s5050_s6 + $0x8] sm:$0xf] %vm636_vm1, %v970_v31 }
0x1561   :  { %v972_v35 = vpop.permute.xlu0 %971 }
0x1562   :  { %v985_v2 = vpop.permute.xlu1 %984  ;;  %2963 = vst.msk [vmem:[%s5050_s6 + $0xc] sm:$0xf] %vm636_vm1, %v972_v35  ;;  %1309 = vrot.lane.b32.xlu0 %v3059_v43, %s3550_s4  ;;  %1322 = vrot.lane.b32.xlu1 %v3060_v63, %s3549_s0 }
0x1563   :  { %2966 = vst.msk [vmem:[%s5050_s6 + $0x30] sm:$0xf] %vm652_vm15, %v985_v2 }
0x1565   :  { %v987_v53 = vpop.permute.xlu0 %986 }
0x1566   :  { %2967 = vst.msk [vmem:[%s5050_s6 + $0x34] sm:$0xf] %vm652_vm15, %v987_v53  ;;  %1324 = vrot.lane.b32.xlu0 %v3061_v4, %s3549_s0  ;;  %1645 = vrot.lane.b32.xlu1 %v3062_v40, %s3550_s4 }
0x156a   :  { %1647 = vrot.lane.b32.xlu0 %v3063_v26, %s3550_s4  ;;  %1660 = vrot.lane.b32.xlu1 %v3064_v50, %s3549_s0 }
0x156e   :  { %1662 = vrot.lane.b32.xlu0 %v3065_v41, %s3549_s0  ;;  %1959 = vrot.lane.b32.xlu1 %v3066_v48, %s3550_s4 }
0x1572   :  { %1961 = vrot.lane.b32.xlu0 %v3067_v16, %s3550_s4  ;;  %1973 = vrot.lane.b32.xlu1 %v3068_v11, %s3549_s0 }
0x1576   :  { %1975 = vrot.lane.b32.xlu0 %v3069_v18, %s3549_s0  ;;  %2271 = vrot.lane.b32.xlu1 %v3070_v1, %s3550_s4 }
0x157a   :  { %2273 = vrot.lane.b32.xlu0 %v3071_v8, %s3550_s4  ;;  %2285 = vrot.lane.b32.xlu1 %v3072_v15, %s3549_s0 }
0x157e   :  { %2287 = vrot.lane.b32.xlu0 %v3073_v17, %s3549_s0  ;;  %2583 = vrot.lane.b32.xlu1 %v3074_v12, %s3550_s4 }
0x1582   :  { %2585 = vrot.lane.b32.xlu0 %v3075_v30, %s3550_s4  ;;  %2597 = vrot.lane.b32.xlu1 %v3076_v20, %s3549_s0 }
0x1586   :  { %v2708_v23 = vpop.permute.xlu1 %2707  ;;  %2599 = vrot.lane.b32.xlu0 %v3077_v54, %s3549_s0  ;;  %2739 = vrot.lane.b32.xlu1 %v4782_v59, %s3551_s30  ;;  %v2867_v59 = vsel %vm5086_vm3, %v4799_v10, %v4777_v37 }
0x1587   :  { %v2713_v21 = vmul.f32 %v4726_v24, %v2708_v23 }
0x1589   :  { %v2723_v24 = vsel %vm590_vm9, %v2713_v21, %v4797_v60  ;;  %vm5087_vm9 = vmmov %vm5084_vm2 }
0x158a   :  { %v2710_v9 = vpop.permute.xlu0 %2709  ;;  %2741 = vrot.lane.b32.xlu0 %v4786_v36, %s3551_s30  ;;  %2880 = vrot.lane.b32.xlu1 %v2866_v7, %s3551_s30  ;;  %v3078_v28 = vpack.c.bf16 %v2723_v24, %v2723_v24 }
0x158b   :  { %v2714_v3 = vmul.f32 %v4730_v27, %v2710_v9 }
0x158d   :  { %v2724_v36 = vsel %vm591_vm10, %v2714_v3, %v4802_v45  ;;  %vm5088_vm10 = vmmov %vm5086_vm3 }
0x158e   :  { %2882 = vrot.lane.b32.xlu0 %v2867_v59, %s3551_s30  ;;  %2729 = vrot.lane.b32.xlu1 %v2723_v24, %s3550_s4  ;;  %v3079_v27 = vpack.c.bf16 %v2724_v36, %v2724_v36 }
0x1592   :  { %2731 = vrot.lane.b32.xlu0 %v2724_v36, %s3550_s4  ;;  %2894 = vrot.lane.b32.xlu1 %v3078_v28, %s3550_s4 }
0x1596   :  { %2896 = vrot.lane.b32.xlu0 %v3079_v27, %s3550_s4 }
0x15cc   :  { %v2849_v37 = vpop.permute.xlu1 %2848 }
0x15cd   :  { %v2854_v33 = vmul.f32 %v4734_v22, %v2849_v37 }
0x15cf   :  { %v2864_v13 = vsel %vm5087_vm9, %v2854_v33, %v4804_v6 }
0x15d0   :  { %v2851_v56 = vpop.permute.xlu0 %2850  ;;  %2870 = vrot.lane.b32.xlu1 %v2864_v13, %s3550_s4  ;;  %v1308_v29 = vpop.permute.xlu1 %1307  ;;  %v3080_v32 = vpack.c.bf16 %v2864_v13, %v2864_v13 }
0x15d1   :  { %v2855_v62 = vmul.f32 %v4738_v38, %v2851_v56  ;;  %2976 = vst.msk [vmem:[%s5050_s6 + $0x10] sm:$0xf] %vm636_vm1, %v1308_v29 }
0x15d3   :  { %v2865_v22 = vsel %vm5088_vm10, %v2855_v62, %v4806_v44 }
0x15d4   :  { %2872 = vrot.lane.b32.xlu0 %v2865_v22, %s3550_s4  ;;  %v1310_v39 = vpop.permute.xlu0 %1309  ;;  %2908 = vrot.lane.b32.xlu1 %v3080_v32, %s3549_s0  ;;  %v1323_v60 = vpop.permute.xlu1 %1322  ;;  %v3081_v38 = vpack.c.bf16 %v2865_v22, %v2865_v22 }
0x15d5   :  { %2977 = vst.msk [vmem:[%s5050_s6 + $0x14] sm:$0xf] %vm636_vm1, %v1310_v39 }
0x15d6   :  { %2980 = vst.msk [vmem:[%s5050_s6 + $0x28] sm:$0xf] %vm652_vm15, %v1323_v60 }
0x15d8   :  { %2910 = vrot.lane.b32.xlu0 %v3081_v38, %s3549_s0  ;;  %v1325_v10 = vpop.permute.xlu0 %1324  ;;  %v1646_v45 = vpop.permute.xlu1 %1645 }
0x15d9   :  { %2981 = vst.msk [vmem:[%s5050_s6 + $0x2c] sm:$0xf] %vm652_vm15, %v1325_v10 }
0x15da   :  { %2990 = vst.msk [vmem:[%s5050_s6 + $0x18] sm:$0xf] %vm636_vm1, %v1646_v45 }
0x15dc   :  { %v1648_v6 = vpop.permute.xlu0 %1647  ;;  %v1661_v44 = vpop.permute.xlu1 %1660 }
0x15dd   :  { %2991 = vst.msk [vmem:[%s5050_s6 + $0x1c] sm:$0xf] %vm636_vm1, %v1648_v6 }
0x15de   :  { %2994 = vst.msk [vmem:[%s5050_s6 + $0x20] sm:$0xf] %vm652_vm15, %v1661_v44 }
0x15e0   :  { %v1663_v25 = vpop.permute.xlu0 %1662  ;;  %v1960_v0 = vpop.permute.xlu1 %1959 }
0x15e1   :  { %2995 = vst.msk [vmem:[%s5050_s6 + $0x24] sm:$0xf] %vm652_vm15, %v1663_v25 }
0x15e2   :  { %3004 = vst.msk [vmem:[%s5050_s6 + $0x20] sm:$0xf] %vm636_vm1, %v1960_v0 }
0x15e4   :  { %v1962_v57 = vpop.permute.xlu0 %1961  ;;  %v1974_v51 = vpop.permute.xlu1 %1973 }
0x15e5   :  { %3005 = vst.msk [vmem:[%s5050_s6 + $0x24] sm:$0xf] %vm636_vm1, %v1962_v57 }
0x15e6   :  { %3008 = vst.msk [vmem:[%s5050_s6 + $0x18] sm:$0xf] %vm652_vm15, %v1974_v51 }
0x15e8   :  { %v1976_v47 = vpop.permute.xlu0 %1975  ;;  %v2272_v46 = vpop.permute.xlu1 %2271 }
0x15e9   :  { %3009 = vst.msk [vmem:[%s5050_s6 + $0x1c] sm:$0xf] %vm652_vm15, %v1976_v47 }
0x15ea   :  { %3018 = vst.msk [vmem:[%s5050_s6 + $0x28] sm:$0xf] %vm636_vm1, %v2272_v46 }
0x15ec   :  { %v2274_v55 = vpop.permute.xlu0 %2273  ;;  %v2286_v31 = vpop.permute.xlu1 %2285 }
0x15ed   :  { %3019 = vst.msk [vmem:[%s5050_s6 + $0x2c] sm:$0xf] %vm636_vm1, %v2274_v55 }
0x15ee   :  { %3022 = vst.msk [vmem:[%s5050_s6 + $0x10] sm:$0xf] %vm652_vm15, %v2286_v31 }
0x15f0   :  { %v2288_v34 = vpop.permute.xlu0 %2287  ;;  %v2584_v43 = vpop.permute.xlu1 %2583 }
0x15f1   :  { %3023 = vst.msk [vmem:[%s5050_s6 + $0x14] sm:$0xf] %vm652_vm15, %v2288_v34 }
0x15f2   :  { %3032 = vst.msk [vmem:[%s5050_s6 + $0x30] sm:$0xf] %vm636_vm1, %v2584_v43 }
0x15f4   :  { %v2586_v58 = vpop.permute.xlu0 %2585  ;;  %v2598_v63 = vpop.permute.xlu1 %2597 }
0x15f5   :  { %3033 = vst.msk [vmem:[%s5050_s6 + $0x34] sm:$0xf] %vm636_vm1, %v2586_v58 }
0x15f6   :  { %3036 = vst.msk [vmem:[%s5050_s6 + $0x8] sm:$0xf] %vm652_vm15, %v2598_v63 }
0x15f8   :  { %v2600_v35 = vpop.permute.xlu0 %2599  ;;  %v2740_v2 = vpop.permute.xlu1 %2739 }
0x15f9   :  { %3037 = vst.msk [vmem:[%s5050_s6 + $0xc] sm:$0xf] %vm652_vm15, %v2600_v35 }
0x15fa   :  { %2745 = vst.msk [vmem:[#allocation5] sm:$0xff] %vm274_vm0, %v2740_v2 }
0x15fc   :  { %v2742_v61 = vpop.permute.xlu0 %2741  ;;  %v2881_v4 = vpop.permute.xlu1 %2880 }
0x15fd   :  { %2746 = vst.msk [vmem:[#allocation5 + $0x8] sm:$0xff] %vm274_vm0, %v2742_v61  ;;  %2886 = vst.msk [vmem:[#allocation7] sm:$0xff] %vm274_vm0, %v2881_v4 }
0x1600   :  { %v2883_v49 = vpop.permute.xlu0 %2882  ;;  %v2730_v40 = vpop.permute.xlu1 %2729 }
0x1601   :  { %2887 = vst.msk [vmem:[#allocation7 + $0x8] sm:$0xff] %vm274_vm0, %v2883_v49  ;;  %2735 = vst.msk [vmem:[#allocation4] sm:$0xff] %vm274_vm0, %v2730_v40 }
0x1604   :  { %v2732_v53 = vpop.permute.xlu0 %2731  ;;  %v2895_v14 = vpop.permute.xlu1 %2894 }
0x1605   :  { %2736 = vst.msk [vmem:[#allocation4 + $0x8] sm:$0xff] %vm274_vm0, %v2732_v53 }
0x1606   :  { %3046 = vst.msk [vmem:[%s5050_s6 + $0x38] sm:$0xf] %vm636_vm1, %v2895_v14 }
0x1608   :  { %v2897_v26 = vpop.permute.xlu0 %2896 }
0x1609   :  { %3047 = vst.msk [vmem:[%s5050_s6 + $0x3c] sm:$0xf] %vm636_vm1, %v2897_v26 }
0x1642   :  { %v2871_v42 = vpop.permute.xlu1 %2870 }
0x1643   :  { %2876 = vst.msk [vmem:[#allocation6] sm:$0xff] %vm274_vm0, %v2871_v42 }
0x1646   :  { %v2873_v50 = vpop.permute.xlu0 %2872  ;;  %v2909_v52 = vpop.permute.xlu1 %2908 }
0x1647   :  { %2877 = vst.msk [vmem:[#allocation6 + $0x8] sm:$0xff] %vm274_vm0, %v2873_v50 }
0x1648   :  { %2914 = vst.msk [vmem:[%s5050_s6] sm:$0xf] %vm652_vm15, %v2909_v52 }
0x164a   :  { %v2911_v41 = vpop.permute.xlu0 %2910 }
0x164b   :  { %2915 = vst.msk [vmem:[%s5050_s6 + $0x4] sm:$0xf] %vm652_vm15, %v2911_v41 }

// kernel: s2dc_forward.3
= control target key start
LH: loop header
LB: loop body
LE: loop exit
PB: predicated region body
PF: predicated region fallthrough
CT: control target
= control target key end

     0   :  { %v3613_v1 = vmov 0   ;;  %v3614_v2 = vmov 0.0   ;;  %vm322_vm0 = vcmask 261120   ;;  %vm3615_vm1 = vmmov 0   ;;  %s3617_s13 = smov 32   ;;  %s3618_s17 = smov 96   ;;  %s4876_s1 = inlined_call_operand.vmem [shape: bf16[64,256], index: 1, kind: input, shape index: {}]   ;;  %s4877_s0 = inlined_call_operand.vmem [shape: bf16[8,16,64], index: 0, kind: input, shape index: {}]   ;;  %s4878_s2 = inlined_call_operand.vmem [shape: bf16[32,128], index: 2, kind: input, shape index: {}]   ;;  %s4879_s3 = inlined_call_operand.vmem [shape: bf16[32,128], index: 3, kind: input, shape index: {}]   ;;  %s4880_s4 = inlined_call_operand.vmem [shape: f32[1,256], index: 4, kind: input, shape index: {}]   ;;  %s4881_s5 = inlined_call_operand.vmem [shape: s32[16,1], index: 5, kind: input, shape index: {}]   ;;  %s4882_s6 = inlined_call_operand.vmem [shape: bf16[64,128], index: 6, kind: input, shape index: {}]   ;;  %s4883_s8 = inlined_call_operand.vmem [shape: bf16[128,4], index: 8, kind: input, shape index: {}]   ;;  %s4884_s7 = inlined_call_operand.vmem [shape: f32[1,128], index: 7, kind: input, shape index: {}]   ;;  %s4885_s9 = inlined_call_operand.vmem [shape: f32[1,4], index: 9, kind: input, shape index: {}]   ;;  %s4886_s10 = inlined_call_operand.vmem [shape: f32[16,4], index: 10, kind: output, shape index: {}]  }
   0x1   :  { %v3313_v0 = vld [vmem:[%s4876_s1 + $0x34] ss:$8 sps:$4 sm:$0xff]   ;;  %209 = vmatprep.mubr.bf16.mxu0 %v3613_v1  ;;  %3149 = vmatprep.subr.bf16.mxu1 %v3614_v2  ;;  %v3315_v3 = vld [vmem:[%s4876_s1 + $0x30] ss:$8 sps:$4 sm:$0xff]   ;;  %327 = vst.msk [vmem:[#allocation6] sm:$0xff] %vm322_vm0, %v3614_v2  ;;  %328 = vst.msk [vmem:[#allocation6 + $0x8] sm:$0xff] %vm322_vm0, %v3614_v2  ;;  %v62_v28 = vlaneseq }
   0x2   :  { %3153 = vmatprep.mubr.msk.bf16.mxu1 %vm3615_vm1, %v3614_v2  ;;  %323 = vst.msk [vmem:[#allocation4] sm:$0xff] %vm322_vm0, %v3614_v2  ;;  %324 = vst.msk [vmem:[#allocation4 + $0x8] sm:$0xff] %vm322_vm0, %v3614_v2  ;;  %3311 = vset.pattern.permute.xlu0 %v3613_v1  ;;  %v3316_v4 = vld [vmem:[%s4876_s1 + $0x24] ss:$8 sps:$4 sm:$0xff]   ;;  %v3318_v5 = vld [vmem:[%s4876_s1 + $0x20] ss:$8 sps:$4 sm:$0xff]  }
   0x3   :  { %325 = vst.msk [vmem:[#allocation5] sm:$0xff] %vm322_vm0, %v3614_v2  ;;  %326 = vst.msk [vmem:[#allocation5 + $0x8] sm:$0xff] %vm322_vm0, %v3614_v2  ;;  %185 = vmatprep.subr.bf16.mxu0 %v3313_v0  ;;  %3312 = vset.pattern.permute.xlu1 %v3613_v1  ;;  %v3319_v6 = vld [vmem:[%s4876_s1 + $0x14] ss:$8 sps:$4 sm:$0xff]   ;;  %v3321_v7 = vld [vmem:[%s4876_s1 + $0x10] ss:$8 sps:$4 sm:$0xff]  }
   0x4   :  { %329 = vst.msk [vmem:[#allocation7] sm:$0xff] %vm322_vm0, %v3614_v2  ;;  %330 = vst.msk [vmem:[#allocation7 + $0x8] sm:$0xff] %vm322_vm0, %v3614_v2  ;;  %186 = vmatpush1.bf16.msra.mxu0 %v3315_v3  ;;  %v3322_v8 = vld [vmem:[%s4876_s1 + $0x4] ss:$8 sps:$4 sm:$0xff]   ;;  %v3324_v9 = vld [vmem:[%s4876_s1] ss:$8 sps:$4 sm:$0xff]  }
   0x5   :  { %187 = vmatprep.subr.bf16.mxu0 %v3316_v4  ;;  %v3325_v10 = vld [vmem:[%s4877_s0] sm:$0xff]   ;;  %v3726_v11 = vld [vmem:[%s4878_s2 + $0x8] sm:$0xff]   ;;  %vm152_vm2 = vcmask 523264   ;;  %v3328_v19 = vld [vmem:[%s4877_s0 + $0x10] sm:$0xff]   ;;  %v63_v29 = vshrl.u32 %v62_v28, 7 }
   0x6   :  { %v3731_v12 = vld [vmem:[%s4879_s3 + $0x8] sm:$0xff]   ;;  %v3738_v13 = vld [vmem:[%s4879_s3] sm:$0xff]   ;;  %v3329_v20 = vld [vmem:[%s4877_s0 + $0x18] sm:$0xff]  }
   0x7   :  { %3150 = vmatpush3.bf16.msra.mxu1 %v3731_v12  ;;  %v3751_v16 = vld [vmem:[%s4878_s2] sm:$0xff]   ;;  %v3327_v18 = vld [vmem:[%s4877_s0 + $0x8] sm:$0xff]   ;;  %v3333_v23 = vld [vmem:[%s4877_s0 + $0x30] sm:$0xff]   ;;  %v68_v30 = vsub.s32 1, %v63_v29  ;;  %v64_v35 = vsub.s32 0, %v63_v29 }
   0x8   :  { %188 = vmatpush1.bf16.msra.mxu0 %v3318_v5  ;;  %v3740_v14 = vld [vmem:[#allocation6] sm:$0xff]  ;;  %v3742_v15 = vld [vmem:[#allocation6 + $0x8] sm:$0xff]  ;;  %3151 = vmatprep.subr.bf16.mxu1 %v3614_v2  ;;  %v3335_v24 = vld [vmem:[%s4877_s0 + $0x38] sm:$0xff]  }
   0x9   :  { %189 = vmatprep.subr.bf16.mxu0 %v3319_v6  ;;  %v511_v17 = vpack.c.bf16 %v3742_v15, %v3740_v14  ;;  %v3330_v21 = vld [vmem:[%s4877_s0 + $0x20] sm:$0xff]   ;;  %v3332_v22 = vld [vmem:[%s4877_s0 + $0x28] sm:$0xff]  }
   0xa   :  { %v3803_v25 = vld [vmem:[#allocation4] sm:$0xff]  ;;  %v3805_v26 = vld [vmem:[#allocation4 + $0x8] sm:$0xff] }
   0xb   :  { %3152 = vmatpush3.bf16.msra.mxu1 %v3738_v13  ;;  %v345_v27 = vpack.c.bf16 %v3805_v26, %v3803_v25  ;;  %v60_v31 = vld [vmem:[%s4880_s4] sm:$0x3]  ;;  %s3616_s4 = smov 64  }
   0xc   :  { %190 = vmatpush1.bf16.msra.mxu0 %v3321_v7  ;;  %3157 = vmatprep.subr.bf16.mxu1 %v3614_v2  ;;  %v3819_v32 = vrot.slane %v60_v31, %v68_v30  ;;  %v3828_v40 = vrot.slane %v60_v31, %v64_v35 }
   0xd   :  { %191 = vmatprep.subr.bf16.mxu0 %v3322_v8 }
   0xe   :  { %3154 = vmatmul.mubr.msk.bf16.vlgmr.msra.gmra.mxu1 %vm322_vm0, %v511_v17 }
   0xf   :  { %3158 = vmatpush3.bf16.msra.mxu1 %v3726_v11  ;;  %3161 = vmatprep.mubr.msk.bf16.mxu1 %vm3615_vm1, %v3614_v2 }
  0x10   :  { %192 = vmatpush1.bf16.msra.mxu0 %v3324_v9  ;;  %3159 = vmatprep.subr.bf16.mxu1 %v3614_v2 }
  0x11   :  { %3141 = vmatprep.subr.bf16.mxu0 %v3614_v2 }
  0x13   :  { %3002 = vmatmul.mubr.msk.bf16.vlgmr.msra.gmra.mxu0 %vm152_vm2, %v3325_v10  ;;  %3160 = vmatpush3.bf16.msra.mxu1 %v3751_v16 }
  0x14   :  { %3142 = vmatpush3.bf16.msra.mxu0 %v3726_v11  ;;  %219 = vmatprep.mubr.bf16.mxu0 %v3613_v1 }
  0x15   :  { %3143 = vmatprep.subr.bf16.mxu0 %v3614_v2  ;;  %3165 = vmatprep.subr.bf16.mxu1 %v3614_v2 }
  0x18   :  { %3144 = vmatpush3.bf16.msra.mxu0 %v3751_v16 }
  0x19   :  { %3213 = vmatprep.subr.bf16.mxu0 %v3614_v2 }
  0x1b   :  { %3003 = vmatmul.mubr.msk.bf16.gmra.mxu0 %vm152_vm2, %v3327_v18 }
  0x1c   :  { %229 = vmatprep.mubr.bf16.mxu0 %v3613_v1 }
  0x23   :  { %3004 = vmatmul.mubr.msk.bf16.gmra.mxu0 %vm152_vm2, %v3328_v19 }
  0x24   :  { %239 = vmatprep.mubr.bf16.mxu0 %v3613_v1 }
  0x2b   :  { %3005 = vmatmul.mubr.msk.bf16.gmra.mxu0 %vm152_vm2, %v3329_v20 }
  0x2c   :  { %249 = vmatprep.mubr.bf16.mxu0 %v3613_v1 }
  0x33   :  { %3006 = vmatmul.mubr.msk.bf16.gmra.mxu0 %vm152_vm2, %v3330_v21 }
  0x34   :  { %259 = vmatprep.mubr.bf16.mxu0 %v3613_v1 }
  0x3b   :  { %3007 = vmatmul.mubr.msk.bf16.gmra.mxu0 %vm152_vm2, %v3332_v22 }
  0x3c   :  { %269 = vmatprep.mubr.bf16.mxu0 %v3613_v1 }
  0x43   :  { %3008 = vmatmul.mubr.msk.bf16.gmra.mxu0 %vm152_vm2, %v3333_v23 }
  0x44   :  { %279 = vmatprep.mubr.bf16.mxu0 %v3613_v1 }
  0x4b   :  { %3009 = vmatmul.mubr.msk.bf16.gmra.mxu0 %vm152_vm2, %v3335_v24 }
  0x4c   :  { %3145 = vmatprep.mubr.msk.bf16.mxu0 %vm3615_vm1, %v3614_v2 }
  0x53   :  { %3146 = vmatmul.mubr.msk.bf16.vlgmr.msra.gmra.mxu0 %vm322_vm0, %v345_v27 }
  0x54   :  { %3214 = vmatpush3.bf16.msra.mxu0 %v3731_v12  ;;  %3217 = vmatprep.mubr.msk.bf16.mxu0 %vm3615_vm1, %v3614_v2 }
  0x55   :  { %3215 = vmatprep.subr.bf16.mxu0 %v3614_v2 }
  0x58   :  { %3216 = vmatpush3.bf16.msra.mxu0 %v3738_v13 }
  0x59   :  { %3229 = vmatprep.subr.bf16.mxu0 %v3614_v2 }
  0xce   :  { %v561_v39 = vpop.f32.mrf.mxu1 }
  0xd0   :  { %v3155_v43 = vpop.f32.mrf.mxu1 }
  0xd2   :  { %v564_v46 = vpop.f32.mrf.mxu1 }
  0xd3   :  { %v3821_v33 = vpop.f32.mrf.mxu0 }
  0xd4   :  { %v3156_v49 = vpop.f32.mrf.mxu1 }
  0xd5   :  { %v213_v34 = vpop.f32.mrf.mxu0 }
  0xd6   :  { %v3824_v36 = vadd.f32 %v213_v34, %v3819_v32 }
  0xd7   :  { %v3826_v37 = vpop.f32.mrf.mxu0 }
  0xd9   :  { %v217_v38 = vpop.f32.mrf.mxu0 }
  0xda   :  { %v3831_v41 = vadd.f32 %v217_v38, %v3819_v32 }
  0xdb   :  { %v221_v42 = vpop.f32.mrf.mxu0 }
  0xdc   :  { %v3834_v44 = vadd.f32 %v221_v42, %v3828_v40 }
  0xdd   :  { %v223_v45 = vpop.f32.mrf.mxu0 }
  0xde   :  { %v3837_v47 = vadd.f32 %v223_v45, %v3819_v32 }
  0xdf   :  { %v225_v48 = vpop.f32.mrf.mxu0 }
  0xe0   :  { %v3840_v50 = vadd.f32 %v225_v48, %v3828_v40 }
  0xe1   :  { %v227_v51 = vpop.f32.mrf.mxu0 }
  0xe2   :  { %v3843_v52 = vadd.f32 %v227_v51, %v3819_v32 }
  0xe3   :  { %v231_v53 = vpop.f32.mrf.mxu0 }
  0xe4   :  { %v3846_v54 = vadd.f32 %v231_v53, %v3828_v40 }
  0xe5   :  { %v233_v55 = vpop.f32.mrf.mxu0 }
  0xe6   :  { %v3849_v56 = vadd.f32 %v233_v55, %v3819_v32 }
  0xe7   :  { %v235_v57 = vpop.f32.mrf.mxu0 }
  0xe8   :  { %v3852_v58 = vadd.f32 %v235_v57, %v3828_v40 }
  0xe9   :  { %v237_v59 = vpop.f32.mrf.mxu0 }
  0xea   :  { %v3855_v60 = vadd.f32 %v237_v59, %v3819_v32 }
  0xeb   :  { %v241_v61 = vpop.f32.mrf.mxu0 }
  0xec   :  { %v3858_v62 = vadd.f32 %v241_v61, %v3828_v40 }
  0xed   :  { %v243_v63 = vpop.f32.mrf.mxu0 }
  0xee   :  { %v3861_v0 = vadd.f32 %v243_v63, %v3819_v32 }
  0xef   :  { %v245_v3 = vpop.f32.mrf.mxu0 }
  0xf0   :  { %v3864_v4 = vadd.f32 %v245_v3, %v3828_v40  ;;  %v212_v3 = vadd.f32 %v3821_v33, %v3828_v40 }
  0xf1   :  { %v247_v5 = vpop.f32.mrf.mxu0 }
  0xf2   :  { %v3867_v6 = vadd.f32 %v247_v5, %v3819_v32 }
  0xf3   :  { %v251_v7 = vpop.f32.mrf.mxu0 }
  0xf4   :  { %v3870_v8 = vadd.f32 %v251_v7, %v3828_v40 }
  0xf5   :  { %v253_v9 = vpop.f32.mrf.mxu0 }
  0xf6   :  { %v3873_v10 = vadd.f32 %v253_v9, %v3819_v32 }
  0xf7   :  { %v255_v17 = vpop.f32.mrf.mxu0 }
  0xf8   :  { %v3876_v18 = vadd.f32 %v255_v17, %v3828_v40 }
  0xf9   :  { %v257_v19 = vpop.f32.mrf.mxu0 }
  0xfa   :  { %v3879_v20 = vadd.f32 %v257_v19, %v3819_v32 }
  0xfb   :  { %v261_v21 = vpop.f32.mrf.mxu0 }
  0xfc   :  { %v3882_v22 = vadd.f32 %v261_v21, %v3828_v40  ;;  %v216_v21 = vadd.f32 %v3826_v37, %v3828_v40  ;;  %v404_v37 = vld [vmem:[#allocation5] sm:$0xff] }
  0xfd   :  { %v263_v23 = vpop.f32.mrf.mxu0 }
  0xfe   :  { %v3885_v24 = vadd.f32 %v263_v23, %v3819_v32 }
  0xff   :  { %v265_v27 = vpop.f32.mrf.mxu0 }
 0x100   :  { %v3888_v28 = vadd.f32 %v265_v27, %v3828_v40 }
 0x101   :  { %v267_v29 = vpop.f32.mrf.mxu0 }
 0x102   :  { %v3891_v30 = vadd.f32 %v267_v29, %v3819_v32 }
 0x103   :  { %v271_v31 = vpop.f32.mrf.mxu0 }
 0x104   :  { %v3894_v34 = vadd.f32 %v271_v31, %v3828_v40 }
 0x105   :  { %v273_v35 = vpop.f32.mrf.mxu0 }
 0x106   :  { %v3897_v38 = vadd.f32 %v273_v35, %v3819_v32 }
 0x107   :  { %v275_v42 = vpop.f32.mrf.mxu0 }
 0x108   :  { %v3900_v43 = vadd.f32 %v275_v42, %v3828_v40 }
 0x109   :  { %v277_v45 = vpop.f32.mrf.mxu0 }
 0x10a   :  { %v3903_v48 = vadd.f32 %v277_v45, %v3819_v32 }
 0x10b   :  { %v281_v49 = vpop.f32.mrf.mxu0 }
 0x10c   :  { %v3906_v51 = vadd.f32 %v281_v49, %v3828_v40 }
 0x10d   :  { %v283_v53 = vpop.f32.mrf.mxu0 }
 0x10e   :  { %v284_v55 = vadd.f32 %v283_v53, %v3819_v32 }
 0x10f   :  { %v285_v57 = vpop.f32.mrf.mxu0 }
 0x110   :  { %v3910_v59 = vadd.f32 %v285_v57, %v3828_v40  ;;  %v568_v61 = vadd.f32 %v561_v39, %v284_v55 }
 0x111   :  { %v287_v63 = vpop.f32.mrf.mxu0 }
 0x112   :  { %3349 = vtanh.f32 %v568_v61  ;;  %v288_v5 = vadd.f32 %v287_v63, %v3819_v32  ;;  %v405_v32 = vld [vmem:[#allocation5 + $0x8] sm:$0xff]  ;;  %v3018_v42 = vmul.f32 -1.442695, %v568_v61 }
 0x113   :  { %v395_v7 = vpop.f32.mrf.mxu0 }
 0x114   :  { %v402_v9 = vadd.f32 %v395_v7, %v212_v3  ;;  %v569_v17 = vadd.f32 %v564_v46, %v288_v5 }
 0x115   :  { %v3147_v19 = vpop.f32.mrf.mxu0 }
 0x116   :  { %3351 = vtanh.f32 %v402_v9  ;;  %v3013_v40 = vmul.f32 -1.442695, %v402_v9  ;;  %v3019_v45 = vmul.f32 -1.442695, %v569_v17 }
 0x117   :  { %3353 = vtanh.f32 %v569_v17  ;;  %v398_v23 = vpop.f32.mrf.mxu0 }
 0x118   :  { %v403_v27 = vadd.f32 %v398_v23, %v216_v21 }
 0x119   :  { %v3148_v29 = vpop.f32.mrf.mxu0 }
 0x11a   :  { %3355 = vtanh.f32 %v403_v27  ;;  %v3014_v35 = vmul.f32 -1.442695, %v403_v27  ;;  %v570_v27 = vld [vmem:[#allocation7] sm:$0xff] }
 0x11b   :  { %3357 = vpow2.f32 %v3013_v40 }
 0x11c   :  { %3359 = vpow2.f32 %v3014_v35 }
 0x11d   :  { %3361 = vpow2.f32 %v3018_v42 }
 0x11e   :  { %3363 = vpow2.f32 %v3019_v45 }
 0x11f   :  { %v3350_v39 = vpop.eup %3349 }
 0x120   :  { %598 = vrot.lane.b32.xlu1 %v3350_v39, %s3616_s4  ;;  %v3933_v39 = vld [vmem:[%s4881_s5] sm:$0xff] }
 0x121   :  { %vm462_vm3 = vcmp.gt.s32.totalorder %v3933_v39, 0  ;;  %vm628_vm5 = vcmp.gt.s32.totalorder %v3933_v39, 7  ;;  %vm782_vm11 = vcmp.gt.s32.totalorder %v3933_v39, 1  ;;  %vm936_vm13 = vcmp.gt.s32.totalorder %v3933_v39, 6 }
 0x122   :  { %v464_v35 = vsel %vm462_vm3, 1, %v3613_v1 }
 0x123   :  { %v3352_v33 = vpop.eup %3351 }
 0x124   :  { %v3354_v31 = vpop.eup %3353  ;;  %432 = vrot.lane.b32.xlu0 %v3352_v33, %s3616_s4 }
 0x125   :  { %600 = vrot.lane.b32.xlu1 %v3354_v31, %s3616_s4  ;;  %v571_v31 = vld [vmem:[#allocation7 + $0x8] sm:$0xff] }
 0x127   :  { %v3356_v46 = vpop.eup %3355 }
 0x128   :  { %434 = vrot.lane.b32.xlu0 %v3356_v46, %s3616_s4  ;;  %v3358_v49 = vpop.eup %3357 }
 0x129   :  { %424 = vrot.lane.b32.xlu1 %v405_v32, %s3617_s13  ;;  %v412_v53 = vadd.f32 1.0, %v3358_v49  ;;  %v3360_v55 = vpop.eup %3359 }
 0x12a   :  { %v413_v57 = vadd.f32 1.0, %v3360_v55  ;;  %v3362_v63 = vpop.eup %3361 }
 0x12b   :  { %3365 = vrcp.f32 %v412_v53  ;;  %v578_v3 = vadd.f32 1.0, %v3362_v63  ;;  %v3364_v5 = vpop.eup %3363 }
 0x12c   :  { %422 = vrot.lane.b32.xlu0 %v404_v37, %s3617_s13  ;;  %3367 = vrcp.f32 %v413_v57  ;;  %v579_v7 = vadd.f32 1.0, %v3364_v5  ;;  %v3944_v37 = vld [vmem:[%s4881_s5 + $0x8] sm:$0xff] }
 0x12d   :  { %3369 = vrcp.f32 %v578_v3  ;;  %vm463_vm4 = vcmp.gt.s32.totalorder %v3944_v37, 0  ;;  %vm629_vm6 = vcmp.gt.s32.totalorder %v3944_v37, 7  ;;  %vm783_vm12 = vcmp.gt.s32.totalorder %v3944_v37, 1 }
 0x12e   :  { %3371 = vrcp.f32 %v579_v7  ;;  %v465_v45 = vsel %vm463_vm4, 1, %v3613_v1  ;;  %vm937_vm14 = vcmp.gt.s32.totalorder %v3944_v37, 6 }
 0x138   :  { %v3923_v9 = vpop.eup %3365 }
 0x139   :  { %v3927_v17 = vpop.eup %3367 }
 0x13a   :  { %v3937_v33 = vpop.eup %3369 }
 0x13b   :  { %v3948_v40 = vpop.eup %3371 }
 0x192   :  { %v599_v21 = vpop.permute.xlu1 %598 }
 0x193   :  { %v604_v32 = vmul.f32 %v3937_v33, %v599_v21 }
 0x196   :  { %v433_v19 = vpop.permute.xlu0 %432 }
 0x197   :  { %v438_v61 = vmul.f32 %v3923_v9, %v433_v19  ;;  %v601_v46 = vpop.permute.xlu1 %600 }
 0x198   :  { %v605_v42 = vmul.f32 %v3948_v40, %v601_v46 }
 0x199   :  { %442 = vrot.lane.b32.xlu0 %v438_v61, %s3617_s13 }
 0x19a   :  { %v435_v23 = vpop.permute.xlu0 %434 }
 0x19b   :  { %v439_v29 = vmul.f32 %v3927_v17, %v435_v23  ;;  %v3963_v55 = vpop.permute.xlu1 %424 }
 0x19c   :  { %v429_v3 = vmul.f32 %v3927_v17, %v3963_v55 }
 0x19d   :  { %444 = vrot.lane.b32.xlu1 %v439_v29, %s3617_s13  ;;  %588 = vrot.lane.b32.xlu0 %v570_v27, %s3617_s13 }
 0x19e   :  { %v3959_v49 = vpop.permute.xlu0 %422 }
 0x19f   :  { %v428_v53 = vmul.f32 %v3923_v9, %v3959_v49 }
 0x1a1   :  { %590 = vrot.lane.b32.xlu1 %v571_v31, %s3617_s13  ;;  %608 = vrot.lane.b32.xlu0 %v604_v32, %s3617_s13  ;;  %v630_v32 = vsel %vm628_vm5, 1, %v3613_v1  ;;  %vm1090_vm5 = vcmp.gt.s32.totalorder %v3933_v39, 2 }
 0x1a5   :  { %610 = vrot.lane.b32.xlu1 %v605_v42, %s3617_s13  ;;  %467 = vperm.xlu0 %3311, %v464_v35   ;;  %v631_v35 = vsel %vm629_vm6, 1, %v3613_v1  ;;  %vm1091_vm6 = vcmp.gt.s32.totalorder %v3944_v37, 2 }
 0x1a9   :  { %470 = vperm.xlu1 %3312, %v465_v45   ;;  %478 = vrot.lane.b32.xlu0 %v3805_v26, %s3618_s17 }
 0x1ad   :  { %476 = vrot.lane.b32.xlu1 %v3803_v25, %s3618_s17 }
 0x20b   :  { %v443_v57 = vpop.permute.xlu0 %442 }
 0x20c   :  { %v448_v63 = vadd.f32 %v443_v57, %v428_v53 }
 0x20e   :  { %3373 = vtanh.f32 %v448_v63 }
 0x20f   :  { %v445_v5 = vpop.permute.xlu1 %444  ;;  %v589_v7 = vpop.permute.xlu0 %588 }
 0x210   :  { %v449_v19 = vadd.f32 %v445_v5, %v429_v3  ;;  %v594_v26 = vmul.f32 %v3937_v33, %v589_v7 }
 0x212   :  { %3375 = vtanh.f32 %v449_v19 }
 0x213   :  { %v591_v25 = vpop.permute.xlu1 %590  ;;  %v609_v61 = vpop.permute.xlu0 %608 }
 0x214   :  { %v614_v21 = vadd.f32 %v609_v61, %v594_v26  ;;  %v595_v23 = vmul.f32 %v3948_v40, %v591_v25 }
 0x216   :  { %3377 = vtanh.f32 %v614_v21 }
 0x217   :  { %v611_v27 = vpop.permute.xlu1 %610 }
 0x218   :  { %v615_v29 = vadd.f32 %v611_v27, %v595_v23 }
 0x21a   :  { %3379 = vtanh.f32 %v615_v29 }
 0x21b   :  { %v3374_v31 = vpop.eup %3373 }
 0x21c   :  { %454 = vrot.lane.b32.xlu1 %v3374_v31, %s3616_s4 }
 0x21f   :  { %v3376_v46 = vpop.eup %3375 }
 0x220   :  { %456 = vrot.lane.b32.xlu0 %v3376_v46, %s3616_s4  ;;  %633 = vperm.xlu1 %3312, %v630_v32   ;;  %v3983_v57 = vpop.permute.xlu0 %467 }
 0x221   :  { %vm4888_vm7 = vcmp.eq.s32.totalorder %v3983_v57, 1 }
 0x223   :  { %v3378_v42 = vpop.eup %3377 }
 0x224   :  { %636 = vperm.xlu0 %3311, %v631_v35   ;;  %620 = vrot.lane.b32.xlu1 %v3378_v42, %s3616_s4  ;;  %v3981_v53 = vpop.permute.xlu1 %470  ;;  %v479_v5 = vpop.permute.xlu0 %478 }
 0x225   :  { %vm4887_vm8 = vcmp.eq.s32.totalorder %v3981_v53, 1 }
 0x227   :  { %v3380_v45 = vpop.eup %3379 }
 0x228   :  { %622 = vrot.lane.b32.xlu0 %v3380_v45, %s3616_s4  ;;  %642 = vrot.lane.b32.xlu1 %v3740_v14, %s3618_s17  ;;  %v477_v3 = vpop.permute.xlu1 %476 }
 0x22c   :  { %644 = vrot.lane.b32.xlu0 %v3742_v15, %s3618_s17 }
 0x28e   :  { %v455_v26 = vpop.permute.xlu1 %454 }
 0x28f   :  { %v460_v61 = vmul.f32 %v3923_v9, %v455_v26  ;;  %v485_v26 = vsel %vm4887_vm8, %v449_v19, %v3963_v55 }
 0x291   :  { %v482_v23 = vsel %vm4888_vm7, %v460_v61, %v477_v3 }
 0x292   :  { %v457_v27 = vpop.permute.xlu0 %456  ;;  %488 = vrot.lane.b32.xlu1 %v482_v23, %s3617_s13 }
 0x293   :  { %v461_v14 = vmul.f32 %v3927_v17, %v457_v27 }
 0x295   :  { %v483_v15 = vsel %vm4887_vm8, %v461_v14, %v479_v5 }
 0x296   :  { %490 = vrot.lane.b32.xlu0 %v483_v15, %s3617_s13 }
 0x29b   :  { %v3995_v31 = vpop.permute.xlu1 %633 }
 0x29c   :  { %vm638_vm9 = vcmp.eq.s32.totalorder %v3995_v31, 1 }
 0x29f   :  { %v3997_v9 = vpop.permute.xlu0 %636  ;;  %v621_v32 = vpop.permute.xlu1 %620 }
 0x2a0   :  { %v626_v46 = vmul.f32 %v3937_v33, %v621_v32  ;;  %vm639_vm10 = vcmp.eq.s32.totalorder %v3997_v9, 1  ;;  %v484_v33 = vsel %vm4888_vm7, %v448_v63, %v3959_v49 }
 0x2a1   :  { %v651_v61 = vsel %vm639_vm10, %v615_v29, %v591_v25 }
 0x2a3   :  { %v623_v35 = vpop.permute.xlu0 %622  ;;  %v643_v42 = vpop.permute.xlu1 %642 }
 0x2a4   :  { %v648_v17 = vsel %vm638_vm9, %v626_v46, %v643_v42  ;;  %v627_v45 = vmul.f32 %v3948_v40, %v623_v35  ;;  %v650_v40 = vsel %vm638_vm9, %v614_v21, %v589_v7 }
 0x2a5   :  { %654 = vrot.lane.b32.xlu1 %v648_v17, %s3617_s13 }
 0x2a7   :  { %v645_v3 = vpop.permute.xlu0 %644 }
 0x2a8   :  { %v649_v5 = vsel %vm639_vm10, %v627_v45, %v645_v3 }
 0x2a9   :  { %656 = vrot.lane.b32.xlu0 %v649_v5, %s3617_s13  ;;  %498 = vrot.lane.b32.xlu1 %v484_v33, %s3618_s17 }
 0x2ad   :  { %500 = vrot.lane.b32.xlu0 %v485_v26, %s3618_s17  ;;  %664 = vrot.lane.b32.xlu1 %v650_v40, %s3618_s17 }
 0x2b1   :  { %666 = vrot.lane.b32.xlu0 %v651_v61, %s3618_s17 }
 0x304   :  { %v489_v49 = vpop.permute.xlu1 %488 }
 0x305   :  { %494 = vst.msk [vmem:[#allocation4] sm:$0xff] %vm322_vm0, %v489_v49 }
 0x308   :  { %v491_v63 = vpop.permute.xlu0 %490 }
 0x309   :  { %495 = vst.msk [vmem:[#allocation4 + $0x8] sm:$0xff] %vm322_vm0, %v491_v63 }
 0x30c   :  { %v4025_v23 = vld [vmem:[#allocation4] sm:$0xff] }
 0x310   :  { %v4027_v55 = vld [vmem:[#allocation4 + $0x8] sm:$0xff] }
 0x311   :  { %v677_v7 = vpack.c.bf16 %v4027_v55, %v4025_v23 }
 0x313   :  { %3162 = vmatmul.mubr.msk.bf16.vlgmr.msra.gmra.mxu1 %vm322_vm0, %v677_v7 }
 0x314   :  { %3166 = vmatpush3.bf16.msra.mxu1 %v3731_v12  ;;  %3169 = vmatprep.mubr.msk.bf16.mxu1 %vm3615_vm1, %v3614_v2 }
 0x315   :  { %3167 = vmatprep.subr.bf16.mxu1 %v3614_v2 }
 0x317   :  { %v655_v19 = vpop.permute.xlu1 %654 }
 0x318   :  { %660 = vst.msk [vmem:[#allocation6] sm:$0xff] %vm322_vm0, %v655_v19  ;;  %3168 = vmatpush3.bf16.msra.mxu1 %v3738_v13 }
 0x319   :  { %3173 = vmatprep.subr.bf16.mxu1 %v3614_v2 }
 0x31b   :  { %v657_v25 = vpop.permute.xlu0 %656  ;;  %v499_v21 = vpop.permute.xlu1 %498 }
 0x31c   :  { %661 = vst.msk [vmem:[#allocation6 + $0x8] sm:$0xff] %vm322_vm0, %v657_v25  ;;  %504 = vst.msk [vmem:[#allocation5] sm:$0xff] %vm322_vm0, %v499_v21 }
 0x31f   :  { %v501_v29 = vpop.permute.xlu0 %500  ;;  %v665_v27 = vpop.permute.xlu1 %664  ;;  %v4043_v15 = vld [vmem:[#allocation6] sm:$0xff] }
 0x320   :  { %505 = vst.msk [vmem:[#allocation5 + $0x8] sm:$0xff] %vm322_vm0, %v501_v29  ;;  %670 = vst.msk [vmem:[#allocation7] sm:$0xff] %vm322_vm0, %v665_v27 }
 0x323   :  { %v667_v14 = vpop.permute.xlu0 %666  ;;  %v4045_v32 = vld [vmem:[#allocation6 + $0x8] sm:$0xff]  ;;  %v724_v25 = vld [vmem:[#allocation5] sm:$0xff] }
 0x324   :  { %671 = vst.msk [vmem:[#allocation7 + $0x8] sm:$0xff] %vm322_vm0, %v667_v14  ;;  %v831_v46 = vpack.c.bf16 %v4045_v32, %v4043_v15 }
 0x326   :  { %3170 = vmatmul.mubr.msk.bf16.vlgmr.msra.gmra.mxu1 %vm322_vm0, %v831_v46 }
 0x327   :  { %3174 = vmatpush3.bf16.msra.mxu1 %v3726_v11  ;;  %3177 = vmatprep.mubr.msk.bf16.mxu1 %vm3615_vm1, %v3614_v2  ;;  %v725_v21 = vld [vmem:[#allocation5 + $0x8] sm:$0xff] }
 0x328   :  { %3175 = vmatprep.subr.bf16.mxu1 %v3614_v2 }
 0x32b   :  { %3176 = vmatpush3.bf16.msra.mxu1 %v3751_v16 }
 0x32c   :  { %3181 = vmatprep.subr.bf16.mxu1 %v3614_v2 }
 0x3d3   :  { %v715_v35 = vpop.f32.mrf.mxu1 }
 0x3d4   :  { %v722_v42 = vadd.f32 %v715_v35, %v3834_v44 }
 0x3d5   :  { %v3163_v17 = vpop.f32.mrf.mxu1 }
 0x3d6   :  { %3381 = vtanh.f32 %v722_v42 }
 0x3d7   :  { %v718_v45 = vpop.f32.mrf.mxu1 }
 0x3d8   :  { %v723_v3 = vadd.f32 %v718_v45, %v3840_v50 }
 0x3d9   :  { %v3164_v5 = vpop.f32.mrf.mxu1 }
 0x3da   :  { %3383 = vtanh.f32 %v723_v3  ;;  %v3022_v29 = vmul.f32 -1.442695, %v723_v3 }
 0x3e3   :  { %v3382_v33 = vpop.eup %3381 }
 0x3e4   :  { %752 = vrot.lane.b32.xlu1 %v3382_v33, %s3616_s4 }
 0x3e6   :  { %v869_v26 = vpop.f32.mrf.mxu1 }
 0x3e7   :  { %v3384_v40 = vpop.eup %3383  ;;  %v876_v61 = vadd.f32 %v869_v26, %v3897_v38  ;;  %v3021_v38 = vmul.f32 -1.442695, %v722_v42 }
 0x3e8   :  { %754 = vrot.lane.b32.xlu0 %v3384_v40, %s3616_s4  ;;  %v3171_v49 = vpop.f32.mrf.mxu1 }
 0x3e9   :  { %3385 = vtanh.f32 %v876_v61 }
 0x3ea   :  { %v872_v63 = vpop.f32.mrf.mxu1 }
 0x3eb   :  { %v877_v44 = vadd.f32 %v872_v63, %v3903_v48  ;;  %v3024_v48 = vmul.f32 -1.442695, %v876_v61 }
 0x3ec   :  { %v3172_v7 = vpop.f32.mrf.mxu1 }
 0x3ed   :  { %3387 = vtanh.f32 %v877_v44  ;;  %v3025_v35 = vmul.f32 -1.442695, %v877_v44  ;;  %v878_v44 = vld [vmem:[#allocation7] sm:$0xff]  ;;  %v879_v7 = vld [vmem:[#allocation7 + $0x8] sm:$0xff] }
 0x3ee   :  { %3389 = vpow2.f32 %v3021_v38 }
 0x3ef   :  { %3391 = vpow2.f32 %v3022_v29  ;;  %v784_v29 = vsel %vm782_vm11, 1, %v3613_v1  ;;  %vm1244_vm11 = vcmp.gt.s32.totalorder %v3933_v39, 5 }
 0x3f0   :  { %3393 = vpow2.f32 %v3024_v48  ;;  %v785_v48 = vsel %vm783_vm12, 1, %v3613_v1  ;;  %vm1245_vm12 = vcmp.gt.s32.totalorder %v3944_v37, 5 }
 0x3f6   :  { %v3386_v19 = vpop.eup %3385 }
 0x3f7   :  { %906 = vrot.lane.b32.xlu1 %v3386_v19, %s3616_s4 }
 0x3fa   :  { %v3388_v50 = vpop.eup %3387 }
 0x3fb   :  { %908 = vrot.lane.b32.xlu0 %v3388_v50, %s3616_s4  ;;  %742 = vrot.lane.b32.xlu1 %v724_v25, %s3617_s13  ;;  %v3390_v27 = vpop.eup %3389 }
 0x3fc   :  { %v732_v14 = vadd.f32 1.0, %v3390_v27  ;;  %v3392_v46 = vpop.eup %3391 }
 0x3fd   :  { %v733_v17 = vadd.f32 1.0, %v3392_v46  ;;  %v3394_v45 = vpop.eup %3393 }
 0x3fe   :  { %3395 = vrcp.f32 %v732_v14  ;;  %v886_v42 = vadd.f32 1.0, %v3394_v45 }
 0x3ff   :  { %744 = vrot.lane.b32.xlu0 %v725_v21, %s3617_s13  ;;  %3397 = vpow2.f32 %v3025_v35 }
 0x400   :  { %3399 = vrcp.f32 %v733_v17 }
 0x401   :  { %3401 = vrcp.f32 %v886_v42 }
 0x40b   :  { %v4067_v5 = vpop.eup %3395 }
 0x40c   :  { %v3398_v40 = vpop.eup %3397 }
 0x40d   :  { %v4071_v3 = vpop.eup %3399  ;;  %v887_v63 = vadd.f32 1.0, %v3398_v40 }
 0x40e   :  { %v4077_v19 = vpop.eup %3401 }
 0x40f   :  { %3403 = vrcp.f32 %v887_v63 }
 0x41c   :  { %v4082_v21 = vpop.eup %3403 }
 0x456   :  { %v753_v33 = vpop.permute.xlu1 %752 }
 0x457   :  { %v758_v26 = vmul.f32 %v4067_v5, %v753_v33 }
 0x459   :  { %762 = vrot.lane.b32.xlu1 %v758_v26, %s3617_s13 }
 0x45a   :  { %v755_v61 = vpop.permute.xlu0 %754 }
 0x45b   :  { %v759_v49 = vmul.f32 %v4071_v3, %v755_v61  ;;  %v938_v61 = vsel %vm936_vm13, 1, %v3613_v1 }
 0x45d   :  { %764 = vrot.lane.b32.xlu0 %v759_v49, %s3617_s13  ;;  %896 = vrot.lane.b32.xlu1 %v878_v44, %s3617_s13 }
 0x461   :  { %898 = vrot.lane.b32.xlu0 %v879_v7, %s3617_s13 }
 0x469   :  { %v907_v50 = vpop.permute.xlu1 %906 }
 0x46a   :  { %v912_v25 = vmul.f32 %v4077_v19, %v907_v50 }
 0x46c   :  { %916 = vrot.lane.b32.xlu1 %v912_v25, %s3617_s13  ;;  %v939_v25 = vsel %vm937_vm14, 1, %v3613_v1 }
 0x46d   :  { %v909_v38 = vpop.permute.xlu0 %908  ;;  %v4093_v14 = vpop.permute.xlu1 %742 }
 0x46e   :  { %v913_v27 = vmul.f32 %v4082_v21, %v909_v38  ;;  %v748_v46 = vmul.f32 %v4067_v5, %v4093_v14 }
 0x470   :  { %918 = vrot.lane.b32.xlu0 %v913_v27, %s3617_s13  ;;  %787 = vperm.xlu1 %3312, %v784_v29  }
 0x471   :  { %v4097_v35 = vpop.permute.xlu0 %744 }
 0x472   :  { %v749_v33 = vmul.f32 %v4071_v3, %v4097_v35 }
 0x474   :  { %790 = vperm.xlu0 %3311, %v785_v48   ;;  %796 = vrot.lane.b32.xlu1 %v4025_v23, %s3618_s17 }
 0x478   :  { %798 = vrot.lane.b32.xlu0 %v4027_v55, %s3618_s17 }
 0x4cb   :  { %v763_v17 = vpop.permute.xlu1 %762 }
 0x4cc   :  { %v768_v45 = vadd.f32 %v763_v17, %v748_v46 }
 0x4ce   :  { %3405 = vtanh.f32 %v768_v45 }
 0x4cf   :  { %v765_v26 = vpop.permute.xlu0 %764  ;;  %v897_v23 = vpop.permute.xlu1 %896 }
 0x4d0   :  { %v769_v42 = vadd.f32 %v765_v26, %v749_v33  ;;  %v902_v40 = vmul.f32 %v4077_v19, %v897_v23 }
 0x4d2   :  { %3407 = vtanh.f32 %v769_v42 }
 0x4d3   :  { %v899_v49 = vpop.permute.xlu0 %898 }
 0x4d4   :  { %v903_v50 = vmul.f32 %v4082_v21, %v899_v49 }
 0x4db   :  { %v3406_v55 = vpop.eup %3405 }
 0x4dc   :  { %774 = vrot.lane.b32.xlu1 %v3406_v55, %s3616_s4 }
 0x4de   :  { %v917_v63 = vpop.permute.xlu1 %916 }
 0x4df   :  { %v3408_v44 = vpop.eup %3407  ;;  %v922_v7 = vadd.f32 %v917_v63, %v902_v40 }
 0x4e0   :  { %776 = vrot.lane.b32.xlu0 %v3408_v44, %s3616_s4  ;;  %941 = vperm.xlu1 %3312, %v938_v61  }
 0x4e1   :  { %3409 = vtanh.f32 %v922_v7 }
 0x4e2   :  { %v919_v38 = vpop.permute.xlu0 %918 }
 0x4e3   :  { %v923_v29 = vadd.f32 %v919_v38, %v903_v50 }
 0x4e4   :  { %944 = vperm.xlu0 %3311, %v939_v25  }
 0x4e5   :  { %3411 = vtanh.f32 %v923_v29 }
 0x4eb   :  { %v4115_v46 = vpop.permute.xlu1 %787 }
 0x4ec   :  { %vm792_vm15 = vcmp.eq.s32.totalorder %v4115_v46, 1 }
 0x4ee   :  { %v3410_v27 = vpop.eup %3409 }
 0x4ef   :  { %928 = vrot.lane.b32.xlu1 %v3410_v27, %s3616_s4  ;;  %v4117_v17 = vpop.permute.xlu0 %790  ;;  %v797_v33 = vpop.permute.xlu1 %796 }
 0x4f0   :  { %vm793_vm2 = vcmp.eq.s32.totalorder %v4117_v17, 1 }
 0x4f2   :  { %v3412_v48 = vpop.eup %3411 }
 0x4f3   :  { %930 = vrot.lane.b32.xlu0 %v3412_v48, %s3616_s4  ;;  %950 = vrot.lane.b32.xlu1 %v4043_v15, %s3618_s17  ;;  %v799_v26 = vpop.permute.xlu0 %798 }
 0x4f7   :  { %952 = vrot.lane.b32.xlu0 %v4045_v32, %s3618_s17 }
 0x54e   :  { %v775_v55 = vpop.permute.xlu1 %774 }
 0x54f   :  { %v780_v40 = vmul.f32 %v4067_v5, %v775_v55  ;;  %v805_v55 = vsel %vm793_vm2, %v769_v42, %v4097_v35 }
 0x551   :  { %v802_v61 = vsel %vm792_vm15, %v780_v40, %v797_v33 }
 0x552   :  { %v777_v63 = vpop.permute.xlu0 %776  ;;  %808 = vrot.lane.b32.xlu1 %v802_v61, %s3617_s13 }
 0x553   :  { %v781_v15 = vmul.f32 %v4071_v3, %v777_v63 }
 0x555   :  { %v803_v32 = vsel %vm793_vm2, %v781_v15, %v799_v26 }
 0x556   :  { %810 = vrot.lane.b32.xlu0 %v803_v32, %s3617_s13 }
 0x55b   :  { %v4129_v44 = vpop.permute.xlu1 %941 }
 0x55c   :  { %vm946_vm3 = vcmp.eq.s32.totalorder %v4129_v44, 1 }
 0x55f   :  { %v4131_v5 = vpop.permute.xlu0 %944 }
 0x560   :  { %vm947_vm4 = vcmp.eq.s32.totalorder %v4131_v5, 1 }
 0x561   :  { %v929_v50 = vpop.permute.xlu1 %928  ;;  %v959_v40 = vsel %vm947_vm4, %v923_v29, %v899_v49 }
 0x562   :  { %v934_v25 = vmul.f32 %v4077_v19, %v929_v50  ;;  %v804_v19 = vsel %vm792_vm15, %v768_v45, %v4093_v14 }
 0x565   :  { %v931_v38 = vpop.permute.xlu0 %930  ;;  %v951_v27 = vpop.permute.xlu1 %950 }
 0x566   :  { %v956_v3 = vsel %vm946_vm3, %v934_v25, %v951_v27  ;;  %v935_v48 = vmul.f32 %v4082_v21, %v931_v38  ;;  %v958_v21 = vsel %vm946_vm3, %v922_v7, %v897_v23 }
 0x567   :  { %962 = vrot.lane.b32.xlu1 %v956_v3, %s3617_s13 }
 0x569   :  { %v953_v33 = vpop.permute.xlu0 %952 }
 0x56a   :  { %v957_v26 = vsel %vm947_vm4, %v935_v48, %v953_v33 }
 0x56b   :  { %964 = vrot.lane.b32.xlu0 %v957_v26, %s3617_s13  ;;  %818 = vrot.lane.b32.xlu1 %v804_v19, %s3618_s17 }
 0x56f   :  { %820 = vrot.lane.b32.xlu0 %v805_v55, %s3618_s17  ;;  %972 = vrot.lane.b32.xlu1 %v958_v21, %s3618_s17 }
 0x573   :  { %974 = vrot.lane.b32.xlu0 %v959_v40, %s3618_s17 }
 0x5c4   :  { %v809_v14 = vpop.permute.xlu1 %808 }
 0x5c5   :  { %814 = vst.msk [vmem:[#allocation4] sm:$0xff] %vm322_vm0, %v809_v14 }
 0x5c8   :  { %v811_v45 = vpop.permute.xlu0 %810 }
 0x5c9   :  { %815 = vst.msk [vmem:[#allocation4 + $0x8] sm:$0xff] %vm322_vm0, %v811_v45 }
 0x5cc   :  { %v4159_v61 = vld [vmem:[#allocation4] sm:$0xff] }
 0x5d0   :  { %v4161_v35 = vld [vmem:[#allocation4 + $0x8] sm:$0xff] }
 0x5d1   :  { %v985_v42 = vpack.c.bf16 %v4161_v35, %v4159_v61 }
 0x5d3   :  { %3178 = vmatmul.mubr.msk.bf16.vlgmr.msra.gmra.mxu1 %vm322_vm0, %v985_v42 }
 0x5d4   :  { %3182 = vmatpush3.bf16.msra.mxu1 %v3731_v12  ;;  %3185 = vmatprep.mubr.msk.bf16.mxu1 %vm3615_vm1, %v3614_v2 }
 0x5d5   :  { %3183 = vmatprep.subr.bf16.mxu1 %v3614_v2 }
 0x5d8   :  { %3184 = vmatpush3.bf16.msra.mxu1 %v3738_v13 }
 0x5d9   :  { %v963_v23 = vpop.permute.xlu1 %962  ;;  %3189 = vmatprep.subr.bf16.mxu1 %v3614_v2 }
 0x5da   :  { %968 = vst.msk [vmem:[#allocation6] sm:$0xff] %vm322_vm0, %v963_v23 }
 0x5dd   :  { %v965_v49 = vpop.permute.xlu0 %964  ;;  %v819_v7 = vpop.permute.xlu1 %818 }
 0x5de   :  { %969 = vst.msk [vmem:[#allocation6 + $0x8] sm:$0xff] %vm322_vm0, %v965_v49  ;;  %824 = vst.msk [vmem:[#allocation5] sm:$0xff] %vm322_vm0, %v819_v7 }
 0x5e1   :  { %v821_v29 = vpop.permute.xlu0 %820  ;;  %v973_v12 = vpop.permute.xlu1 %972  ;;  %v4177_v15 = vld [vmem:[#allocation6] sm:$0xff] }
 0x5e2   :  { %825 = vst.msk [vmem:[#allocation5 + $0x8] sm:$0xff] %vm322_vm0, %v821_v29  ;;  %978 = vst.msk [vmem:[#allocation7] sm:$0xff] %vm322_vm0, %v973_v12 }
 0x5e5   :  { %v975_v63 = vpop.permute.xlu0 %974  ;;  %v4179_v13 = vld [vmem:[#allocation6 + $0x8] sm:$0xff]  ;;  %v1032_v14 = vld [vmem:[#allocation5] sm:$0xff] }
 0x5e6   :  { %979 = vst.msk [vmem:[#allocation7 + $0x8] sm:$0xff] %vm322_vm0, %v975_v63  ;;  %v1139_v32 = vpack.c.bf16 %v4179_v13, %v4177_v15 }
 0x5e8   :  { %3186 = vmatmul.mubr.msk.bf16.vlgmr.msra.gmra.mxu1 %vm322_vm0, %v1139_v32 }
 0x5e9   :  { %3190 = vmatpush3.bf16.msra.mxu1 %v3726_v11  ;;  %3193 = vmatprep.mubr.msk.bf16.mxu1 %vm3615_vm1, %v3614_v2  ;;  %v1033_v45 = vld [vmem:[#allocation5 + $0x8] sm:$0xff] }
 0x5ea   :  { %3191 = vmatprep.subr.bf16.mxu1 %v3614_v2 }
 0x5ed   :  { %3192 = vmatpush3.bf16.msra.mxu1 %v3751_v16 }
 0x5ee   :  { %3197 = vmatprep.subr.bf16.mxu1 %v3614_v2 }
 0x693   :  { %v1023_v50 = vpop.f32.mrf.mxu1 }
 0x694   :  { %v1030_v25 = vadd.f32 %v1023_v50, %v3846_v54 }
 0x695   :  { %v3179_v38 = vpop.f32.mrf.mxu1 }
 0x696   :  { %3413 = vtanh.f32 %v1030_v25 }
 0x697   :  { %v1026_v27 = vpop.f32.mrf.mxu1 }
 0x698   :  { %v1031_v3 = vadd.f32 %v1026_v27, %v3852_v58 }
 0x699   :  { %v3180_v48 = vpop.f32.mrf.mxu1 }
 0x69a   :  { %3415 = vtanh.f32 %v1031_v3  ;;  %v3028_v42 = vmul.f32 -1.442695, %v1031_v3 }
 0x6a3   :  { %v3414_v11 = vpop.eup %3413 }
 0x6a4   :  { %1060 = vrot.lane.b32.xlu1 %v3414_v11, %s3616_s4 }
 0x6a7   :  { %v3416_v33 = vpop.eup %3415 }
 0x6a8   :  { %1062 = vrot.lane.b32.xlu0 %v3416_v33, %s3616_s4  ;;  %v1177_v26 = vpop.f32.mrf.mxu1  ;;  %v1186_v33 = vld [vmem:[#allocation7] sm:$0xff] }
 0x6a9   :  { %v1184_v16 = vadd.f32 %v1177_v26, %v3885_v24  ;;  %v3027_v24 = vmul.f32 -1.442695, %v1030_v25 }
 0x6aa   :  { %v3187_v19 = vpop.f32.mrf.mxu1 }
 0x6ab   :  { %3417 = vtanh.f32 %v1184_v16  ;;  %v3030_v7 = vmul.f32 -1.442695, %v1184_v16  ;;  %v1187_v16 = vld [vmem:[#allocation7 + $0x8] sm:$0xff] }
 0x6ac   :  { %v1180_v55 = vpop.f32.mrf.mxu1 }
 0x6ad   :  { %v1185_v54 = vadd.f32 %v1180_v55, %v3891_v30 }
 0x6ae   :  { %v3188_v21 = vpop.f32.mrf.mxu1 }
 0x6af   :  { %3419 = vtanh.f32 %v1185_v54  ;;  %v3031_v12 = vmul.f32 -1.442695, %v1185_v54 }
 0x6b0   :  { %3421 = vpow2.f32 %v3027_v24 }
 0x6b1   :  { %3423 = vpow2.f32 %v3028_v42 }
 0x6b8   :  { %v3418_v40 = vpop.eup %3417 }
 0x6b9   :  { %1214 = vrot.lane.b32.xlu1 %v3418_v40, %s3616_s4 }
 0x6bc   :  { %v3420_v58 = vpop.eup %3419 }
 0x6bd   :  { %1216 = vrot.lane.b32.xlu0 %v3420_v58, %s3616_s4  ;;  %1050 = vrot.lane.b32.xlu1 %v1032_v14, %s3617_s13  ;;  %v3422_v23 = vpop.eup %3421  ;;  %v1092_v58 = vsel %vm1090_vm5, 1, %v3613_v1 }
 0x6be   :  { %v1040_v30 = vadd.f32 1.0, %v3422_v23  ;;  %v3424_v49 = vpop.eup %3423 }
 0x6bf   :  { %v1041_v29 = vadd.f32 1.0, %v3424_v49 }
 0x6c0   :  { %3425 = vrcp.f32 %v1040_v30 }
 0x6c1   :  { %1052 = vrot.lane.b32.xlu0 %v1033_v45, %s3617_s13  ;;  %3427 = vpow2.f32 %v3030_v7  ;;  %v1093_v45 = vsel %vm1091_vm6, 1, %v3613_v1 }
 0x6c2   :  { %3429 = vrcp.f32 %v1041_v29 }
 0x6c3   :  { %3431 = vpow2.f32 %v3031_v12 }
 0x6cd   :  { %v4201_v63 = vpop.eup %3425 }
 0x6ce   :  { %v3428_v50 = vpop.eup %3427 }
 0x6cf   :  { %v4205_v25 = vpop.eup %3429  ;;  %v1194_v27 = vadd.f32 1.0, %v3428_v50 }
 0x6d0   :  { %v3432_v48 = vpop.eup %3431 }
 0x6d1   :  { %3433 = vrcp.f32 %v1194_v27  ;;  %v1195_v26 = vadd.f32 1.0, %v3432_v48 }
 0x6d3   :  { %3435 = vrcp.f32 %v1195_v26 }
 0x6de   :  { %v4211_v19 = vpop.eup %3433 }
 0x6e0   :  { %v4216_v21 = vpop.eup %3435 }
 0x716   :  { %v1061_v32 = vpop.permute.xlu1 %1060 }
 0x717   :  { %v1066_v38 = vmul.f32 %v4201_v63, %v1061_v32  ;;  %v1246_v32 = vsel %vm1244_vm11, 1, %v3613_v1 }
 0x719   :  { %1070 = vrot.lane.b32.xlu1 %v1066_v38, %s3617_s13 }
 0x71a   :  { %v1063_v3 = vpop.permute.xlu0 %1062 }
 0x71b   :  { %v1067_v11 = vmul.f32 %v4205_v25, %v1063_v3 }
 0x71d   :  { %1072 = vrot.lane.b32.xlu0 %v1067_v11, %s3617_s13  ;;  %1204 = vrot.lane.b32.xlu1 %v1186_v33, %s3617_s13  ;;  %v1247_v11 = vsel %vm1245_vm12, 1, %v3613_v1 }
 0x721   :  { %1206 = vrot.lane.b32.xlu0 %v1187_v16, %s3617_s13 }
 0x72b   :  { %v1215_v55 = vpop.permute.xlu1 %1214 }
 0x72c   :  { %v1220_v54 = vmul.f32 %v4211_v19, %v1215_v55 }
 0x72e   :  { %1224 = vrot.lane.b32.xlu1 %v1220_v54, %s3617_s13 }
 0x72f   :  { %v1217_v40 = vpop.permute.xlu0 %1216  ;;  %v4227_v24 = vpop.permute.xlu1 %1050 }
 0x730   :  { %v1221_v14 = vmul.f32 %v4216_v21, %v1217_v40  ;;  %v1056_v42 = vmul.f32 %v4201_v63, %v4227_v24 }
 0x732   :  { %1226 = vrot.lane.b32.xlu0 %v1221_v14, %s3617_s13  ;;  %1095 = vperm.xlu1 %3312, %v1092_v58  }
 0x733   :  { %v4231_v23 = vpop.permute.xlu0 %1052 }
 0x734   :  { %v1057_v7 = vmul.f32 %v4205_v25, %v4231_v23 }
 0x736   :  { %1098 = vperm.xlu0 %3311, %v1093_v45   ;;  %1104 = vrot.lane.b32.xlu1 %v4159_v61, %s3618_s17 }
 0x73a   :  { %1106 = vrot.lane.b32.xlu0 %v4161_v35, %s3618_s17 }
 0x78b   :  { %v1071_v30 = vpop.permute.xlu1 %1070 }
 0x78c   :  { %v1076_v49 = vadd.f32 %v1071_v30, %v1056_v42 }
 0x78e   :  { %3437 = vtanh.f32 %v1076_v49 }
 0x78f   :  { %v1073_v29 = vpop.permute.xlu0 %1072  ;;  %v1205_v35 = vpop.permute.xlu1 %1204 }
 0x790   :  { %v1077_v12 = vadd.f32 %v1073_v29, %v1057_v7  ;;  %v1210_v38 = vmul.f32 %v4211_v19, %v1205_v35 }
 0x792   :  { %3439 = vtanh.f32 %v1077_v12 }
 0x793   :  { %v1207_v27 = vpop.permute.xlu0 %1206 }
 0x794   :  { %v1211_v39 = vmul.f32 %v4216_v21, %v1207_v27 }
 0x79b   :  { %v3438_v61 = vpop.eup %3437 }
 0x79c   :  { %1082 = vrot.lane.b32.xlu1 %v3438_v61, %s3616_s4 }
 0x79f   :  { %v3440_v50 = vpop.eup %3439 }
 0x7a0   :  { %1084 = vrot.lane.b32.xlu0 %v3440_v50, %s3616_s4  ;;  %1249 = vperm.xlu1 %3312, %v1246_v32   ;;  %v1225_v3 = vpop.permute.xlu1 %1224 }
 0x7a1   :  { %v1230_v48 = vadd.f32 %v1225_v3, %v1210_v38 }
 0x7a3   :  { %3441 = vtanh.f32 %v1230_v48 }
 0x7a4   :  { %1252 = vperm.xlu0 %3311, %v1247_v11   ;;  %v1227_v33 = vpop.permute.xlu0 %1226 }
 0x7a5   :  { %v1231_v26 = vadd.f32 %v1227_v33, %v1211_v39 }
 0x7a7   :  { %3443 = vtanh.f32 %v1231_v26 }
 0x7ad   :  { %v4249_v55 = vpop.permute.xlu1 %1095 }
 0x7ae   :  { %vm1100_vm13 = vcmp.eq.s32.totalorder %v4249_v55, 1 }
 0x7b0   :  { %v3442_v16 = vpop.eup %3441 }
 0x7b1   :  { %1236 = vrot.lane.b32.xlu1 %v3442_v16, %s3616_s4  ;;  %v4251_v54 = vpop.permute.xlu0 %1098  ;;  %v1105_v40 = vpop.permute.xlu1 %1104 }
 0x7b2   :  { %vm1101_vm14 = vcmp.eq.s32.totalorder %v4251_v54, 1 }
 0x7b3   :  { %v1113_v39 = vsel %vm1101_vm14, %v1077_v12, %v4231_v23 }
 0x7b4   :  { %v3444_v37 = vpop.eup %3443 }
 0x7b5   :  { %1238 = vrot.lane.b32.xlu0 %v3444_v37, %s3616_s4  ;;  %1258 = vrot.lane.b32.xlu1 %v4177_v15, %s3618_s17  ;;  %v1107_v58 = vpop.permute.xlu0 %1106 }
 0x7b9   :  { %1260 = vrot.lane.b32.xlu0 %v4179_v13, %s3618_s17 }
 0x80e   :  { %v1083_v14 = vpop.permute.xlu1 %1082 }
 0x80f   :  { %v1088_v45 = vmul.f32 %v4201_v63, %v1083_v14 }
 0x811   :  { %v1110_v42 = vsel %vm1100_vm13, %v1088_v45, %v1105_v40 }
 0x812   :  { %v1085_v30 = vpop.permute.xlu0 %1084  ;;  %1116 = vrot.lane.b32.xlu1 %v1110_v42, %s3617_s13 }
 0x813   :  { %v1089_v15 = vmul.f32 %v4205_v25, %v1085_v30 }
 0x815   :  { %v1111_v13 = vsel %vm1101_vm14, %v1089_v15, %v1107_v58  ;;  %v4332_v15 = vld [vmem:[%s4878_s2 + $0x8] sm:$0xff]  }
 0x816   :  { %1118 = vrot.lane.b32.xlu0 %v1111_v13, %s3617_s13  ;;  %v4341_v13 = vld [vmem:[%s4878_s2] sm:$0xff]  }
 0x81b   :  { %v4263_v7 = vpop.permute.xlu1 %1249 }
 0x81c   :  { %vm1254_vm5 = vcmp.eq.s32.totalorder %v4263_v7, 1 }
 0x81f   :  { %v4265_v63 = vpop.permute.xlu0 %1252 }
 0x820   :  { %vm1255_vm6 = vcmp.eq.s32.totalorder %v4265_v63, 1 }
 0x821   :  { %v1267_v33 = vsel %vm1255_vm6, %v1231_v26, %v1207_v27  ;;  %v4312_v27 = vld [vmem:[%s4879_s3] sm:$0xff]  }
 0x823   :  { %v1237_v29 = vpop.permute.xlu1 %1236 }
 0x824   :  { %v1242_v61 = vmul.f32 %v4211_v19, %v1237_v29  ;;  %v1112_v19 = vsel %vm1100_vm13, %v1076_v49, %v4227_v24 }
 0x827   :  { %v1239_v32 = vpop.permute.xlu0 %1238  ;;  %v1259_v50 = vpop.permute.xlu1 %1258 }
 0x828   :  { %v1264_v25 = vsel %vm1254_vm5, %v1242_v61, %v1259_v50  ;;  %v1243_v38 = vmul.f32 %v4216_v21, %v1239_v32  ;;  %v1266_v21 = vsel %vm1254_vm5, %v1230_v48, %v1205_v35  ;;  %v4303_v35 = vld [vmem:[%s4879_s3 + $0x8] sm:$0xff]  }
 0x829   :  { %1270 = vrot.lane.b32.xlu1 %v1264_v25, %s3617_s13 }
 0x82b   :  { %v1261_v3 = vpop.permute.xlu0 %1260 }
 0x82c   :  { %v1265_v11 = vsel %vm1255_vm6, %v1243_v38, %v1261_v3 }
 0x82d   :  { %1272 = vrot.lane.b32.xlu0 %v1265_v11, %s3617_s13  ;;  %1126 = vrot.lane.b32.xlu1 %v1112_v19, %s3618_s17 }
 0x831   :  { %1128 = vrot.lane.b32.xlu0 %v1113_v39, %s3618_s17  ;;  %1280 = vrot.lane.b32.xlu1 %v1266_v21, %s3618_s17 }
 0x835   :  { %1282 = vrot.lane.b32.xlu0 %v1267_v33, %s3618_s17 }
 0x884   :  { %v1117_v24 = vpop.permute.xlu1 %1116 }
 0x885   :  { %1122 = vst.msk [vmem:[#allocation4] sm:$0xff] %vm322_vm0, %v1117_v24 }
 0x888   :  { %v1119_v49 = vpop.permute.xlu0 %1118 }
 0x889   :  { %1123 = vst.msk [vmem:[#allocation4 + $0x8] sm:$0xff] %vm322_vm0, %v1119_v49 }
 0x88c   :  { %v4293_v16 = vld [vmem:[#allocation4] sm:$0xff] }
 0x890   :  { %v4295_v23 = vld [vmem:[#allocation4 + $0x8] sm:$0xff] }
 0x891   :  { %v1293_v12 = vpack.c.bf16 %v4295_v23, %v4293_v16 }
 0x893   :  { %3194 = vmatmul.mubr.msk.bf16.vlgmr.msra.gmra.mxu1 %vm322_vm0, %v1293_v12 }
 0x894   :  { %3198 = vmatpush3.bf16.msra.mxu1 %v4303_v35  ;;  %3201 = vmatprep.mubr.msk.bf16.mxu1 %vm3615_vm1, %v3614_v2 }
 0x895   :  { %3199 = vmatprep.subr.bf16.mxu1 %v3614_v2 }
 0x898   :  { %3200 = vmatpush3.bf16.msra.mxu1 %v4312_v27 }
 0x899   :  { %3205 = vmatprep.subr.bf16.mxu1 %v3614_v2 }
 0x89b   :  { %v1271_v48 = vpop.permute.xlu1 %1270 }
 0x89c   :  { %1276 = vst.msk [vmem:[#allocation6] sm:$0xff] %vm322_vm0, %v1271_v48 }
 0x89f   :  { %v1273_v26 = vpop.permute.xlu0 %1272  ;;  %v1127_v37 = vpop.permute.xlu1 %1126 }
 0x8a0   :  { %1277 = vst.msk [vmem:[#allocation6 + $0x8] sm:$0xff] %vm322_vm0, %v1273_v26  ;;  %1132 = vst.msk [vmem:[#allocation5] sm:$0xff] %vm322_vm0, %v1127_v37 }
 0x8a3   :  { %v1129_v40 = vpop.permute.xlu0 %1128  ;;  %v1281_v58 = vpop.permute.xlu1 %1280  ;;  %v4321_v45 = vld [vmem:[#allocation6] sm:$0xff] }
 0x8a4   :  { %1133 = vst.msk [vmem:[#allocation5 + $0x8] sm:$0xff] %vm322_vm0, %v1129_v40  ;;  %1286 = vst.msk [vmem:[#allocation7] sm:$0xff] %vm322_vm0, %v1281_v58 }
 0x8a7   :  { %v1283_v14 = vpop.permute.xlu0 %1282  ;;  %v4323_v42 = vld [vmem:[#allocation6 + $0x8] sm:$0xff]  ;;  %v1340_v12 = vld [vmem:[#allocation5] sm:$0xff] }
 0x8a8   :  { %1287 = vst.msk [vmem:[#allocation7 + $0x8] sm:$0xff] %vm322_vm0, %v1283_v14  ;;  %v1447_v30 = vpack.c.bf16 %v4323_v42, %v4321_v45 }
 0x8aa   :  { %3202 = vmatmul.mubr.msk.bf16.vlgmr.msra.gmra.mxu1 %vm322_vm0, %v1447_v30 }
 0x8ab   :  { %3206 = vmatpush3.bf16.msra.mxu1 %v4332_v15  ;;  %3209 = vmatprep.mubr.msk.bf16.mxu1 %vm3615_vm1, %v3614_v2  ;;  %v1341_v48 = vld [vmem:[#allocation5 + $0x8] sm:$0xff]  ;;  %v1494_v26 = vld [vmem:[#allocation7] sm:$0xff] }
 0x8ac   :  { %3207 = vmatprep.subr.bf16.mxu1 %v3614_v2 }
 0x8af   :  { %3208 = vmatpush3.bf16.msra.mxu1 %v4341_v13 }
 0x8b0   :  { %3221 = vmatprep.subr.bf16.mxu1 %v3614_v2 }
 0x953   :  { %v1331_v29 = vpop.f32.mrf.mxu1 }
 0x954   :  { %v1338_v61 = vadd.f32 %v1331_v29, %v3858_v62 }
 0x955   :  { %v3195_v32 = vpop.f32.mrf.mxu1 }
 0x956   :  { %3445 = vtanh.f32 %v1338_v61 }
 0x957   :  { %v1334_v50 = vpop.f32.mrf.mxu1 }
 0x958   :  { %v1339_v25 = vadd.f32 %v1334_v50, %v3864_v4 }
 0x959   :  { %v3196_v38 = vpop.f32.mrf.mxu1 }
 0x95a   :  { %3447 = vtanh.f32 %v1339_v25  ;;  %v3034_v37 = vmul.f32 -1.442695, %v1339_v25 }
 0x963   :  { %v3446_v3 = vpop.eup %3445 }
 0x964   :  { %1368 = vrot.lane.b32.xlu1 %v3446_v3, %s3616_s4 }
 0x967   :  { %v3448_v11 = vpop.eup %3447 }
 0x968   :  { %1370 = vrot.lane.b32.xlu0 %v3448_v11, %s3616_s4 }
 0x96a   :  { %v1485_v19 = vpop.f32.mrf.mxu1 }
 0x96b   :  { %v1492_v39 = vadd.f32 %v1485_v19, %v3873_v10  ;;  %v1495_v10 = vld [vmem:[#allocation7 + $0x8] sm:$0xff] }
 0x96c   :  { %v3203_v21 = vpop.f32.mrf.mxu1 }
 0x96d   :  { %3449 = vtanh.f32 %v1492_v39  ;;  %v3036_v30 = vmul.f32 -1.442695, %v1492_v39 }
 0x96e   :  { %v1488_v33 = vpop.f32.mrf.mxu1 }
 0x96f   :  { %v1493_v62 = vadd.f32 %v1488_v33, %v3879_v20  ;;  %v3033_v20 = vmul.f32 -1.442695, %v1338_v61 }
 0x970   :  { %v3204_v24 = vpop.f32.mrf.mxu1 }
 0x971   :  { %3451 = vtanh.f32 %v1493_v62  ;;  %v3037_v32 = vmul.f32 -1.442695, %v1493_v62 }
 0x972   :  { %3453 = vpow2.f32 %v3033_v20  ;;  %v3610_v20 = vld [vmem:[%s4881_s5 + $0x8] sm:$0xff] }
 0x973   :  { %3455 = vpow2.f32 %v3034_v37  ;;  %vm1399_vm12 = vcmp.gt.s32.totalorder %v3610_v20, 3  ;;  %vm1553_vm7 = vcmp.gt.s32.totalorder %v3610_v20, 4 }
 0x974   :  { %v1401_v37 = vsel %vm1399_vm12, 1, %v3613_v1 }
 0x97a   :  { %v3450_v49 = vpop.eup %3449 }
 0x97b   :  { %1522 = vrot.lane.b32.xlu1 %v3450_v49, %s3616_s4 }
 0x97e   :  { %v3452_v4 = vpop.eup %3451 }
 0x97f   :  { %1524 = vrot.lane.b32.xlu0 %v3452_v4, %s3616_s4  ;;  %1358 = vrot.lane.b32.xlu1 %v1340_v12, %s3617_s13  ;;  %v3454_v40 = vpop.eup %3453  ;;  %v3609_v4 = vld [vmem:[%s4881_s5] sm:$0xff] }
 0x980   :  { %v1348_v58 = vadd.f32 1.0, %v3454_v40  ;;  %v3456_v14 = vpop.eup %3455  ;;  %vm1398_vm11 = vcmp.gt.s32.totalorder %v3609_v4, 3  ;;  %vm1552_vm8 = vcmp.gt.s32.totalorder %v3609_v4, 4 }
 0x981   :  { %v1349_v29 = vadd.f32 1.0, %v3456_v14  ;;  %v1554_v40 = vsel %vm1552_vm8, 1, %v3613_v1 }
 0x982   :  { %3457 = vrcp.f32 %v1348_v58  ;;  %v1555_v58 = vsel %vm1553_vm7, 1, %v3613_v1 }
 0x983   :  { %1360 = vrot.lane.b32.xlu0 %v1341_v48, %s3617_s13  ;;  %1512 = vrot.lane.b32.xlu1 %v1494_v26, %s3617_s13  ;;  %3459 = vpow2.f32 %v3036_v30  ;;  %v1400_v26 = vsel %vm1398_vm11, 1, %v3613_v1 }
 0x984   :  { %3461 = vrcp.f32 %v1349_v29 }
 0x985   :  { %3463 = vpow2.f32 %v3037_v32 }
 0x987   :  { %1514 = vrot.lane.b32.xlu0 %v1495_v10, %s3617_s13 }
 0x98f   :  { %v4357_v50 = vpop.eup %3457 }
 0x990   :  { %v3460_v11 = vpop.eup %3459 }
 0x991   :  { %v4361_v61 = vpop.eup %3461  ;;  %v1502_v39 = vadd.f32 1.0, %v3460_v11 }
 0x992   :  { %v3464_v21 = vpop.eup %3463 }
 0x993   :  { %3465 = vrcp.f32 %v1502_v39  ;;  %v1503_v33 = vadd.f32 1.0, %v3464_v21 }
 0x995   :  { %3467 = vrcp.f32 %v1503_v33 }
 0x9a0   :  { %v4365_v62 = vpop.eup %3465 }
 0x9a2   :  { %v4372_v12 = vpop.eup %3467 }
 0x9d6   :  { %v1369_v38 = vpop.permute.xlu1 %1368 }
 0x9d7   :  { %v1374_v3 = vmul.f32 %v4357_v50, %v1369_v38 }
 0x9d9   :  { %1378 = vrot.lane.b32.xlu1 %v1374_v3, %s3617_s13 }
 0x9da   :  { %v1371_v25 = vpop.permute.xlu0 %1370 }
 0x9db   :  { %v1375_v19 = vmul.f32 %v4361_v61, %v1371_v25 }
 0x9dd   :  { %1380 = vrot.lane.b32.xlu0 %v1375_v19, %s3617_s13 }
 0x9ed   :  { %v1523_v24 = vpop.permute.xlu1 %1522 }
 0x9ee   :  { %v1528_v49 = vmul.f32 %v4365_v62, %v1523_v24 }
 0x9f0   :  { %1532 = vrot.lane.b32.xlu1 %v1528_v49, %s3617_s13 }
 0x9f1   :  { %v1525_v48 = vpop.permute.xlu0 %1524  ;;  %v1359_v14 = vpop.permute.xlu1 %1358 }
 0x9f2   :  { %v1529_v10 = vmul.f32 %v4372_v12, %v1525_v48  ;;  %v1364_v32 = vmul.f32 %v4357_v50, %v1359_v14 }
 0x9f4   :  { %1534 = vrot.lane.b32.xlu0 %v1529_v10, %s3617_s13  ;;  %1403 = vperm.xlu1 %3312, %v1400_v26  }
 0x9f5   :  { %v1361_v30 = vpop.permute.xlu0 %1360  ;;  %v1513_v29 = vpop.permute.xlu1 %1512 }
 0x9f6   :  { %v1365_v25 = vmul.f32 %v4361_v61, %v1361_v30 }
 0x9f8   :  { %1406 = vperm.xlu0 %3311, %v1401_v37   ;;  %1557 = vperm.xlu1 %3312, %v1554_v40  }
 0x9f9   :  { %v1515_v38 = vpop.permute.xlu0 %1514 }
 0x9fa   :  { %v1519_v24 = vmul.f32 %v4372_v12, %v1515_v38 }
 0x9fc   :  { %1560 = vperm.xlu0 %3311, %v1555_v58   ;;  %1412 = vrot.lane.b32.xlu1 %v4293_v16, %s3618_s17 }
 0xa00   :  { %1414 = vrot.lane.b32.xlu0 %v4295_v23, %s3618_s17  ;;  %v1518_v23 = vmul.f32 %v4365_v62, %v1513_v29 }
 0xa4b   :  { %v1379_v3 = vpop.permute.xlu1 %1378 }
 0xa4c   :  { %v1384_v11 = vadd.f32 %v1379_v3, %v1364_v32 }
 0xa4e   :  { %3469 = vtanh.f32 %v1384_v11 }
 0xa4f   :  { %v1381_v19 = vpop.permute.xlu0 %1380 }
 0xa50   :  { %v1385_v1 = vadd.f32 %v1381_v19, %v1365_v25 }
 0xa52   :  { %3471 = vtanh.f32 %v1385_v1 }
 0xa5b   :  { %v3470_v39 = vpop.eup %3469 }
 0xa5c   :  { %1390 = vrot.lane.b32.xlu1 %v3470_v39, %s3616_s4 }
 0xa5f   :  { %v3472_v16 = vpop.eup %3471 }
 0xa60   :  { %1392 = vrot.lane.b32.xlu0 %v3472_v16, %s3616_s4 }
 0xa62   :  { %v1533_v21 = vpop.permute.xlu1 %1532 }
 0xa63   :  { %v1538_v33 = vadd.f32 %v1533_v21, %v1518_v23 }
 0xa65   :  { %3473 = vtanh.f32 %v1538_v33 }
 0xa66   :  { %v1535_v49 = vpop.permute.xlu0 %1534 }
 0xa67   :  { %v1539_v4 = vadd.f32 %v1535_v49, %v1519_v24 }
 0xa69   :  { %3475 = vtanh.f32 %v1539_v4 }
 0xa6f   :  { %v4399_v10 = vpop.permute.xlu1 %1403 }
 0xa70   :  { %vm1408_vm7 = vcmp.eq.s32.totalorder %v4399_v10, 1 }
 0xa72   :  { %v3474_v48 = vpop.eup %3473 }
 0xa73   :  { %1544 = vrot.lane.b32.xlu1 %v3474_v48, %s3616_s4  ;;  %v4401_v20 = vpop.permute.xlu0 %1406  ;;  %v4403_v37 = vpop.permute.xlu1 %1557 }
 0xa74   :  { %vm1409_vm8 = vcmp.eq.s32.totalorder %v4401_v20, 1  ;;  %vm1562_vm11 = vcmp.eq.s32.totalorder %v4403_v37, 1 }
 0xa76   :  { %v3476_v26 = vpop.eup %3475 }
 0xa77   :  { %1546 = vrot.lane.b32.xlu0 %v3476_v26, %s3616_s4  ;;  %1566 = vrot.lane.b32.xlu1 %v4321_v45, %s3618_s17  ;;  %v4405_v40 = vpop.permute.xlu0 %1560  ;;  %v1413_v58 = vpop.permute.xlu1 %1412  ;;  %v1421_v26 = vsel %vm1409_vm8, %v1385_v1, %v1361_v30 }
 0xa78   :  { %vm1563_vm12 = vcmp.eq.s32.totalorder %v4405_v40, 1 }
 0xa7b   :  { %1568 = vrot.lane.b32.xlu0 %v4323_v42, %s3618_s17  ;;  %v1415_v32 = vpop.permute.xlu0 %1414 }
 0xace   :  { %v1391_v3 = vpop.permute.xlu1 %1390 }
 0xacf   :  { %v1396_v25 = vmul.f32 %v4357_v50, %v1391_v3 }
 0xad1   :  { %v1418_v45 = vsel %vm1408_vm7, %v1396_v25, %v1413_v58  ;;  %v1574_v58 = vsel %vm1562_vm11, %v1538_v33, %v1513_v29 }
 0xad2   :  { %v1393_v19 = vpop.permute.xlu0 %1392  ;;  %1424 = vrot.lane.b32.xlu1 %v1418_v45, %s3617_s13 }
 0xad3   :  { %v1397_v42 = vmul.f32 %v4361_v61, %v1393_v19 }
 0xad5   :  { %v1419_v39 = vsel %vm1409_vm8, %v1397_v42, %v1415_v32 }
 0xad6   :  { %1426 = vrot.lane.b32.xlu0 %v1419_v39, %s3617_s13 }
 0xae5   :  { %v1545_v16 = vpop.permute.xlu1 %1544 }
 0xae6   :  { %v1550_v50 = vmul.f32 %v4365_v62, %v1545_v16  ;;  %v1420_v62 = vsel %vm1408_vm7, %v1384_v11, %v1359_v14 }
 0xae9   :  { %v1547_v23 = vpop.permute.xlu0 %1546  ;;  %v1567_v21 = vpop.permute.xlu1 %1566 }
 0xaea   :  { %v1572_v24 = vsel %vm1562_vm11, %v1550_v50, %v1567_v21  ;;  %v1551_v61 = vmul.f32 %v4372_v12, %v1547_v23  ;;  %v1575_v12 = vsel %vm1563_vm12, %v1539_v4, %v1515_v38 }
 0xaeb   :  { %1578 = vrot.lane.b32.xlu1 %v1572_v24, %s3617_s13 }
 0xaed   :  { %v1569_v49 = vpop.permute.xlu0 %1568 }
 0xaee   :  { %v1573_v48 = vsel %vm1563_vm12, %v1551_v61, %v1569_v49 }
 0xaef   :  { %1580 = vrot.lane.b32.xlu0 %v1573_v48, %s3617_s13  ;;  %1434 = vrot.lane.b32.xlu1 %v1420_v62, %s3618_s17 }
 0xaf3   :  { %1436 = vrot.lane.b32.xlu0 %v1421_v26, %s3618_s17  ;;  %1588 = vrot.lane.b32.xlu1 %v1574_v58, %s3618_s17 }
 0xaf7   :  { %1590 = vrot.lane.b32.xlu0 %v1575_v12, %s3618_s17 }
 0xb44   :  { %v1425_v14 = vpop.permute.xlu1 %1424 }
 0xb45   :  { %1430 = vst.msk [vmem:[#allocation4] sm:$0xff] %vm322_vm0, %v1425_v14 }
 0xb48   :  { %v1427_v11 = vpop.permute.xlu0 %1426 }
 0xb49   :  { %1431 = vst.msk [vmem:[#allocation4 + $0x8] sm:$0xff] %vm322_vm0, %v1427_v11 }
 0xb4c   :  { %v4441_v32 = vld [vmem:[#allocation4] sm:$0xff] }
 0xb50   :  { %v4443_v30 = vld [vmem:[#allocation4 + $0x8] sm:$0xff] }
 0xb51   :  { %v1601_v29 = vpack.c.bf16 %v4443_v30, %v4441_v32 }
 0xb53   :  { %3210 = vmatmul.mubr.msk.bf16.vlgmr.msra.gmra.mxu1 %vm322_vm0, %v1601_v29 }
 0xb54   :  { %3222 = vmatpush3.bf16.msra.mxu1 %v4332_v15  ;;  %3225 = vmatprep.mubr.msk.bf16.mxu1 %vm3615_vm1, %v3614_v2 }
 0xb55   :  { %3223 = vmatprep.subr.bf16.mxu1 %v3614_v2 }
 0xb58   :  { %3224 = vmatpush3.bf16.msra.mxu1 %v4341_v13 }
 0xb59   :  { %3237 = vmatprep.subr.bf16.mxu1 %v3614_v2 }
 0xb5d   :  { %v1579_v38 = vpop.permute.xlu1 %1578 }
 0xb5e   :  { %1584 = vst.msk [vmem:[#allocation6] sm:$0xff] %vm322_vm0, %v1579_v38 }
 0xb61   :  { %v1581_v1 = vpop.permute.xlu0 %1580  ;;  %v1435_v33 = vpop.permute.xlu1 %1434 }
 0xb62   :  { %1585 = vst.msk [vmem:[#allocation6 + $0x8] sm:$0xff] %vm322_vm0, %v1581_v1  ;;  %1440 = vst.msk [vmem:[#allocation5] sm:$0xff] %vm322_vm0, %v1435_v33 }
 0xb65   :  { %v1437_v4 = vpop.permute.xlu0 %1436  ;;  %v1589_v3 = vpop.permute.xlu1 %1588  ;;  %v4459_v45 = vld [vmem:[#allocation6] sm:$0xff] }
 0xb66   :  { %1441 = vst.msk [vmem:[#allocation5 + $0x8] sm:$0xff] %vm322_vm0, %v1437_v4  ;;  %1594 = vst.msk [vmem:[#allocation7] sm:$0xff] %vm322_vm0, %v1589_v3 }
 0xb69   :  { %v1591_v25 = vpop.permute.xlu0 %1590  ;;  %v4461_v19 = vld [vmem:[#allocation6 + $0x8] sm:$0xff]  ;;  %v1648_v11 = vld [vmem:[#allocation5] sm:$0xff] }
 0xb6a   :  { %1595 = vst.msk [vmem:[#allocation7 + $0x8] sm:$0xff] %vm322_vm0, %v1591_v25  ;;  %v1743_v42 = vpack.c.bf16 %v4461_v19, %v4459_v45 }
 0xb6c   :  { %3218 = vmatmul.mubr.msk.bf16.vlgmr.msra.gmra.mxu0 %vm322_vm0, %v1743_v42 }
 0xb6d   :  { %3230 = vmatpush3.bf16.msra.mxu0 %v4303_v35  ;;  %3233 = vmatprep.mubr.msk.bf16.mxu0 %vm3615_vm1, %v3614_v2  ;;  %v1649_v29 = vld [vmem:[#allocation5 + $0x8] sm:$0xff]  ;;  %v1790_v38 = vld [vmem:[#allocation7] sm:$0xff] }
 0xb6e   :  { %3231 = vmatprep.subr.bf16.mxu0 %v3614_v2 }
 0xb71   :  { %3232 = vmatpush3.bf16.msra.mxu0 %v4312_v27 }
 0xb72   :  { %3245 = vmatprep.subr.bf16.mxu0 %v3614_v2 }
 0xc13   :  { %v1639_v39 = vpop.f32.mrf.mxu1 }
 0xc14   :  { %v1646_v16 = vadd.f32 %v1639_v39, %v3870_v8 }
 0xc15   :  { %v3211_v50 = vpop.f32.mrf.mxu1 }
 0xc16   :  { %3477 = vtanh.f32 %v1646_v16 }
 0xc17   :  { %v1642_v23 = vpop.f32.mrf.mxu1 }
 0xc18   :  { %v1647_v21 = vadd.f32 %v1642_v23, %v3876_v18 }
 0xc19   :  { %v3212_v24 = vpop.f32.mrf.mxu1 }
 0xc1a   :  { %3479 = vtanh.f32 %v1647_v21  ;;  %v3040_v1 = vmul.f32 -1.442695, %v1647_v21 }
 0xc23   :  { %v3478_v61 = vpop.eup %3477 }
 0xc24   :  { %1676 = vrot.lane.b32.xlu1 %v3478_v61, %s3616_s4 }
 0xc27   :  { %v3480_v49 = vpop.eup %3479 }
 0xc28   :  { %1678 = vrot.lane.b32.xlu0 %v3480_v49, %s3616_s4 }
 0xc2c   :  { %v1781_v48 = vpop.f32.mrf.mxu0 }
 0xc2d   :  { %v1788_v62 = vadd.f32 %v1781_v48, %v3861_v0  ;;  %v1791_v0 = vld [vmem:[#allocation7 + $0x8] sm:$0xff] }
 0xc2e   :  { %v3219_v26 = vpop.f32.mrf.mxu0 }
 0xc2f   :  { %3481 = vtanh.f32 %v1788_v62  ;;  %v3042_v42 = vmul.f32 -1.442695, %v1788_v62 }
 0xc30   :  { %v1784_v58 = vpop.f32.mrf.mxu0 }
 0xc31   :  { %v1789_v8 = vadd.f32 %v1784_v58, %v3867_v6  ;;  %v3039_v6 = vmul.f32 -1.442695, %v1646_v16 }
 0xc32   :  { %v3220_v12 = vpop.f32.mrf.mxu0 }
 0xc33   :  { %3483 = vtanh.f32 %v1789_v8  ;;  %v3043_v39 = vmul.f32 -1.442695, %v1789_v8 }
 0xc34   :  { %3485 = vpow2.f32 %v3039_v6 }
 0xc35   :  { %3487 = vpow2.f32 %v3040_v1 }
 0xc3c   :  { %v3482_v14 = vpop.eup %3481 }
 0xc3d   :  { %1818 = vrot.lane.b32.xlu1 %v3482_v14, %s3616_s4 }
 0xc40   :  { %v3484_v18 = vpop.eup %3483 }
 0xc41   :  { %1820 = vrot.lane.b32.xlu0 %v3484_v18, %s3616_s4  ;;  %1666 = vrot.lane.b32.xlu1 %v1648_v11, %s3617_s13  ;;  %v3486_v33 = vpop.eup %3485 }
 0xc42   :  { %v1656_v4 = vadd.f32 1.0, %v3486_v33  ;;  %v3488_v3 = vpop.eup %3487 }
 0xc43   :  { %v1657_v25 = vadd.f32 1.0, %v3488_v3 }
 0xc44   :  { %3489 = vrcp.f32 %v1656_v4 }
 0xc45   :  { %1668 = vrot.lane.b32.xlu0 %v1649_v29, %s3617_s13  ;;  %1808 = vrot.lane.b32.xlu1 %v1790_v38, %s3617_s13  ;;  %3491 = vrcp.f32 %v1657_v25 }
 0xc46   :  { %3493 = vpow2.f32 %v3042_v42 }
 0xc47   :  { %3495 = vpow2.f32 %v3043_v39 }
 0xc49   :  { %1810 = vrot.lane.b32.xlu0 %v1791_v0, %s3617_s13 }
 0xc51   :  { %v3490_v50 = vpop.eup %3489 }
 0xc52   :  { %v3492_v61 = vpop.eup %3491 }
 0xc53   :  { %v3494_v49 = vpop.eup %3493 }
 0xc54   :  { %v1798_v48 = vadd.f32 1.0, %v3494_v49  ;;  %v3496_v26 = vpop.eup %3495 }
 0xc55   :  { %v1799_v58 = vadd.f32 1.0, %v3496_v26 }
 0xc56   :  { %3497 = vrcp.f32 %v1798_v48 }
 0xc57   :  { %3499 = vrcp.f32 %v1799_v58 }
 0xc63   :  { %v3498_v62 = vpop.eup %3497 }
 0xc64   :  { %v3500_v14 = vpop.eup %3499 }
 0xc96   :  { %v1677_v23 = vpop.permute.xlu1 %1676 }
 0xc97   :  { %v1682_v24 = vmul.f32 %v3490_v50, %v1677_v23 }
 0xc99   :  { %1686 = vrot.lane.b32.xlu1 %v1682_v24, %s3617_s13 }
 0xc9a   :  { %v1679_v16 = vpop.permute.xlu0 %1678 }
 0xc9b   :  { %v1683_v21 = vmul.f32 %v3492_v61, %v1679_v16 }
 0xc9d   :  { %1688 = vrot.lane.b32.xlu0 %v1683_v21, %s3617_s13 }
 0xcaf   :  { %v1819_v12 = vpop.permute.xlu1 %1818 }
 0xcb0   :  { %v1824_v8 = vmul.f32 %v3498_v62, %v1819_v12 }
 0xcb2   :  { %1828 = vrot.lane.b32.xlu1 %v1824_v8, %s3617_s13 }
 0xcb3   :  { %v1821_v18 = vpop.permute.xlu0 %1820  ;;  %v1667_v29 = vpop.permute.xlu1 %1666 }
 0xcb4   :  { %v1825_v11 = vmul.f32 %v3500_v14, %v1821_v18  ;;  %v1672_v6 = vmul.f32 %v3490_v50, %v1667_v29 }
 0xcb6   :  { %1830 = vrot.lane.b32.xlu0 %v1825_v11, %s3617_s13  ;;  %1708 = vrot.lane.b32.xlu1 %v4441_v32, %s3618_s17 }
 0xcb7   :  { %v1669_v38 = vpop.permute.xlu0 %1668  ;;  %v1809_v0 = vpop.permute.xlu1 %1808 }
 0xcb8   :  { %v1673_v3 = vmul.f32 %v3492_v61, %v1669_v38  ;;  %v1814_v32 = vmul.f32 %v3498_v62, %v1809_v0 }
 0xcba   :  { %1710 = vrot.lane.b32.xlu0 %v4443_v30, %s3618_s17 }
 0xcbb   :  { %v1811_v1 = vpop.permute.xlu0 %1810 }
 0xcbc   :  { %v1815_v16 = vmul.f32 %v3500_v14, %v1811_v1 }
 0xd0b   :  { %v1687_v33 = vpop.permute.xlu1 %1686 }
 0xd0c   :  { %v1692_v4 = vadd.f32 %v1687_v33, %v1672_v6 }
 0xd0e   :  { %3501 = vtanh.f32 %v1692_v4 }
 0xd0f   :  { %v1689_v25 = vpop.permute.xlu0 %1688 }
 0xd10   :  { %v1693_v42 = vadd.f32 %v1689_v25, %v1673_v3 }
 0xd12   :  { %3503 = vtanh.f32 %v1693_v42 }
 0xd1b   :  { %v3502_v39 = vpop.eup %3501 }
 0xd1c   :  { %1698 = vrot.lane.b32.xlu1 %v3502_v39, %s3616_s4 }
 0xd1f   :  { %v3504_v23 = vpop.eup %3503 }
 0xd20   :  { %1700 = vrot.lane.b32.xlu0 %v3504_v23, %s3616_s4 }
 0xd24   :  { %v1829_v30 = vpop.permute.xlu1 %1828 }
 0xd25   :  { %v1834_v24 = vadd.f32 %v1829_v30, %v1814_v32 }
 0xd27   :  { %3505 = vtanh.f32 %v1834_v24 }
 0xd28   :  { %v1831_v49 = vpop.permute.xlu0 %1830  ;;  %v1709_v58 = vpop.permute.xlu1 %1708 }
 0xd29   :  { %v1835_v21 = vadd.f32 %v1831_v49, %v1815_v16  ;;  %v1858_v16 = vsel %vm1408_vm7, %v1834_v24, %v1809_v0 }
 0xd2b   :  { %3507 = vtanh.f32 %v1835_v21 }
 0xd2c   :  { %v1711_v12 = vpop.permute.xlu0 %1710 }
 0xd34   :  { %v3506_v48 = vpop.eup %3505 }
 0xd35   :  { %1840 = vrot.lane.b32.xlu1 %v3506_v48, %s3616_s4 }
 0xd38   :  { %v3508_v26 = vpop.eup %3507 }
 0xd39   :  { %1842 = vrot.lane.b32.xlu0 %v3508_v26, %s3616_s4  ;;  %1850 = vrot.lane.b32.xlu1 %v4459_v45, %s3618_s17 }
 0xd3d   :  { %1852 = vrot.lane.b32.xlu0 %v4461_v19, %s3618_s17 }
 0xd8e   :  { %v1699_v8 = vpop.permute.xlu1 %1698 }
 0xd8f   :  { %v1704_v18 = vmul.f32 %v3490_v50, %v1699_v8 }
 0xd91   :  { %v1714_v11 = vsel %vm1562_vm11, %v1704_v18, %v1709_v58 }
 0xd92   :  { %v1701_v6 = vpop.permute.xlu0 %1700  ;;  %1720 = vrot.lane.b32.xlu1 %v1714_v11, %s3617_s13 }
 0xd93   :  { %v1705_v33 = vmul.f32 %v3492_v61, %v1701_v6  ;;  %v1716_v61 = vsel %vm1562_vm11, %v1692_v4, %v1667_v29 }
 0xd95   :  { %v1715_v3 = vsel %vm1563_vm12, %v1705_v33, %v1711_v12 }
 0xd96   :  { %1722 = vrot.lane.b32.xlu0 %v1715_v3, %s3617_s13 }
 0xda7   :  { %v1841_v45 = vpop.permute.xlu1 %1840 }
 0xda8   :  { %v1846_v25 = vmul.f32 %v3498_v62, %v1841_v45  ;;  %v1717_v62 = vsel %vm1563_vm12, %v1693_v42, %v1669_v38 }
 0xdab   :  { %v1843_v39 = vpop.permute.xlu0 %1842  ;;  %v1851_v19 = vpop.permute.xlu1 %1850 }
 0xdac   :  { %v1856_v23 = vsel %vm1408_vm7, %v1846_v25, %v1851_v19  ;;  %v1847_v50 = vmul.f32 %v3500_v14, %v1843_v39  ;;  %v1859_v14 = vsel %vm1409_vm8, %v1835_v21, %v1811_v1 }
 0xdad   :  { %1862 = vrot.lane.b32.xlu1 %v1856_v23, %s3617_s13 }
 0xdaf   :  { %v1853_v32 = vpop.permute.xlu0 %1852 }
 0xdb0   :  { %v1857_v30 = vsel %vm1409_vm8, %v1847_v50, %v1853_v32 }
 0xdb1   :  { %1864 = vrot.lane.b32.xlu0 %v1857_v30, %s3617_s13  ;;  %1730 = vrot.lane.b32.xlu1 %v1716_v61, %s3618_s17 }
 0xdb5   :  { %1732 = vrot.lane.b32.xlu0 %v1717_v62, %s3618_s17  ;;  %1872 = vrot.lane.b32.xlu1 %v1858_v16, %s3618_s17 }
 0xdb9   :  { %1874 = vrot.lane.b32.xlu0 %v1859_v14, %s3618_s17 }
 0xe04   :  { %v1721_v37 = vpop.permute.xlu1 %1720 }
 0xe05   :  { %1726 = vst.msk [vmem:[#allocation4] sm:$0xff] %vm322_vm0, %v1721_v37 }
 0xe08   :  { %v1723_v29 = vpop.permute.xlu0 %1722 }
 0xe09   :  { %1727 = vst.msk [vmem:[#allocation4 + $0x8] sm:$0xff] %vm322_vm0, %v1723_v29 }
 0xe0c   :  { %v4527_v40 = vld [vmem:[#allocation4] sm:$0xff] }
 0xe10   :  { %v4529_v38 = vld [vmem:[#allocation4 + $0x8] sm:$0xff] }
 0xe11   :  { %v1885_v10 = vpack.c.bf16 %v4529_v38, %v4527_v40 }
 0xe13   :  { %3226 = vmatmul.mubr.msk.bf16.vlgmr.msra.gmra.mxu1 %vm322_vm0, %v1885_v10 }
 0xe14   :  { %3238 = vmatpush3.bf16.msra.mxu1 %v4332_v15  ;;  %3241 = vmatprep.mubr.msk.bf16.mxu1 %vm3615_vm1, %v3614_v2 }
 0xe15   :  { %3239 = vmatprep.subr.bf16.mxu1 %v3614_v2 }
 0xe18   :  { %3240 = vmatpush3.bf16.msra.mxu1 %v4341_v13 }
 0xe19   :  { %3253 = vmatprep.subr.bf16.mxu1 %v3614_v2 }
 0xe1f   :  { %v1863_v20 = vpop.permute.xlu1 %1862 }
 0xe20   :  { %1868 = vst.msk [vmem:[#allocation6] sm:$0xff] %vm322_vm0, %v1863_v20 }
 0xe23   :  { %v1865_v0 = vpop.permute.xlu0 %1864  ;;  %v1731_v1 = vpop.permute.xlu1 %1730 }
 0xe24   :  { %1869 = vst.msk [vmem:[#allocation6 + $0x8] sm:$0xff] %vm322_vm0, %v1865_v0  ;;  %1736 = vst.msk [vmem:[#allocation5] sm:$0xff] %vm322_vm0, %v1731_v1 }
 0xe27   :  { %v1733_v4 = vpop.permute.xlu0 %1732  ;;  %v1873_v42 = vpop.permute.xlu1 %1872  ;;  %v4545_v49 = vld [vmem:[#allocation6] sm:$0xff] }
 0xe28   :  { %1737 = vst.msk [vmem:[#allocation5 + $0x8] sm:$0xff] %vm322_vm0, %v1733_v4  ;;  %1878 = vst.msk [vmem:[#allocation7] sm:$0xff] %vm322_vm0, %v1873_v42 }
 0xe2b   :  { %v1875_v24 = vpop.permute.xlu0 %1874  ;;  %v4547_v21 = vld [vmem:[#allocation6 + $0x8] sm:$0xff]  ;;  %v1932_v19 = vld [vmem:[#allocation5] sm:$0xff] }
 0xe2c   :  { %1879 = vst.msk [vmem:[#allocation7 + $0x8] sm:$0xff] %vm322_vm0, %v1875_v24  ;;  %v2027_v48 = vpack.c.bf16 %v4547_v21, %v4545_v49 }
 0xe2e   :  { %3234 = vmatmul.mubr.msk.bf16.vlgmr.msra.gmra.mxu0 %vm322_vm0, %v2027_v48 }
 0xe2f   :  { %3246 = vmatpush3.bf16.msra.mxu0 %v4303_v35  ;;  %3249 = vmatprep.mubr.msk.bf16.mxu0 %vm3615_vm1, %v3614_v2  ;;  %v1933_v23 = vld [vmem:[#allocation5 + $0x8] sm:$0xff]  ;;  %v2074_v50 = vld [vmem:[#allocation7] sm:$0xff] }
 0xe30   :  { %3247 = vmatprep.subr.bf16.mxu0 %v3614_v2 }
 0xe33   :  { %3248 = vmatpush3.bf16.msra.mxu0 %v4312_v27 }
 0xe34   :  { %3261 = vmatprep.subr.bf16.mxu0 %v3614_v2 }
 0xed3   :  { %v1923_v26 = vpop.f32.mrf.mxu1 }
 0xed4   :  { %v1930_v58 = vadd.f32 %v1923_v26, %v3882_v22 }
 0xed5   :  { %v3227_v12 = vpop.f32.mrf.mxu1 }
 0xed6   :  { %3509 = vtanh.f32 %v1930_v58 }
 0xed7   :  { %v1926_v8 = vpop.f32.mrf.mxu1 }
 0xed8   :  { %v1931_v18 = vadd.f32 %v1926_v8, %v3888_v28 }
 0xed9   :  { %v3228_v11 = vpop.f32.mrf.mxu1 }
 0xeda   :  { %3511 = vtanh.f32 %v1931_v18  ;;  %v3046_v32 = vmul.f32 -1.442695, %v1931_v18 }
 0xee3   :  { %v3510_v35 = vpop.eup %3509 }
 0xee4   :  { %1960 = vrot.lane.b32.xlu1 %v3510_v35, %s3616_s4 }
 0xee7   :  { %v3512_v6 = vpop.eup %3511 }
 0xee8   :  { %1962 = vrot.lane.b32.xlu0 %v3512_v6, %s3616_s4 }
 0xeee   :  { %v2065_v33 = vpop.f32.mrf.mxu0 }
 0xeef   :  { %v2072_v27 = vadd.f32 %v2065_v33, %v3849_v56  ;;  %v2075_v56 = vld [vmem:[#allocation7 + $0x8] sm:$0xff] }
 0xef0   :  { %v3235_v3 = vpop.f32.mrf.mxu0 }
 0xef1   :  { %3513 = vtanh.f32 %v2072_v27  ;;  %v3048_v14 = vmul.f32 -1.442695, %v2072_v27 }
 0xef2   :  { %v2068_v45 = vpop.f32.mrf.mxu0 }
 0xef3   :  { %v2073_v22 = vadd.f32 %v2068_v45, %v3855_v60  ;;  %v3045_v60 = vmul.f32 -1.442695, %v1930_v58 }
 0xef4   :  { %v3236_v25 = vpop.f32.mrf.mxu0 }
 0xef5   :  { %3515 = vtanh.f32 %v2073_v22  ;;  %v3049_v37 = vmul.f32 -1.442695, %v2073_v22 }
 0xef6   :  { %3517 = vpow2.f32 %v3045_v60 }
 0xef7   :  { %3519 = vpow2.f32 %v3046_v32 }
 0xefe   :  { %v3514_v39 = vpop.eup %3513 }
 0xeff   :  { %2102 = vrot.lane.b32.xlu1 %v3514_v39, %s3616_s4 }
 0xf02   :  { %v3516_v28 = vpop.eup %3515 }
 0xf03   :  { %2104 = vrot.lane.b32.xlu0 %v3516_v28, %s3616_s4  ;;  %1950 = vrot.lane.b32.xlu1 %v1932_v19, %s3617_s13  ;;  %v3518_v30 = vpop.eup %3517 }
 0xf04   :  { %v1940_v61 = vadd.f32 1.0, %v3518_v30  ;;  %v3520_v62 = vpop.eup %3519 }
 0xf05   :  { %v1941_v16 = vadd.f32 1.0, %v3520_v62 }
 0xf06   :  { %3521 = vrcp.f32 %v1940_v61 }
 0xf07   :  { %1952 = vrot.lane.b32.xlu0 %v1933_v23, %s3617_s13  ;;  %2092 = vrot.lane.b32.xlu1 %v2074_v50, %s3617_s13  ;;  %3523 = vrcp.f32 %v1941_v16 }
 0xf08   :  { %3525 = vpow2.f32 %v3048_v14 }
 0xf09   :  { %3527 = vpow2.f32 %v3049_v37 }
 0xf0b   :  { %2094 = vrot.lane.b32.xlu0 %v2075_v56, %s3617_s13 }
 0xf13   :  { %v3522_v29 = vpop.eup %3521 }
 0xf14   :  { %v3524_v0 = vpop.eup %3523 }
 0xf15   :  { %v3526_v42 = vpop.eup %3525 }
 0xf16   :  { %v2082_v24 = vadd.f32 1.0, %v3526_v42  ;;  %v3528_v48 = vpop.eup %3527 }
 0xf17   :  { %v2083_v26 = vadd.f32 1.0, %v3528_v48 }
 0xf18   :  { %3529 = vrcp.f32 %v2082_v24 }
 0xf19   :  { %3531 = vrcp.f32 %v2083_v26 }
 0xf25   :  { %v3530_v58 = vpop.eup %3529 }
 0xf26   :  { %v3532_v18 = vpop.eup %3531 }
 0xf56   :  { %v1961_v10 = vpop.permute.xlu1 %1960 }
 0xf57   :  { %v1966_v20 = vmul.f32 %v3522_v29, %v1961_v10 }
 0xf59   :  { %1970 = vrot.lane.b32.xlu1 %v1966_v20, %s3617_s13 }
 0xf5a   :  { %v1963_v1 = vpop.permute.xlu0 %1962 }
 0xf5b   :  { %v1967_v4 = vmul.f32 %v3524_v0, %v1963_v1 }
 0xf5d   :  { %1972 = vrot.lane.b32.xlu0 %v1967_v4, %s3617_s13 }
 0xf71   :  { %v2103_v12 = vpop.permute.xlu1 %2102 }
 0xf72   :  { %v2108_v8 = vmul.f32 %v3530_v58, %v2103_v12 }
 0xf74   :  { %2112 = vrot.lane.b32.xlu1 %v2108_v8, %s3617_s13 }
 0xf75   :  { %v2105_v11 = vpop.permute.xlu0 %2104  ;;  %v1951_v6 = vpop.permute.xlu1 %1950 }
 0xf76   :  { %v2109_v35 = vmul.f32 %v3532_v18, %v2105_v11  ;;  %v1956_v3 = vmul.f32 %v3522_v29, %v1951_v6 }
 0xf78   :  { %2114 = vrot.lane.b32.xlu0 %v2109_v35, %s3617_s13  ;;  %1992 = vrot.lane.b32.xlu1 %v4527_v40, %s3618_s17 }
 0xf79   :  { %v1953_v33 = vpop.permute.xlu0 %1952  ;;  %v2093_v27 = vpop.permute.xlu1 %2092 }
 0xf7a   :  { %v1957_v39 = vmul.f32 %v3524_v0, %v1953_v33  ;;  %v2098_v40 = vmul.f32 %v3530_v58, %v2093_v27 }
 0xf7c   :  { %1994 = vrot.lane.b32.xlu0 %v4529_v38, %s3618_s17 }
 0xf7d   :  { %v2095_v45 = vpop.permute.xlu0 %2094 }
 0xf7e   :  { %v2099_v60 = vmul.f32 %v3532_v18, %v2095_v45 }
 0xfcb   :  { %v1971_v22 = vpop.permute.xlu1 %1970 }
 0xfcc   :  { %v1976_v25 = vadd.f32 %v1971_v22, %v1956_v3 }
 0xfce   :  { %3533 = vtanh.f32 %v1976_v25 }
 0xfcf   :  { %v1973_v28 = vpop.permute.xlu0 %1972 }
 0xfd0   :  { %v1977_v19 = vadd.f32 %v1973_v28, %v1957_v39  ;;  %v3611_v39 = vld [vmem:[%s4879_s3 + $0x8] sm:$0xff]   ;;  %v3612_v28 = vld [vmem:[%s4879_s3] sm:$0xff]  }
 0xfd2   :  { %3535 = vtanh.f32 %v1977_v19 }
 0xfdb   :  { %v3534_v23 = vpop.eup %3533 }
 0xfdc   :  { %1982 = vrot.lane.b32.xlu1 %v3534_v23, %s3616_s4 }
 0xfdf   :  { %v3536_v50 = vpop.eup %3535 }
 0xfe0   :  { %1984 = vrot.lane.b32.xlu0 %v3536_v50, %s3616_s4 }
 0xfe6   :  { %v2113_v38 = vpop.permute.xlu1 %2112 }
 0xfe7   :  { %v2118_v56 = vadd.f32 %v2113_v38, %v2098_v40 }
 0xfe9   :  { %3537 = vtanh.f32 %v2118_v56  ;;  %v2142_v11 = vsel %vm1100_vm13, %v2118_v56, %v2093_v27 }
 0xfea   :  { %v2115_v32 = vpop.permute.xlu0 %2114  ;;  %v1993_v16 = vpop.permute.xlu1 %1992 }
 0xfeb   :  { %v2119_v30 = vadd.f32 %v2115_v32, %v2099_v60 }
 0xfed   :  { %3539 = vtanh.f32 %v2119_v30 }
 0xfee   :  { %v1995_v14 = vpop.permute.xlu0 %1994 }
 0xff6   :  { %v3538_v61 = vpop.eup %3537 }
 0xff7   :  { %2124 = vrot.lane.b32.xlu1 %v3538_v61, %s3616_s4 }
 0xffa   :  { %v3540_v62 = vpop.eup %3539 }
 0xffb   :  { %2126 = vrot.lane.b32.xlu0 %v3540_v62, %s3616_s4  ;;  %2134 = vrot.lane.b32.xlu1 %v4545_v49, %s3618_s17 }
 0xfff   :  { %2136 = vrot.lane.b32.xlu0 %v4547_v21, %s3618_s17 }
0x104e   :  { %v1983_v37 = vpop.permute.xlu1 %1982 }
0x104f   :  { %v1988_v10 = vmul.f32 %v3522_v29, %v1983_v37 }
0x1051   :  { %v1998_v20 = vsel %vm1254_vm5, %v1988_v10, %v1993_v16 }
0x1052   :  { %v1985_v1 = vpop.permute.xlu0 %1984  ;;  %2004 = vrot.lane.b32.xlu1 %v1998_v20, %s3617_s13 }
0x1053   :  { %v1989_v4 = vmul.f32 %v3524_v0, %v1985_v1  ;;  %v2000_v0 = vsel %vm1254_vm5, %v1976_v25, %v1951_v6 }
0x1055   :  { %v1999_v42 = vsel %vm1255_vm6, %v1989_v4, %v1995_v14 }
0x1056   :  { %2006 = vrot.lane.b32.xlu0 %v1999_v42, %s3617_s13 }
0x1069   :  { %v2125_v49 = vpop.permute.xlu1 %2124 }
0x106a   :  { %v2130_v24 = vmul.f32 %v3530_v58, %v2125_v49  ;;  %v2001_v58 = vsel %vm1255_vm6, %v1977_v19, %v1953_v33 }
0x106d   :  { %v2127_v48 = vpop.permute.xlu0 %2126  ;;  %v2135_v21 = vpop.permute.xlu1 %2134 }
0x106e   :  { %v2140_v26 = vsel %vm1100_vm13, %v2130_v24, %v2135_v21  ;;  %v2131_v29 = vmul.f32 %v3532_v18, %v2127_v48  ;;  %v2143_v18 = vsel %vm1101_vm14, %v2119_v30, %v2095_v45 }
0x106f   :  { %2146 = vrot.lane.b32.xlu1 %v2140_v26, %s3617_s13 }
0x1071   :  { %v2137_v12 = vpop.permute.xlu0 %2136 }
0x1072   :  { %v2141_v8 = vsel %vm1101_vm14, %v2131_v29, %v2137_v12 }
0x1073   :  { %2148 = vrot.lane.b32.xlu0 %v2141_v8, %s3617_s13  ;;  %2014 = vrot.lane.b32.xlu1 %v2000_v0, %s3618_s17 }
0x1077   :  { %2016 = vrot.lane.b32.xlu0 %v2001_v58, %s3618_s17  ;;  %2156 = vrot.lane.b32.xlu1 %v2142_v11, %s3618_s17 }
0x107b   :  { %2158 = vrot.lane.b32.xlu0 %v2143_v18, %s3618_s17 }
0x10c4   :  { %v2005_v7 = vpop.permute.xlu1 %2004 }
0x10c5   :  { %2010 = vst.msk [vmem:[#allocation4] sm:$0xff] %vm322_vm0, %v2005_v7 }
0x10c8   :  { %v2007_v35 = vpop.permute.xlu0 %2006 }
0x10c9   :  { %2011 = vst.msk [vmem:[#allocation4 + $0x8] sm:$0xff] %vm322_vm0, %v2007_v35 }
0x10cc   :  { %v4613_v63 = vld [vmem:[#allocation4] sm:$0xff] }
0x10d0   :  { %v4615_v6 = vld [vmem:[#allocation4 + $0x8] sm:$0xff] }
0x10d1   :  { %v2169_v55 = vpack.c.bf16 %v4615_v6, %v4613_v63 }
0x10d3   :  { %3242 = vmatmul.mubr.msk.bf16.vlgmr.msra.gmra.mxu1 %vm322_vm0, %v2169_v55 }
0x10d4   :  { %3254 = vmatpush3.bf16.msra.mxu1 %v4332_v15  ;;  %3257 = vmatprep.mubr.msk.bf16.mxu1 %vm3615_vm1, %v3614_v2 }
0x10d5   :  { %3255 = vmatprep.subr.bf16.mxu1 %v3614_v2 }
0x10d8   :  { %3256 = vmatpush3.bf16.msra.mxu1 %v4341_v13 }
0x10d9   :  { %3269 = vmatprep.subr.bf16.mxu1 %v3614_v2 }
0x10e1   :  { %v2147_v54 = vpop.permute.xlu1 %2146 }
0x10e2   :  { %2152 = vst.msk [vmem:[#allocation6] sm:$0xff] %vm322_vm0, %v2147_v54 }
0x10e5   :  { %v2149_v33 = vpop.permute.xlu0 %2148  ;;  %v2015_v27 = vpop.permute.xlu1 %2014 }
0x10e6   :  { %2153 = vst.msk [vmem:[#allocation6 + $0x8] sm:$0xff] %vm322_vm0, %v2149_v33  ;;  %2020 = vst.msk [vmem:[#allocation5] sm:$0xff] %vm322_vm0, %v2015_v27 }
0x10e9   :  { %v2017_v3 = vpop.permute.xlu0 %2016  ;;  %v2157_v15 = vpop.permute.xlu1 %2156  ;;  %v4631_v22 = vld [vmem:[#allocation6] sm:$0xff] }
0x10ea   :  { %2021 = vst.msk [vmem:[#allocation5 + $0x8] sm:$0xff] %vm322_vm0, %v2017_v3  ;;  %2162 = vst.msk [vmem:[#allocation7] sm:$0xff] %vm322_vm0, %v2157_v15 }
0x10ed   :  { %v2159_v45 = vpop.permute.xlu0 %2158  ;;  %v4633_v13 = vld [vmem:[#allocation6 + $0x8] sm:$0xff]  ;;  %v2216_v10 = vld [vmem:[#allocation5] sm:$0xff] }
0x10ee   :  { %2163 = vst.msk [vmem:[#allocation7 + $0x8] sm:$0xff] %vm322_vm0, %v2159_v45  ;;  %v2311_v25 = vpack.c.bf16 %v4633_v13, %v4631_v22 }
0x10f0   :  { %3250 = vmatmul.mubr.msk.bf16.vlgmr.msra.gmra.mxu0 %vm322_vm0, %v2311_v25 }
0x10f1   :  { %3262 = vmatpush3.bf16.msra.mxu0 %v3611_v39  ;;  %3265 = vmatprep.mubr.msk.bf16.mxu0 %vm3615_vm1, %v3614_v2  ;;  %v2217_v20 = vld [vmem:[#allocation5 + $0x8] sm:$0xff]  ;;  %v2358_v1 = vld [vmem:[#allocation7] sm:$0xff] }
0x10f2   :  { %3263 = vmatprep.subr.bf16.mxu0 %v3614_v2 }
0x10f5   :  { %3264 = vmatpush3.bf16.msra.mxu0 %v3612_v28 }
0x10f6   :  { %3277 = vmatprep.subr.bf16.mxu0 %v3614_v2 }
0x1193   :  { %v2207_v19 = vpop.f32.mrf.mxu1 }
0x1194   :  { %v2214_v23 = vadd.f32 %v2207_v19, %v3894_v34 }
0x1195   :  { %v3243_v50 = vpop.f32.mrf.mxu1 }
0x1196   :  { %3541 = vtanh.f32 %v2214_v23 }
0x1197   :  { %v2210_v40 = vpop.f32.mrf.mxu1 }
0x1198   :  { %v2215_v38 = vadd.f32 %v2210_v40, %v3900_v43 }
0x1199   :  { %v3244_v56 = vpop.f32.mrf.mxu1 }
0x119a   :  { %3543 = vtanh.f32 %v2215_v38  ;;  %v3052_v4 = vmul.f32 -1.442695, %v2215_v38 }
0x11a3   :  { %v3542_v60 = vpop.eup %3541 }
0x11a4   :  { %2244 = vrot.lane.b32.xlu1 %v3542_v60, %s3616_s4 }
0x11a7   :  { %v3544_v32 = vpop.eup %3543 }
0x11a8   :  { %2246 = vrot.lane.b32.xlu0 %v3544_v32, %s3616_s4 }
0x11b0   :  { %v2349_v30 = vpop.f32.mrf.mxu0 }
0x11b1   :  { %v2356_v61 = vadd.f32 %v2349_v30, %v3837_v47  ;;  %v2359_v47 = vld [vmem:[#allocation7 + $0x8] sm:$0xff] }
0x11b2   :  { %v3251_v62 = vpop.f32.mrf.mxu0 }
0x11b3   :  { %3545 = vtanh.f32 %v2356_v61  ;;  %v3054_v21 = vmul.f32 -1.442695, %v2356_v61 }
0x11b4   :  { %v2352_v16 = vpop.f32.mrf.mxu0 }
0x11b5   :  { %v2357_v34 = vadd.f32 %v2352_v16, %v3843_v52  ;;  %v3051_v52 = vmul.f32 -1.442695, %v2214_v23 }
0x11b6   :  { %v3252_v14 = vpop.f32.mrf.mxu0 }
0x11b7   :  { %3547 = vtanh.f32 %v2357_v34  ;;  %v3055_v26 = vmul.f32 -1.442695, %v2357_v34 }
0x11b8   :  { %3549 = vpow2.f32 %v3051_v52 }
0x11b9   :  { %3551 = vpow2.f32 %v3052_v4 }
0x11c0   :  { %v3546_v37 = vpop.eup %3545 }
0x11c1   :  { %2386 = vrot.lane.b32.xlu1 %v3546_v37, %s3616_s4 }
0x11c4   :  { %v3548_v43 = vpop.eup %3547 }
0x11c5   :  { %2388 = vrot.lane.b32.xlu0 %v3548_v43, %s3616_s4  ;;  %2234 = vrot.lane.b32.xlu1 %v2216_v10, %s3617_s13  ;;  %v3550_v42 = vpop.eup %3549 }
0x11c6   :  { %v2224_v49 = vadd.f32 1.0, %v3550_v42  ;;  %v3552_v24 = vpop.eup %3551 }
0x11c7   :  { %v2225_v48 = vadd.f32 1.0, %v3552_v24 }
0x11c8   :  { %3553 = vrcp.f32 %v2224_v49 }
0x11c9   :  { %2236 = vrot.lane.b32.xlu0 %v2217_v20, %s3617_s13  ;;  %2376 = vrot.lane.b32.xlu1 %v2358_v1, %s3617_s13  ;;  %3555 = vrcp.f32 %v2225_v48 }
0x11ca   :  { %3557 = vpow2.f32 %v3054_v21 }
0x11cb   :  { %3559 = vpow2.f32 %v3055_v26 }
0x11cd   :  { %2378 = vrot.lane.b32.xlu0 %v2359_v47, %s3617_s13 }
0x11d5   :  { %v3554_v29 = vpop.eup %3553 }
0x11d6   :  { %v3556_v0 = vpop.eup %3555 }
0x11d7   :  { %v3558_v18 = vpop.eup %3557 }
0x11d8   :  { %v2366_v7 = vadd.f32 1.0, %v3558_v18  ;;  %v3560_v35 = vpop.eup %3559 }
0x11d9   :  { %v2367_v55 = vadd.f32 1.0, %v3560_v35 }
0x11da   :  { %3561 = vrcp.f32 %v2366_v7 }
0x11db   :  { %3563 = vrcp.f32 %v2367_v55 }
0x11e7   :  { %v3562_v54 = vpop.eup %3561 }
0x11e8   :  { %v3564_v3 = vpop.eup %3563 }
0x1216   :  { %v2245_v12 = vpop.permute.xlu1 %2244 }
0x1217   :  { %v2250_v8 = vmul.f32 %v3554_v29, %v2245_v12 }
0x1219   :  { %2254 = vrot.lane.b32.xlu1 %v2250_v8, %s3617_s13 }
0x121a   :  { %v2247_v58 = vpop.permute.xlu0 %2246 }
0x121b   :  { %v2251_v11 = vmul.f32 %v3556_v0, %v2247_v58 }
0x121d   :  { %2256 = vrot.lane.b32.xlu0 %v2251_v11, %s3617_s13 }
0x1233   :  { %v2387_v33 = vpop.permute.xlu1 %2386 }
0x1234   :  { %v2392_v27 = vmul.f32 %v3562_v54, %v2387_v33 }
0x1236   :  { %2396 = vrot.lane.b32.xlu1 %v2392_v27, %s3617_s13 }
0x1237   :  { %v2389_v15 = vpop.permute.xlu0 %2388  ;;  %v2235_v25 = vpop.permute.xlu1 %2234 }
0x1238   :  { %v2393_v45 = vmul.f32 %v3564_v3, %v2389_v15  ;;  %v2240_v19 = vmul.f32 %v3554_v29, %v2235_v25 }
0x123a   :  { %2398 = vrot.lane.b32.xlu0 %v2393_v45, %s3617_s13  ;;  %2276 = vrot.lane.b32.xlu1 %v4613_v63, %s3618_s17 }
0x123b   :  { %v2237_v39 = vpop.permute.xlu0 %2236  ;;  %v2377_v28 = vpop.permute.xlu1 %2376 }
0x123c   :  { %v2241_v38 = vmul.f32 %v3556_v0, %v2237_v39  ;;  %v2382_v63 = vmul.f32 %v3562_v54, %v2377_v28 }
0x123e   :  { %2278 = vrot.lane.b32.xlu0 %v4615_v6, %s3618_s17 }
0x123f   :  { %v2379_v23 = vpop.permute.xlu0 %2378 }
0x1240   :  { %v2383_v62 = vmul.f32 %v3564_v3, %v2379_v23 }
0x128b   :  { %v2255_v50 = vpop.permute.xlu1 %2254 }
0x128c   :  { %v2260_v40 = vadd.f32 %v2255_v50, %v2240_v19 }
0x128e   :  { %3565 = vtanh.f32 %v2260_v40  ;;  %v2284_v12 = vsel %vm946_vm3, %v2260_v40, %v2235_v25 }
0x128f   :  { %v2257_v56 = vpop.permute.xlu0 %2256 }
0x1290   :  { %v2261_v60 = vadd.f32 %v2257_v56, %v2241_v38 }
0x1292   :  { %3567 = vtanh.f32 %v2261_v60  ;;  %v2285_v8 = vsel %vm947_vm4, %v2261_v60, %v2237_v39 }
0x129b   :  { %v3566_v32 = vpop.eup %3565 }
0x129c   :  { %2266 = vrot.lane.b32.xlu1 %v3566_v32, %s3616_s4 }
0x129f   :  { %v3568_v30 = vpop.eup %3567 }
0x12a0   :  { %2268 = vrot.lane.b32.xlu0 %v3568_v30, %s3616_s4 }
0x12a8   :  { %v2397_v6 = vpop.permute.xlu1 %2396 }
0x12a9   :  { %v2402_v61 = vadd.f32 %v2397_v6, %v2382_v63 }
0x12ab   :  { %3569 = vtanh.f32 %v2402_v61 }
0x12ac   :  { %v2399_v16 = vpop.permute.xlu0 %2398  ;;  %v2277_v43 = vpop.permute.xlu1 %2276 }
0x12ad   :  { %v2403_v34 = vadd.f32 %v2399_v16, %v2383_v62 }
0x12af   :  { %3571 = vtanh.f32 %v2403_v34  ;;  %v2427_v58 = vsel %vm793_vm2, %v2403_v34, %v2379_v23 }
0x12b0   :  { %v2279_v10 = vpop.permute.xlu0 %2278 }
0x12b8   :  { %v3570_v14 = vpop.eup %3569 }
0x12b9   :  { %2408 = vrot.lane.b32.xlu1 %v3570_v14, %s3616_s4 }
0x12bc   :  { %v3572_v37 = vpop.eup %3571 }
0x12bd   :  { %2410 = vrot.lane.b32.xlu0 %v3572_v37, %s3616_s4  ;;  %2418 = vrot.lane.b32.xlu1 %v4631_v22, %s3618_s17 }
0x12c1   :  { %2420 = vrot.lane.b32.xlu0 %v4633_v13, %s3618_s17 }
0x130e   :  { %v2267_v20 = vpop.permute.xlu1 %2266 }
0x130f   :  { %v2272_v1 = vmul.f32 %v3554_v29, %v2267_v20 }
0x1311   :  { %v2282_v47 = vsel %vm946_vm3, %v2272_v1, %v2277_v43 }
0x1312   :  { %v2269_v52 = vpop.permute.xlu0 %2268  ;;  %2288 = vrot.lane.b32.xlu1 %v2282_v47, %s3617_s13 }
0x1313   :  { %v2273_v4 = vmul.f32 %v3556_v0, %v2269_v52  ;;  %v2426_v0 = vsel %vm792_vm15, %v2402_v61, %v2377_v28 }
0x1315   :  { %v2283_v42 = vsel %vm947_vm4, %v2273_v4, %v2279_v10 }
0x1316   :  { %2290 = vrot.lane.b32.xlu0 %v2283_v42, %s3617_s13 }
0x132b   :  { %v2409_v22 = vpop.permute.xlu1 %2408 }
0x132c   :  { %v2414_v49 = vmul.f32 %v3562_v54, %v2409_v22 }
0x132f   :  { %v2411_v24 = vpop.permute.xlu0 %2410  ;;  %v2419_v13 = vpop.permute.xlu1 %2418 }
0x1330   :  { %v2424_v48 = vsel %vm792_vm15, %v2414_v49, %v2419_v13  ;;  %v2415_v21 = vmul.f32 %v3564_v3, %v2411_v24  ;;  %vm4889_vm15 = vcmp.eq.s32.totalorder %v3983_v57, 1 }
0x1331   :  { %2430 = vrot.lane.b32.xlu1 %v2424_v48, %s3617_s13  ;;  %vm4891_vm3 = vmmov %vm4889_vm15 }
0x1333   :  { %v2421_v26 = vpop.permute.xlu0 %2420 }
0x1334   :  { %v2425_v29 = vsel %vm793_vm2, %v2415_v21, %v2421_v26  ;;  %vm4890_vm2 = vcmp.eq.s32.totalorder %v3981_v53, 1 }
0x1335   :  { %2432 = vrot.lane.b32.xlu0 %v2425_v29, %s3617_s13  ;;  %2298 = vrot.lane.b32.xlu1 %v2284_v12, %s3618_s17  ;;  %vm4892_vm4 = vmmov %vm4890_vm2 }
0x1339   :  { %2300 = vrot.lane.b32.xlu0 %v2285_v8, %s3618_s17  ;;  %2440 = vrot.lane.b32.xlu1 %v2426_v0, %s3618_s17 }
0x133d   :  { %2442 = vrot.lane.b32.xlu0 %v2427_v58, %s3618_s17 }
0x1384   :  { %v2289_v44 = vpop.permute.xlu1 %2288 }
0x1385   :  { %2294 = vst.msk [vmem:[#allocation4] sm:$0xff] %vm322_vm0, %v2289_v44 }
0x1388   :  { %v2291_v11 = vpop.permute.xlu0 %2290 }
0x1389   :  { %2295 = vst.msk [vmem:[#allocation4 + $0x8] sm:$0xff] %vm322_vm0, %v2291_v11 }
0x138c   :  { %v4703_v5 = vld [vmem:[#allocation4] sm:$0xff] }
0x1390   :  { %v4705_v18 = vld [vmem:[#allocation4 + $0x8] sm:$0xff] }
0x1391   :  { %v2453_v46 = vpack.c.bf16 %v4705_v18, %v4703_v5 }
0x1393   :  { %3258 = vmatmul.mubr.msk.bf16.vlgmr.msra.gmra.mxu1 %vm322_vm0, %v2453_v46 }
0x1394   :  { %3273 = vmatprep.mubr.msk.bf16.mxu1 %vm3615_vm1, %v3614_v2 }
0x13a3   :  { %v2431_v17 = vpop.permute.xlu1 %2430 }
0x13a4   :  { %2436 = vst.msk [vmem:[#allocation6] sm:$0xff] %vm322_vm0, %v2431_v17 }
0x13a7   :  { %v2433_v7 = vpop.permute.xlu0 %2432  ;;  %v2299_v35 = vpop.permute.xlu1 %2298 }
0x13a8   :  { %2437 = vst.msk [vmem:[#allocation6 + $0x8] sm:$0xff] %vm322_vm0, %v2433_v7  ;;  %2304 = vst.msk [vmem:[#allocation5] sm:$0xff] %vm322_vm0, %v2299_v35 }
0x13ab   :  { %v2301_v55 = vpop.permute.xlu0 %2300  ;;  %v2441_v54 = vpop.permute.xlu1 %2440  ;;  %v4717_v27 = vld [vmem:[#allocation6] sm:$0xff] }
0x13ac   :  { %2305 = vst.msk [vmem:[#allocation5 + $0x8] sm:$0xff] %vm322_vm0, %v2301_v55  ;;  %2446 = vst.msk [vmem:[#allocation7] sm:$0xff] %vm322_vm0, %v2441_v54 }
0x13af   :  { %v2443_v33 = vpop.permute.xlu0 %2442  ;;  %v4719_v3 = vld [vmem:[#allocation6 + $0x8] sm:$0xff]  ;;  %v2500_v6 = vld [vmem:[#allocation5] sm:$0xff] }
0x13b0   :  { %2447 = vst.msk [vmem:[#allocation7 + $0x8] sm:$0xff] %vm322_vm0, %v2443_v33  ;;  %v2594_v15 = vpack.c.bf16 %v4719_v3, %v4717_v27 }
0x13b2   :  { %3266 = vmatmul.mubr.msk.bf16.vlgmr.msra.gmra.mxu0 %vm322_vm0, %v2594_v15 }
0x13b3   :  { %3281 = vmatprep.mubr.msk.bf16.mxu0 %vm3615_vm1, %v3614_v2  ;;  %v2501_v61 = vld [vmem:[#allocation5 + $0x8] sm:$0xff]  ;;  %v2641_v62 = vld [vmem:[#allocation7] sm:$0xff] }
0x1453   :  { %v2491_v45 = vpop.f32.mrf.mxu1 }
0x1454   :  { %v2498_v25 = vadd.f32 %v2491_v45, %v3906_v51 }
0x1455   :  { %v3259_v39 = vpop.f32.mrf.mxu1 }
0x1456   :  { %3573 = vtanh.f32 %v2498_v25 }
0x1457   :  { %v2494_v28 = vpop.f32.mrf.mxu1 }
0x1458   :  { %v2499_v19 = vadd.f32 %v2494_v28, %v3910_v59 }
0x1459   :  { %v3260_v23 = vpop.f32.mrf.mxu1 }
0x145a   :  { %3575 = vtanh.f32 %v2499_v19  ;;  %v3058_v16 = vmul.f32 -1.442695, %v2499_v19 }
0x1463   :  { %v3574_v50 = vpop.eup %3573 }
0x1464   :  { %2528 = vrot.lane.b32.xlu1 %v3574_v50, %s3616_s4 }
0x1467   :  { %v3576_v40 = vpop.eup %3575 }
0x1468   :  { %2530 = vrot.lane.b32.xlu0 %v3576_v40, %s3616_s4 }
0x1472   :  { %v2632_v38 = vpop.f32.mrf.mxu0 }
0x1473   :  { %v2639_v56 = vadd.f32 %v2632_v38, %v3824_v36  ;;  %v2642_v36 = vld [vmem:[#allocation7 + $0x8] sm:$0xff]  ;;  %v3337_v38 = vld [vmem:[%s4882_s6 + $0x8] sm:$0xff]  }
0x1474   :  { %v3267_v60 = vpop.f32.mrf.mxu0  ;;  %3278 = vmatpush3.bf16.msra.mxu0 %v3337_v38 }
0x1475   :  { %3577 = vtanh.f32 %v2639_v56  ;;  %v3060_v10 = vmul.f32 -1.442695, %v2639_v56  ;;  %v3338_v56 = vld [vmem:[%s4882_s6] sm:$0xff]   ;;  %3279 = vmatprep.subr.bf16.mxu0 %v3614_v2 }
0x1476   :  { %v2635_v32 = vpop.f32.mrf.mxu0 }
0x1477   :  { %v2640_v51 = vadd.f32 %v2635_v32, %v3831_v41  ;;  %v3057_v41 = vmul.f32 -1.442695, %v2498_v25 }
0x1478   :  { %v3268_v30 = vpop.f32.mrf.mxu0  ;;  %3280 = vmatpush3.bf16.msra.mxu0 %v3338_v56 }
0x1479   :  { %3579 = vtanh.f32 %v2640_v51  ;;  %v3061_v20 = vmul.f32 -1.442695, %v2640_v51 }
0x147a   :  { %3581 = vpow2.f32 %v3057_v41 }
0x147b   :  { %3583 = vpow2.f32 %v3058_v16 }
0x1482   :  { %v3578_v63 = vpop.eup %3577 }
0x1483   :  { %2669 = vrot.lane.b32.xlu1 %v3578_v63, %s3616_s4 }
0x1486   :  { %v3580_v59 = vpop.eup %3579 }
0x1487   :  { %2671 = vrot.lane.b32.xlu0 %v3580_v59, %s3616_s4  ;;  %2518 = vrot.lane.b32.xlu1 %v2500_v6, %s3617_s13  ;;  %v3582_v34 = vpop.eup %3581  ;;  %v3339_v59 = vld [vmem:[%s4882_s6 + $0x18] sm:$0xff]  }
0x1488   :  { %v2508_v14 = vadd.f32 1.0, %v3582_v34  ;;  %v3584_v37 = vpop.eup %3583  ;;  %3270 = vmatpush3.bf16.msra.mxu1 %v3339_v59 }
0x1489   :  { %v2509_v43 = vadd.f32 1.0, %v3584_v37  ;;  %3271 = vmatprep.subr.bf16.mxu1 %v3614_v2 }
0x148a   :  { %3585 = vrcp.f32 %v2508_v14 }
0x148b   :  { %2520 = vrot.lane.b32.xlu0 %v2501_v61, %s3617_s13  ;;  %2659 = vrot.lane.b32.xlu1 %v2641_v62, %s3617_s13  ;;  %3587 = vrcp.f32 %v2509_v43  ;;  %v3340_v61 = vld [vmem:[%s4882_s6 + $0x10] sm:$0xff]  }
0x148c   :  { %3589 = vpow2.f32 %v3060_v10  ;;  %3272 = vmatpush3.bf16.msra.mxu1 %v3340_v61 }
0x148d   :  { %3591 = vpow2.f32 %v3061_v20  ;;  %3285 = vmatprep.subr.bf16.mxu1 %v3614_v2 }
0x148f   :  { %2661 = vrot.lane.b32.xlu0 %v2642_v36, %s3617_s13 }
0x1497   :  { %v4739_v1 = vpop.eup %3585 }
0x1498   :  { %v4743_v4 = vpop.eup %3587 }
0x1499   :  { %v3590_v49 = vpop.eup %3589 }
0x149a   :  { %v2649_v24 = vadd.f32 1.0, %v3590_v49  ;;  %v3592_v13 = vpop.eup %3591 }
0x149b   :  { %v2650_v48 = vadd.f32 1.0, %v3592_v13 }
0x149c   :  { %3593 = vrcp.f32 %v2649_v24 }
0x149d   :  { %3595 = vrcp.f32 %v2650_v48 }
0x14a9   :  { %v3594_v21 = vpop.eup %3593 }
0x14aa   :  { %v4748_v12 = vpop.eup %3595 }
0x14d6   :  { %v2529_v47 = vpop.permute.xlu1 %2528 }
0x14d7   :  { %v2534_v52 = vmul.f32 %v4739_v1, %v2529_v47 }
0x14d9   :  { %2538 = vrot.lane.b32.xlu1 %v2534_v52, %s3617_s13 }
0x14da   :  { %v2531_v42 = vpop.permute.xlu0 %2530 }
0x14db   :  { %v2535_v22 = vmul.f32 %v4743_v4, %v2531_v42 }
0x14dd   :  { %2540 = vrot.lane.b32.xlu0 %v2535_v22, %s3617_s13 }
0x14f5   :  { %v2670_v26 = vpop.permute.xlu1 %2669 }
0x14f6   :  { %v2675_v29 = vmul.f32 %v3594_v21, %v2670_v26  ;;  %v3341_v26 = vld [vmem:[%s4883_s8 + $0x38] sm:$0xff]  }
0x14f8   :  { %2679 = vrot.lane.b32.xlu1 %v2675_v29, %s3617_s13  ;;  %v3342_v29 = vld [vmem:[%s4883_s8 + $0x30] sm:$0xff]  }
0x14f9   :  { %v2672_v8 = vpop.permute.xlu0 %2671  ;;  %v2519_v58 = vpop.permute.xlu1 %2518 }
0x14fa   :  { %v2676_v0 = vmul.f32 %v4748_v12, %v2672_v8  ;;  %v2524_v46 = vmul.f32 %v4739_v1, %v2519_v58  ;;  %v3344_v8 = vld [vmem:[%s4883_s8 + $0x20] sm:$0xff]  }
0x14fc   :  { %2681 = vrot.lane.b32.xlu0 %v2676_v0, %s3617_s13  ;;  %2560 = vrot.lane.b32.xlu1 %v4703_v5, %s3618_s17  ;;  %v3345_v0 = vld [vmem:[%s4883_s8 + $0x18] sm:$0xff]  }
0x14fd   :  { %v4756_v44 = vpop.permute.xlu0 %2520  ;;  %v4758_v11 = vpop.permute.xlu1 %2659 }
0x14fe   :  { %v2525_v55 = vmul.f32 %v4743_v4, %v4756_v44  ;;  %v2665_v15 = vmul.f32 %v3594_v21, %v4758_v11 }
0x1500   :  { %2562 = vrot.lane.b32.xlu0 %v4705_v18, %s3618_s17 }
0x1501   :  { %v4761_v17 = vpop.permute.xlu0 %2661 }
0x1502   :  { %v2666_v39 = vmul.f32 %v4748_v12, %v4761_v17 }
0x154b   :  { %v2539_v7 = vpop.permute.xlu1 %2538 }
0x154c   :  { %v2544_v35 = vadd.f32 %v2539_v7, %v2524_v46 }
0x154e   :  { %3597 = vtanh.f32 %v2544_v35  ;;  %v2568_v43 = vsel %vm638_vm9, %v2544_v35, %v2519_v58  ;;  %v3346_v58 = vld [vmem:[%s4883_s8 + $0x10] sm:$0xff]  }
0x154f   :  { %v2541_v54 = vpop.permute.xlu0 %2540 }
0x1550   :  { %v2545_v5 = vadd.f32 %v2541_v54, %v2525_v55 }
0x1552   :  { %3599 = vtanh.f32 %v2545_v5  ;;  %v2569_v10 = vsel %vm639_vm10, %v2545_v5, %v4756_v44  ;;  %v3347_v44 = vld [vmem:[%s4883_s8 + $0x8] sm:$0xff]  }
0x155b   :  { %v3598_v33 = vpop.eup %3597 }
0x155c   :  { %2550 = vrot.lane.b32.xlu1 %v3598_v33, %s3616_s4  ;;  %v3068_v33 = vld [vmem:[%s4884_s7] ss:$0 sm:$0xff] }
0x155f   :  { %v3600_v18 = vpop.eup %3599 }
0x1560   :  { %2552 = vrot.lane.b32.xlu0 %v3600_v18, %s3616_s4 }
0x156a   :  { %v2680_v45 = vpop.permute.xlu1 %2679 }
0x156b   :  { %v2685_v25 = vadd.f32 %v2680_v45, %v2665_v15 }
0x156d   :  { %3601 = vtanh.f32 %v2685_v25  ;;  %v2709_v20 = vsel %vm4891_vm3, %v2685_v25, %v4758_v11  ;;  %v3348_v11 = vld [vmem:[%s4883_s8] sm:$0xff]  }
0x156e   :  { %v2682_v28 = vpop.permute.xlu0 %2681  ;;  %v2561_v40 = vpop.permute.xlu1 %2560 }
0x156f   :  { %v2686_v19 = vadd.f32 %v2682_v28, %v2666_v39  ;;  %v3069_v28 = vld [vmem:[%s4885_s9] ss:$0 sm:$0xff] }
0x1571   :  { %3603 = vtanh.f32 %v2686_v19  ;;  %v2710_v31 = vsel %vm4892_vm4, %v2686_v19, %v4761_v17 }
0x1572   :  { %v2563_v60 = vpop.permute.xlu0 %2562 }
0x157a   :  { %v3602_v23 = vpop.eup %3601 }
0x157b   :  { %2691 = vrot.lane.b32.xlu1 %v3602_v23, %s3616_s4 }
0x157e   :  { %v3604_v50 = vpop.eup %3603 }
0x157f   :  { %2693 = vrot.lane.b32.xlu0 %v3604_v50, %s3616_s4  ;;  %2701 = vrot.lane.b32.xlu1 %v4717_v27, %s3618_s17 }
0x1583   :  { %2703 = vrot.lane.b32.xlu0 %v4719_v3, %s3618_s17 }
0x15ce   :  { %v2551_v32 = vpop.permute.xlu1 %2550 }
0x15cf   :  { %v2556_v51 = vmul.f32 %v4739_v1, %v2551_v32 }
0x15d1   :  { %v2566_v27 = vsel %vm638_vm9, %v2556_v51, %v2561_v40 }
0x15d2   :  { %v2553_v3 = vpop.permute.xlu0 %2552  ;;  %2572 = vrot.lane.b32.xlu1 %v2566_v27, %s3617_s13 }
0x15d3   :  { %v2557_v30 = vmul.f32 %v4743_v4, %v2553_v3 }
0x15d5   :  { %v2567_v63 = vsel %vm639_vm10, %v2557_v30, %v2563_v60 }
0x15d6   :  { %2574 = vrot.lane.b32.xlu0 %v2567_v63, %s3617_s13 }
0x15ed   :  { %v2692_v6 = vpop.permute.xlu1 %2691 }
0x15ee   :  { %v2697_v62 = vmul.f32 %v3594_v21, %v2692_v6 }
0x15f1   :  { %v2694_v36 = vpop.permute.xlu0 %2693  ;;  %v2702_v41 = vpop.permute.xlu1 %2701 }
0x15f2   :  { %v2707_v16 = vsel %vm4889_vm15, %v2697_v62, %v2702_v41  ;;  %v2698_v34 = vmul.f32 %v4748_v12, %v2694_v36  ;;  %v3343_v12 = vld [vmem:[%s4883_s8 + $0x28] sm:$0xff]  }
0x15f3   :  { %2713 = vrot.lane.b32.xlu1 %v2707_v16, %s3617_s13 }
0x15f5   :  { %v2704_v14 = vpop.permute.xlu0 %2703 }
0x15f6   :  { %v2708_v37 = vsel %vm4890_vm2, %v2698_v34, %v2704_v14 }
0x15f7   :  { %2715 = vrot.lane.b32.xlu0 %v2708_v37, %s3617_s13  ;;  %2582 = vrot.lane.b32.xlu1 %v2568_v43, %s3618_s17 }
0x15fb   :  { %2584 = vrot.lane.b32.xlu0 %v2569_v10, %s3618_s17  ;;  %2723 = vrot.lane.b32.xlu1 %v2709_v20, %s3618_s17 }
0x15ff   :  { %2725 = vrot.lane.b32.xlu0 %v2710_v31, %s3618_s17 }
0x1644   :  { %v2573_v1 = vpop.permute.xlu1 %2572 }
0x1645   :  { %2578 = vst.msk [vmem:[#allocation4] sm:$0xff] %vm322_vm0, %v2573_v1 }
0x1648   :  { %v2575_v47 = vpop.permute.xlu0 %2574 }
0x1649   :  { %2579 = vst.msk [vmem:[#allocation4 + $0x8] sm:$0xff] %vm322_vm0, %v2575_v47 }
0x164c   :  { %v2731_v9 = vld [vmem:[#allocation4] sm:$0xff] }
0x1650   :  { %v2732_v52 = vld [vmem:[#allocation4 + $0x8] sm:$0xff] }
0x1651   :  { %v2733_v57 = vpack.c.bf16 %v2732_v52, %v2731_v9 }
0x1653   :  { %3282 = vmatmul.mubr.msk.bf16.vlgmr.msra.gmra.mxu0 %vm322_vm0, %v2733_v57 }
0x1665   :  { %v2714_v4 = vpop.permute.xlu1 %2713 }
0x1666   :  { %2719 = vst.msk [vmem:[#allocation6] sm:$0xff] %vm322_vm0, %v2714_v4 }
0x1669   :  { %v2716_v42 = vpop.permute.xlu0 %2715  ;;  %v2583_v22 = vpop.permute.xlu1 %2582 }
0x166a   :  { %2720 = vst.msk [vmem:[#allocation6 + $0x8] sm:$0xff] %vm322_vm0, %v2716_v42  ;;  %2588 = vst.msk [vmem:[#allocation5] sm:$0xff] %vm322_vm0, %v2583_v22 }
0x166d   :  { %v2585_v53 = vpop.permute.xlu0 %2584  ;;  %v2724_v49 = vpop.permute.xlu1 %2723  ;;  %v2734_v13 = vld [vmem:[#allocation6] sm:$0xff] }
0x166e   :  { %2589 = vst.msk [vmem:[#allocation5 + $0x8] sm:$0xff] %vm322_vm0, %v2585_v53  ;;  %2729 = vst.msk [vmem:[#allocation7] sm:$0xff] %vm322_vm0, %v2724_v49 }
0x1671   :  { %v2726_v24 = vpop.permute.xlu0 %2725  ;;  %v2735_v48 = vld [vmem:[#allocation6 + $0x8] sm:$0xff] }
0x1672   :  { %2730 = vst.msk [vmem:[#allocation7 + $0x8] sm:$0xff] %vm322_vm0, %v2726_v24  ;;  %v2736_v21 = vpack.c.bf16 %v2735_v48, %v2734_v13 }
0x1674   :  { %3274 = vmatmul.mubr.msk.bf16.vlgmr.msra.gmra.mxu1 %vm322_vm0, %v2736_v21  ;;  %vm2979_vm0 = vcmask 31744  }
0x1675   :  { %3301 = vmatprep.mubr.msk.bf16.mxu1 %vm3615_vm1, %v3614_v2  ;;  %3286 = vmatpush3.bf16.msra.mxu1 %v3341_v26 }
0x1676   :  { %3287 = vmatprep.subr.bf16.mxu1 %v3614_v2 }
0x1679   :  { %3288 = vmatpush3.bf16.msra.mxu1 %v3342_v29 }
0x167a   :  { %3289 = vmatprep.subr.bf16.mxu1 %v3614_v2 }
0x167d   :  { %3290 = vmatpush3.bf16.msra.mxu1 %v3343_v12 }
0x167e   :  { %3291 = vmatprep.subr.bf16.mxu1 %v3614_v2 }
0x1681   :  { %3292 = vmatpush3.bf16.msra.mxu1 %v3344_v8 }
0x1682   :  { %3293 = vmatprep.subr.bf16.mxu1 %v3614_v2 }
0x1685   :  { %3294 = vmatpush3.bf16.msra.mxu1 %v3345_v0 }
0x1686   :  { %3295 = vmatprep.subr.bf16.mxu1 %v3614_v2 }
0x1689   :  { %3296 = vmatpush3.bf16.msra.mxu1 %v3346_v58 }
0x168a   :  { %3297 = vmatprep.subr.bf16.mxu1 %v3614_v2 }
0x168d   :  { %3298 = vmatpush3.bf16.msra.mxu1 %v3347_v44 }
0x168e   :  { %3299 = vmatprep.subr.bf16.mxu1 %v3614_v2 }
0x1691   :  { %3300 = vmatpush3.bf16.msra.mxu1 %v3348_v11 }
0x1713   :  { %v2850_v46 = vpop.f32.mrf.mxu0 }
0x1715   :  { %v3283_v17 = vpop.f32.mrf.mxu0 }
0x1717   :  { %v2853_v7 = vpop.f32.mrf.mxu0 }
0x1719   :  { %v3284_v35 = vpop.f32.mrf.mxu0 }
0x1734   :  { %v2794_v55 = vpop.f32.mrf.mxu1 }
0x1735   :  { %v2851_v5 = vadd.f32 %v2850_v46, %v2794_v55 }
0x1736   :  { %v3275_v54 = vpop.f32.mrf.mxu1 }
0x1737   :  { %v2864_v2 = vadd.f32 %v3068_v33, %v2851_v5 }
0x1738   :  { %v2797_v18 = vpop.f32.mrf.mxu1 }
0x1739   :  { %v2854_v15 = vadd.f32 %v2853_v7, %v2797_v18 }
0x173a   :  { %v3276_v45 = vpop.f32.mrf.mxu1 }
0x173b   :  { %v2865_v25 = vadd.f32 %v3068_v33, %v2854_v15 }
0x173d   :  { %v2866_v39 = vpack.c.bf16 %v2865_v25, %v2864_v2 }
0x173f   :  { %3302 = vmatmul.mubr.bf16.vlgmr.msra.gmra.mxu1 %v2866_v39 }
0x17ff   :  { %v2972_v19 = vpop.f32.mrf.mxu1 }
0x1800   :  { %v2973_v23 = vadd.f32 %v3069_v28, %v2972_v19 }
0x1801   :  { %v3303_v50 = vpop.f32.mrf.mxu1 }
0x1802   :  { %2980 = vst.msk [vmem:[%s4886_s10] sm:$0xff] %vm2979_vm0, %v2973_v23 }
0x1803   :  { %v2975_v40 = vpop.f32.mrf.mxu1 }
0x1804   :  { %v2976_v38 = vadd.f32 %v3069_v28, %v2975_v40 }
0x1805   :  { %v3304_v56 = vpop.f32.mrf.mxu1 }
0x1806   :  { %2981 = vst.msk [vmem:[%s4886_s10 + $0x8] sm:$0xff] %vm2979_vm0, %v2976_v38 }

</bundles_post_ra>
